<compile_context>
chip_gen: v6e
topology: v6e:2x2x1
jax: 0.10.0
libtpu: 0.0.40
codegen_flags: <defaults>
</compile_context>

<pallas_src>
import functools

import numpy as np

import jax
import jax.numpy as jnp
from jax import lax
from jax.experimental import pallas as pl
from jax.experimental.pallas import tpu as pltpu

EPS = 1e-5


def _vmem():
    # whole-array block resident in VMEM (all tensors here are tiny: < 1 MiB)
    return pl.BlockSpec(memory_space=pltpu.MemorySpace.VMEM)


# ----------------------------- Pallas kernels -----------------------------

def _conv_block_kernel(x_ref, pos_ref, wn_ref, wa_ref, ga_ref, ba_ref,
                       go_ref, bo_ref, o_ref, xf_ref, col_ref, *,
                       dilations, height, width, max_shift):
    # x:   (Cin, P)            channel-major input, P = N*H*W
    # pos: (2, P) int32        row 0 = output pixel h index, row 1 = w index
    # wn:  (4, Cin)            1x1 norm-conv weight
    # wa:  (sum_cout, 36*nd)   block-diagonal stacked 3x3 ASPP weights
    # ga/ba: (sum_cout, 1)     per-branch BN gamma/beta
    # go/bo: (4+sum_cout, 1)   bn_out gamma/beta
    # o:   (4+sum_cout, P)
    # xf:  (4, P + 2*max_shift) lane-padded x1 scratch
    # col: (36*nd, P)          im2col scratch
    p = x_ref.shape[1]

    # 1) 1x1 "norm" conv (bias-free): (4, Cin) @ (Cin, P)
    x1 = jnp.dot(wn_ref[...], x_ref[...], preferred_element_type=jnp.float32)
    c1 = x1.shape[0]  # = 4

    # 2) lane-padded copy of x1 so every dilated tap is one in-bounds slice
    xf_ref[...] = jnp.zeros(xf_ref.shape, jnp.float32)
    xf_ref[:, max_shift:max_shift + p] = x1

    h_idx = pos_ref[0:1, :]
    w_idx = pos_ref[1:2, :]

    # 3) im2col for ALL dilation branches, entirely in VMEM.
    #    (padding=1 => each branch's conv is "same": out[h,w] reads
    #     x1[h+(kh-1)*d, w+(kw-1)*d], zero outside the image.)
    for b, d in enumerate(dilations):
        for kh in range(3):
            for kw in range(3):
                dh = (kh - 1) * d
                dw = (kw - 1) * d
                ofs = max_shift + dh * width + dw
                tap = xf_ref[:, ofs:ofs + p]
                conds = []
                if dh > 0:
                    conds.append(h_idx < height - dh)
                elif dh < 0:
                    conds.append(h_idx >= -dh)
                if dw > 0:
                    conds.append(w_idx < width - dw)
                elif dw < 0:
                    conds.append(w_idx >= -dw)
                if conds:
                    valid = conds[0]
                    for cnd in conds[1:]:
                        valid = valid & cnd
                    tap = tap * valid.astype(jnp.float32)
                r = (b * 9 + kh * 3 + kw) * c1
                col_ref[r:r + c1, :] = tap

    # 4) all atrous 3x3 convs as ONE block-diagonal MXU matmul
    branch = jnp.dot(wa_ref[...], col_ref[...],
                     preferred_element_type=jnp.float32)   # (sum_cout, P)

    # 5) BatchNorm (training batch stats, biased var, one-pass) + ReLU
    def bn_relu(v, g, bt):
        m = jnp.mean(v, axis=1, keepdims=True)
        var = jnp.maximum(jnp.mean(v * v, axis=1, keepdims=True) - m * m, 0.0)
        return jnp.maximum((v - m) * lax.rsqrt(var + EPS) * g + bt, 0.0)

    yb = bn_relu(branch, ga_ref[...], ba_ref[...])          # per-branch BN + ReLU

    # 6) channel concat [x1, aspp1..asppN] + bn_out + relu_out.
    #    bn_out is per-channel, so it factors exactly over the concat row blocks;
    #    write each block straight into the output (no concat op, no extra pass).
    o_ref[0:c1, :] = bn_relu(x1, go_ref[0:c1, :], bo_ref[0:c1, :])
    o_ref[c1:, :] = bn_relu(yb, go_ref[c1:, :], bo_ref[c1:, :])


def _head_kernel(x_ref, wn_ref, w1_ref, w2_ref, o_ref, *, batch, hw):
    # x:  (Ccat, P)   channel-major
    # wn: (4, Ccat)   1x1 "normal" conv weight
    # w1: (4*hw, hidden) fc1 weight (rows in PyTorch NCHW-flatten order c*hw+hw_idx)
    # w2: (hidden, n_classes)
    x4 = jnp.dot(wn_ref[...], x_ref[...], preferred_element_type=jnp.float32)  # (4, P)
    hidden = w1_ref.shape[1]
    acc = jnp.zeros((batch, hidden), jnp.float32)
    # PyTorch's x.view(B, -1) (NCHW flatten) + fc1, done as channel-sliced matmuls
    # so no transpose of the activation is ever materialized.
    for c in range(x4.shape[0]):
        xc = x4[c:c + 1, :].reshape(batch, hw)                      # (N, H*W)
        acc = acc + jnp.dot(xc, w1_ref[c * hw:(c + 1) * hw, :],
                            preferred_element_type=jnp.float32)
    o_ref[...] = jnp.dot(acc, w2_ref[...], preferred_element_type=jnp.float32)


# ----------------------------- wrappers -----------------------------------

def conv_block(x2d, pos, bp, dilations, height, width):
    nd = len(dilations)
    p = x2d.shape[1]
    c_cat = 4 + bp['wa'].shape[0]
    max_shift = (width + 1) * max(dilations)
    kern = functools.partial(_conv_block_kernel, dilations=tuple(dilations),
                             height=height, width=width, max_shift=max_shift)
    return pl.pallas_call(
        kern,
        in_specs=[_vmem()] * 8,
        out_specs=_vmem(),
        out_shape=jax.ShapeDtypeStruct((c_cat, p), jnp.float32),
        scratch_shapes=[
            pltpu.VMEM((4, p + 2 * max_shift), jnp.float32),   # lane-padded x1
            pltpu.VMEM((4 * 9 * nd, p), jnp.float32),          # im2col buffer
        ],
    )(x2d, pos, bp['norm_w'], bp['wa'], bp['ga'], bp['ba'], bp['go'], bp['bo'])


def head(x2d, wn, w1, w2, batch, hw):
    kern = functools.partial(_head_kernel, batch=batch, hw=hw)
    return pl.pallas_call(
        kern,
        in_specs=[_vmem()] * 4,
        out_specs=_vmem(),
        out_shape=jax.ShapeDtypeStruct((batch, w2.shape[1]), jnp.float32),
    )(x2d, wn, w1, w2)


# ----------------------------- model glue ----------------------------------

def _make_pos(n, height, width):
    idx = np.arange(n * height * width)
    hpos = (idx // width) % height
    wpos = idx % width
    return jnp.asarray(np.stack([hpos, wpos]).astype(np.int32))   # (2, P)


def cloudnet_forward(x_nchw, packed, dilations, padding):
    # kernel=3, padding=1 keeps the ASPP spatial size equal to the input, which
    # the channel concat in ConvBlock requires (same implicit constraint as PyTorch).
    assert padding == 1, "ConvBlock's channel concat requires padding == 1"
    n, c, height, width = x_nchw.shape
    p = n * height * width
    x = jnp.transpose(x_nchw, (1, 0, 2, 3)).reshape(c, p).astype(jnp.float32)
    pos = _make_pos(n, height, width)
    for bp in packed['blocks']:
        x = conv_block(x, pos, bp, dilations, height, width)
    return head(x, packed['normal_w'], packed['fc1_w'], packed['fc2_w'],
                n, height * width)


def init_cloudnet_params(key, *, res, n_classes, n_channels, out_channels,
                         dilations, n_blocks):
    # Mirrors the PyTorch parameter structure (OIHW conv weights, per-branch BN).
    nd = len(dilations)
    cat_ch = 4 + sum(out_channels)
    # PyTorch chains aspp in_channels, but the forward feeds the 4-channel x1 to
    # every branch; this only works because all out_channels equal 4.
    aspp_in_ch = [4] + list(out_channels[:-1])

    def rnd(k, shape, scale):
        return scale * jax.random.normal(k, shape, jnp.float32)

    keys = iter(jax.random.split(key, n_blocks * (1 + nd) + 4))
    params = {'blocks': []}
    in_ch = n_channels
    for _b in range(n_blocks):
        bp = {'norm_w': rnd(next(keys), (4, in_ch), 0.2), 'aspp': []}
        for i in range(nd):
            co = out_channels[i]
            bp['aspp'].append({
                'w': rnd(next(keys), (co, aspp_in_ch[i], 3, 3), 0.2),
                'gamma': jnp.ones((co, 1), jnp.float32),
                'beta': jnp.zeros((co, 1), jnp.float32),
            })
        bp['bnout_gamma'] = jnp.ones((cat_ch, 1), jnp.float32)
        bp['bnout_beta'] = jnp.zeros((cat_ch, 1), jnp.float32)
        params['blocks'].append(bp)
        in_ch = out_channels[0] * (nd + 1)
    params['normal_w'] = rnd(next(keys), (4, (nd + 1) * 4), 0.2)
    # TODO(synk): the PyTorch __init__ sizes fc1 as res**3*(len(out_channels)+1),
    # which does not match the flattened activation (4*res*res); fc1 is sized to
    # the shape the forward pass actually produces so the network runs end-to-end.
    flat_dim = 4 * res * res
    params['fc1_w'] = rnd(next(keys), (flat_dim, 128), 0.05)
    params['fc2_w'] = rnd(next(keys), (128, n_classes), 0.05)
    return params


def pack_params(params, dilations):
    # One-time repack (outside jit): stack the 4 ASPP branch weights of each block
    # into a single block-diagonal (sum_cout, 36*nd) matrix so the fused kernel
    # does one MXU matmul per block; stack BN params to match.
    nd = len(dilations)
    packed = {'blocks': []}
    for bp in params['blocks']:
        couts = [int(a['w'].shape[0]) for a in bp['aspp']]
        total = sum(couts)
        wa = jnp.zeros((total, 36 * nd), jnp.float32)
        gs, bs = [], []
        ro = 0
        for i, a in enumerate(bp['aspp']):
            co, ci = int(a['w'].shape[0]), int(a['w'].shape[1])
            # the forward always feeds the 4-channel x1 to every branch
            assert ci == 4, "ASPP branch in_channels must be 4 (x1 has 4 channels)"
            wflat = jnp.transpose(a['w'], (0, 2, 3, 1)).reshape(co, 9 * ci)
            wa = wa.at[ro:ro + co, i * 36:(i + 1) * 36].set(wflat)
            gs.append(a['gamma'])
            bs.append(a['beta'])
            ro += co
        packed['blocks'].append({
            'norm_w': bp['norm_w'],
            'wa': wa,
            'ga': jnp.concatenate(gs, axis=0),
            'ba': jnp.concatenate(bs, axis=0),
            'go': bp['bnout_gamma'],
            'bo': bp['bnout_beta'],
        })
    packed['normal_w'] = params['normal_w']
    packed['fc1_w'] = params['fc1_w']
    packed['fc2_w'] = params['fc2_w']
    return packed


# ----------------------------- main -----------------------------------------

if __name__ == "__main__":
    res = 16
    n_classes = 3
    n_channels = 4
    out_channels = [4, 4, 4, 4]
    dilations = [1, 2, 4, 8]
    padding = 1          # kernel=3, padding=1 keeps spatial size (module requirement)
    n_blocks = 2
    batch = 2

    key = jax.random.PRNGKey(0)
    kx, kp = jax.random.split(key)
    x = jax.random.normal(kx, (batch, n_channels, res, res), jnp.float32)   # NCHW
    params = init_cloudnet_params(kp, res=res, n_classes=n_classes,
                                  n_channels=n_channels, out_channels=out_channels,
                                  dilations=dilations, n_blocks=n_blocks)
    packed = pack_params(params, dilations)

    fwd = jax.jit(functools.partial(cloudnet_forward,
                                    dilations=tuple(dilations), padding=padding))
    logits = fwd(x, packed)
    jax.block_until_ready(logits)
    assert logits.shape == (batch, n_classes)
    assert bool(jnp.all(jnp.isfinite(logits)))
    print("KERNEL_OK")
</pallas_src>

<mosaic_0001>
module attributes {stable_mosaic.version = 11 : i64} {
  func.func @_conv_block_kernel(%arg0: memref<4x512xf32, #tpu.memory_space<vmem>>, %arg1: memref<2x512xi32, #tpu.memory_space<vmem>>, %arg2: memref<4x4xf32, #tpu.memory_space<vmem>>, %arg3: memref<16x144xf32, #tpu.memory_space<vmem>>, %arg4: memref<16x1xf32, #tpu.memory_space<vmem>>, %arg5: memref<16x1xf32, #tpu.memory_space<vmem>>, %arg6: memref<20x1xf32, #tpu.memory_space<vmem>>, %arg7: memref<20x1xf32, #tpu.memory_space<vmem>>, %arg8: memref<20x512xf32, #tpu.memory_space<vmem>>, %arg9: memref<4x784xf32, #tpu.memory_space<vmem>>, %arg10: memref<144x512xf32, #tpu.memory_space<vmem>>) attributes {dimension_semantics = [], scalar_prefetch = 0 : i64, scratch_operands = 2 : i64, tpu.core_type = #tpu.core_type<tc>} {
    %c0 = arith.constant 0 : index
    %c0_0 = arith.constant 0 : index
    %0 = vector.load %arg2[%c0, %c0_0] : memref<4x4xf32, #tpu.memory_space<vmem>>, vector<4x4xf32>
    %c0_1 = arith.constant 0 : index
    %c0_2 = arith.constant 0 : index
    %1 = vector.load %arg0[%c0_1, %c0_2] : memref<4x512xf32, #tpu.memory_space<vmem>>, vector<4x512xf32>
    %cst = arith.constant dense<0.000000e+00> : vector<4x512xf32>
    %2 = tpu.matmul %0, %1, %cst {dimension_numbers = #tpu.dot_dimension_numbers<[1], [0], [0], [1], [0, 0, 1, 1], [], []>} : vector<4x4xf32>, vector<4x512xf32>, vector<4x512xf32> -> vector<4x512xf32>
    %cst_3 = arith.constant 0.000000e+00 : f32
    %3 = vector.broadcast %cst_3 : f32 to vector<4x784xf32>
    %c0_4 = arith.constant 0 : index
    %c0_5 = arith.constant 0 : index
    %4 = vector.load %arg9[%c0_4, %c0_5] : memref<4x784xf32, #tpu.memory_space<vmem>>, vector<4x784xf32>
    tpu.vector_store %arg9[%c0_4, %c0_5], %3 {strides = array<i32>} : memref<4x784xf32, #tpu.memory_space<vmem>>, vector<4x784xf32>,
    %c0_6 = arith.constant 0 : index
    %c136 = arith.constant 136 : index
    %5 = vector.load %arg9[%c0_6, %c136] : memref<4x784xf32, #tpu.memory_space<vmem>>, vector<4x512xf32>
    tpu.vector_store %arg9[%c0_6, %c136], %2 {strides = array<i32>} : memref<4x784xf32, #tpu.memory_space<vmem>>, vector<4x512xf32>,
    %c0_7 = arith.constant 0 : index
    %c0_8 = arith.constant 0 : index
    %6 = vector.load %arg1[%c0_7, %c0_8] : memref<2x512xi32, #tpu.memory_space<vmem>>, vector<1x512xi32>
    %c1 = arith.constant 1 : index
    %c0_9 = arith.constant 0 : index
    %7 = vector.load %arg1[%c1, %c0_9] : memref<2x512xi32, #tpu.memory_space<vmem>>, vector<1x512xi32>
    %c0_10 = arith.constant 0 : index
    %c119 = arith.constant 119 : index
    %8 = vector.load %arg9[%c0_10, %c119] : memref<4x784xf32, #tpu.memory_space<vmem>>, vector<4x512xf32>
    %c1_i32 = arith.constant 1 : i32
    %9 = vector.broadcast %c1_i32 : i32 to vector<1x512xi32>
    %10 = arith.cmpi sge, %6, %9 : vector<1x512xi32>
    %c1_i32_11 = arith.constant 1 : i32
    %11 = vector.broadcast %c1_i32_11 : i32 to vector<1x512xi32>
    %12 = arith.cmpi sge, %7, %11 : vector<1x512xi32>
    %13 = arith.andi %10, %12 : vector<1x512xi1>
    %14 = arith.extui %13 : vector<1x512xi1> to vector<1x512xi32>
    %15 = arith.sitofp %14 : vector<1x512xi32> to vector<1x512xf32>
    %16 = vector.broadcast %15 : vector<1x512xf32> to vector<4x512xf32>
    %17 = arith.mulf %8, %16 : vector<4x512xf32>
    %c0_12 = arith.constant 0 : index
    %c0_13 = arith.constant 0 : index
    %18 = vector.load %arg10[%c0_12, %c0_13] : memref<144x512xf32, #tpu.memory_space<vmem>>, vector<4x512xf32>
    tpu.vector_store %arg10[%c0_12, %c0_13], %17 {strides = array<i32>} : memref<144x512xf32, #tpu.memory_space<vmem>>, vector<4x512xf32>,
    %c0_14 = arith.constant 0 : index
    %c120 = arith.constant 120 : index
    %19 = vector.load %arg9[%c0_14, %c120] : memref<4x784xf32, #tpu.memory_space<vmem>>, vector<4x512xf32>
    %c1_i32_15 = arith.constant 1 : i32
    %20 = vector.broadcast %c1_i32_15 : i32 to vector<1x512xi32>
    %21 = arith.cmpi sge, %6, %20 : vector<1x512xi32>
    %22 = arith.extui %21 : vector<1x512xi1> to vector<1x512xi32>
    %23 = arith.sitofp %22 : vector<1x512xi32> to vector<1x512xf32>
    %24 = vector.broadcast %23 : vector<1x512xf32> to vector<4x512xf32>
    %25 = arith.mulf %19, %24 : vector<4x512xf32>
    %c4 = arith.constant 4 : index
    %c0_16 = arith.constant 0 : index
    %26 = vector.load %arg10[%c4, %c0_16] : memref<144x512xf32, #tpu.memory_space<vmem>>, vector<4x512xf32>
    tpu.vector_store %arg10[%c4, %c0_16], %25 {strides = array<i32>} : memref<144x512xf32, #tpu.memory_space<vmem>>, vector<4x512xf32>,
    %c0_17 = arith.constant 0 : index
    %c121 = arith.constant 121 : index
    %27 = vector.load %arg9[%c0_17, %c121] : memref<4x784xf32, #tpu.memory_space<vmem>>, vector<4x512xf32>
    %c1_i32_18 = arith.constant 1 : i32
    %28 = vector.broadcast %c1_i32_18 : i32 to vector<1x512xi32>
    %29 = arith.cmpi sge, %6, %28 : vector<1x512xi32>
    %c15_i32 = arith.constant 15 : i32
    %30 = vector.broadcast %c15_i32 : i32 to vector<1x512xi32>
    %31 = arith.cmpi slt, %7, %30 : vector<1x512xi32>
    %32 = arith.andi %29, %31 : vector<1x512xi1>
    %33 = arith.extui %32 : vector<1x512xi1> to vector<1x512xi32>
    %34 = arith.sitofp %33 : vector<1x512xi32> to vector<1x512xf32>
    %35 = vector.broadcast %34 : vector<1x512xf32> to vector<4x512xf32>
    %36 = arith.mulf %27, %35 : vector<4x512xf32>
    %c8 = arith.constant 8 : index
    %c0_19 = arith.constant 0 : index
    %37 = vector.load %arg10[%c8, %c0_19] : memref<144x512xf32, #tpu.memory_space<vmem>>, vector<4x512xf32>
    tpu.vector_store %arg10[%c8, %c0_19], %36 {strides = array<i32>} : memref<144x512xf32, #tpu.memory_space<vmem>>, vector<4x512xf32>,
    %c0_20 = arith.constant 0 : index
    %c135 = arith.constant 135 : index
    %38 = vector.load %arg9[%c0_20, %c135] : memref<4x784xf32, #tpu.memory_space<vmem>>, vector<4x512xf32>
    %c1_i32_21 = arith.constant 1 : i32
    %39 = vector.broadcast %c1_i32_21 : i32 to vector<1x512xi32>
    %40 = arith.cmpi sge, %7, %39 : vector<1x512xi32>
    %41 = arith.extui %40 : vector<1x512xi1> to vector<1x512xi32>
    %42 = arith.sitofp %41 : vector<1x512xi32> to vector<1x512xf32>
    %43 = vector.broadcast %42 : vector<1x512xf32> to vector<4x512xf32>
    %44 = arith.mulf %38, %43 : vector<4x512xf32>
    %c12 = arith.constant 12 : index
    %c0_22 = arith.constant 0 : index
    %45 = vector.load %arg10[%c12, %c0_22] : memref<144x512xf32, #tpu.memory_space<vmem>>, vector<4x512xf32>
    tpu.vector_store %arg10[%c12, %c0_22], %44 {strides = array<i32>} : memref<144x512xf32, #tpu.memory_space<vmem>>, vector<4x512xf32>,
    %c0_23 = arith.constant 0 : index
    %c136_24 = arith.constant 136 : index
    %46 = vector.load %arg9[%c0_23, %c136_24] : memref<4x784xf32, #tpu.memory_space<vmem>>, vector<4x512xf32>
    %c16 = arith.constant 16 : index
    %c0_25 = arith.constant 0 : index
    %47 = vector.load %arg10[%c16, %c0_25] : memref<144x512xf32, #tpu.memory_space<vmem>>, vector<4x512xf32>
    tpu.vector_store %arg10[%c16, %c0_25], %46 {strides = array<i32>} : memref<144x512xf32, #tpu.memory_space<vmem>>, vector<4x512xf32>,
    %c0_26 = arith.constant 0 : index
    %c137 = arith.constant 137 : index
    %48 = vector.load %arg9[%c0_26, %c137] : memref<4x784xf32, #tpu.memory_space<vmem>>, vector<4x512xf32>
    %c15_i32_27 = arith.constant 15 : i32
    %49 = vector.broadcast %c15_i32_27 : i32 to vector<1x512xi32>
    %50 = arith.cmpi slt, %7, %49 : vector<1x512xi32>
    %51 = arith.extui %50 : vector<1x512xi1> to vector<1x512xi32>
    %52 = arith.sitofp %51 : vector<1x512xi32> to vector<1x512xf32>
    %53 = vector.broadcast %52 : vector<1x512xf32> to vector<4x512xf32>
    %54 = arith.mulf %48, %53 : vector<4x512xf32>
    %c20 = arith.constant 20 : index
    %c0_28 = arith.constant 0 : index
    %55 = vector.load %arg10[%c20, %c0_28] : memref<144x512xf32, #tpu.memory_space<vmem>>, vector<4x512xf32>
    tpu.vector_store %arg10[%c20, %c0_28], %54 {strides = array<i32>} : memref<144x512xf32, #tpu.memory_space<vmem>>, vector<4x512xf32>,
    %c0_29 = arith.constant 0 : index
    %c151 = arith.constant 151 : index
    %56 = vector.load %arg9[%c0_29, %c151] : memref<4x784xf32, #tpu.memory_space<vmem>>, vector<4x512xf32>
    %c15_i32_30 = arith.constant 15 : i32
    %57 = vector.broadcast %c15_i32_30 : i32 to vector<1x512xi32>
    %58 = arith.cmpi slt, %6, %57 : vector<1x512xi32>
    %c1_i32_31 = arith.constant 1 : i32
    %59 = vector.broadcast %c1_i32_31 : i32 to vector<1x512xi32>
    %60 = arith.cmpi sge, %7, %59 : vector<1x512xi32>
    %61 = arith.andi %58, %60 : vector<1x512xi1>
    %62 = arith.extui %61 : vector<1x512xi1> to vector<1x512xi32>
    %63 = arith.sitofp %62 : vector<1x512xi32> to vector<1x512xf32>
    %64 = vector.broadcast %63 : vector<1x512xf32> to vector<4x512xf32>
    %65 = arith.mulf %56, %64 : vector<4x512xf32>
    %c24 = arith.constant 24 : index
    %c0_32 = arith.constant 0 : index
    %66 = vector.load %arg10[%c24, %c0_32] : memref<144x512xf32, #tpu.memory_space<vmem>>, vector<4x512xf32>
    tpu.vector_store %arg10[%c24, %c0_32], %65 {strides = array<i32>} : memref<144x512xf32, #tpu.memory_space<vmem>>, vector<4x512xf32>,
    %c0_33 = arith.constant 0 : index
    %c152 = arith.constant 152 : index
    %67 = vector.load %arg9[%c0_33, %c152] : memref<4x784xf32, #tpu.memory_space<vmem>>, vector<4x512xf32>
    %c15_i32_34 = arith.constant 15 : i32
    %68 = vector.broadcast %c15_i32_34 : i32 to vector<1x512xi32>
    %69 = arith.cmpi slt, %6, %68 : vector<1x512xi32>
    %70 = arith.extui %69 : vector<1x512xi1> to vector<1x512xi32>
    %71 = arith.sitofp %70 : vector<1x512xi32> to vector<1x512xf32>
    %72 = vector.broadcast %71 : vector<1x512xf32> to vector<4x512xf32>
    %73 = arith.mulf %67, %72 : vector<4x512xf32>
    %c28 = arith.constant 28 : index
    %c0_35 = arith.constant 0 : index
    %74 = vector.load %arg10[%c28, %c0_35] : memref<144x512xf32, #tpu.memory_space<vmem>>, vector<4x512xf32>
    tpu.vector_store %arg10[%c28, %c0_35], %73 {strides = array<i32>} : memref<144x512xf32, #tpu.memory_space<vmem>>, vector<4x512xf32>,
    %c0_36 = arith.constant 0 : index
    %c153 = arith.constant 153 : index
    %75 = vector.load %arg9[%c0_36, %c153] : memref<4x784xf32, #tpu.memory_space<vmem>>, vector<4x512xf32>
    %c15_i32_37 = arith.constant 15 : i32
    %76 = vector.broadcast %c15_i32_37 : i32 to vector<1x512xi32>
    %77 = arith.cmpi slt, %6, %76 : vector<1x512xi32>
    %c15_i32_38 = arith.constant 15 : i32
    %78 = vector.broadcast %c15_i32_38 : i32 to vector<1x512xi32>
    %79 = arith.cmpi slt, %7, %78 : vector<1x512xi32>
    %80 = arith.andi %77, %79 : vector<1x512xi1>
    %81 = arith.extui %80 : vector<1x512xi1> to vector<1x512xi32>
    %82 = arith.sitofp %81 : vector<1x512xi32> to vector<1x512xf32>
    %83 = vector.broadcast %82 : vector<1x512xf32> to vector<4x512xf32>
    %84 = arith.mulf %75, %83 : vector<4x512xf32>
    %c32 = arith.constant 32 : index
    %c0_39 = arith.constant 0 : index
    %85 = vector.load %arg10[%c32, %c0_39] : memref<144x512xf32, #tpu.memory_space<vmem>>, vector<4x512xf32>
    tpu.vector_store %arg10[%c32, %c0_39], %84 {strides = array<i32>} : memref<144x512xf32, #tpu.memory_space<vmem>>, vector<4x512xf32>,
    %c0_40 = arith.constant 0 : index
    %c102 = arith.constant 102 : index
    %86 = vector.load %arg9[%c0_40, %c102] : memref<4x784xf32, #tpu.memory_space<vmem>>, vector<4x512xf32>
    %c2_i32 = arith.constant 2 : i32
    %87 = vector.broadcast %c2_i32 : i32 to vector<1x512xi32>
    %88 = arith.cmpi sge, %6, %87 : vector<1x512xi32>
    %c2_i32_41 = arith.constant 2 : i32
    %89 = vector.broadcast %c2_i32_41 : i32 to vector<1x512xi32>
    %90 = arith.cmpi sge, %7, %89 : vector<1x512xi32>
    %91 = arith.andi %88, %90 : vector<1x512xi1>
    %92 = arith.extui %91 : vector<1x512xi1> to vector<1x512xi32>
    %93 = arith.sitofp %92 : vector<1x512xi32> to vector<1x512xf32>
    %94 = vector.broadcast %93 : vector<1x512xf32> to vector<4x512xf32>
    %95 = arith.mulf %86, %94 : vector<4x512xf32>
    %c36 = arith.constant 36 : index
    %c0_42 = arith.constant 0 : index
    %96 = vector.load %arg10[%c36, %c0_42] : memref<144x512xf32, #tpu.memory_space<vmem>>, vector<4x512xf32>
    tpu.vector_store %arg10[%c36, %c0_42], %95 {strides = array<i32>} : memref<144x512xf32, #tpu.memory_space<vmem>>, vector<4x512xf32>,
    %c0_43 = arith.constant 0 : index
    %c104 = arith.constant 104 : index
    %97 = vector.load %arg9[%c0_43, %c104] : memref<4x784xf32, #tpu.memory_space<vmem>>, vector<4x512xf32>
    %c2_i32_44 = arith.constant 2 : i32
    %98 = vector.broadcast %c2_i32_44 : i32 to vector<1x512xi32>
    %99 = arith.cmpi sge, %6, %98 : vector<1x512xi32>
    %100 = arith.extui %99 : vector<1x512xi1> to vector<1x512xi32>
    %101 = arith.sitofp %100 : vector<1x512xi32> to vector<1x512xf32>
    %102 = vector.broadcast %101 : vector<1x512xf32> to vector<4x512xf32>
    %103 = arith.mulf %97, %102 : vector<4x512xf32>
    %c40 = arith.constant 40 : index
    %c0_45 = arith.constant 0 : index
    %104 = vector.load %arg10[%c40, %c0_45] : memref<144x512xf32, #tpu.memory_space<vmem>>, vector<4x512xf32>
    tpu.vector_store %arg10[%c40, %c0_45], %103 {strides = array<i32>} : memref<144x512xf32, #tpu.memory_space<vmem>>, vector<4x512xf32>,
    %c0_46 = arith.constant 0 : index
    %c106 = arith.constant 106 : index
    %105 = vector.load %arg9[%c0_46, %c106] : memref<4x784xf32, #tpu.memory_space<vmem>>, vector<4x512xf32>
    %c2_i32_47 = arith.constant 2 : i32
    %106 = vector.broadcast %c2_i32_47 : i32 to vector<1x512xi32>
    %107 = arith.cmpi sge, %6, %106 : vector<1x512xi32>
    %c14_i32 = arith.constant 14 : i32
    %108 = vector.broadcast %c14_i32 : i32 to vector<1x512xi32>
    %109 = arith.cmpi slt, %7, %108 : vector<1x512xi32>
    %110 = arith.andi %107, %109 : vector<1x512xi1>
    %111 = arith.extui %110 : vector<1x512xi1> to vector<1x512xi32>
    %112 = arith.sitofp %111 : vector<1x512xi32> to vector<1x512xf32>
    %113 = vector.broadcast %112 : vector<1x512xf32> to vector<4x512xf32>
    %114 = arith.mulf %105, %113 : vector<4x512xf32>
    %c44 = arith.constant 44 : index
    %c0_48 = arith.constant 0 : index
    %115 = vector.load %arg10[%c44, %c0_48] : memref<144x512xf32, #tpu.memory_space<vmem>>, vector<4x512xf32>
    tpu.vector_store %arg10[%c44, %c0_48], %114 {strides = array<i32>} : memref<144x512xf32, #tpu.memory_space<vmem>>, vector<4x512xf32>,
    %c0_49 = arith.constant 0 : index
    %c134 = arith.constant 134 : index
    %116 = vector.load %arg9[%c0_49, %c134] : memref<4x784xf32, #tpu.memory_space<vmem>>, vector<4x512xf32>
    %c2_i32_50 = arith.constant 2 : i32
    %117 = vector.broadcast %c2_i32_50 : i32 to vector<1x512xi32>
    %118 = arith.cmpi sge, %7, %117 : vector<1x512xi32>
    %119 = arith.extui %118 : vector<1x512xi1> to vector<1x512xi32>
    %120 = arith.sitofp %119 : vector<1x512xi32> to vector<1x512xf32>
    %121 = vector.broadcast %120 : vector<1x512xf32> to vector<4x512xf32>
    %122 = arith.mulf %116, %121 : vector<4x512xf32>
    %c48 = arith.constant 48 : index
    %c0_51 = arith.constant 0 : index
    %123 = vector.load %arg10[%c48, %c0_51] : memref<144x512xf32, #tpu.memory_space<vmem>>, vector<4x512xf32>
    tpu.vector_store %arg10[%c48, %c0_51], %122 {strides = array<i32>} : memref<144x512xf32, #tpu.memory_space<vmem>>, vector<4x512xf32>,
    %c0_52 = arith.constant 0 : index
    %c136_53 = arith.constant 136 : index
    %124 = vector.load %arg9[%c0_52, %c136_53] : memref<4x784xf32, #tpu.memory_space<vmem>>, vector<4x512xf32>
    %c52 = arith.constant 52 : index
    %c0_54 = arith.constant 0 : index
    %125 = vector.load %arg10[%c52, %c0_54] : memref<144x512xf32, #tpu.memory_space<vmem>>, vector<4x512xf32>
    tpu.vector_store %arg10[%c52, %c0_54], %124 {strides = array<i32>} : memref<144x512xf32, #tpu.memory_space<vmem>>, vector<4x512xf32>,
    %c0_55 = arith.constant 0 : index
    %c138 = arith.constant 138 : index
    %126 = vector.load %arg9[%c0_55, %c138] : memref<4x784xf32, #tpu.memory_space<vmem>>, vector<4x512xf32>
    %c14_i32_56 = arith.constant 14 : i32
    %127 = vector.broadcast %c14_i32_56 : i32 to vector<1x512xi32>
    %128 = arith.cmpi slt, %7, %127 : vector<1x512xi32>
    %129 = arith.extui %128 : vector<1x512xi1> to vector<1x512xi32>
    %130 = arith.sitofp %129 : vector<1x512xi32> to vector<1x512xf32>
    %131 = vector.broadcast %130 : vector<1x512xf32> to vector<4x512xf32>
    %132 = arith.mulf %126, %131 : vector<4x512xf32>
    %c56 = arith.constant 56 : index
    %c0_57 = arith.constant 0 : index
    %133 = vector.load %arg10[%c56, %c0_57] : memref<144x512xf32, #tpu.memory_space<vmem>>, vector<4x512xf32>
    tpu.vector_store %arg10[%c56, %c0_57], %132 {strides = array<i32>} : memref<144x512xf32, #tpu.memory_space<vmem>>, vector<4x512xf32>,
    %c0_58 = arith.constant 0 : index
    %c166 = arith.constant 166 : index
    %134 = vector.load %arg9[%c0_58, %c166] : memref<4x784xf32, #tpu.memory_space<vmem>>, vector<4x512xf32>
    %c14_i32_59 = arith.constant 14 : i32
    %135 = vector.broadcast %c14_i32_59 : i32 to vector<1x512xi32>
    %136 = arith.cmpi slt, %6, %135 : vector<1x512xi32>
    %c2_i32_60 = arith.constant 2 : i32
    %137 = vector.broadcast %c2_i32_60 : i32 to vector<1x512xi32>
    %138 = arith.cmpi sge, %7, %137 : vector<1x512xi32>
    %139 = arith.andi %136, %138 : vector<1x512xi1>
    %140 = arith.extui %139 : vector<1x512xi1> to vector<1x512xi32>
    %141 = arith.sitofp %140 : vector<1x512xi32> to vector<1x512xf32>
    %142 = vector.broadcast %141 : vector<1x512xf32> to vector<4x512xf32>
    %143 = arith.mulf %134, %142 : vector<4x512xf32>
    %c60 = arith.constant 60 : index
    %c0_61 = arith.constant 0 : index
    %144 = vector.load %arg10[%c60, %c0_61] : memref<144x512xf32, #tpu.memory_space<vmem>>, vector<4x512xf32>
    tpu.vector_store %arg10[%c60, %c0_61], %143 {strides = array<i32>} : memref<144x512xf32, #tpu.memory_space<vmem>>, vector<4x512xf32>,
    %c0_62 = arith.constant 0 : index
    %c168 = arith.constant 168 : index
    %145 = vector.load %arg9[%c0_62, %c168] : memref<4x784xf32, #tpu.memory_space<vmem>>, vector<4x512xf32>
    %c14_i32_63 = arith.constant 14 : i32
    %146 = vector.broadcast %c14_i32_63 : i32 to vector<1x512xi32>
    %147 = arith.cmpi slt, %6, %146 : vector<1x512xi32>
    %148 = arith.extui %147 : vector<1x512xi1> to vector<1x512xi32>
    %149 = arith.sitofp %148 : vector<1x512xi32> to vector<1x512xf32>
    %150 = vector.broadcast %149 : vector<1x512xf32> to vector<4x512xf32>
    %151 = arith.mulf %145, %150 : vector<4x512xf32>
    %c64 = arith.constant 64 : index
    %c0_64 = arith.constant 0 : index
    %152 = vector.load %arg10[%c64, %c0_64] : memref<144x512xf32, #tpu.memory_space<vmem>>, vector<4x512xf32>
    tpu.vector_store %arg10[%c64, %c0_64], %151 {strides = array<i32>} : memref<144x512xf32, #tpu.memory_space<vmem>>, vector<4x512xf32>,
    %c0_65 = arith.constant 0 : index
    %c170 = arith.constant 170 : index
    %153 = vector.load %arg9[%c0_65, %c170] : memref<4x784xf32, #tpu.memory_space<vmem>>, vector<4x512xf32>
    %c14_i32_66 = arith.constant 14 : i32
    %154 = vector.broadcast %c14_i32_66 : i32 to vector<1x512xi32>
    %155 = arith.cmpi slt, %6, %154 : vector<1x512xi32>
    %c14_i32_67 = arith.constant 14 : i32
    %156 = vector.broadcast %c14_i32_67 : i32 to vector<1x512xi32>
    %157 = arith.cmpi slt, %7, %156 : vector<1x512xi32>
    %158 = arith.andi %155, %157 : vector<1x512xi1>
    %159 = arith.extui %158 : vector<1x512xi1> to vector<1x512xi32>
    %160 = arith.sitofp %159 : vector<1x512xi32> to vector<1x512xf32>
    %161 = vector.broadcast %160 : vector<1x512xf32> to vector<4x512xf32>
    %162 = arith.mulf %153, %161 : vector<4x512xf32>
    %c68 = arith.constant 68 : index
    %c0_68 = arith.constant 0 : index
    %163 = vector.load %arg10[%c68, %c0_68] : memref<144x512xf32, #tpu.memory_space<vmem>>, vector<4x512xf32>
    tpu.vector_store %arg10[%c68, %c0_68], %162 {strides = array<i32>} : memref<144x512xf32, #tpu.memory_space<vmem>>, vector<4x512xf32>,
    %c0_69 = arith.constant 0 : index
    %c68_70 = arith.constant 68 : index
    %164 = vector.load %arg9[%c0_69, %c68_70] : memref<4x784xf32, #tpu.memory_space<vmem>>, vector<4x512xf32>
    %c4_i32 = arith.constant 4 : i32
    %165 = vector.broadcast %c4_i32 : i32 to vector<1x512xi32>
    %166 = arith.cmpi sge, %6, %165 : vector<1x512xi32>
    %c4_i32_71 = arith.constant 4 : i32
    %167 = vector.broadcast %c4_i32_71 : i32 to vector<1x512xi32>
    %168 = arith.cmpi sge, %7, %167 : vector<1x512xi32>
    %169 = arith.andi %166, %168 : vector<1x512xi1>
    %170 = arith.extui %169 : vector<1x512xi1> to vector<1x512xi32>
    %171 = arith.sitofp %170 : vector<1x512xi32> to vector<1x512xf32>
    %172 = vector.broadcast %171 : vector<1x512xf32> to vector<4x512xf32>
    %173 = arith.mulf %164, %172 : vector<4x512xf32>
    %c72 = arith.constant 72 : index
    %c0_72 = arith.constant 0 : index
    %174 = vector.load %arg10[%c72, %c0_72] : memref<144x512xf32, #tpu.memory_space<vmem>>, vector<4x512xf32>
    tpu.vector_store %arg10[%c72, %c0_72], %173 {strides = array<i32>} : memref<144x512xf32, #tpu.memory_space<vmem>>, vector<4x512xf32>,
    %c0_73 = arith.constant 0 : index
    %c72_74 = arith.constant 72 : index
    %175 = vector.load %arg9[%c0_73, %c72_74] : memref<4x784xf32, #tpu.memory_space<vmem>>, vector<4x512xf32>
    %c4_i32_75 = arith.constant 4 : i32
    %176 = vector.broadcast %c4_i32_75 : i32 to vector<1x512xi32>
    %177 = arith.cmpi sge, %6, %176 : vector<1x512xi32>
    %178 = arith.extui %177 : vector<1x512xi1> to vector<1x512xi32>
    %179 = arith.sitofp %178 : vector<1x512xi32> to vector<1x512xf32>
    %180 = vector.broadcast %179 : vector<1x512xf32> to vector<4x512xf32>
    %181 = arith.mulf %175, %180 : vector<4x512xf32>
    %c76 = arith.constant 76 : index
    %c0_76 = arith.constant 0 : index
    %182 = vector.load %arg10[%c76, %c0_76] : memref<144x512xf32, #tpu.memory_space<vmem>>, vector<4x512xf32>
    tpu.vector_store %arg10[%c76, %c0_76], %181 {strides = array<i32>} : memref<144x512xf32, #tpu.memory_space<vmem>>, vector<4x512xf32>,
    %c0_77 = arith.constant 0 : index
    %c76_78 = arith.constant 76 : index
    %183 = vector.load %arg9[%c0_77, %c76_78] : memref<4x784xf32, #tpu.memory_space<vmem>>, vector<4x512xf32>
    %c4_i32_79 = arith.constant 4 : i32
    %184 = vector.broadcast %c4_i32_79 : i32 to vector<1x512xi32>
    %185 = arith.cmpi sge, %6, %184 : vector<1x512xi32>
    %c12_i32 = arith.constant 12 : i32
    %186 = vector.broadcast %c12_i32 : i32 to vector<1x512xi32>
    %187 = arith.cmpi slt, %7, %186 : vector<1x512xi32>
    %188 = arith.andi %185, %187 : vector<1x512xi1>
    %189 = arith.extui %188 : vector<1x512xi1> to vector<1x512xi32>
    %190 = arith.sitofp %189 : vector<1x512xi32> to vector<1x512xf32>
    %191 = vector.broadcast %190 : vector<1x512xf32> to vector<4x512xf32>
    %192 = arith.mulf %183, %191 : vector<4x512xf32>
    %c80 = arith.constant 80 : index
    %c0_80 = arith.constant 0 : index
    %193 = vector.load %arg10[%c80, %c0_80] : memref<144x512xf32, #tpu.memory_space<vmem>>, vector<4x512xf32>
    tpu.vector_store %arg10[%c80, %c0_80], %192 {strides = array<i32>} : memref<144x512xf32, #tpu.memory_space<vmem>>, vector<4x512xf32>,
    %c0_81 = arith.constant 0 : index
    %c132 = arith.constant 132 : index
    %194 = vector.load %arg9[%c0_81, %c132] : memref<4x784xf32, #tpu.memory_space<vmem>>, vector<4x512xf32>
    %c4_i32_82 = arith.constant 4 : i32
    %195 = vector.broadcast %c4_i32_82 : i32 to vector<1x512xi32>
    %196 = arith.cmpi sge, %7, %195 : vector<1x512xi32>
    %197 = arith.extui %196 : vector<1x512xi1> to vector<1x512xi32>
    %198 = arith.sitofp %197 : vector<1x512xi32> to vector<1x512xf32>
    %199 = vector.broadcast %198 : vector<1x512xf32> to vector<4x512xf32>
    %200 = arith.mulf %194, %199 : vector<4x512xf32>
    %c84 = arith.constant 84 : index
    %c0_83 = arith.constant 0 : index
    %201 = vector.load %arg10[%c84, %c0_83] : memref<144x512xf32, #tpu.memory_space<vmem>>, vector<4x512xf32>
    tpu.vector_store %arg10[%c84, %c0_83], %200 {strides = array<i32>} : memref<144x512xf32, #tpu.memory_space<vmem>>, vector<4x512xf32>,
    %c0_84 = arith.constant 0 : index
    %c136_85 = arith.constant 136 : index
    %202 = vector.load %arg9[%c0_84, %c136_85] : memref<4x784xf32, #tpu.memory_space<vmem>>, vector<4x512xf32>
    %c88 = arith.constant 88 : index
    %c0_86 = arith.constant 0 : index
    %203 = vector.load %arg10[%c88, %c0_86] : memref<144x512xf32, #tpu.memory_space<vmem>>, vector<4x512xf32>
    tpu.vector_store %arg10[%c88, %c0_86], %202 {strides = array<i32>} : memref<144x512xf32, #tpu.memory_space<vmem>>, vector<4x512xf32>,
    %c0_87 = arith.constant 0 : index
    %c140 = arith.constant 140 : index
    %204 = vector.load %arg9[%c0_87, %c140] : memref<4x784xf32, #tpu.memory_space<vmem>>, vector<4x512xf32>
    %c12_i32_88 = arith.constant 12 : i32
    %205 = vector.broadcast %c12_i32_88 : i32 to vector<1x512xi32>
    %206 = arith.cmpi slt, %7, %205 : vector<1x512xi32>
    %207 = arith.extui %206 : vector<1x512xi1> to vector<1x512xi32>
    %208 = arith.sitofp %207 : vector<1x512xi32> to vector<1x512xf32>
    %209 = vector.broadcast %208 : vector<1x512xf32> to vector<4x512xf32>
    %210 = arith.mulf %204, %209 : vector<4x512xf32>
    %c92 = arith.constant 92 : index
    %c0_89 = arith.constant 0 : index
    %211 = vector.load %arg10[%c92, %c0_89] : memref<144x512xf32, #tpu.memory_space<vmem>>, vector<4x512xf32>
    tpu.vector_store %arg10[%c92, %c0_89], %210 {strides = array<i32>} : memref<144x512xf32, #tpu.memory_space<vmem>>, vector<4x512xf32>,
    %c0_90 = arith.constant 0 : index
    %c196 = arith.constant 196 : index
    %212 = vector.load %arg9[%c0_90, %c196] : memref<4x784xf32, #tpu.memory_space<vmem>>, vector<4x512xf32>
    %c12_i32_91 = arith.constant 12 : i32
    %213 = vector.broadcast %c12_i32_91 : i32 to vector<1x512xi32>
    %214 = arith.cmpi slt, %6, %213 : vector<1x512xi32>
    %c4_i32_92 = arith.constant 4 : i32
    %215 = vector.broadcast %c4_i32_92 : i32 to vector<1x512xi32>
    %216 = arith.cmpi sge, %7, %215 : vector<1x512xi32>
    %217 = arith.andi %214, %216 : vector<1x512xi1>
    %218 = arith.extui %217 : vector<1x512xi1> to vector<1x512xi32>
    %219 = arith.sitofp %218 : vector<1x512xi32> to vector<1x512xf32>
    %220 = vector.broadcast %219 : vector<1x512xf32> to vector<4x512xf32>
    %221 = arith.mulf %212, %220 : vector<4x512xf32>
    %c96 = arith.constant 96 : index
    %c0_93 = arith.constant 0 : index
    %222 = vector.load %arg10[%c96, %c0_93] : memref<144x512xf32, #tpu.memory_space<vmem>>, vector<4x512xf32>
    tpu.vector_store %arg10[%c96, %c0_93], %221 {strides = array<i32>} : memref<144x512xf32, #tpu.memory_space<vmem>>, vector<4x512xf32>,
    %c0_94 = arith.constant 0 : index
    %c200 = arith.constant 200 : index
    %223 = vector.load %arg9[%c0_94, %c200] : memref<4x784xf32, #tpu.memory_space<vmem>>, vector<4x512xf32>
    %c12_i32_95 = arith.constant 12 : i32
    %224 = vector.broadcast %c12_i32_95 : i32 to vector<1x512xi32>
    %225 = arith.cmpi slt, %6, %224 : vector<1x512xi32>
    %226 = arith.extui %225 : vector<1x512xi1> to vector<1x512xi32>
    %227 = arith.sitofp %226 : vector<1x512xi32> to vector<1x512xf32>
    %228 = vector.broadcast %227 : vector<1x512xf32> to vector<4x512xf32>
    %229 = arith.mulf %223, %228 : vector<4x512xf32>
    %c100 = arith.constant 100 : index
    %c0_96 = arith.constant 0 : index
    %230 = vector.load %arg10[%c100, %c0_96] : memref<144x512xf32, #tpu.memory_space<vmem>>, vector<4x512xf32>
    tpu.vector_store %arg10[%c100, %c0_96], %229 {strides = array<i32>} : memref<144x512xf32, #tpu.memory_space<vmem>>, vector<4x512xf32>,
    %c0_97 = arith.constant 0 : index
    %c204 = arith.constant 204 : index
    %231 = vector.load %arg9[%c0_97, %c204] : memref<4x784xf32, #tpu.memory_space<vmem>>, vector<4x512xf32>
    %c12_i32_98 = arith.constant 12 : i32
    %232 = vector.broadcast %c12_i32_98 : i32 to vector<1x512xi32>
    %233 = arith.cmpi slt, %6, %232 : vector<1x512xi32>
    %c12_i32_99 = arith.constant 12 : i32
    %234 = vector.broadcast %c12_i32_99 : i32 to vector<1x512xi32>
    %235 = arith.cmpi slt, %7, %234 : vector<1x512xi32>
    %236 = arith.andi %233, %235 : vector<1x512xi1>
    %237 = arith.extui %236 : vector<1x512xi1> to vector<1x512xi32>
    %238 = arith.sitofp %237 : vector<1x512xi32> to vector<1x512xf32>
    %239 = vector.broadcast %238 : vector<1x512xf32> to vector<4x512xf32>
    %240 = arith.mulf %231, %239 : vector<4x512xf32>
    %c104_100 = arith.constant 104 : index
    %c0_101 = arith.constant 0 : index
    %241 = vector.load %arg10[%c104_100, %c0_101] : memref<144x512xf32, #tpu.memory_space<vmem>>, vector<4x512xf32>
    tpu.vector_store %arg10[%c104_100, %c0_101], %240 {strides = array<i32>} : memref<144x512xf32, #tpu.memory_space<vmem>>, vector<4x512xf32>,
    %c0_102 = arith.constant 0 : index
    %c0_103 = arith.constant 0 : index
    %242 = vector.load %arg9[%c0_102, %c0_103] : memref<4x784xf32, #tpu.memory_space<vmem>>, vector<4x512xf32>
    %c8_i32 = arith.constant 8 : i32
    %243 = vector.broadcast %c8_i32 : i32 to vector<1x512xi32>
    %244 = arith.cmpi sge, %6, %243 : vector<1x512xi32>
    %c8_i32_104 = arith.constant 8 : i32
    %245 = vector.broadcast %c8_i32_104 : i32 to vector<1x512xi32>
    %246 = arith.cmpi sge, %7, %245 : vector<1x512xi32>
    %247 = arith.andi %244, %246 : vector<1x512xi1>
    %248 = arith.extui %247 : vector<1x512xi1> to vector<1x512xi32>
    %249 = arith.sitofp %248 : vector<1x512xi32> to vector<1x512xf32>
    %250 = vector.broadcast %249 : vector<1x512xf32> to vector<4x512xf32>
    %251 = arith.mulf %242, %250 : vector<4x512xf32>
    %c108 = arith.constant 108 : index
    %c0_105 = arith.constant 0 : index
    %252 = vector.load %arg10[%c108, %c0_105] : memref<144x512xf32, #tpu.memory_space<vmem>>, vector<4x512xf32>
    tpu.vector_store %arg10[%c108, %c0_105], %251 {strides = array<i32>} : memref<144x512xf32, #tpu.memory_space<vmem>>, vector<4x512xf32>,
    %c0_106 = arith.constant 0 : index
    %c8_107 = arith.constant 8 : index
    %253 = vector.load %arg9[%c0_106, %c8_107] : memref<4x784xf32, #tpu.memory_space<vmem>>, vector<4x512xf32>
    %c8_i32_108 = arith.constant 8 : i32
    %254 = vector.broadcast %c8_i32_108 : i32 to vector<1x512xi32>
    %255 = arith.cmpi sge, %6, %254 : vector<1x512xi32>
    %256 = arith.extui %255 : vector<1x512xi1> to vector<1x512xi32>
    %257 = arith.sitofp %256 : vector<1x512xi32> to vector<1x512xf32>
    %258 = vector.broadcast %257 : vector<1x512xf32> to vector<4x512xf32>
    %259 = arith.mulf %253, %258 : vector<4x512xf32>
    %c112 = arith.constant 112 : index
    %c0_109 = arith.constant 0 : index
    %260 = vector.load %arg10[%c112, %c0_109] : memref<144x512xf32, #tpu.memory_space<vmem>>, vector<4x512xf32>
    tpu.vector_store %arg10[%c112, %c0_109], %259 {strides = array<i32>} : memref<144x512xf32, #tpu.memory_space<vmem>>, vector<4x512xf32>,
    %c0_110 = arith.constant 0 : index
    %c16_111 = arith.constant 16 : index
    %261 = vector.load %arg9[%c0_110, %c16_111] : memref<4x784xf32, #tpu.memory_space<vmem>>, vector<4x512xf32>
    %c8_i32_112 = arith.constant 8 : i32
    %262 = vector.broadcast %c8_i32_112 : i32 to vector<1x512xi32>
    %263 = arith.cmpi sge, %6, %262 : vector<1x512xi32>
    %c8_i32_113 = arith.constant 8 : i32
    %264 = vector.broadcast %c8_i32_113 : i32 to vector<1x512xi32>
    %265 = arith.cmpi slt, %7, %264 : vector<1x512xi32>
    %266 = arith.andi %263, %265 : vector<1x512xi1>
    %267 = arith.extui %266 : vector<1x512xi1> to vector<1x512xi32>
    %268 = arith.sitofp %267 : vector<1x512xi32> to vector<1x512xf32>
    %269 = vector.broadcast %268 : vector<1x512xf32> to vector<4x512xf32>
    %270 = arith.mulf %261, %269 : vector<4x512xf32>
    %c116 = arith.constant 116 : index
    %c0_114 = arith.constant 0 : index
    %271 = vector.load %arg10[%c116, %c0_114] : memref<144x512xf32, #tpu.memory_space<vmem>>, vector<4x512xf32>
    tpu.vector_store %arg10[%c116, %c0_114], %270 {strides = array<i32>} : memref<144x512xf32, #tpu.memory_space<vmem>>, vector<4x512xf32>,
    %c0_115 = arith.constant 0 : index
    %c128 = arith.constant 128 : index
    %272 = vector.load %arg9[%c0_115, %c128] : memref<4x784xf32, #tpu.memory_space<vmem>>, vector<4x512xf32>
    %c8_i32_116 = arith.constant 8 : i32
    %273 = vector.broadcast %c8_i32_116 : i32 to vector<1x512xi32>
    %274 = arith.cmpi sge, %7, %273 : vector<1x512xi32>
    %275 = arith.extui %274 : vector<1x512xi1> to vector<1x512xi32>
    %276 = arith.sitofp %275 : vector<1x512xi32> to vector<1x512xf32>
    %277 = vector.broadcast %276 : vector<1x512xf32> to vector<4x512xf32>
    %278 = arith.mulf %272, %277 : vector<4x512xf32>
    %c120_117 = arith.constant 120 : index
    %c0_118 = arith.constant 0 : index
    %279 = vector.load %arg10[%c120_117, %c0_118] : memref<144x512xf32, #tpu.memory_space<vmem>>, vector<4x512xf32>
    tpu.vector_store %arg10[%c120_117, %c0_118], %278 {strides = array<i32>} : memref<144x512xf32, #tpu.memory_space<vmem>>, vector<4x512xf32>,
    %c0_119 = arith.constant 0 : index
    %c136_120 = arith.constant 136 : index
    %280 = vector.load %arg9[%c0_119, %c136_120] : memref<4x784xf32, #tpu.memory_space<vmem>>, vector<4x512xf32>
    %c124 = arith.constant 124 : index
    %c0_121 = arith.constant 0 : index
    %281 = vector.load %arg10[%c124, %c0_121] : memref<144x512xf32, #tpu.memory_space<vmem>>, vector<4x512xf32>
    tpu.vector_store %arg10[%c124, %c0_121], %280 {strides = array<i32>} : memref<144x512xf32, #tpu.memory_space<vmem>>, vector<4x512xf32>,
    %c0_122 = arith.constant 0 : index
    %c144 = arith.constant 144 : index
    %282 = vector.load %arg9[%c0_122, %c144] : memref<4x784xf32, #tpu.memory_space<vmem>>, vector<4x512xf32>
    %c8_i32_123 = arith.constant 8 : i32
    %283 = vector.broadcast %c8_i32_123 : i32 to vector<1x512xi32>
    %284 = arith.cmpi slt, %7, %283 : vector<1x512xi32>
    %285 = arith.extui %284 : vector<1x512xi1> to vector<1x512xi32>
    %286 = arith.sitofp %285 : vector<1x512xi32> to vector<1x512xf32>
    %287 = vector.broadcast %286 : vector<1x512xf32> to vector<4x512xf32>
    %288 = arith.mulf %282, %287 : vector<4x512xf32>
    %c128_124 = arith.constant 128 : index
    %c0_125 = arith.constant 0 : index
    %289 = vector.load %arg10[%c128_124, %c0_125] : memref<144x512xf32, #tpu.memory_space<vmem>>, vector<4x512xf32>
    tpu.vector_store %arg10[%c128_124, %c0_125], %288 {strides = array<i32>} : memref<144x512xf32, #tpu.memory_space<vmem>>, vector<4x512xf32>,
    %c0_126 = arith.constant 0 : index
    %c256 = arith.constant 256 : index
    %290 = vector.load %arg9[%c0_126, %c256] : memref<4x784xf32, #tpu.memory_space<vmem>>, vector<4x512xf32>
    %c8_i32_127 = arith.constant 8 : i32
    %291 = vector.broadcast %c8_i32_127 : i32 to vector<1x512xi32>
    %292 = arith.cmpi slt, %6, %291 : vector<1x512xi32>
    %c8_i32_128 = arith.constant 8 : i32
    %293 = vector.broadcast %c8_i32_128 : i32 to vector<1x512xi32>
    %294 = arith.cmpi sge, %7, %293 : vector<1x512xi32>
    %295 = arith.andi %292, %294 : vector<1x512xi1>
    %296 = arith.extui %295 : vector<1x512xi1> to vector<1x512xi32>
    %297 = arith.sitofp %296 : vector<1x512xi32> to vector<1x512xf32>
    %298 = vector.broadcast %297 : vector<1x512xf32> to vector<4x512xf32>
    %299 = arith.mulf %290, %298 : vector<4x512xf32>
    %c132_129 = arith.constant 132 : index
    %c0_130 = arith.constant 0 : index
    %300 = vector.load %arg10[%c132_129, %c0_130] : memref<144x512xf32, #tpu.memory_space<vmem>>, vector<4x512xf32>
    tpu.vector_store %arg10[%c132_129, %c0_130], %299 {strides = array<i32>} : memref<144x512xf32, #tpu.memory_space<vmem>>, vector<4x512xf32>,
    %c0_131 = arith.constant 0 : index
    %c264 = arith.constant 264 : index
    %301 = vector.load %arg9[%c0_131, %c264] : memref<4x784xf32, #tpu.memory_space<vmem>>, vector<4x512xf32>
    %c8_i32_132 = arith.constant 8 : i32
    %302 = vector.broadcast %c8_i32_132 : i32 to vector<1x512xi32>
    %303 = arith.cmpi slt, %6, %302 : vector<1x512xi32>
    %304 = arith.extui %303 : vector<1x512xi1> to vector<1x512xi32>
    %305 = arith.sitofp %304 : vector<1x512xi32> to vector<1x512xf32>
    %306 = vector.broadcast %305 : vector<1x512xf32> to vector<4x512xf32>
    %307 = arith.mulf %301, %306 : vector<4x512xf32>
    %c136_133 = arith.constant 136 : index
    %c0_134 = arith.constant 0 : index
    %308 = vector.load %arg10[%c136_133, %c0_134] : memref<144x512xf32, #tpu.memory_space<vmem>>, vector<4x512xf32>
    tpu.vector_store %arg10[%c136_133, %c0_134], %307 {strides = array<i32>} : memref<144x512xf32, #tpu.memory_space<vmem>>, vector<4x512xf32>,
    %c0_135 = arith.constant 0 : index
    %c272 = arith.constant 272 : index
    %309 = vector.load %arg9[%c0_135, %c272] : memref<4x784xf32, #tpu.memory_space<vmem>>, vector<4x512xf32>
    %c8_i32_136 = arith.constant 8 : i32
    %310 = vector.broadcast %c8_i32_136 : i32 to vector<1x512xi32>
    %311 = arith.cmpi slt, %6, %310 : vector<1x512xi32>
    %c8_i32_137 = arith.constant 8 : i32
    %312 = vector.broadcast %c8_i32_137 : i32 to vector<1x512xi32>
    %313 = arith.cmpi slt, %7, %312 : vector<1x512xi32>
    %314 = arith.andi %311, %313 : vector<1x512xi1>
    %315 = arith.extui %314 : vector<1x512xi1> to vector<1x512xi32>
    %316 = arith.sitofp %315 : vector<1x512xi32> to vector<1x512xf32>
    %317 = vector.broadcast %316 : vector<1x512xf32> to vector<4x512xf32>
    %318 = arith.mulf %309, %317 : vector<4x512xf32>
    %c140_138 = arith.constant 140 : index
    %c0_139 = arith.constant 0 : index
    %319 = vector.load %arg10[%c140_138, %c0_139] : memref<144x512xf32, #tpu.memory_space<vmem>>, vector<4x512xf32>
    tpu.vector_store %arg10[%c140_138, %c0_139], %318 {strides = array<i32>} : memref<144x512xf32, #tpu.memory_space<vmem>>, vector<4x512xf32>,
    %c0_140 = arith.constant 0 : index
    %c0_141 = arith.constant 0 : index
    %320 = vector.load %arg3[%c0_140, %c0_141] : memref<16x144xf32, #tpu.memory_space<vmem>>, vector<16x144xf32>
    %c0_142 = arith.constant 0 : index
    %c0_143 = arith.constant 0 : index
    %321 = vector.load %arg10[%c0_142, %c0_143] : memref<144x512xf32, #tpu.memory_space<vmem>>, vector<144x512xf32>
    %cst_144 = arith.constant dense<0.000000e+00> : vector<16x512xf32>
    %322 = tpu.matmul %320, %321, %cst_144 {dimension_numbers = #tpu.dot_dimension_numbers<[1], [0], [0], [1], [0, 0, 1, 1], [], []>} : vector<16x144xf32>, vector<144x512xf32>, vector<16x512xf32> -> vector<16x512xf32>
    %c0_145 = arith.constant 0 : index
    %c0_146 = arith.constant 0 : index
    %323 = vector.load %arg4[%c0_145, %c0_146] : memref<16x1xf32, #tpu.memory_space<vmem>>, vector<16x1xf32>
    %c0_147 = arith.constant 0 : index
    %c0_148 = arith.constant 0 : index
    %324 = vector.load %arg5[%c0_147, %c0_148] : memref<16x1xf32, #tpu.memory_space<vmem>>, vector<16x1xf32>
    %cst_149 = arith.constant dense<0.000000e+00> : vector<16xf32>
    %325 = vector.multi_reduction <add>, %322, %cst_149 [1] : vector<16x512xf32> to vector<16xf32>
    %326 = vector.shape_cast %325 : vector<16xf32> to vector<16x1xf32>
    %cst_150 = arith.constant 5.120000e+02 : f32
    %327 = vector.broadcast %cst_150 : f32 to vector<16x1xf32>
    %328 = arith.divf %326, %327 : vector<16x1xf32>
    %329 = arith.mulf %322, %322 : vector<16x512xf32>
    %cst_151 = arith.constant dense<0.000000e+00> : vector<16xf32>
    %330 = vector.multi_reduction <add>, %329, %cst_151 [1] : vector<16x512xf32> to vector<16xf32>
    %331 = vector.shape_cast %330 : vector<16xf32> to vector<16x1xf32>
    %cst_152 = arith.constant 5.120000e+02 : f32
    %332 = vector.broadcast %cst_152 : f32 to vector<16x1xf32>
    %333 = arith.divf %331, %332 : vector<16x1xf32>
    %334 = arith.mulf %328, %328 : vector<16x1xf32>
    %335 = arith.subf %333, %334 : vector<16x1xf32>
    %cst_153 = arith.constant 0.000000e+00 : f32
    %336 = vector.broadcast %cst_153 : f32 to vector<16x1xf32>
    %337 = arith.maximumf %335, %336 : vector<16x1xf32>
    %338 = vector.broadcast %328 : vector<16x1xf32> to vector<16x512xf32>
    %339 = arith.subf %322, %338 : vector<16x512xf32>
    %cst_154 = arith.constant 9.99999974E-6 : f32
    %340 = vector.broadcast %cst_154 : f32 to vector<16x1xf32>
    %341 = arith.addf %337, %340 : vector<16x1xf32>
    %342 = math.rsqrt %341 : vector<16x1xf32>
    %343 = vector.broadcast %342 : vector<16x1xf32> to vector<16x512xf32>
    %344 = arith.mulf %339, %343 : vector<16x512xf32>
    %345 = vector.broadcast %323 : vector<16x1xf32> to vector<16x512xf32>
    %346 = arith.mulf %344, %345 : vector<16x512xf32>
    %347 = vector.broadcast %324 : vector<16x1xf32> to vector<16x512xf32>
    %348 = arith.addf %346, %347 : vector<16x512xf32>
    %cst_155 = arith.constant 0.000000e+00 : f32
    %349 = vector.broadcast %cst_155 : f32 to vector<16x512xf32>
    %350 = arith.maximumf %348, %349 : vector<16x512xf32>
    %c0_156 = arith.constant 0 : index
    %c0_157 = arith.constant 0 : index
    %351 = vector.load %arg6[%c0_156, %c0_157] : memref<20x1xf32, #tpu.memory_space<vmem>>, vector<4x1xf32>
    %c0_158 = arith.constant 0 : index
    %c0_159 = arith.constant 0 : index
    %352 = vector.load %arg7[%c0_158, %c0_159] : memref<20x1xf32, #tpu.memory_space<vmem>>, vector<4x1xf32>
    %cst_160 = arith.constant dense<0.000000e+00> : vector<4xf32>
    %353 = vector.multi_reduction <add>, %2, %cst_160 [1] : vector<4x512xf32> to vector<4xf32>
    %354 = vector.shape_cast %353 : vector<4xf32> to vector<4x1xf32>
    %cst_161 = arith.constant 5.120000e+02 : f32
    %355 = vector.broadcast %cst_161 : f32 to vector<4x1xf32>
    %356 = arith.divf %354, %355 : vector<4x1xf32>
    %357 = arith.mulf %2, %2 : vector<4x512xf32>
    %cst_162 = arith.constant dense<0.000000e+00> : vector<4xf32>
    %358 = vector.multi_reduction <add>, %357, %cst_162 [1] : vector<4x512xf32> to vector<4xf32>
    %359 = vector.shape_cast %358 : vector<4xf32> to vector<4x1xf32>
    %cst_163 = arith.constant 5.120000e+02 : f32
    %360 = vector.broadcast %cst_163 : f32 to vector<4x1xf32>
    %361 = arith.divf %359, %360 : vector<4x1xf32>
    %362 = arith.mulf %356, %356 : vector<4x1xf32>
    %363 = arith.subf %361, %362 : vector<4x1xf32>
    %cst_164 = arith.constant 0.000000e+00 : f32
    %364 = vector.broadcast %cst_164 : f32 to vector<4x1xf32>
    %365 = arith.maximumf %363, %364 : vector<4x1xf32>
    %366 = vector.broadcast %356 : vector<4x1xf32> to vector<4x512xf32>
    %367 = arith.subf %2, %366 : vector<4x512xf32>
    %cst_165 = arith.constant 9.99999974E-6 : f32
    %368 = vector.broadcast %cst_165 : f32 to vector<4x1xf32>
    %369 = arith.addf %365, %368 : vector<4x1xf32>
    %370 = math.rsqrt %369 : vector<4x1xf32>
    %371 = vector.broadcast %370 : vector<4x1xf32> to vector<4x512xf32>
    %372 = arith.mulf %367, %371 : vector<4x512xf32>
    %373 = vector.broadcast %351 : vector<4x1xf32> to vector<4x512xf32>
    %374 = arith.mulf %372, %373 : vector<4x512xf32>
    %375 = vector.broadcast %352 : vector<4x1xf32> to vector<4x512xf32>
    %376 = arith.addf %374, %375 : vector<4x512xf32>
    %cst_166 = arith.constant 0.000000e+00 : f32
    %377 = vector.broadcast %cst_166 : f32 to vector<4x512xf32>
    %378 = arith.maximumf %376, %377 : vector<4x512xf32>
    %c0_167 = arith.constant 0 : index
    %c0_168 = arith.constant 0 : index
    %379 = vector.load %arg8[%c0_167, %c0_168] : memref<20x512xf32, #tpu.memory_space<vmem>>, vector<4x512xf32>
    tpu.vector_store %arg8[%c0_167, %c0_168], %378 {strides = array<i32>} : memref<20x512xf32, #tpu.memory_space<vmem>>, vector<4x512xf32>,
    %c4_169 = arith.constant 4 : index
    %c0_170 = arith.constant 0 : index
    %380 = vector.load %arg6[%c4_169, %c0_170] : memref<20x1xf32, #tpu.memory_space<vmem>>, vector<16x1xf32>
    %c4_171 = arith.constant 4 : index
    %c0_172 = arith.constant 0 : index
    %381 = vector.load %arg7[%c4_171, %c0_172] : memref<20x1xf32, #tpu.memory_space<vmem>>, vector<16x1xf32>
    %cst_173 = arith.constant dense<0.000000e+00> : vector<16xf32>
    %382 = vector.multi_reduction <add>, %350, %cst_173 [1] : vector<16x512xf32> to vector<16xf32>
    %383 = vector.shape_cast %382 : vector<16xf32> to vector<16x1xf32>
    %cst_174 = arith.constant 5.120000e+02 : f32
    %384 = vector.broadcast %cst_174 : f32 to vector<16x1xf32>
    %385 = arith.divf %383, %384 : vector<16x1xf32>
    %386 = arith.mulf %350, %350 : vector<16x512xf32>
    %cst_175 = arith.constant dense<0.000000e+00> : vector<16xf32>
    %387 = vector.multi_reduction <add>, %386, %cst_175 [1] : vector<16x512xf32> to vector<16xf32>
    %388 = vector.shape_cast %387 : vector<16xf32> to vector<16x1xf32>
    %cst_176 = arith.constant 5.120000e+02 : f32
    %389 = vector.broadcast %cst_176 : f32 to vector<16x1xf32>
    %390 = arith.divf %388, %389 : vector<16x1xf32>
    %391 = arith.mulf %385, %385 : vector<16x1xf32>
    %392 = arith.subf %390, %391 : vector<16x1xf32>
    %cst_177 = arith.constant 0.000000e+00 : f32
    %393 = vector.broadcast %cst_177 : f32 to vector<16x1xf32>
    %394 = arith.maximumf %392, %393 : vector<16x1xf32>
    %395 = vector.broadcast %385 : vector<16x1xf32> to vector<16x512xf32>
    %396 = arith.subf %350, %395 : vector<16x512xf32>
    %cst_178 = arith.constant 9.99999974E-6 : f32
    %397 = vector.broadcast %cst_178 : f32 to vector<16x1xf32>
    %398 = arith.addf %394, %397 : vector<16x1xf32>
    %399 = math.rsqrt %398 : vector<16x1xf32>
    %400 = vector.broadcast %399 : vector<16x1xf32> to vector<16x512xf32>
    %401 = arith.mulf %396, %400 : vector<16x512xf32>
    %402 = vector.broadcast %380 : vector<16x1xf32> to vector<16x512xf32>
    %403 = arith.mulf %401, %402 : vector<16x512xf32>
    %404 = vector.broadcast %381 : vector<16x1xf32> to vector<16x512xf32>
    %405 = arith.addf %403, %404 : vector<16x512xf32>
    %cst_179 = arith.constant 0.000000e+00 : f32
    %406 = vector.broadcast %cst_179 : f32 to vector<16x512xf32>
    %407 = arith.maximumf %405, %406 : vector<16x512xf32>
    %c4_180 = arith.constant 4 : index
    %c0_181 = arith.constant 0 : index
    %408 = vector.load %arg8[%c4_180, %c0_181] : memref<20x512xf32, #tpu.memory_space<vmem>>, vector<16x512xf32>
    tpu.vector_store %arg8[%c4_180, %c0_181], %407 {strides = array<i32>} : memref<20x512xf32, #tpu.memory_space<vmem>>, vector<16x512xf32>,
    return
  }
}

module attributes {stable_mosaic.version = 11 : i64} {
  func.func @_head_kernel(%arg0: memref<20x512xf32, #tpu.memory_space<vmem>>, %arg1: memref<4x20xf32, #tpu.memory_space<vmem>>, %arg2: memref<1024x128xf32, #tpu.memory_space<vmem>>, %arg3: memref<128x3xf32, #tpu.memory_space<vmem>>, %arg4: memref<2x3xf32, #tpu.memory_space<vmem>>) attributes {dimension_semantics = [], scalar_prefetch = 0 : i64, scratch_operands = 0 : i64, tpu.core_type = #tpu.core_type<tc>} {
    %c0 = arith.constant 0 : index
    %c0_0 = arith.constant 0 : index
    %0 = vector.load %arg1[%c0, %c0_0] : memref<4x20xf32, #tpu.memory_space<vmem>>, vector<4x20xf32>
    %c0_1 = arith.constant 0 : index
    %c0_2 = arith.constant 0 : index
    %1 = vector.load %arg0[%c0_1, %c0_2] : memref<20x512xf32, #tpu.memory_space<vmem>>, vector<20x512xf32>
    %cst = arith.constant dense<0.000000e+00> : vector<4x512xf32>
    %2 = tpu.matmul %0, %1, %cst {dimension_numbers = #tpu.dot_dimension_numbers<[1], [0], [0], [1], [0, 0, 1, 1], [], []>} : vector<4x20xf32>, vector<20x512xf32>, vector<4x512xf32> -> vector<4x512xf32>
    %cst_3 = arith.constant 0.000000e+00 : f32
    %3 = vector.broadcast %cst_3 : f32 to vector<2x128xf32>
    %4 = vector.extract_strided_slice %2 {offsets = [0, 0], sizes = [1, 512], strides = [1, 1]} : vector<4x512xf32> to vector<1x512xf32>
    %5 = vector.shape_cast %4 : vector<1x512xf32> to vector<2x256xf32>
    %c0_4 = arith.constant 0 : index
    %c0_5 = arith.constant 0 : index
    %6 = vector.load %arg2[%c0_4, %c0_5] : memref<1024x128xf32, #tpu.memory_space<vmem>>, vector<256x128xf32>
    %cst_6 = arith.constant dense<0.000000e+00> : vector<2x128xf32>
    %7 = tpu.matmul %5, %6, %cst_6 {dimension_numbers = #tpu.dot_dimension_numbers<[1], [0], [0], [1], [0, 0, 1, 1], [], []>} : vector<2x256xf32>, vector<256x128xf32>, vector<2x128xf32> -> vector<2x128xf32>
    %8 = arith.addf %3, %7 : vector<2x128xf32>
    %9 = vector.extract_strided_slice %2 {offsets = [1, 0], sizes = [1, 512], strides = [1, 1]} : vector<4x512xf32> to vector<1x512xf32>
    %10 = vector.shape_cast %9 : vector<1x512xf32> to vector<2x256xf32>
    %c256 = arith.constant 256 : index
    %c0_7 = arith.constant 0 : index
    %11 = vector.load %arg2[%c256, %c0_7] : memref<1024x128xf32, #tpu.memory_space<vmem>>, vector<256x128xf32>
    %cst_8 = arith.constant dense<0.000000e+00> : vector<2x128xf32>
    %12 = tpu.matmul %10, %11, %cst_8 {dimension_numbers = #tpu.dot_dimension_numbers<[1], [0], [0], [1], [0, 0, 1, 1], [], []>} : vector<2x256xf32>, vector<256x128xf32>, vector<2x128xf32> -> vector<2x128xf32>
    %13 = arith.addf %8, %12 : vector<2x128xf32>
    %14 = vector.extract_strided_slice %2 {offsets = [2, 0], sizes = [1, 512], strides = [1, 1]} : vector<4x512xf32> to vector<1x512xf32>
    %15 = vector.shape_cast %14 : vector<1x512xf32> to vector<2x256xf32>
    %c512 = arith.constant 512 : index
    %c0_9 = arith.constant 0 : index
    %16 = vector.load %arg2[%c512, %c0_9] : memref<1024x128xf32, #tpu.memory_space<vmem>>, vector<256x128xf32>
    %cst_10 = arith.constant dense<0.000000e+00> : vector<2x128xf32>
    %17 = tpu.matmul %15, %16, %cst_10 {dimension_numbers = #tpu.dot_dimension_numbers<[1], [0], [0], [1], [0, 0, 1, 1], [], []>} : vector<2x256xf32>, vector<256x128xf32>, vector<2x128xf32> -> vector<2x128xf32>
    %18 = arith.addf %13, %17 : vector<2x128xf32>
    %19 = vector.extract_strided_slice %2 {offsets = [3, 0], sizes = [1, 512], strides = [1, 1]} : vector<4x512xf32> to vector<1x512xf32>
    %20 = vector.shape_cast %19 : vector<1x512xf32> to vector<2x256xf32>
    %c768 = arith.constant 768 : index
    %c0_11 = arith.constant 0 : index
    %21 = vector.load %arg2[%c768, %c0_11] : memref<1024x128xf32, #tpu.memory_space<vmem>>, vector<256x128xf32>
    %cst_12 = arith.constant dense<0.000000e+00> : vector<2x128xf32>
    %22 = tpu.matmul %20, %21, %cst_12 {dimension_numbers = #tpu.dot_dimension_numbers<[1], [0], [0], [1], [0, 0, 1, 1], [], []>} : vector<2x256xf32>, vector<256x128xf32>, vector<2x128xf32> -> vector<2x128xf32>
    %23 = arith.addf %18, %22 : vector<2x128xf32>
    %c0_13 = arith.constant 0 : index
    %c0_14 = arith.constant 0 : index
    %24 = vector.load %arg3[%c0_13, %c0_14] : memref<128x3xf32, #tpu.memory_space<vmem>>, vector<128x3xf32>
    %cst_15 = arith.constant dense<0.000000e+00> : vector<2x3xf32>
    %25 = tpu.matmul %23, %24, %cst_15 {dimension_numbers = #tpu.dot_dimension_numbers<[1], [0], [0], [1], [0, 0, 1, 1], [], []>} : vector<2x128xf32>, vector<128x3xf32>, vector<2x3xf32> -> vector<2x3xf32>
    %c0_16 = arith.constant 0 : index
    %c0_17 = arith.constant 0 : index
    %26 = vector.load %arg4[%c0_16, %c0_17] : memref<2x3xf32, #tpu.memory_space<vmem>>, vector<2x3xf32>
    tpu.vector_store %arg4[%c0_16, %c0_17], %25 {strides = array<i32>} : memref<2x3xf32, #tpu.memory_space<vmem>>, vector<2x3xf32>,
    return
  }
}

module attributes {stable_mosaic.version = 11 : i64} {
  func.func @_conv_block_kernel(%arg0: memref<20x512xf32, #tpu.memory_space<vmem>>, %arg1: memref<2x512xi32, #tpu.memory_space<vmem>>, %arg2: memref<4x20xf32, #tpu.memory_space<vmem>>, %arg3: memref<16x144xf32, #tpu.memory_space<vmem>>, %arg4: memref<16x1xf32, #tpu.memory_space<vmem>>, %arg5: memref<16x1xf32, #tpu.memory_space<vmem>>, %arg6: memref<20x1xf32, #tpu.memory_space<vmem>>, %arg7: memref<20x1xf32, #tpu.memory_space<vmem>>, %arg8: memref<20x512xf32, #tpu.memory_space<vmem>>, %arg9: memref<4x784xf32, #tpu.memory_space<vmem>>, %arg10: memref<144x512xf32, #tpu.memory_space<vmem>>) attributes {dimension_semantics = [], scalar_prefetch = 0 : i64, scratch_operands = 2 : i64, tpu.core_type = #tpu.core_type<tc>} {
    %c0 = arith.constant 0 : index
    %c0_0 = arith.constant 0 : index
    %0 = vector.load %arg2[%c0, %c0_0] : memref<4x20xf32, #tpu.memory_space<vmem>>, vector<4x20xf32>
    %c0_1 = arith.constant 0 : index
    %c0_2 = arith.constant 0 : index
    %1 = vector.load %arg0[%c0_1, %c0_2] : memref<20x512xf32, #tpu.memory_space<vmem>>, vector<20x512xf32>
    %cst = arith.constant dense<0.000000e+00> : vector<4x512xf32>
    %2 = tpu.matmul %0, %1, %cst {dimension_numbers = #tpu.dot_dimension_numbers<[1], [0], [0], [1], [0, 0, 1, 1], [], []>} : vector<4x20xf32>, vector<20x512xf32>, vector<4x512xf32> -> vector<4x512xf32>
    %cst_3 = arith.constant 0.000000e+00 : f32
    %3 = vector.broadcast %cst_3 : f32 to vector<4x784xf32>
    %c0_4 = arith.constant 0 : index
    %c0_5 = arith.constant 0 : index
    %4 = vector.load %arg9[%c0_4, %c0_5] : memref<4x784xf32, #tpu.memory_space<vmem>>, vector<4x784xf32>
    tpu.vector_store %arg9[%c0_4, %c0_5], %3 {strides = array<i32>} : memref<4x784xf32, #tpu.memory_space<vmem>>, vector<4x784xf32>,
    %c0_6 = arith.constant 0 : index
    %c136 = arith.constant 136 : index
    %5 = vector.load %arg9[%c0_6, %c136] : memref<4x784xf32, #tpu.memory_space<vmem>>, vector<4x512xf32>
    tpu.vector_store %arg9[%c0_6, %c136], %2 {strides = array<i32>} : memref<4x784xf32, #tpu.memory_space<vmem>>, vector<4x512xf32>,
    %c0_7 = arith.constant 0 : index
    %c0_8 = arith.constant 0 : index
    %6 = vector.load %arg1[%c0_7, %c0_8] : memref<2x512xi32, #tpu.memory_space<vmem>>, vector<1x512xi32>
    %c1 = arith.constant 1 : index
    %c0_9 = arith.constant 0 : index
    %7 = vector.load %arg1[%c1, %c0_9] : memref<2x512xi32, #tpu.memory_space<vmem>>, vector<1x512xi32>
    %c0_10 = arith.constant 0 : index
    %c119 = arith.constant 119 : index
    %8 = vector.load %arg9[%c0_10, %c119] : memref<4x784xf32, #tpu.memory_space<vmem>>, vector<4x512xf32>
    %c1_i32 = arith.constant 1 : i32
    %9 = vector.broadcast %c1_i32 : i32 to vector<1x512xi32>
    %10 = arith.cmpi sge, %6, %9 : vector<1x512xi32>
    %c1_i32_11 = arith.constant 1 : i32
    %11 = vector.broadcast %c1_i32_11 : i32 to vector<1x512xi32>
    %12 = arith.cmpi sge, %7, %11 : vector<1x512xi32>
    %13 = arith.andi %10, %12 : vector<1x512xi1>
    %14 = arith.extui %13 : vector<1x512xi1> to vector<1x512xi32>
    %15 = arith.sitofp %14 : vector<1x512xi32> to vector<1x512xf32>
    %16 = vector.broadcast %15 : vector<1x512xf32> to vector<4x512xf32>
    %17 = arith.mulf %8, %16 : vector<4x512xf32>
    %c0_12 = arith.constant 0 : index
    %c0_13 = arith.constant 0 : index
    %18 = vector.load %arg10[%c0_12, %c0_13] : memref<144x512xf32, #tpu.memory_space<vmem>>, vector<4x512xf32>
    tpu.vector_store %arg10[%c0_12, %c0_13], %17 {strides = array<i32>} : memref<144x512xf32, #tpu.memory_space<vmem>>, vector<4x512xf32>,
    %c0_14 = arith.constant 0 : index
    %c120 = arith.constant 120 : index
    %19 = vector.load %arg9[%c0_14, %c120] : memref<4x784xf32, #tpu.memory_space<vmem>>, vector<4x512xf32>
    %c1_i32_15 = arith.constant 1 : i32
    %20 = vector.broadcast %c1_i32_15 : i32 to vector<1x512xi32>
    %21 = arith.cmpi sge, %6, %20 : vector<1x512xi32>
    %22 = arith.extui %21 : vector<1x512xi1> to vector<1x512xi32>
    %23 = arith.sitofp %22 : vector<1x512xi32> to vector<1x512xf32>
    %24 = vector.broadcast %23 : vector<1x512xf32> to vector<4x512xf32>
    %25 = arith.mulf %19, %24 : vector<4x512xf32>
    %c4 = arith.constant 4 : index
    %c0_16 = arith.constant 0 : index
    %26 = vector.load %arg10[%c4, %c0_16] : memref<144x512xf32, #tpu.memory_space<vmem>>, vector<4x512xf32>
    tpu.vector_store %arg10[%c4, %c0_16], %25 {strides = array<i32>} : memref<144x512xf32, #tpu.memory_space<vmem>>, vector<4x512xf32>,
    %c0_17 = arith.constant 0 : index
    %c121 = arith.constant 121 : index
    %27 = vector.load %arg9[%c0_17, %c121] : memref<4x784xf32, #tpu.memory_space<vmem>>, vector<4x512xf32>
    %c1_i32_18 = arith.constant 1 : i32
    %28 = vector.broadcast %c1_i32_18 : i32 to vector<1x512xi32>
    %29 = arith.cmpi sge, %6, %28 : vector<1x512xi32>
    %c15_i32 = arith.constant 15 : i32
    %30 = vector.broadcast %c15_i32 : i32 to vector<1x512xi32>
    %31 = arith.cmpi slt, %7, %30 : vector<1x512xi32>
    %32 = arith.andi %29, %31 : vector<1x512xi1>
    %33 = arith.extui %32 : vector<1x512xi1> to vector<1x512xi32>
    %34 = arith.sitofp %33 : vector<1x512xi32> to vector<1x512xf32>
    %35 = vector.broadcast %34 : vector<1x512xf32> to vector<4x512xf32>
    %36 = arith.mulf %27, %35 : vector<4x512xf32>
    %c8 = arith.constant 8 : index
    %c0_19 = arith.constant 0 : index
    %37 = vector.load %arg10[%c8, %c0_19] : memref<144x512xf32, #tpu.memory_space<vmem>>, vector<4x512xf32>
    tpu.vector_store %arg10[%c8, %c0_19], %36 {strides = array<i32>} : memref<144x512xf32, #tpu.memory_space<vmem>>, vector<4x512xf32>,
    %c0_20 = arith.constant 0 : index
    %c135 = arith.constant 135 : index
    %38 = vector.load %arg9[%c0_20, %c135] : memref<4x784xf32, #tpu.memory_space<vmem>>, vector<4x512xf32>
    %c1_i32_21 = arith.constant 1 : i32
    %39 = vector.broadcast %c1_i32_21 : i32 to vector<1x512xi32>
    %40 = arith.cmpi sge, %7, %39 : vector<1x512xi32>
    %41 = arith.extui %40 : vector<1x512xi1> to vector<1x512xi32>
    %42 = arith.sitofp %41 : vector<1x512xi32> to vector<1x512xf32>
    %43 = vector.broadcast %42 : vector<1x512xf32> to vector<4x512xf32>
    %44 = arith.mulf %38, %43 : vector<4x512xf32>
    %c12 = arith.constant 12 : index
    %c0_22 = arith.constant 0 : index
    %45 = vector.load %arg10[%c12, %c0_22] : memref<144x512xf32, #tpu.memory_space<vmem>>, vector<4x512xf32>
    tpu.vector_store %arg10[%c12, %c0_22], %44 {strides = array<i32>} : memref<144x512xf32, #tpu.memory_space<vmem>>, vector<4x512xf32>,
    %c0_23 = arith.constant 0 : index
    %c136_24 = arith.constant 136 : index
    %46 = vector.load %arg9[%c0_23, %c136_24] : memref<4x784xf32, #tpu.memory_space<vmem>>, vector<4x512xf32>
    %c16 = arith.constant 16 : index
    %c0_25 = arith.constant 0 : index
    %47 = vector.load %arg10[%c16, %c0_25] : memref<144x512xf32, #tpu.memory_space<vmem>>, vector<4x512xf32>
    tpu.vector_store %arg10[%c16, %c0_25], %46 {strides = array<i32>} : memref<144x512xf32, #tpu.memory_space<vmem>>, vector<4x512xf32>,
    %c0_26 = arith.constant 0 : index
    %c137 = arith.constant 137 : index
    %48 = vector.load %arg9[%c0_26, %c137] : memref<4x784xf32, #tpu.memory_space<vmem>>, vector<4x512xf32>
    %c15_i32_27 = arith.constant 15 : i32
    %49 = vector.broadcast %c15_i32_27 : i32 to vector<1x512xi32>
    %50 = arith.cmpi slt, %7, %49 : vector<1x512xi32>
    %51 = arith.extui %50 : vector<1x512xi1> to vector<1x512xi32>
    %52 = arith.sitofp %51 : vector<1x512xi32> to vector<1x512xf32>
    %53 = vector.broadcast %52 : vector<1x512xf32> to vector<4x512xf32>
    %54 = arith.mulf %48, %53 : vector<4x512xf32>
    %c20 = arith.constant 20 : index
    %c0_28 = arith.constant 0 : index
    %55 = vector.load %arg10[%c20, %c0_28] : memref<144x512xf32, #tpu.memory_space<vmem>>, vector<4x512xf32>
    tpu.vector_store %arg10[%c20, %c0_28], %54 {strides = array<i32>} : memref<144x512xf32, #tpu.memory_space<vmem>>, vector<4x512xf32>,
    %c0_29 = arith.constant 0 : index
    %c151 = arith.constant 151 : index
    %56 = vector.load %arg9[%c0_29, %c151] : memref<4x784xf32, #tpu.memory_space<vmem>>, vector<4x512xf32>
    %c15_i32_30 = arith.constant 15 : i32
    %57 = vector.broadcast %c15_i32_30 : i32 to vector<1x512xi32>
    %58 = arith.cmpi slt, %6, %57 : vector<1x512xi32>
    %c1_i32_31 = arith.constant 1 : i32
    %59 = vector.broadcast %c1_i32_31 : i32 to vector<1x512xi32>
    %60 = arith.cmpi sge, %7, %59 : vector<1x512xi32>
    %61 = arith.andi %58, %60 : vector<1x512xi1>
    %62 = arith.extui %61 : vector<1x512xi1> to vector<1x512xi32>
    %63 = arith.sitofp %62 : vector<1x512xi32> to vector<1x512xf32>
    %64 = vector.broadcast %63 : vector<1x512xf32> to vector<4x512xf32>
    %65 = arith.mulf %56, %64 : vector<4x512xf32>
    %c24 = arith.constant 24 : index
    %c0_32 = arith.constant 0 : index
    %66 = vector.load %arg10[%c24, %c0_32] : memref<144x512xf32, #tpu.memory_space<vmem>>, vector<4x512xf32>
    tpu.vector_store %arg10[%c24, %c0_32], %65 {strides = array<i32>} : memref<144x512xf32, #tpu.memory_space<vmem>>, vector<4x512xf32>,
    %c0_33 = arith.constant 0 : index
    %c152 = arith.constant 152 : index
    %67 = vector.load %arg9[%c0_33, %c152] : memref<4x784xf32, #tpu.memory_space<vmem>>, vector<4x512xf32>
    %c15_i32_34 = arith.constant 15 : i32
    %68 = vector.broadcast %c15_i32_34 : i32 to vector<1x512xi32>
    %69 = arith.cmpi slt, %6, %68 : vector<1x512xi32>
    %70 = arith.extui %69 : vector<1x512xi1> to vector<1x512xi32>
    %71 = arith.sitofp %70 : vector<1x512xi32> to vector<1x512xf32>
    %72 = vector.broadcast %71 : vector<1x512xf32> to vector<4x512xf32>
    %73 = arith.mulf %67, %72 : vector<4x512xf32>
    %c28 = arith.constant 28 : index
    %c0_35 = arith.constant 0 : index
    %74 = vector.load %arg10[%c28, %c0_35] : memref<144x512xf32, #tpu.memory_space<vmem>>, vector<4x512xf32>
    tpu.vector_store %arg10[%c28, %c0_35], %73 {strides = array<i32>} : memref<144x512xf32, #tpu.memory_space<vmem>>, vector<4x512xf32>,
    %c0_36 = arith.constant 0 : index
    %c153 = arith.constant 153 : index
    %75 = vector.load %arg9[%c0_36, %c153] : memref<4x784xf32, #tpu.memory_space<vmem>>, vector<4x512xf32>
    %c15_i32_37 = arith.constant 15 : i32
    %76 = vector.broadcast %c15_i32_37 : i32 to vector<1x512xi32>
    %77 = arith.cmpi slt, %6, %76 : vector<1x512xi32>
    %c15_i32_38 = arith.constant 15 : i32
    %78 = vector.broadcast %c15_i32_38 : i32 to vector<1x512xi32>
    %79 = arith.cmpi slt, %7, %78 : vector<1x512xi32>
    %80 = arith.andi %77, %79 : vector<1x512xi1>
    %81 = arith.extui %80 : vector<1x512xi1> to vector<1x512xi32>
    %82 = arith.sitofp %81 : vector<1x512xi32> to vector<1x512xf32>
    %83 = vector.broadcast %82 : vector<1x512xf32> to vector<4x512xf32>
    %84 = arith.mulf %75, %83 : vector<4x512xf32>
    %c32 = arith.constant 32 : index
    %c0_39 = arith.constant 0 : index
    %85 = vector.load %arg10[%c32, %c0_39] : memref<144x512xf32, #tpu.memory_space<vmem>>, vector<4x512xf32>
    tpu.vector_store %arg10[%c32, %c0_39], %84 {strides = array<i32>} : memref<144x512xf32, #tpu.memory_space<vmem>>, vector<4x512xf32>,
    %c0_40 = arith.constant 0 : index
    %c102 = arith.constant 102 : index
    %86 = vector.load %arg9[%c0_40, %c102] : memref<4x784xf32, #tpu.memory_space<vmem>>, vector<4x512xf32>
    %c2_i32 = arith.constant 2 : i32
    %87 = vector.broadcast %c2_i32 : i32 to vector<1x512xi32>
    %88 = arith.cmpi sge, %6, %87 : vector<1x512xi32>
    %c2_i32_41 = arith.constant 2 : i32
    %89 = vector.broadcast %c2_i32_41 : i32 to vector<1x512xi32>
    %90 = arith.cmpi sge, %7, %89 : vector<1x512xi32>
    %91 = arith.andi %88, %90 : vector<1x512xi1>
    %92 = arith.extui %91 : vector<1x512xi1> to vector<1x512xi32>
    %93 = arith.sitofp %92 : vector<1x512xi32> to vector<1x512xf32>
    %94 = vector.broadcast %93 : vector<1x512xf32> to vector<4x512xf32>
    %95 = arith.mulf %86, %94 : vector<4x512xf32>
    %c36 = arith.constant 36 : index
    %c0_42 = arith.constant 0 : index
    %96 = vector.load %arg10[%c36, %c0_42] : memref<144x512xf32, #tpu.memory_space<vmem>>, vector<4x512xf32>
    tpu.vector_store %arg10[%c36, %c0_42], %95 {strides = array<i32>} : memref<144x512xf32, #tpu.memory_space<vmem>>, vector<4x512xf32>,
    %c0_43 = arith.constant 0 : index
    %c104 = arith.constant 104 : index
    %97 = vector.load %arg9[%c0_43, %c104] : memref<4x784xf32, #tpu.memory_space<vmem>>, vector<4x512xf32>
    %c2_i32_44 = arith.constant 2 : i32
    %98 = vector.broadcast %c2_i32_44 : i32 to vector<1x512xi32>
    %99 = arith.cmpi sge, %6, %98 : vector<1x512xi32>
    %100 = arith.extui %99 : vector<1x512xi1> to vector<1x512xi32>
    %101 = arith.sitofp %100 : vector<1x512xi32> to vector<1x512xf32>
    %102 = vector.broadcast %101 : vector<1x512xf32> to vector<4x512xf32>
    %103 = arith.mulf %97, %102 : vector<4x512xf32>
    %c40 = arith.constant 40 : index
    %c0_45 = arith.constant 0 : index
    %104 = vector.load %arg10[%c40, %c0_45] : memref<144x512xf32, #tpu.memory_space<vmem>>, vector<4x512xf32>
    tpu.vector_store %arg10[%c40, %c0_45], %103 {strides = array<i32>} : memref<144x512xf32, #tpu.memory_space<vmem>>, vector<4x512xf32>,
    %c0_46 = arith.constant 0 : index
    %c106 = arith.constant 106 : index
    %105 = vector.load %arg9[%c0_46, %c106] : memref<4x784xf32, #tpu.memory_space<vmem>>, vector<4x512xf32>
    %c2_i32_47 = arith.constant 2 : i32
    %106 = vector.broadcast %c2_i32_47 : i32 to vector<1x512xi32>
    %107 = arith.cmpi sge, %6, %106 : vector<1x512xi32>
    %c14_i32 = arith.constant 14 : i32
    %108 = vector.broadcast %c14_i32 : i32 to vector<1x512xi32>
    %109 = arith.cmpi slt, %7, %108 : vector<1x512xi32>
    %110 = arith.andi %107, %109 : vector<1x512xi1>
    %111 = arith.extui %110 : vector<1x512xi1> to vector<1x512xi32>
    %112 = arith.sitofp %111 : vector<1x512xi32> to vector<1x512xf32>
    %113 = vector.broadcast %112 : vector<1x512xf32> to vector<4x512xf32>
    %114 = arith.mulf %105, %113 : vector<4x512xf32>
    %c44 = arith.constant 44 : index
    %c0_48 = arith.constant 0 : index
    %115 = vector.load %arg10[%c44, %c0_48] : memref<144x512xf32, #tpu.memory_space<vmem>>, vector<4x512xf32>
    tpu.vector_store %arg10[%c44, %c0_48], %114 {strides = array<i32>} : memref<144x512xf32, #tpu.memory_space<vmem>>, vector<4x512xf32>,
    %c0_49 = arith.constant 0 : index
    %c134 = arith.constant 134 : index
    %116 = vector.load %arg9[%c0_49, %c134] : memref<4x784xf32, #tpu.memory_space<vmem>>, vector<4x512xf32>
    %c2_i32_50 = arith.constant 2 : i32
    %117 = vector.broadcast %c2_i32_50 : i32 to vector<1x512xi32>
    %118 = arith.cmpi sge, %7, %117 : vector<1x512xi32>
    %119 = arith.extui %118 : vector<1x512xi1> to vector<1x512xi32>
    %120 = arith.sitofp %119 : vector<1x512xi32> to vector<1x512xf32>
    %121 = vector.broadcast %120 : vector<1x512xf32> to vector<4x512xf32>
    %122 = arith.mulf %116, %121 : vector<4x512xf32>
    %c48 = arith.constant 48 : index
    %c0_51 = arith.constant 0 : index
    %123 = vector.load %arg10[%c48, %c0_51] : memref<144x512xf32, #tpu.memory_space<vmem>>, vector<4x512xf32>
    tpu.vector_store %arg10[%c48, %c0_51], %122 {strides = array<i32>} : memref<144x512xf32, #tpu.memory_space<vmem>>, vector<4x512xf32>,
    %c0_52 = arith.constant 0 : index
    %c136_53 = arith.constant 136 : index
    %124 = vector.load %arg9[%c0_52, %c136_53] : memref<4x784xf32, #tpu.memory_space<vmem>>, vector<4x512xf32>
    %c52 = arith.constant 52 : index
    %c0_54 = arith.constant 0 : index
    %125 = vector.load %arg10[%c52, %c0_54] : memref<144x512xf32, #tpu.memory_space<vmem>>, vector<4x512xf32>
    tpu.vector_store %arg10[%c52, %c0_54], %124 {strides = array<i32>} : memref<144x512xf32, #tpu.memory_space<vmem>>, vector<4x512xf32>,
    %c0_55 = arith.constant 0 : index
    %c138 = arith.constant 138 : index
    %126 = vector.load %arg9[%c0_55, %c138] : memref<4x784xf32, #tpu.memory_space<vmem>>, vector<4x512xf32>
    %c14_i32_56 = arith.constant 14 : i32
    %127 = vector.broadcast %c14_i32_56 : i32 to vector<1x512xi32>
    %128 = arith.cmpi slt, %7, %127 : vector<1x512xi32>
    %129 = arith.extui %128 : vector<1x512xi1> to vector<1x512xi32>
    %130 = arith.sitofp %129 : vector<1x512xi32> to vector<1x512xf32>
    %131 = vector.broadcast %130 : vector<1x512xf32> to vector<4x512xf32>
    %132 = arith.mulf %126, %131 : vector<4x512xf32>
    %c56 = arith.constant 56 : index
    %c0_57 = arith.constant 0 : index
    %133 = vector.load %arg10[%c56, %c0_57] : memref<144x512xf32, #tpu.memory_space<vmem>>, vector<4x512xf32>
    tpu.vector_store %arg10[%c56, %c0_57], %132 {strides = array<i32>} : memref<144x512xf32, #tpu.memory_space<vmem>>, vector<4x512xf32>,
    %c0_58 = arith.constant 0 : index
    %c166 = arith.constant 166 : index
    %134 = vector.load %arg9[%c0_58, %c166] : memref<4x784xf32, #tpu.memory_space<vmem>>, vector<4x512xf32>
    %c14_i32_59 = arith.constant 14 : i32
    %135 = vector.broadcast %c14_i32_59 : i32 to vector<1x512xi32>
    %136 = arith.cmpi slt, %6, %135 : vector<1x512xi32>
    %c2_i32_60 = arith.constant 2 : i32
    %137 = vector.broadcast %c2_i32_60 : i32 to vector<1x512xi32>
    %138 = arith.cmpi sge, %7, %137 : vector<1x512xi32>
    %139 = arith.andi %136, %138 : vector<1x512xi1>
    %140 = arith.extui %139 : vector<1x512xi1> to vector<1x512xi32>
    %141 = arith.sitofp %140 : vector<1x512xi32> to vector<1x512xf32>
    %142 = vector.broadcast %141 : vector<1x512xf32> to vector<4x512xf32>
    %143 = arith.mulf %134, %142 : vector<4x512xf32>
    %c60 = arith.constant 60 : index
    %c0_61 = arith.constant 0 : index
    %144 = vector.load %arg10[%c60, %c0_61] : memref<144x512xf32, #tpu.memory_space<vmem>>, vector<4x512xf32>
    tpu.vector_store %arg10[%c60, %c0_61], %143 {strides = array<i32>} : memref<144x512xf32, #tpu.memory_space<vmem>>, vector<4x512xf32>,
    %c0_62 = arith.constant 0 : index
    %c168 = arith.constant 168 : index
    %145 = vector.load %arg9[%c0_62, %c168] : memref<4x784xf32, #tpu.memory_space<vmem>>, vector<4x512xf32>
    %c14_i32_63 = arith.constant 14 : i32
    %146 = vector.broadcast %c14_i32_63 : i32 to vector<1x512xi32>
    %147 = arith.cmpi slt, %6, %146 : vector<1x512xi32>
    %148 = arith.extui %147 : vector<1x512xi1> to vector<1x512xi32>
    %149 = arith.sitofp %148 : vector<1x512xi32> to vector<1x512xf32>
    %150 = vector.broadcast %149 : vector<1x512xf32> to vector<4x512xf32>
    %151 = arith.mulf %145, %150 : vector<4x512xf32>
    %c64 = arith.constant 64 : index
    %c0_64 = arith.constant 0 : index
    %152 = vector.load %arg10[%c64, %c0_64] : memref<144x512xf32, #tpu.memory_space<vmem>>, vector<4x512xf32>
    tpu.vector_store %arg10[%c64, %c0_64], %151 {strides = array<i32>} : memref<144x512xf32, #tpu.memory_space<vmem>>, vector<4x512xf32>,
    %c0_65 = arith.constant 0 : index
    %c170 = arith.constant 170 : index
    %153 = vector.load %arg9[%c0_65, %c170] : memref<4x784xf32, #tpu.memory_space<vmem>>, vector<4x512xf32>
    %c14_i32_66 = arith.constant 14 : i32
    %154 = vector.broadcast %c14_i32_66 : i32 to vector<1x512xi32>
    %155 = arith.cmpi slt, %6, %154 : vector<1x512xi32>
    %c14_i32_67 = arith.constant 14 : i32
    %156 = vector.broadcast %c14_i32_67 : i32 to vector<1x512xi32>
    %157 = arith.cmpi slt, %7, %156 : vector<1x512xi32>
    %158 = arith.andi %155, %157 : vector<1x512xi1>
    %159 = arith.extui %158 : vector<1x512xi1> to vector<1x512xi32>
    %160 = arith.sitofp %159 : vector<1x512xi32> to vector<1x512xf32>
    %161 = vector.broadcast %160 : vector<1x512xf32> to vector<4x512xf32>
    %162 = arith.mulf %153, %161 : vector<4x512xf32>
    %c68 = arith.constant 68 : index
    %c0_68 = arith.constant 0 : index
    %163 = vector.load %arg10[%c68, %c0_68] : memref<144x512xf32, #tpu.memory_space<vmem>>, vector<4x512xf32>
    tpu.vector_store %arg10[%c68, %c0_68], %162 {strides = array<i32>} : memref<144x512xf32, #tpu.memory_space<vmem>>, vector<4x512xf32>,
    %c0_69 = arith.constant 0 : index
    %c68_70 = arith.constant 68 : index
    %164 = vector.load %arg9[%c0_69, %c68_70] : memref<4x784xf32, #tpu.memory_space<vmem>>, vector<4x512xf32>
    %c4_i32 = arith.constant 4 : i32
    %165 = vector.broadcast %c4_i32 : i32 to vector<1x512xi32>
    %166 = arith.cmpi sge, %6, %165 : vector<1x512xi32>
    %c4_i32_71 = arith.constant 4 : i32
    %167 = vector.broadcast %c4_i32_71 : i32 to vector<1x512xi32>
    %168 = arith.cmpi sge, %7, %167 : vector<1x512xi32>
    %169 = arith.andi %166, %168 : vector<1x512xi1>
    %170 = arith.extui %169 : vector<1x512xi1> to vector<1x512xi32>
    %171 = arith.sitofp %170 : vector<1x512xi32> to vector<1x512xf32>
    %172 = vector.broadcast %171 : vector<1x512xf32> to vector<4x512xf32>
    %173 = arith.mulf %164, %172 : vector<4x512xf32>
    %c72 = arith.constant 72 : index
    %c0_72 = arith.constant 0 : index
    %174 = vector.load %arg10[%c72, %c0_72] : memref<144x512xf32, #tpu.memory_space<vmem>>, vector<4x512xf32>
    tpu.vector_store %arg10[%c72, %c0_72], %173 {strides = array<i32>} : memref<144x512xf32, #tpu.memory_space<vmem>>, vector<4x512xf32>,
    %c0_73 = arith.constant 0 : index
    %c72_74 = arith.constant 72 : index
    %175 = vector.load %arg9[%c0_73, %c72_74] : memref<4x784xf32, #tpu.memory_space<vmem>>, vector<4x512xf32>
    %c4_i32_75 = arith.constant 4 : i32
    %176 = vector.broadcast %c4_i32_75 : i32 to vector<1x512xi32>
    %177 = arith.cmpi sge, %6, %176 : vector<1x512xi32>
    %178 = arith.extui %177 : vector<1x512xi1> to vector<1x512xi32>
    %179 = arith.sitofp %178 : vector<1x512xi32> to vector<1x512xf32>
    %180 = vector.broadcast %179 : vector<1x512xf32> to vector<4x512xf32>
    %181 = arith.mulf %175, %180 : vector<4x512xf32>
    %c76 = arith.constant 76 : index
    %c0_76 = arith.constant 0 : index
    %182 = vector.load %arg10[%c76, %c0_76] : memref<144x512xf32, #tpu.memory_space<vmem>>, vector<4x512xf32>
    tpu.vector_store %arg10[%c76, %c0_76], %181 {strides = array<i32>} : memref<144x512xf32, #tpu.memory_space<vmem>>, vector<4x512xf32>,
    %c0_77 = arith.constant 0 : index
    %c76_78 = arith.constant 76 : index
    %183 = vector.load %arg9[%c0_77, %c76_78] : memref<4x784xf32, #tpu.memory_space<vmem>>, vector<4x512xf32>
    %c4_i32_79 = arith.constant 4 : i32
    %184 = vector.broadcast %c4_i32_79 : i32 to vector<1x512xi32>
    %185 = arith.cmpi sge, %6, %184 : vector<1x512xi32>
    %c12_i32 = arith.constant 12 : i32
    %186 = vector.broadcast %c12_i32 : i32 to vector<1x512xi32>
    %187 = arith.cmpi slt, %7, %186 : vector<1x512xi32>
    %188 = arith.andi %185, %187 : vector<1x512xi1>
    %189 = arith.extui %188 : vector<1x512xi1> to vector<1x512xi32>
    %190 = arith.sitofp %189 : vector<1x512xi32> to vector<1x512xf32>
    %191 = vector.broadcast %190 : vector<1x512xf32> to vector<4x512xf32>
    %192 = arith.mulf %183, %191 : vector<4x512xf32>
    %c80 = arith.constant 80 : index
    %c0_80 = arith.constant 0 : index
    %193 = vector.load %arg10[%c80, %c0_80] : memref<144x512xf32, #tpu.memory_space<vmem>>, vector<4x512xf32>
    tpu.vector_store %arg10[%c80, %c0_80], %192 {strides = array<i32>} : memref<144x512xf32, #tpu.memory_space<vmem>>, vector<4x512xf32>,
    %c0_81 = arith.constant 0 : index
    %c132 = arith.constant 132 : index
    %194 = vector.load %arg9[%c0_81, %c132] : memref<4x784xf32, #tpu.memory_space<vmem>>, vector<4x512xf32>
    %c4_i32_82 = arith.constant 4 : i32
    %195 = vector.broadcast %c4_i32_82 : i32 to vector<1x512xi32>
    %196 = arith.cmpi sge, %7, %195 : vector<1x512xi32>
    %197 = arith.extui %196 : vector<1x512xi1> to vector<1x512xi32>
    %198 = arith.sitofp %197 : vector<1x512xi32> to vector<1x512xf32>
    %199 = vector.broadcast %198 : vector<1x512xf32> to vector<4x512xf32>
    %200 = arith.mulf %194, %199 : vector<4x512xf32>
    %c84 = arith.constant 84 : index
    %c0_83 = arith.constant 0 : index
    %201 = vector.load %arg10[%c84, %c0_83] : memref<144x512xf32, #tpu.memory_space<vmem>>, vector<4x512xf32>
    tpu.vector_store %arg10[%c84, %c0_83], %200 {strides = array<i32>} : memref<144x512xf32, #tpu.memory_space<vmem>>, vector<4x512xf32>,
    %c0_84 = arith.constant 0 : index
    %c136_85 = arith.constant 136 : index
    %202 = vector.load %arg9[%c0_84, %c136_85] : memref<4x784xf32, #tpu.memory_space<vmem>>, vector<4x512xf32>
    %c88 = arith.constant 88 : index
    %c0_86 = arith.constant 0 : index
    %203 = vector.load %arg10[%c88, %c0_86] : memref<144x512xf32, #tpu.memory_space<vmem>>, vector<4x512xf32>
    tpu.vector_store %arg10[%c88, %c0_86], %202 {strides = array<i32>} : memref<144x512xf32, #tpu.memory_space<vmem>>, vector<4x512xf32>,
    %c0_87 = arith.constant 0 : index
    %c140 = arith.constant 140 : index
    %204 = vector.load %arg9[%c0_87, %c140] : memref<4x784xf32, #tpu.memory_space<vmem>>, vector<4x512xf32>
    %c12_i32_88 = arith.constant 12 : i32
    %205 = vector.broadcast %c12_i32_88 : i32 to vector<1x512xi32>
    %206 = arith.cmpi slt, %7, %205 : vector<1x512xi32>
    %207 = arith.extui %206 : vector<1x512xi1> to vector<1x512xi32>
    %208 = arith.sitofp %207 : vector<1x512xi32> to vector<1x512xf32>
    %209 = vector.broadcast %208 : vector<1x512xf32> to vector<4x512xf32>
    %210 = arith.mulf %204, %209 : vector<4x512xf32>
    %c92 = arith.constant 92 : index
    %c0_89 = arith.constant 0 : index
    %211 = vector.load %arg10[%c92, %c0_89] : memref<144x512xf32, #tpu.memory_space<vmem>>, vector<4x512xf32>
    tpu.vector_store %arg10[%c92, %c0_89], %210 {strides = array<i32>} : memref<144x512xf32, #tpu.memory_space<vmem>>, vector<4x512xf32>,
    %c0_90 = arith.constant 0 : index
    %c196 = arith.constant 196 : index
    %212 = vector.load %arg9[%c0_90, %c196] : memref<4x784xf32, #tpu.memory_space<vmem>>, vector<4x512xf32>
    %c12_i32_91 = arith.constant 12 : i32
    %213 = vector.broadcast %c12_i32_91 : i32 to vector<1x512xi32>
    %214 = arith.cmpi slt, %6, %213 : vector<1x512xi32>
    %c4_i32_92 = arith.constant 4 : i32
    %215 = vector.broadcast %c4_i32_92 : i32 to vector<1x512xi32>
    %216 = arith.cmpi sge, %7, %215 : vector<1x512xi32>
    %217 = arith.andi %214, %216 : vector<1x512xi1>
    %218 = arith.extui %217 : vector<1x512xi1> to vector<1x512xi32>
    %219 = arith.sitofp %218 : vector<1x512xi32> to vector<1x512xf32>
    %220 = vector.broadcast %219 : vector<1x512xf32> to vector<4x512xf32>
    %221 = arith.mulf %212, %220 : vector<4x512xf32>
    %c96 = arith.constant 96 : index
    %c0_93 = arith.constant 0 : index
    %222 = vector.load %arg10[%c96, %c0_93] : memref<144x512xf32, #tpu.memory_space<vmem>>, vector<4x512xf32>
    tpu.vector_store %arg10[%c96, %c0_93], %221 {strides = array<i32>} : memref<144x512xf32, #tpu.memory_space<vmem>>, vector<4x512xf32>,
    %c0_94 = arith.constant 0 : index
    %c200 = arith.constant 200 : index
    %223 = vector.load %arg9[%c0_94, %c200] : memref<4x784xf32, #tpu.memory_space<vmem>>, vector<4x512xf32>
    %c12_i32_95 = arith.constant 12 : i32
    %224 = vector.broadcast %c12_i32_95 : i32 to vector<1x512xi32>
    %225 = arith.cmpi slt, %6, %224 : vector<1x512xi32>
    %226 = arith.extui %225 : vector<1x512xi1> to vector<1x512xi32>
    %227 = arith.sitofp %226 : vector<1x512xi32> to vector<1x512xf32>
    %228 = vector.broadcast %227 : vector<1x512xf32> to vector<4x512xf32>
    %229 = arith.mulf %223, %228 : vector<4x512xf32>
    %c100 = arith.constant 100 : index
    %c0_96 = arith.constant 0 : index
    %230 = vector.load %arg10[%c100, %c0_96] : memref<144x512xf32, #tpu.memory_space<vmem>>, vector<4x512xf32>
    tpu.vector_store %arg10[%c100, %c0_96], %229 {strides = array<i32>} : memref<144x512xf32, #tpu.memory_space<vmem>>, vector<4x512xf32>,
    %c0_97 = arith.constant 0 : index
    %c204 = arith.constant 204 : index
    %231 = vector.load %arg9[%c0_97, %c204] : memref<4x784xf32, #tpu.memory_space<vmem>>, vector<4x512xf32>
    %c12_i32_98 = arith.constant 12 : i32
    %232 = vector.broadcast %c12_i32_98 : i32 to vector<1x512xi32>
    %233 = arith.cmpi slt, %6, %232 : vector<1x512xi32>
    %c12_i32_99 = arith.constant 12 : i32
    %234 = vector.broadcast %c12_i32_99 : i32 to vector<1x512xi32>
    %235 = arith.cmpi slt, %7, %234 : vector<1x512xi32>
    %236 = arith.andi %233, %235 : vector<1x512xi1>
    %237 = arith.extui %236 : vector<1x512xi1> to vector<1x512xi32>
    %238 = arith.sitofp %237 : vector<1x512xi32> to vector<1x512xf32>
    %239 = vector.broadcast %238 : vector<1x512xf32> to vector<4x512xf32>
    %240 = arith.mulf %231, %239 : vector<4x512xf32>
    %c104_100 = arith.constant 104 : index
    %c0_101 = arith.constant 0 : index
    %241 = vector.load %arg10[%c104_100, %c0_101] : memref<144x512xf32, #tpu.memory_space<vmem>>, vector<4x512xf32>
    tpu.vector_store %arg10[%c104_100, %c0_101], %240 {strides = array<i32>} : memref<144x512xf32, #tpu.memory_space<vmem>>, vector<4x512xf32>,
    %c0_102 = arith.constant 0 : index
    %c0_103 = arith.constant 0 : index
    %242 = vector.load %arg9[%c0_102, %c0_103] : memref<4x784xf32, #tpu.memory_space<vmem>>, vector<4x512xf32>
    %c8_i32 = arith.constant 8 : i32
    %243 = vector.broadcast %c8_i32 : i32 to vector<1x512xi32>
    %244 = arith.cmpi sge, %6, %243 : vector<1x512xi32>
    %c8_i32_104 = arith.constant 8 : i32
    %245 = vector.broadcast %c8_i32_104 : i32 to vector<1x512xi32>
    %246 = arith.cmpi sge, %7, %245 : vector<1x512xi32>
    %247 = arith.andi %244, %246 : vector<1x512xi1>
    %248 = arith.extui %247 : vector<1x512xi1> to vector<1x512xi32>
    %249 = arith.sitofp %248 : vector<1x512xi32> to vector<1x512xf32>
    %250 = vector.broadcast %249 : vector<1x512xf32> to vector<4x512xf32>
    %251 = arith.mulf %242, %250 : vector<4x512xf32>
    %c108 = arith.constant 108 : index
    %c0_105 = arith.constant 0 : index
    %252 = vector.load %arg10[%c108, %c0_105] : memref<144x512xf32, #tpu.memory_space<vmem>>, vector<4x512xf32>
    tpu.vector_store %arg10[%c108, %c0_105], %251 {strides = array<i32>} : memref<144x512xf32, #tpu.memory_space<vmem>>, vector<4x512xf32>,
    %c0_106 = arith.constant 0 : index
    %c8_107 = arith.constant 8 : index
    %253 = vector.load %arg9[%c0_106, %c8_107] : memref<4x784xf32, #tpu.memory_space<vmem>>, vector<4x512xf32>
    %c8_i32_108 = arith.constant 8 : i32
    %254 = vector.broadcast %c8_i32_108 : i32 to vector<1x512xi32>
    %255 = arith.cmpi sge, %6, %254 : vector<1x512xi32>
    %256 = arith.extui %255 : vector<1x512xi1> to vector<1x512xi32>
    %257 = arith.sitofp %256 : vector<1x512xi32> to vector<1x512xf32>
    %258 = vector.broadcast %257 : vector<1x512xf32> to vector<4x512xf32>
    %259 = arith.mulf %253, %258 : vector<4x512xf32>
    %c112 = arith.constant 112 : index
    %c0_109 = arith.constant 0 : index
    %260 = vector.load %arg10[%c112, %c0_109] : memref<144x512xf32, #tpu.memory_space<vmem>>, vector<4x512xf32>
    tpu.vector_store %arg10[%c112, %c0_109], %259 {strides = array<i32>} : memref<144x512xf32, #tpu.memory_space<vmem>>, vector<4x512xf32>,
    %c0_110 = arith.constant 0 : index
    %c16_111 = arith.constant 16 : index
    %261 = vector.load %arg9[%c0_110, %c16_111] : memref<4x784xf32, #tpu.memory_space<vmem>>, vector<4x512xf32>
    %c8_i32_112 = arith.constant 8 : i32
    %262 = vector.broadcast %c8_i32_112 : i32 to vector<1x512xi32>
    %263 = arith.cmpi sge, %6, %262 : vector<1x512xi32>
    %c8_i32_113 = arith.constant 8 : i32
    %264 = vector.broadcast %c8_i32_113 : i32 to vector<1x512xi32>
    %265 = arith.cmpi slt, %7, %264 : vector<1x512xi32>
    %266 = arith.andi %263, %265 : vector<1x512xi1>
    %267 = arith.extui %266 : vector<1x512xi1> to vector<1x512xi32>
    %268 = arith.sitofp %267 : vector<1x512xi32> to vector<1x512xf32>
    %269 = vector.broadcast %268 : vector<1x512xf32> to vector<4x512xf32>
    %270 = arith.mulf %261, %269 : vector<4x512xf32>
    %c116 = arith.constant 116 : index
    %c0_114 = arith.constant 0 : index
    %271 = vector.load %arg10[%c116, %c0_114] : memref<144x512xf32, #tpu.memory_space<vmem>>, vector<4x512xf32>
    tpu.vector_store %arg10[%c116, %c0_114], %270 {strides = array<i32>} : memref<144x512xf32, #tpu.memory_space<vmem>>, vector<4x512xf32>,
    %c0_115 = arith.constant 0 : index
    %c128 = arith.constant 128 : index
    %272 = vector.load %arg9[%c0_115, %c128] : memref<4x784xf32, #tpu.memory_space<vmem>>, vector<4x512xf32>
    %c8_i32_116 = arith.constant 8 : i32
    %273 = vector.broadcast %c8_i32_116 : i32 to vector<1x512xi32>
    %274 = arith.cmpi sge, %7, %273 : vector<1x512xi32>
    %275 = arith.extui %274 : vector<1x512xi1> to vector<1x512xi32>
    %276 = arith.sitofp %275 : vector<1x512xi32> to vector<1x512xf32>
    %277 = vector.broadcast %276 : vector<1x512xf32> to vector<4x512xf32>
    %278 = arith.mulf %272, %277 : vector<4x512xf32>
    %c120_117 = arith.constant 120 : index
    %c0_118 = arith.constant 0 : index
    %279 = vector.load %arg10[%c120_117, %c0_118] : memref<144x512xf32, #tpu.memory_space<vmem>>, vector<4x512xf32>
    tpu.vector_store %arg10[%c120_117, %c0_118], %278 {strides = array<i32>} : memref<144x512xf32, #tpu.memory_space<vmem>>, vector<4x512xf32>,
    %c0_119 = arith.constant 0 : index
    %c136_120 = arith.constant 136 : index
    %280 = vector.load %arg9[%c0_119, %c136_120] : memref<4x784xf32, #tpu.memory_space<vmem>>, vector<4x512xf32>
    %c124 = arith.constant 124 : index
    %c0_121 = arith.constant 0 : index
    %281 = vector.load %arg10[%c124, %c0_121] : memref<144x512xf32, #tpu.memory_space<vmem>>, vector<4x512xf32>
    tpu.vector_store %arg10[%c124, %c0_121], %280 {strides = array<i32>} : memref<144x512xf32, #tpu.memory_space<vmem>>, vector<4x512xf32>,
    %c0_122 = arith.constant 0 : index
    %c144 = arith.constant 144 : index
    %282 = vector.load %arg9[%c0_122, %c144] : memref<4x784xf32, #tpu.memory_space<vmem>>, vector<4x512xf32>
    %c8_i32_123 = arith.constant 8 : i32
    %283 = vector.broadcast %c8_i32_123 : i32 to vector<1x512xi32>
    %284 = arith.cmpi slt, %7, %283 : vector<1x512xi32>
    %285 = arith.extui %284 : vector<1x512xi1> to vector<1x512xi32>
    %286 = arith.sitofp %285 : vector<1x512xi32> to vector<1x512xf32>
    %287 = vector.broadcast %286 : vector<1x512xf32> to vector<4x512xf32>
    %288 = arith.mulf %282, %287 : vector<4x512xf32>
    %c128_124 = arith.constant 128 : index
    %c0_125 = arith.constant 0 : index
    %289 = vector.load %arg10[%c128_124, %c0_125] : memref<144x512xf32, #tpu.memory_space<vmem>>, vector<4x512xf32>
    tpu.vector_store %arg10[%c128_124, %c0_125], %288 {strides = array<i32>} : memref<144x512xf32, #tpu.memory_space<vmem>>, vector<4x512xf32>,
    %c0_126 = arith.constant 0 : index
    %c256 = arith.constant 256 : index
    %290 = vector.load %arg9[%c0_126, %c256] : memref<4x784xf32, #tpu.memory_space<vmem>>, vector<4x512xf32>
    %c8_i32_127 = arith.constant 8 : i32
    %291 = vector.broadcast %c8_i32_127 : i32 to vector<1x512xi32>
    %292 = arith.cmpi slt, %6, %291 : vector<1x512xi32>
    %c8_i32_128 = arith.constant 8 : i32
    %293 = vector.broadcast %c8_i32_128 : i32 to vector<1x512xi32>
    %294 = arith.cmpi sge, %7, %293 : vector<1x512xi32>
    %295 = arith.andi %292, %294 : vector<1x512xi1>
    %296 = arith.extui %295 : vector<1x512xi1> to vector<1x512xi32>
    %297 = arith.sitofp %296 : vector<1x512xi32> to vector<1x512xf32>
    %298 = vector.broadcast %297 : vector<1x512xf32> to vector<4x512xf32>
    %299 = arith.mulf %290, %298 : vector<4x512xf32>
    %c132_129 = arith.constant 132 : index
    %c0_130 = arith.constant 0 : index
    %300 = vector.load %arg10[%c132_129, %c0_130] : memref<144x512xf32, #tpu.memory_space<vmem>>, vector<4x512xf32>
    tpu.vector_store %arg10[%c132_129, %c0_130], %299 {strides = array<i32>} : memref<144x512xf32, #tpu.memory_space<vmem>>, vector<4x512xf32>,
    %c0_131 = arith.constant 0 : index
    %c264 = arith.constant 264 : index
    %301 = vector.load %arg9[%c0_131, %c264] : memref<4x784xf32, #tpu.memory_space<vmem>>, vector<4x512xf32>
    %c8_i32_132 = arith.constant 8 : i32
    %302 = vector.broadcast %c8_i32_132 : i32 to vector<1x512xi32>
    %303 = arith.cmpi slt, %6, %302 : vector<1x512xi32>
    %304 = arith.extui %303 : vector<1x512xi1> to vector<1x512xi32>
    %305 = arith.sitofp %304 : vector<1x512xi32> to vector<1x512xf32>
    %306 = vector.broadcast %305 : vector<1x512xf32> to vector<4x512xf32>
    %307 = arith.mulf %301, %306 : vector<4x512xf32>
    %c136_133 = arith.constant 136 : index
    %c0_134 = arith.constant 0 : index
    %308 = vector.load %arg10[%c136_133, %c0_134] : memref<144x512xf32, #tpu.memory_space<vmem>>, vector<4x512xf32>
    tpu.vector_store %arg10[%c136_133, %c0_134], %307 {strides = array<i32>} : memref<144x512xf32, #tpu.memory_space<vmem>>, vector<4x512xf32>,
    %c0_135 = arith.constant 0 : index
    %c272 = arith.constant 272 : index
    %309 = vector.load %arg9[%c0_135, %c272] : memref<4x784xf32, #tpu.memory_space<vmem>>, vector<4x512xf32>
    %c8_i32_136 = arith.constant 8 : i32
    %310 = vector.broadcast %c8_i32_136 : i32 to vector<1x512xi32>
    %311 = arith.cmpi slt, %6, %310 : vector<1x512xi32>
    %c8_i32_137 = arith.constant 8 : i32
    %312 = vector.broadcast %c8_i32_137 : i32 to vector<1x512xi32>
    %313 = arith.cmpi slt, %7, %312 : vector<1x512xi32>
    %314 = arith.andi %311, %313 : vector<1x512xi1>
    %315 = arith.extui %314 : vector<1x512xi1> to vector<1x512xi32>
    %316 = arith.sitofp %315 : vector<1x512xi32> to vector<1x512xf32>
    %317 = vector.broadcast %316 : vector<1x512xf32> to vector<4x512xf32>
    %318 = arith.mulf %309, %317 : vector<4x512xf32>
    %c140_138 = arith.constant 140 : index
    %c0_139 = arith.constant 0 : index
    %319 = vector.load %arg10[%c140_138, %c0_139] : memref<144x512xf32, #tpu.memory_space<vmem>>, vector<4x512xf32>
    tpu.vector_store %arg10[%c140_138, %c0_139], %318 {strides = array<i32>} : memref<144x512xf32, #tpu.memory_space<vmem>>, vector<4x512xf32>,
    %c0_140 = arith.constant 0 : index
    %c0_141 = arith.constant 0 : index
    %320 = vector.load %arg3[%c0_140, %c0_141] : memref<16x144xf32, #tpu.memory_space<vmem>>, vector<16x144xf32>
    %c0_142 = arith.constant 0 : index
    %c0_143 = arith.constant 0 : index
    %321 = vector.load %arg10[%c0_142, %c0_143] : memref<144x512xf32, #tpu.memory_space<vmem>>, vector<144x512xf32>
    %cst_144 = arith.constant dense<0.000000e+00> : vector<16x512xf32>
    %322 = tpu.matmul %320, %321, %cst_144 {dimension_numbers = #tpu.dot_dimension_numbers<[1], [0], [0], [1], [0, 0, 1, 1], [], []>} : vector<16x144xf32>, vector<144x512xf32>, vector<16x512xf32> -> vector<16x512xf32>
    %c0_145 = arith.constant 0 : index
    %c0_146 = arith.constant 0 : index
    %323 = vector.load %arg4[%c0_145, %c0_146] : memref<16x1xf32, #tpu.memory_space<vmem>>, vector<16x1xf32>
    %c0_147 = arith.constant 0 : index
    %c0_148 = arith.constant 0 : index
    %324 = vector.load %arg5[%c0_147, %c0_148] : memref<16x1xf32, #tpu.memory_space<vmem>>, vector<16x1xf32>
    %cst_149 = arith.constant dense<0.000000e+00> : vector<16xf32>
    %325 = vector.multi_reduction <add>, %322, %cst_149 [1] : vector<16x512xf32> to vector<16xf32>
    %326 = vector.shape_cast %325 : vector<16xf32> to vector<16x1xf32>
    %cst_150 = arith.constant 5.120000e+02 : f32
    %327 = vector.broadcast %cst_150 : f32 to vector<16x1xf32>
    %328 = arith.divf %326, %327 : vector<16x1xf32>
    %329 = arith.mulf %322, %322 : vector<16x512xf32>
    %cst_151 = arith.constant dense<0.000000e+00> : vector<16xf32>
    %330 = vector.multi_reduction <add>, %329, %cst_151 [1] : vector<16x512xf32> to vector<16xf32>
    %331 = vector.shape_cast %330 : vector<16xf32> to vector<16x1xf32>
    %cst_152 = arith.constant 5.120000e+02 : f32
    %332 = vector.broadcast %cst_152 : f32 to vector<16x1xf32>
    %333 = arith.divf %331, %332 : vector<16x1xf32>
    %334 = arith.mulf %328, %328 : vector<16x1xf32>
    %335 = arith.subf %333, %334 : vector<16x1xf32>
    %cst_153 = arith.constant 0.000000e+00 : f32
    %336 = vector.broadcast %cst_153 : f32 to vector<16x1xf32>
    %337 = arith.maximumf %335, %336 : vector<16x1xf32>
    %338 = vector.broadcast %328 : vector<16x1xf32> to vector<16x512xf32>
    %339 = arith.subf %322, %338 : vector<16x512xf32>
    %cst_154 = arith.constant 9.99999974E-6 : f32
    %340 = vector.broadcast %cst_154 : f32 to vector<16x1xf32>
    %341 = arith.addf %337, %340 : vector<16x1xf32>
    %342 = math.rsqrt %341 : vector<16x1xf32>
    %343 = vector.broadcast %342 : vector<16x1xf32> to vector<16x512xf32>
    %344 = arith.mulf %339, %343 : vector<16x512xf32>
    %345 = vector.broadcast %323 : vector<16x1xf32> to vector<16x512xf32>
    %346 = arith.mulf %344, %345 : vector<16x512xf32>
    %347 = vector.broadcast %324 : vector<16x1xf32> to vector<16x512xf32>
    %348 = arith.addf %346, %347 : vector<16x512xf32>
    %cst_155 = arith.constant 0.000000e+00 : f32
    %349 = vector.broadcast %cst_155 : f32 to vector<16x512xf32>
    %350 = arith.maximumf %348, %349 : vector<16x512xf32>
    %c0_156 = arith.constant 0 : index
    %c0_157 = arith.constant 0 : index
    %351 = vector.load %arg6[%c0_156, %c0_157] : memref<20x1xf32, #tpu.memory_space<vmem>>, vector<4x1xf32>
    %c0_158 = arith.constant 0 : index
    %c0_159 = arith.constant 0 : index
    %352 = vector.load %arg7[%c0_158, %c0_159] : memref<20x1xf32, #tpu.memory_space<vmem>>, vector<4x1xf32>
    %cst_160 = arith.constant dense<0.000000e+00> : vector<4xf32>
    %353 = vector.multi_reduction <add>, %2, %cst_160 [1] : vector<4x512xf32> to vector<4xf32>
    %354 = vector.shape_cast %353 : vector<4xf32> to vector<4x1xf32>
    %cst_161 = arith.constant 5.120000e+02 : f32
    %355 = vector.broadcast %cst_161 : f32 to vector<4x1xf32>
    %356 = arith.divf %354, %355 : vector<4x1xf32>
    %357 = arith.mulf %2, %2 : vector<4x512xf32>
    %cst_162 = arith.constant dense<0.000000e+00> : vector<4xf32>
    %358 = vector.multi_reduction <add>, %357, %cst_162 [1] : vector<4x512xf32> to vector<4xf32>
    %359 = vector.shape_cast %358 : vector<4xf32> to vector<4x1xf32>
    %cst_163 = arith.constant 5.120000e+02 : f32
    %360 = vector.broadcast %cst_163 : f32 to vector<4x1xf32>
    %361 = arith.divf %359, %360 : vector<4x1xf32>
    %362 = arith.mulf %356, %356 : vector<4x1xf32>
    %363 = arith.subf %361, %362 : vector<4x1xf32>
    %cst_164 = arith.constant 0.000000e+00 : f32
    %364 = vector.broadcast %cst_164 : f32 to vector<4x1xf32>
    %365 = arith.maximumf %363, %364 : vector<4x1xf32>
    %366 = vector.broadcast %356 : vector<4x1xf32> to vector<4x512xf32>
    %367 = arith.subf %2, %366 : vector<4x512xf32>
    %cst_165 = arith.constant 9.99999974E-6 : f32
    %368 = vector.broadcast %cst_165 : f32 to vector<4x1xf32>
    %369 = arith.addf %365, %368 : vector<4x1xf32>
    %370 = math.rsqrt %369 : vector<4x1xf32>
    %371 = vector.broadcast %370 : vector<4x1xf32> to vector<4x512xf32>
    %372 = arith.mulf %367, %371 : vector<4x512xf32>
    %373 = vector.broadcast %351 : vector<4x1xf32> to vector<4x512xf32>
    %374 = arith.mulf %372, %373 : vector<4x512xf32>
    %375 = vector.broadcast %352 : vector<4x1xf32> to vector<4x512xf32>
    %376 = arith.addf %374, %375 : vector<4x512xf32>
    %cst_166 = arith.constant 0.000000e+00 : f32
    %377 = vector.broadcast %cst_166 : f32 to vector<4x512xf32>
    %378 = arith.maximumf %376, %377 : vector<4x512xf32>
    %c0_167 = arith.constant 0 : index
    %c0_168 = arith.constant 0 : index
    %379 = vector.load %arg8[%c0_167, %c0_168] : memref<20x512xf32, #tpu.memory_space<vmem>>, vector<4x512xf32>
    tpu.vector_store %arg8[%c0_167, %c0_168], %378 {strides = array<i32>} : memref<20x512xf32, #tpu.memory_space<vmem>>, vector<4x512xf32>,
    %c4_169 = arith.constant 4 : index
    %c0_170 = arith.constant 0 : index
    %380 = vector.load %arg6[%c4_169, %c0_170] : memref<20x1xf32, #tpu.memory_space<vmem>>, vector<16x1xf32>
    %c4_171 = arith.constant 4 : index
    %c0_172 = arith.constant 0 : index
    %381 = vector.load %arg7[%c4_171, %c0_172] : memref<20x1xf32, #tpu.memory_space<vmem>>, vector<16x1xf32>
    %cst_173 = arith.constant dense<0.000000e+00> : vector<16xf32>
    %382 = vector.multi_reduction <add>, %350, %cst_173 [1] : vector<16x512xf32> to vector<16xf32>
    %383 = vector.shape_cast %382 : vector<16xf32> to vector<16x1xf32>
    %cst_174 = arith.constant 5.120000e+02 : f32
    %384 = vector.broadcast %cst_174 : f32 to vector<16x1xf32>
    %385 = arith.divf %383, %384 : vector<16x1xf32>
    %386 = arith.mulf %350, %350 : vector<16x512xf32>
    %cst_175 = arith.constant dense<0.000000e+00> : vector<16xf32>
    %387 = vector.multi_reduction <add>, %386, %cst_175 [1] : vector<16x512xf32> to vector<16xf32>
    %388 = vector.shape_cast %387 : vector<16xf32> to vector<16x1xf32>
    %cst_176 = arith.constant 5.120000e+02 : f32
    %389 = vector.broadcast %cst_176 : f32 to vector<16x1xf32>
    %390 = arith.divf %388, %389 : vector<16x1xf32>
    %391 = arith.mulf %385, %385 : vector<16x1xf32>
    %392 = arith.subf %390, %391 : vector<16x1xf32>
    %cst_177 = arith.constant 0.000000e+00 : f32
    %393 = vector.broadcast %cst_177 : f32 to vector<16x1xf32>
    %394 = arith.maximumf %392, %393 : vector<16x1xf32>
    %395 = vector.broadcast %385 : vector<16x1xf32> to vector<16x512xf32>
    %396 = arith.subf %350, %395 : vector<16x512xf32>
    %cst_178 = arith.constant 9.99999974E-6 : f32
    %397 = vector.broadcast %cst_178 : f32 to vector<16x1xf32>
    %398 = arith.addf %394, %397 : vector<16x1xf32>
    %399 = math.rsqrt %398 : vector<16x1xf32>
    %400 = vector.broadcast %399 : vector<16x1xf32> to vector<16x512xf32>
    %401 = arith.mulf %396, %400 : vector<16x512xf32>
    %402 = vector.broadcast %380 : vector<16x1xf32> to vector<16x512xf32>
    %403 = arith.mulf %401, %402 : vector<16x512xf32>
    %404 = vector.broadcast %381 : vector<16x1xf32> to vector<16x512xf32>
    %405 = arith.addf %403, %404 : vector<16x512xf32>
    %cst_179 = arith.constant 0.000000e+00 : f32
    %406 = vector.broadcast %cst_179 : f32 to vector<16x512xf32>
    %407 = arith.maximumf %405, %406 : vector<16x512xf32>
    %c4_180 = arith.constant 4 : index
    %c0_181 = arith.constant 0 : index
    %408 = vector.load %arg8[%c4_180, %c0_181] : memref<20x512xf32, #tpu.memory_space<vmem>>, vector<16x512xf32>
    tpu.vector_store %arg8[%c4_180, %c0_181], %407 {strides = array<i32>} : memref<20x512xf32, #tpu.memory_space<vmem>>, vector<16x512xf32>,
    return
  }
}

</mosaic_0001>

<bundles_post_ra>
// kernel: cloudnet_forward.5
= control target key start
LH: loop header
LB: loop body
LE: loop exit
PB: predicated region body
PF: predicated region fallthrough
CT: control target
= control target key end

     0   :  { %vm35_vm0 = vcmask 1043456   ;;  %v1008_v5 = vmov 0.0   ;;  %vm31_vm1 = vcmask 162816   ;;  %s1546_s0 = inlined_call_operand.vmem [shape: f32[20,512], index: 0, kind: input, shape index: {}]   ;;  %s1547_s1 = inlined_call_operand.vmem [shape: f32[4,20], index: 1, kind: input, shape index: {}]   ;;  %s1548_s2 = inlined_call_operand.vmem [shape: f32[1024,128], index: 2, kind: input, shape index: {}]   ;;  %s1549_s3 = inlined_call_operand.vmem [shape: f32[128,3], index: 3, kind: input, shape index: {}]   ;;  %s1550_s4 = inlined_call_operand.hbm [shape: f32[2,3], index: 4, kind: output, shape index: {}]  }
   0x1   :  { %v28_v0 = vld [vmem:[%s1546_s0 + $0x48] sm:$0xf]  ;;  %v27_v1 = vld [vmem:[%s1546_s0 + $0x40] sm:$0xf]  ;;  %112 = vmatprep.mubr.f32.mxu1 %v1008_v5  ;;  %v30_v8 = vld [vmem:[%s1546_s0 + $0x58] sm:$0xf] }
   0x2   :  { %v24_v2 = vld [vmem:[%s1546_s0 + $0x28] sm:$0xff]  ;;  %784 = vmatprep.subr.msk.mxu1 %vm35_vm0, %v28_v0  ;;  %v23_v3 = vld [vmem:[%s1546_s0 + $0x20] sm:$0xff]  ;;  %v305_v9 = vld [vmem:[%s1548_s2 + $0x1f8] sm:$0xff] }
   0x3   :  { %785 = vmatpush1.msk.msra.mxu1 %vm35_vm0, %v27_v1  ;;  %v20_v4 = vld [vmem:[%s1546_s0 + $0x8] sm:$0xff]  ;;  %v19_v6 = vld [vmem:[%s1546_s0] sm:$0xff]  ;;  %v29_v10 = vld [vmem:[%s1546_s0 + $0x50] sm:$0xf]  ;;  %790 = vmatprep.subr.mxu0 %v305_v9 }
   0x4   :  { %76 = vmatprep.subr.mxu1 %v24_v2  ;;  %v18_v7 = vld [vmem:[%s1547_s1] sm:$0xf]  ;;  %v289_v11 = vld [vmem:[%s1548_s2 + $0x178] sm:$0xff]  ;;  %v304_v13 = vld [vmem:[%s1548_s2 + $0x1f0] sm:$0xff] }
   0x5   :  { %77 = vmatpush1.msra.mxu1 %v23_v3  ;;  %v26_v12 = vld [vmem:[%s1546_s0 + $0x38] sm:$0xff]  ;;  %791 = vmatpush3.msra.mxu0 %v289_v11  ;;  %v25_v14 = vld [vmem:[%s1546_s0 + $0x30] sm:$0xff]  ;;  %v303_v17 = vld [vmem:[%s1548_s2 + $0x1e8] sm:$0xff] }
   0x6   :  { %78 = vmatprep.subr.mxu1 %v20_v4  ;;  %v288_v15 = vld [vmem:[%s1548_s2 + $0x170] sm:$0xff]  ;;  %v22_v16 = vld [vmem:[%s1546_s0 + $0x18] sm:$0xff]  ;;  %792 = vmatprep.subr.mxu0 %v304_v13  ;;  %v287_v19 = vld [vmem:[%s1548_s2 + $0x168] sm:$0xff] }
   0x7   :  { %79 = vmatpush1.msra.mxu1 %v19_v6  ;;  %v21_v18 = vld [vmem:[%s1546_s0 + $0x10] sm:$0xff]  ;;  %v257_v20 = vld [vmem:[%s1548_s2 + $0xf8] sm:$0xff]  ;;  %793 = vmatpush3.msra.mxu0 %v288_v15  ;;  %v302_v22 = vld [vmem:[%s1548_s2 + $0x1e0] sm:$0xff] }
   0x8   :  { %786 = vmatmul.mubr.msk.f32.vlgmr.msra.gmra.mxu1 %vm31_vm1, %v18_v7  ;;  %787 = vmatprep.subr.msk.mxu1 %vm35_vm0, %v30_v8  ;;  %v241_v21 = vld [vmem:[%s1548_s2 + $0x78] sm:$0xff] }
   0x9   :  { %788 = vmatpush1.msk.msra.mxu1 %vm35_vm0, %v29_v10  ;;  %183 = vmatprep.mubr.f32.mxu1 %v1008_v5 }
   0xa   :  { %147 = vmatprep.subr.mxu1 %v26_v12  ;;  %794 = vmatprep.subr.mxu0 %v303_v17 }
   0xb   :  { %148 = vmatpush1.msra.mxu1 %v25_v14 }
   0xc   :  { %149 = vmatprep.subr.mxu1 %v22_v16 }
   0xd   :  { %9 = vsyncpa [#allocation3], 0  ;;  %150 = vmatpush1.msra.mxu1 %v21_v18  ;;  %v256_v23 = vld [vmem:[%s1548_s2 + $0xf0] sm:$0xff]  ;;  %795 = vmatpush3.msra.mxu0 %v287_v19  ;;  %v286_v24 = vld [vmem:[%s1548_s2 + $0x160] sm:$0xff]  ;;  %v1009_v17 = vmov 1966171168   ;;  %v199_v19 = vlaneseq }
   0xe   :  { %789 = vmatmul.mubr.msk.f32.vlgmr.msra.gmra.mxu1 %vm31_vm1, %v18_v7  ;;  %825 = vmatprep.subr.mxu1 %v257_v20  ;;  %v240_v25 = vld [vmem:[%s1548_s2 + $0x70] sm:$0xff]  ;;  %v301_v26 = vld [vmem:[%s1548_s2 + $0x1d8] sm:$0xff]  ;;  %v255_v27 = vld [vmem:[%s1548_s2 + $0xe8] sm:$0xff]  ;;  %v197_v18 = vunpack.c.l.s4 %v1009_v17  ;;  %vm1010_vm2 = vmmov 0   ;;  %vm768_vm3 = vcmask 17408  }
   0xf   :  { %826 = vmatpush3.msra.mxu1 %v241_v21  ;;  %796 = vmatprep.subr.mxu0 %v302_v22  ;;  %v285_v28 = vld [vmem:[%s1548_s2 + $0x158] sm:$0xff]  ;;  %v239_v29 = vld [vmem:[%s1548_s2 + $0x68] sm:$0xff]  ;;  %v300_v30 = vld [vmem:[%s1548_s2 + $0x1d0] sm:$0xff]  ;;  %v200_v22 = vshrl.u32 %v199_v19, 7 }
  0x10   :  { %827 = vmatprep.subr.mxu1 %v256_v23  ;;  %797 = vmatpush3.msra.mxu0 %v286_v24  ;;  %v254_v31 = vld [vmem:[%s1548_s2 + $0xe0] sm:$0xff]  ;;  %v253_v33 = vld [vmem:[%s1548_s2 + $0xd8] sm:$0xff]  ;;  %v252_v35 = vld [vmem:[%s1548_s2 + $0xd0] sm:$0xff]  ;;  %v198_v21 = vunpack.c.0.s8 %v197_v18 }
  0x11   :  { %828 = vmatpush3.msra.mxu1 %v240_v25  ;;  %798 = vmatprep.subr.mxu0 %v301_v26  ;;  %v238_v32 = vld [vmem:[%s1548_s2 + $0x60] sm:$0xff]  ;;  %v237_v34 = vld [vmem:[%s1548_s2 + $0x58] sm:$0xff]  ;;  %v284_v36 = vld [vmem:[%s1548_s2 + $0x150] sm:$0xff] }
  0x12   :  { %829 = vmatprep.subr.mxu1 %v255_v27  ;;  %799 = vmatpush3.msra.mxu0 %v285_v28  ;;  %v236_v37 = vld [vmem:[%s1548_s2 + $0x50] sm:$0xff]  ;;  %v299_v38 = vld [vmem:[%s1548_s2 + $0x1c8] sm:$0xff]  ;;  %v298_v42 = vld [vmem:[%s1548_s2 + $0x1c0] sm:$0xff]  ;;  %v201_v26 = vsub.s32 %v198_v21, %v200_v22 }
  0x13   :  { %830 = vmatpush3.msra.mxu1 %v239_v29  ;;  %800 = vmatprep.subr.mxu0 %v300_v30  ;;  %v251_v39 = vld [vmem:[%s1548_s2 + $0xc8] sm:$0xff]  ;;  %v250_v43 = vld [vmem:[%s1548_s2 + $0xc0] sm:$0xff]  ;;  %v297_v46 = vld [vmem:[%s1548_s2 + $0x1b8] sm:$0xff] }
  0x14   :  { %831 = vmatprep.subr.mxu1 %v254_v31  ;;  %801 = vmatpush3.msra.mxu0 %v284_v36  ;;  %v283_v40 = vld [vmem:[%s1548_s2 + $0x148] sm:$0xff]  ;;  %v282_v44 = vld [vmem:[%s1548_s2 + $0x140] sm:$0xff]  ;;  %v249_v47 = vld [vmem:[%s1548_s2 + $0xb8] sm:$0xff] }
  0x15   :  { %832 = vmatpush3.msra.mxu1 %v238_v32  ;;  %802 = vmatprep.subr.mxu0 %v299_v38  ;;  %v235_v41 = vld [vmem:[%s1548_s2 + $0x48] sm:$0xff]  ;;  %v234_v45 = vld [vmem:[%s1548_s2 + $0x40] sm:$0xff]  ;;  %v281_v48 = vld [vmem:[%s1548_s2 + $0x138] sm:$0xff] }
  0x16   :  { %833 = vmatprep.subr.mxu1 %v253_v33  ;;  %803 = vmatpush3.msra.mxu0 %v283_v40  ;;  %v233_v49 = vld [vmem:[%s1548_s2 + $0x38] sm:$0xff]  ;;  %v296_v50 = vld [vmem:[%s1548_s2 + $0x1b0] sm:$0xff]  ;;  %v295_v54 = vld [vmem:[%s1548_s2 + $0x1a8] sm:$0xff] }
  0x17   :  { %834 = vmatpush3.msra.mxu1 %v237_v34  ;;  %804 = vmatprep.subr.mxu0 %v298_v42  ;;  %v248_v51 = vld [vmem:[%s1548_s2 + $0xb0] sm:$0xff]  ;;  %v247_v55 = vld [vmem:[%s1548_s2 + $0xa8] sm:$0xff]  ;;  %v294_v58 = vld [vmem:[%s1548_s2 + $0x1a0] sm:$0xff] }
  0x18   :  { %835 = vmatprep.subr.mxu1 %v252_v35  ;;  %805 = vmatpush3.msra.mxu0 %v282_v44  ;;  %v280_v52 = vld [vmem:[%s1548_s2 + $0x130] sm:$0xff]  ;;  %v279_v56 = vld [vmem:[%s1548_s2 + $0x128] sm:$0xff]  ;;  %v246_v59 = vld [vmem:[%s1548_s2 + $0xa0] sm:$0xff] }
  0x19   :  { %836 = vmatpush3.msra.mxu1 %v236_v37  ;;  %806 = vmatprep.subr.mxu0 %v297_v46  ;;  %v232_v53 = vld [vmem:[%s1548_s2 + $0x30] sm:$0xff]  ;;  %v231_v57 = vld [vmem:[%s1548_s2 + $0x28] sm:$0xff]  ;;  %v278_v60 = vld [vmem:[%s1548_s2 + $0x120] sm:$0xff] }
  0x1a   :  { %837 = vmatprep.subr.mxu1 %v251_v39  ;;  %807 = vmatpush3.msra.mxu0 %v281_v48  ;;  %v230_v61 = vld [vmem:[%s1548_s2 + $0x20] sm:$0xff]  ;;  %v293_v62 = vld [vmem:[%s1548_s2 + $0x198] sm:$0xff]  ;;  %v292_v2 = vld [vmem:[%s1548_s2 + $0x190] sm:$0xff] }
  0x1b   :  { %838 = vmatpush3.msra.mxu1 %v235_v41  ;;  %808 = vmatprep.subr.mxu0 %v296_v50  ;;  %v245_v63 = vld [vmem:[%s1548_s2 + $0x98] sm:$0xff]  ;;  %v244_v3 = vld [vmem:[%s1548_s2 + $0x90] sm:$0xff]  ;;  %v291_v7 = vld [vmem:[%s1548_s2 + $0x188] sm:$0xff] }
  0x1c   :  { %839 = vmatprep.subr.mxu1 %v250_v43  ;;  %809 = vmatpush3.msra.mxu0 %v280_v52  ;;  %v277_v0 = vld [vmem:[%s1548_s2 + $0x118] sm:$0xff]  ;;  %v276_v4 = vld [vmem:[%s1548_s2 + $0x110] sm:$0xff]  ;;  %v243_v8 = vld [vmem:[%s1548_s2 + $0x88] sm:$0xff] }
  0x1d   :  { %840 = vmatpush3.msra.mxu1 %v234_v45  ;;  %810 = vmatprep.subr.mxu0 %v295_v54  ;;  %v229_v1 = vld [vmem:[%s1548_s2 + $0x18] sm:$0xff]  ;;  %v228_v6 = vld [vmem:[%s1548_s2 + $0x10] sm:$0xff]  ;;  %v275_v9 = vld [vmem:[%s1548_s2 + $0x108] sm:$0xff] }
  0x1e   :  { %841 = vmatprep.subr.mxu1 %v249_v47  ;;  %811 = vmatpush3.msra.mxu0 %v279_v56  ;;  %v227_v10 = vld [vmem:[%s1548_s2 + $0x8] sm:$0xff]  ;;  %v290_v11 = vld [vmem:[%s1548_s2 + $0x180] sm:$0xff]  ;;  %v492_v15 = vld [vmem:[%s1548_s2 + $0x2f8] sm:$0xff] }
  0x1f   :  { %842 = vmatpush3.msra.mxu1 %v233_v49  ;;  %812 = vmatprep.subr.mxu0 %v294_v58  ;;  %v242_v12 = vld [vmem:[%s1548_s2 + $0x80] sm:$0xff]  ;;  %v607_v16 = vld [vmem:[%s1548_s2 + $0x3f8] sm:$0xff]  ;;  %v491_v45 = vld [vmem:[%s1548_s2 + $0x2f0] sm:$0xff] }
  0x20   :  { %843 = vmatprep.subr.mxu1 %v248_v51  ;;  %813 = vmatpush3.msra.mxu0 %v278_v60  ;;  %v274_v13 = vld [vmem:[%s1548_s2 + $0x100] sm:$0xff]  ;;  %v476_v43 = vld [vmem:[%s1548_s2 + $0x278] sm:$0xff]  ;;  %v606_v48 = vld [vmem:[%s1548_s2 + $0x3f0] sm:$0xff] }
  0x21   :  { %844 = vmatpush3.msra.mxu1 %v232_v53  ;;  %814 = vmatprep.subr.mxu0 %v293_v62  ;;  %v226_v14 = vld [vmem:[%s1548_s2] sm:$0xff]  ;;  %v591_v44 = vld [vmem:[%s1548_s2 + $0x378] sm:$0xff]  ;;  %v475_v49 = vld [vmem:[%s1548_s2 + $0x270] sm:$0xff] }
  0x22   :  { %845 = vmatprep.subr.mxu1 %v247_v55  ;;  %815 = vmatpush3.msra.mxu0 %v277_v0  ;;  %v590_v50 = vld [vmem:[%s1548_s2 + $0x370] sm:$0xff]  ;;  %v490_v51 = vld [vmem:[%s1548_s2 + $0x2e8] sm:$0xff]  ;;  %v489_v55 = vld [vmem:[%s1548_s2 + $0x2e0] sm:$0xff] }
  0x23   :  { %846 = vmatpush3.msra.mxu1 %v231_v57  ;;  %816 = vmatprep.subr.mxu0 %v292_v2  ;;  %v605_v52 = vld [vmem:[%s1548_s2 + $0x3e8] sm:$0xff]  ;;  %v604_v56 = vld [vmem:[%s1548_s2 + $0x3e0] sm:$0xff]  ;;  %v603_v60 = vld [vmem:[%s1548_s2 + $0x3d8] sm:$0xff] }
  0x24   :  { %847 = vmatprep.subr.mxu1 %v246_v59  ;;  %817 = vmatpush3.msra.mxu0 %v276_v4  ;;  %v474_v53 = vld [vmem:[%s1548_s2 + $0x268] sm:$0xff]  ;;  %v473_v57 = vld [vmem:[%s1548_s2 + $0x260] sm:$0xff]  ;;  %v488_v59 = vld [vmem:[%s1548_s2 + $0x2d8] sm:$0xff] }
  0x25   :  { %848 = vmatpush3.msra.mxu1 %v230_v61  ;;  %818 = vmatprep.subr.mxu0 %v291_v7  ;;  %v589_v54 = vld [vmem:[%s1548_s2 + $0x368] sm:$0xff]  ;;  %v588_v58 = vld [vmem:[%s1548_s2 + $0x360] sm:$0xff]  ;;  %v472_v61 = vld [vmem:[%s1548_s2 + $0x258] sm:$0xff] }
  0x26   :  { %849 = vmatprep.subr.mxu1 %v245_v63  ;;  %819 = vmatpush3.msra.mxu0 %v275_v9  ;;  %v587_v62 = vld [vmem:[%s1548_s2 + $0x358] sm:$0xff]  ;;  %v487_v63 = vld [vmem:[%s1548_s2 + $0x2d0] sm:$0xff]  ;;  %v601_v4 = vld [vmem:[%s1548_s2 + $0x3c8] sm:$0xff] }
  0x27   :  { %850 = vmatpush3.msra.mxu1 %v229_v1  ;;  %820 = vmatprep.subr.mxu0 %v290_v11  ;;  %v602_v0 = vld [vmem:[%s1548_s2 + $0x3d0] sm:$0xff]  ;;  %v585_v7 = vld [vmem:[%s1548_s2 + $0x348] sm:$0xff]  ;;  %v600_v9 = vld [vmem:[%s1548_s2 + $0x3c0] sm:$0xff] }
  0x28   :  { %851 = vmatprep.subr.mxu1 %v244_v3  ;;  %821 = vmatpush3.msra.mxu0 %v274_v13  ;;  %v471_v1 = vld [vmem:[%s1548_s2 + $0x250] sm:$0xff]  ;;  %v486_v3 = vld [vmem:[%s1548_s2 + $0x2c8] sm:$0xff]  ;;  %v584_v11 = vld [vmem:[%s1548_s2 + $0x340] sm:$0xff] }
  0x29   :  { %852 = vmatpush3.msra.mxu1 %v228_v6  ;;  %860 = vmatprep.subr.mxu0 %v492_v15  ;;  %v586_v2 = vld [vmem:[%s1548_s2 + $0x350] sm:$0xff]  ;;  %v470_v6 = vld [vmem:[%s1548_s2 + $0x248] sm:$0xff]  ;;  %v599_v13 = vld [vmem:[%s1548_s2 + $0x3b8] sm:$0xff] }
  0x2a   :  { %853 = vmatprep.subr.mxu1 %v243_v8  ;;  %v485_v8 = vld [vmem:[%s1548_s2 + $0x2c0] sm:$0xff]  ;;  %v583_v15 = vld [vmem:[%s1548_s2 + $0x338] sm:$0xff]  ;;  %v598_v17 = vld [vmem:[%s1548_s2 + $0x3b0] sm:$0xff] }
  0x2b   :  { %854 = vmatpush3.msra.mxu1 %v227_v10  ;;  %v469_v10 = vld [vmem:[%s1548_s2 + $0x240] sm:$0xff]  ;;  %v467_v18 = vld [vmem:[%s1548_s2 + $0x230] sm:$0xff]  ;;  %v597_v21 = vld [vmem:[%s1548_s2 + $0x3a8] sm:$0xff] }
  0x2c   :  { %855 = vmatprep.subr.mxu1 %v242_v12  ;;  %v484_v12 = vld [vmem:[%s1548_s2 + $0x2b8] sm:$0xff]  ;;  %v582_v19 = vld [vmem:[%s1548_s2 + $0x330] sm:$0xff]  ;;  %v466_v22 = vld [vmem:[%s1548_s2 + $0x228] sm:$0xff] }
  0x2d   :  { %856 = vmatpush3.msra.mxu1 %v226_v14  ;;  %v468_v14 = vld [vmem:[%s1548_s2 + $0x238] sm:$0xff] }
  0x2e   :  { %895 = vmatprep.subr.mxu1 %v607_v16  ;;  %v483_v16 = vld [vmem:[%s1548_s2 + $0x2b0] sm:$0xff] }
  0xc8   :  { %v114_v20 = vpop.f32.mrf.mxu1 }
  0xca   :  { %v116_v23 = vpop.f32.mrf.mxu1 }
  0xcb   :  { %v194_v25 = vcombine.low %v114_v20, %v116_v23  ;;  %v482_v20 = vld [vmem:[%s1548_s2 + $0x2a8] sm:$0xff] }
  0xcc   :  { %v581_v23 = vld [vmem:[%s1548_s2 + $0x328] sm:$0xff] }
  0xcd   :  { %v202_v29 = vrot.slane %v194_v25, %v201_v26  ;;  %v596_v25 = vld [vmem:[%s1548_s2 + $0x3a0] sm:$0xff] }
  0xce   :  { %v185_v24 = vpop.f32.mrf.mxu1 }
  0xd0   :  { %v187_v27 = vpop.f32.mrf.mxu1 }
  0xd1   :  { %v195_v28 = vcombine.low %v185_v24, %v187_v27  ;;  %v481_v24 = vld [vmem:[%s1548_s2 + $0x2a0] sm:$0xff] }
  0xd2   :  { %v580_v27 = vld [vmem:[%s1548_s2 + $0x320] sm:$0xff] }
  0xd3   :  { %v209_v30 = vrot.slane %v195_v28, %v201_v26  ;;  %v480_v28 = vld [vmem:[%s1548_s2 + $0x298] sm:$0xff] }
  0xd5   :  { %v210_v31 = vcombine.low %v202_v29, %v209_v30  ;;  %v258_v32 = vcombine.high %v202_v29, %v209_v30  ;;  %v595_v29 = vld [vmem:[%s1548_s2 + $0x398] sm:$0xff] }
  0xd6   :  { %v464_v30 = vld [vmem:[%s1548_s2 + $0x218] sm:$0xff] }
  0xd7   :  { %v217_v33 = vrot.slane %v210_v31, %v201_v26  ;;  %v265_v34 = vrot.slane %v258_v32, %v201_v26  ;;  %v579_v31 = vld [vmem:[%s1548_s2 + $0x318] sm:$0xff]  ;;  %v479_v32 = vld [vmem:[%s1548_s2 + $0x290] sm:$0xff] }
  0xd9   :  { %v273_v35 = vrot.slane %v265_v34, %v201_v26  ;;  %v567_v36 = vcombine.high %v265_v34, %v265_v34  ;;  %v225_v37 = vrot.slane %v217_v33, %v201_v26  ;;  %v452_v38 = vcombine.high %v217_v33, %v217_v33  ;;  %v594_v33 = vld [vmem:[%s1548_s2 + $0x390] sm:$0xff] }
  0xda   :  { %v463_v34 = vld [vmem:[%s1548_s2 + $0x210] sm:$0xff] }
  0xdb   :  { %v307_v39 = vcombine.high %v273_v35, %v273_v35  ;;  %v380_v40 = vcombine.high %v225_v37, %v225_v37  ;;  %v1282_v41 = vrot.slane %v452_v38, %v201_v26  ;;  %v1284_v42 = vrot.slane %v567_v36, %v201_v26  ;;  %v465_v26 = vld [vmem:[%s1548_s2 + $0x220] sm:$0xff]  ;;  %v478_v36 = vld [vmem:[%s1548_s2 + $0x288] sm:$0xff] }
  0xdc   :  { %v462_v38 = vld [vmem:[%s1548_s2 + $0x208] sm:$0xff] }
  0xdd   :  { %373 = vmatprep.mubr.f32.mxu0 %v307_v39  ;;  %446 = vmatprep.mubr.f32.mxu1 %v380_v40  ;;  %v494_v46 = vcombine.high %v1282_v41, %v1282_v41  ;;  %v609_v47 = vcombine.high %v1284_v42, %v1284_v42  ;;  %v577_v39 = vld [vmem:[%s1548_s2 + $0x308] sm:$0xff]  ;;  %v477_v40 = vld [vmem:[%s1548_s2 + $0x280] sm:$0xff] }
  0xde   :  { %374 = vmatmul.mubr.f32.vlgmr.msra.gmra.mxu0 %v273_v35  ;;  %447 = vmatmul.mubr.f32.vlgmr.msra.gmra.mxu1 %v225_v37  ;;  %v578_v35 = vld [vmem:[%s1548_s2 + $0x310] sm:$0xff]  ;;  %v593_v37 = vld [vmem:[%s1548_s2 + $0x388] sm:$0xff] }
  0xdf   :  { %861 = vmatpush3.msra.mxu0 %v476_v43  ;;  %896 = vmatpush3.msra.mxu1 %v591_v44  ;;  %v592_v43 = vld [vmem:[%s1548_s2 + $0x380] sm:$0xff] }
  0xe0   :  { %862 = vmatprep.subr.mxu0 %v491_v45  ;;  %560 = vmatprep.mubr.f32.mxu0 %v494_v46  ;;  %v461_v44 = vld [vmem:[%s1548_s2 + $0x200] sm:$0xff]  ;;  %v697_v46 = vld [vmem:[%s1549_s3 + $0x78] sm:$0xff] }
  0xe1   :  { %897 = vmatprep.subr.mxu1 %v606_v48  ;;  %675 = vmatprep.mubr.f32.mxu1 %v609_v47  ;;  %v576_v45 = vld [vmem:[%s1548_s2 + $0x300] sm:$0xff]  ;;  %v696_v47 = vld [vmem:[%s1549_s3 + $0x70] sm:$0xff]  ;;  %v695_v48 = vld [vmem:[%s1549_s3 + $0x68] sm:$0xff] }
  0xe2   :  { %863 = vmatpush3.msra.mxu0 %v475_v49  ;;  %898 = vmatpush3.msra.mxu1 %v590_v50  ;;  %v692_v49 = vld [vmem:[%s1549_s3 + $0x50] sm:$0xff]  ;;  %v691_v50 = vld [vmem:[%s1549_s3 + $0x48] sm:$0xff] }
  0xe3   :  { %864 = vmatprep.subr.mxu0 %v490_v51  ;;  %899 = vmatprep.subr.mxu1 %v605_v52  ;;  %v690_v51 = vld [vmem:[%s1549_s3 + $0x40] sm:$0xff]  ;;  %v689_v52 = vld [vmem:[%s1549_s3 + $0x38] sm:$0xff] }
  0xe4   :  { %865 = vmatpush3.msra.mxu0 %v474_v53  ;;  %900 = vmatpush3.msra.mxu1 %v589_v54  ;;  %v688_v53 = vld [vmem:[%s1549_s3 + $0x30] sm:$0xff]  ;;  %v687_v54 = vld [vmem:[%s1549_s3 + $0x28] sm:$0xff] }
  0xe5   :  { %866 = vmatprep.subr.mxu0 %v489_v55  ;;  %901 = vmatprep.subr.mxu1 %v604_v56  ;;  %v686_v55 = vld [vmem:[%s1549_s3 + $0x20] sm:$0xff]  ;;  %v685_v56 = vld [vmem:[%s1549_s3 + $0x18] sm:$0xff] }
  0xe6   :  { %867 = vmatpush3.msra.mxu0 %v473_v57  ;;  %902 = vmatpush3.msra.mxu1 %v588_v58  ;;  %v684_v57 = vld [vmem:[%s1549_s3 + $0x10] sm:$0xff]  ;;  %v683_v58 = vld [vmem:[%s1549_s3 + $0x8] sm:$0xff] }
  0xe7   :  { %868 = vmatprep.subr.mxu0 %v488_v59  ;;  %903 = vmatprep.subr.mxu1 %v603_v60  ;;  %v682_v59 = vld [vmem:[%s1549_s3] sm:$0xff] }
  0xe8   :  { %869 = vmatpush3.msra.mxu0 %v472_v61  ;;  %904 = vmatpush3.msra.mxu1 %v587_v62 }
  0xe9   :  { %870 = vmatprep.subr.mxu0 %v487_v63  ;;  %905 = vmatprep.subr.mxu1 %v602_v0 }
  0xea   :  { %871 = vmatpush3.msra.mxu0 %v471_v1  ;;  %906 = vmatpush3.msra.mxu1 %v586_v2 }
  0xeb   :  { %872 = vmatprep.subr.mxu0 %v486_v3  ;;  %907 = vmatprep.subr.mxu1 %v601_v4 }
  0xec   :  { %873 = vmatpush3.msra.mxu0 %v470_v6  ;;  %908 = vmatpush3.msra.mxu1 %v585_v7 }
  0xed   :  { %874 = vmatprep.subr.mxu0 %v485_v8  ;;  %909 = vmatprep.subr.mxu1 %v600_v9 }
  0xee   :  { %875 = vmatpush3.msra.mxu0 %v469_v10  ;;  %910 = vmatpush3.msra.mxu1 %v584_v11 }
  0xef   :  { %876 = vmatprep.subr.mxu0 %v484_v12  ;;  %911 = vmatprep.subr.mxu1 %v599_v13 }
  0xf0   :  { %877 = vmatpush3.msra.mxu0 %v468_v14  ;;  %912 = vmatpush3.msra.mxu1 %v583_v15 }
  0xf1   :  { %878 = vmatprep.subr.mxu0 %v483_v16  ;;  %913 = vmatprep.subr.mxu1 %v598_v17 }
  0xf2   :  { %879 = vmatpush3.msra.mxu0 %v467_v18  ;;  %914 = vmatpush3.msra.mxu1 %v582_v19 }
  0xf3   :  { %880 = vmatprep.subr.mxu0 %v482_v20  ;;  %915 = vmatprep.subr.mxu1 %v597_v21 }
  0xf4   :  { %881 = vmatpush3.msra.mxu0 %v466_v22  ;;  %916 = vmatpush3.msra.mxu1 %v581_v23 }
  0xf5   :  { %882 = vmatprep.subr.mxu0 %v481_v24  ;;  %917 = vmatprep.subr.mxu1 %v596_v25 }
  0xf6   :  { %883 = vmatpush3.msra.mxu0 %v465_v26  ;;  %918 = vmatpush3.msra.mxu1 %v580_v27 }
  0xf7   :  { %884 = vmatprep.subr.mxu0 %v480_v28  ;;  %919 = vmatprep.subr.mxu1 %v595_v29 }
  0xf8   :  { %885 = vmatpush3.msra.mxu0 %v464_v30  ;;  %920 = vmatpush3.msra.mxu1 %v579_v31 }
  0xf9   :  { %886 = vmatprep.subr.mxu0 %v479_v32  ;;  %921 = vmatprep.subr.mxu1 %v594_v33 }
  0xfa   :  { %887 = vmatpush3.msra.mxu0 %v463_v34  ;;  %922 = vmatpush3.msra.mxu1 %v578_v35 }
  0xfb   :  { %888 = vmatprep.subr.mxu0 %v478_v36  ;;  %923 = vmatprep.subr.mxu1 %v593_v37 }
  0xfc   :  { %889 = vmatpush3.msra.mxu0 %v462_v38  ;;  %924 = vmatpush3.msra.mxu1 %v577_v39 }
  0xfd   :  { %890 = vmatprep.subr.mxu0 %v477_v40  ;;  %925 = vmatprep.subr.mxu1 %v592_v43 }
  0xfe   :  { %891 = vmatpush3.msra.mxu0 %v461_v44  ;;  %926 = vmatpush3.msra.mxu1 %v576_v45 }
  0xff   :  { %561 = vmatmul.mubr.f32.vlgmr.msra.gmra.mxu0 %v1282_v41  ;;  %676 = vmatmul.mubr.f32.vlgmr.msra.gmra.mxu1 %v1284_v42  ;;  %v694_v41 = vld [vmem:[%s1549_s3 + $0x60] sm:$0xff]  ;;  %v693_v42 = vld [vmem:[%s1549_s3 + $0x58] sm:$0xff]  ;;  %s1011_s3 = smov [#allocation2]  }
 0x100   :  { %947 = vmatprep.subr.mxu0 %v1008_v5  ;;  %979 = vmatprep.mubr.msk.f32.mxu0 %vm1010_vm2, %v1008_v5  ;;  %s776_s21 = sshll.u32 %s1011_s3, 4  ;;  %s777_s21 = int_to_ptr.vmem [resolvable:$true] %s776_s21 }
 0x101   :  { %948 = vmatpush3.msra.mxu0 %v697_v46  ;;  %s986_s2 = scalar_lea.vmem %s777_s21, 32  ;;  %p991_p1 = scmp.lt.s32.totalorder %s777_s21, %s777_s21 }
 0x102   :  { %949 = vmatprep.subr.mxu0 %v1008_v5  ;;  %p987_p0 = scmp.ne.s32.totalorder %s777_s21, %s986_s2  ;;  %p992_p2 = scmp.lt.s32.totalorder %s986_s2, %s986_s2 }
 0x103   :  { %950 = vmatpush3.msra.mxu0 %v696_v47 }
 0x104   :  { %951 = vmatprep.subr.mxu0 %v1008_v5  ;;  %p993_p3 = por %p992_p2, %p991_p1 }
 0x105   :  { %952 = vmatpush3.msra.mxu0 %v695_v48 }
 0x106   :  { %953 = vmatprep.subr.mxu0 %v1008_v5  ;;  %p994_p4 = pnand %p993_p3, %p987_p0 }
 0x107   :  { %954 = vmatpush3.msra.mxu0 %v694_v41 }
 0x108   :  { %955 = vmatprep.subr.mxu0 %v1008_v5 }
 0x109   :  { %956 = vmatpush3.msra.mxu0 %v693_v42 }
 0x10a   :  { %957 = vmatprep.subr.mxu0 %v1008_v5 }
 0x10b   :  { %958 = vmatpush3.msra.mxu0 %v692_v49 }
 0x10c   :  { %959 = vmatprep.subr.mxu0 %v1008_v5 }
 0x10d   :  { %960 = vmatpush3.msra.mxu0 %v691_v50 }
 0x10e   :  { %961 = vmatprep.subr.mxu0 %v1008_v5 }
 0x10f   :  { %962 = vmatpush3.msra.mxu0 %v690_v51 }
 0x110   :  { %963 = vmatprep.subr.mxu0 %v1008_v5 }
 0x111   :  { %964 = vmatpush3.msra.mxu0 %v689_v52 }
 0x112   :  { %965 = vmatprep.subr.mxu0 %v1008_v5 }
 0x113   :  { %966 = vmatpush3.msra.mxu0 %v688_v53 }
 0x114   :  { %967 = vmatprep.subr.mxu0 %v1008_v5 }
 0x115   :  { %968 = vmatpush3.msra.mxu0 %v687_v54 }
 0x116   :  { %969 = vmatprep.subr.mxu0 %v1008_v5 }
 0x117   :  { %970 = vmatpush3.msra.mxu0 %v686_v55 }
 0x118   :  { %971 = vmatprep.subr.mxu0 %v1008_v5 }
 0x119   :  { %972 = vmatpush3.msra.mxu0 %v685_v56 }
 0x11a   :  { %973 = vmatprep.subr.mxu0 %v1008_v5 }
 0x11b   :  { %974 = vmatpush3.msra.mxu0 %v684_v57 }
 0x11c   :  { %975 = vmatprep.subr.mxu0 %v1008_v5 }
 0x11d   :  { %976 = vmatpush3.msra.mxu0 %v683_v58 }
 0x11e   :  { %977 = vmatprep.subr.mxu0 %v1008_v5 }
 0x11f   :  { %978 = vmatpush3.msra.mxu0 %v682_v59 }
 0x19e   :  { %v822_v60 = vpop.f32.mrf.mxu0  ;;  %v857_v61 = vpop.f32.mrf.mxu1 }
 0x1a0   :  { %v823_v62 = vpop.f32.mrf.mxu0  ;;  %v858_v63 = vpop.f32.mrf.mxu1 }
 0x1a1   :  { %v824_v0 = vadd.f32 %v823_v62, %v822_v60  ;;  %v859_v1 = vadd.f32 %v858_v63, %v857_v61 }
 0x1a3   :  { %v449_v7 = vadd.f32 %v859_v1, %v824_v0 }
 0x1bf   :  { %v892_v2 = vpop.f32.mrf.mxu0  ;;  %v927_v3 = vpop.f32.mrf.mxu1 }
 0x1c1   :  { %v893_v4 = vpop.f32.mrf.mxu0  ;;  %v928_v6 = vpop.f32.mrf.mxu1 }
 0x1c2   :  { %v894_v8 = vadd.f32 %v893_v4, %v892_v2  ;;  %v929_v10 = vadd.f32 %v928_v6, %v927_v3 }
 0x1c4   :  { %v566_v9 = vadd.f32 %v894_v8, %v449_v7 }
 0x1c6   :  { %v681_v11 = vadd.f32 %v929_v10, %v566_v9 }
 0x1c8   :  { %980 = vmatmul.mubr.f32.vlgmr.msra.gmra.mxu0 %v681_v11 }
 0x288   :  { %v764_v5 = vpop.f32.mrf.mxu0 }
 0x289   :  { %769 = vst.msk [vmem:[#allocation2] sm:$0x3] %vm768_vm3, %v764_v5 }
 0x28a   :  { %v981_v12 = vpop.f32.mrf.mxu0 }
 0x28b   :  { %997 = shalt.err (!%p994_p4)
}
 0x28c   :  { %779 = dma.vmem_to_hbm [thread:$0]  %s777_s21, 32, %s1550_s4, [#allocation3]  }
 0x28d   :  { %1006 = dma.done.wait [#allocation3], 32  }
 0x28e   :  { %1007 = vsyncadd [#allocation3], 4294967264 }
 0x28f   :  { %783 = vsyncpa [#allocation3], 1 }

// kernel: cloudnet_forward.3
= control target key start
LH: loop header
LB: loop body
LE: loop exit
PB: predicated region body
PF: predicated region fallthrough
CT: control target
= control target key end

     0   :  { %v234_v0 = vlaneseq  ;;  %vm40_vm0 = vcmask 1043456   ;;  %v3120_v2 = vmov 0.0   ;;  %vm36_vm1 = vcmask 31744   ;;  %s3124_s15 = smov 8   ;;  %s3125_s16 = smov 72   ;;  %s5324_s0 = inlined_call_operand.vmem [shape: f32[4,512], index: 0, kind: input, shape index: {}]   ;;  %s5325_s2 = inlined_call_operand.vmem [shape: f32[4,4], index: 2, kind: input, shape index: {}]   ;;  %s5326_s1 = inlined_call_operand.vmem [shape: s32[2,512], index: 1, kind: input, shape index: {}]   ;;  %s5327_s3 = inlined_call_operand.vmem [shape: f32[16,144], index: 3, kind: input, shape index: {}]   ;;  %s5328_s4 = inlined_call_operand.vmem [shape: f32[16,1], index: 4, kind: input, shape index: {}]   ;;  %s5329_s5 = inlined_call_operand.vmem [shape: f32[16,1], index: 5, kind: input, shape index: {}]   ;;  %s5330_s6 = inlined_call_operand.vmem [shape: f32[20,1], index: 6, kind: input, shape index: {}]   ;;  %s5331_s7 = inlined_call_operand.vmem [shape: f32[20,1], index: 7, kind: input, shape index: {}]   ;;  %s5332_s8 = inlined_call_operand.vmem [shape: f32[20,512], index: 8, kind: output, shape index: {}]  }
   0x1   :  { %v30_v1 = vld [vmem:[%s5324_s0] sm:$0xff]  ;;  %113 = vmatprep.mubr.f32.mxu0 %v3120_v2  ;;  %191 = vst [vmem:[#allocation2] sm:$0xff] %v3120_v2  ;;  %192 = vst [vmem:[#allocation2 + $0x8] sm:$0xff] %v3120_v2  ;;  %v31_v3 = vld [vmem:[%s5324_s0 + $0x8] sm:$0xff]  ;;  %184 = vmatprep.mubr.f32.mxu1 %v3120_v2  ;;  %s3121_s0 = smov 119   ;;  %s3126_s17 = smov 76  }
   0x2   :  { %193 = vst [vmem:[#allocation2 + $0x10] sm:$0xff] %v3120_v2  ;;  %v34_v4 = vcombine.high %v30_v1, %v30_v1  ;;  %v35_v5 = vcombine.high %v31_v3, %v31_v3  ;;  %v3219_v6 = vld [vmem:[%s5326_s1] ss:$2 sm:$0xf]  ;;  %v235_v9 = vshrl.u32 %v234_v0, 7  ;;  %s3127_s18 = smov 12  }
   0x3   :  { %v3224_v7 = vld [vmem:[%s5326_s1 + $0x1] ss:$2 sm:$0xf]  ;;  %vm228_vm2 = vcmp.ge.s32.totalorder %v3219_v6, 1  ;;  %vm1972_vm5 = vcmp.ge.s32.totalorder %v3219_v6, 8  ;;  %s3122_s1 = smov 120  }
   0x4   :  { %v29_v8 = vld [vmem:[%s5325_s2] sm:$0xf]  ;;  %vm229_vm3 = vcmp.ge.s32.totalorder %v3224_v7, 1  ;;  %3016 = vmatprep.subr.msk.mxu0 %vm40_vm0, %v34_v4  ;;  %3019 = vmatprep.subr.msk.mxu1 %vm40_vm0, %v35_v5  ;;  %v3024_v10 = vsel %vm228_vm2, 1.0, %v3120_v2  ;;  %vm1973_vm6 = vcmp.ge.s32.totalorder %v3224_v7, 8  ;;  %vm2079_vm7 = vcmp.lt.s32.totalorder %v3224_v7, 8 }
   0x5   :  { %vm230_vm4 = vmand %vm228_vm2, %vm229_vm3  ;;  %3017 = vmatpush1.msk.msra.mxu0 %vm40_vm0, %v30_v1  ;;  %3020 = vmatpush1.msk.msra.mxu1 %vm40_vm0, %v31_v3  ;;  %v3246_v12 = vsub.s32 0, %v235_v9  ;;  %v3248_v13 = vsub.s32 1, %v235_v9  ;;  %v3250_v14 = vsub.s32 2, %v235_v9  ;;  %v3258_v15 = vsub.s32 3, %v235_v9  ;;  %s3123_s2 = smov 16   ;;  %s3128_s19 = smov 68  }
   0x6   :  { %v3023_v11 = vsel %vm230_vm4, 1.0, %v3120_v2  ;;  %vm1974_vm8 = vmand %vm1972_vm5, %vm1973_vm6  ;;  %3018 = vmatmul.mubr.msk.f32.vlgmr.msra.gmra.mxu0 %vm36_vm1, %v29_v8  ;;  %3021 = vmatmul.mubr.msk.f32.vlgmr.msra.gmra.mxu1 %vm36_vm1, %v29_v8  ;;  %v3050_v17 = vsel %vm1973_vm6, 1.0, %v3120_v2  ;;  %v3048_v18 = vsel %vm1972_vm5, 1.0, %v3120_v2  ;;  %vm1534_vm10 = vcmp.lt.s32.totalorder %v3224_v7, 12  ;;  %s3129_s20 = smov 4   ;;  %s3130_s21 = smov 42  }
   0x7   :  { %v3047_v16 = vsel %vm1974_vm8, 1.0, %v3120_v2  ;;  %v237_v19 = vrot.slane %v3023_v11, %v3246_v12  ;;  %v241_v20 = vrot.slane %v3023_v11, %v3248_v13  ;;  %v245_v21 = vrot.slane %v3023_v11, %v3250_v14  ;;  %vm2080_vm9 = vmand %vm1972_vm5, %vm2079_vm7  ;;  %s3131_s22 = smov 38   ;;  %s3132_s23 = smov 40  }
   0x8   :  { %v305_v22 = vrot.slane %v3024_v10, %v3246_v12  ;;  %v249_v23 = vrot.slane %v3023_v11, %v3258_v15  ;;  %v309_v24 = vrot.slane %v3024_v10, %v3248_v13  ;;  %v313_v25 = vrot.slane %v3024_v10, %v3250_v14  ;;  %s3133_s24 = smov 10   ;;  %s3134_s25 = smov 106  }
   0x9   :  { %v317_v26 = vrot.slane %v3024_v10, %v3258_v15  ;;  %v250_v27 = vcombine.low %v237_v19, %v241_v20  ;;  %v1981_v28 = vrot.slane %v3047_v16, %v3246_v12  ;;  %v1985_v29 = vrot.slane %v3047_v16, %v3248_v13  ;;  %s3135_s26 = smov 6   ;;  %s3136_s27 = smov 102  }
   0xa   :  { %v1989_v30 = vrot.slane %v3047_v16, %v3250_v14  ;;  %v251_v31 = vcombine.low %v245_v21, %v249_v23  ;;  %v1993_v33 = vrot.slane %v3047_v16, %v3258_v15  ;;  %v3049_v35 = vsel %vm2080_vm9, 1.0, %v3120_v2  ;;  %s3137_s28 = smov 104   ;;  %s3138_s29 = smov 24  }
   0xb   :  { %v319_v32 = vcombine.low %v313_v25, %v317_v26  ;;  %252 = vrot.lane.b32.xlu1 %v250_v27, %s3121_s0  ;;  %v3285_v34 = vcombine.low %v1981_v28, %v1985_v29  ;;  %v2155_v36 = vrot.slane %v3050_v17, %v3246_v12  ;;  %v2159_v37 = vrot.slane %v3050_v17, %v3248_v13  ;;  %s3139_s30 = smov 25   ;;  %s3140_s9 = smov 9  }
   0xc   :  { %v318_v38 = vcombine.low %v305_v22, %v309_v24  ;;  %v3291_v39 = vcombine.low %v1989_v30, %v1993_v33  ;;  %v2087_v40 = vrot.slane %v3049_v35, %v3246_v12  ;;  %v2163_v41 = vrot.slane %v3050_v17, %v3250_v14  ;;  %s3141_s10 = smov 23   ;;  %s3142_s11 = smov 7  }
   0xd   :  { %322 = vrot.lane.b32.xlu0 %v319_v32, %s3122_s1  ;;  %v2167_v42 = vrot.slane %v3050_v17, %v3258_v15  ;;  %v3296_v43 = vcombine.low %v2155_v36, %v2159_v37  ;;  %v2095_v44 = vrot.slane %v3049_v35, %v3250_v14  ;;  %v2099_v45 = vrot.slane %v3049_v35, %v3258_v15  ;;  %s3143_s12 = smov 121   ;;  %s3144_s13 = smov 52  }
   0xe   :  { %v2091_v46 = vrot.slane %v3049_v35, %v3248_v13  ;;  %v2019_v47 = vrot.slane %v3048_v18, %v3246_v12  ;;  %v2023_v48 = vrot.slane %v3048_v18, %v3248_v13  ;;  %v2027_v49 = vrot.slane %v3048_v18, %v3250_v14  ;;  %s3145_s14 = smov 56  }
   0xf   :  { %254 = vrot.lane.b32.xlu1 %v251_v31, %s3121_s0  ;;  %v3305_v50 = vcombine.low %v2163_v41, %v2167_v42  ;;  %v2101_v51 = vcombine.low %v2095_v44, %v2099_v45  ;;  %v2031_v52 = vrot.slane %v3048_v18, %v3258_v15  ;;  %vm1771_vm11 = vcmp.lt.s32.totalorder %v3219_v6, 12 }
  0x10   :  { %vm1906_vm12 = vmand %vm1771_vm11, %vm1534_vm10  ;;  %v3045_v53 = vsel %vm1771_vm11, 1.0, %v3120_v2  ;;  %vm1395_vm13 = vcmp.ge.s32.totalorder %v3224_v7, 4  ;;  %v2100_v58 = vcombine.low %v2087_v40, %v2091_v46  ;;  %v2032_v59 = vcombine.low %v2019_v47, %v2023_v48 }
  0x11   :  { %2104 = vrot.lane.b32.xlu0 %v2101_v51, %s3123_s2  ;;  %v2033_v54 = vcombine.low %v2027_v49, %v2031_v52  ;;  %v3046_v55 = vsel %vm1906_vm12, 1.0, %v3120_v2  ;;  %v1845_v56 = vrot.slane %v3045_v53, %v3246_v12  ;;  %v1849_v57 = vrot.slane %v3045_v53, %v3248_v13  ;;  %vm1772_vm14 = vmand %vm1771_vm11, %vm1395_vm13 }
  0x12   :  { %v1913_v60 = vrot.slane %v3046_v55, %v3246_v12  ;;  %v3044_v61 = vsel %vm1772_vm14, 1.0, %v3120_v2  ;;  %v3043_v62 = vsel %vm1534_vm10, 1.0, %v3120_v2  ;;  %v1917_v63 = vrot.slane %v3046_v55, %v3248_v13 }
  0x13   :  { %320 = vrot.lane.b32.xlu1 %v318_v38, %s3122_s1  ;;  %v1858_v0 = vcombine.low %v1845_v56, %v1849_v57  ;;  %v1853_v1 = vrot.slane %v3045_v53, %v3250_v14  ;;  %v1857_v3 = vrot.slane %v3045_v53, %v3258_v15  ;;  %v1921_v4 = vrot.slane %v3046_v55, %v3250_v14 }
  0x14   :  { %v1925_v5 = vrot.slane %v3046_v55, %v3258_v15  ;;  %v1779_v8 = vrot.slane %v3044_v61, %v3246_v12  ;;  %v1783_v9 = vrot.slane %v3044_v61, %v3248_v13  ;;  %v1708_v10 = vrot.slane %v3043_v62, %v3246_v12 }
  0x15   :  { %2036 = vrot.lane.b32.xlu0 %v2033_v54, %s3124_s15  ;;  %v1712_v11 = vrot.slane %v3043_v62, %v3248_v13  ;;  %v1716_v16 = vrot.slane %v3043_v62, %v3250_v14  ;;  %v1720_v17 = vrot.slane %v3043_v62, %v3258_v15  ;;  %v1787_v18 = vrot.slane %v3044_v61, %v3250_v14 }
  0x16   :  { %v1791_v19 = vrot.slane %v3044_v61, %v3258_v15  ;;  %v3042_v20 = vsel %vm1395_vm13, 1.0, %v3120_v2  ;;  %vm1394_vm15 = vcmp.ge.s32.totalorder %v3219_v6, 4  ;;  %v1926_v21 = vcombine.low %v1913_v60, %v1917_v63 }
  0x17   :  { %2102 = vrot.lane.b32.xlu1 %v2100_v58, %s3123_s2  ;;  %v1610_v22 = vrot.slane %v3042_v20, %v3246_v12  ;;  %v1614_v23 = vrot.slane %v3042_v20, %v3248_v13  ;;  %vm1535_vm4 = vmand %vm1394_vm15, %vm1534_vm10  ;;  %v1859_v24 = vcombine.low %v1853_v1, %v1857_v3  ;;  %v1927_v25 = vcombine.low %v1921_v4, %v1925_v5 }
  0x18   :  { %v3041_v26 = vsel %vm1535_vm4, 1.0, %v3120_v2  ;;  %v3040_v27 = vsel %vm1394_vm15, 1.0, %v3120_v2  ;;  %vm1396_vm5 = vmand %vm1394_vm15, %vm1395_vm13  ;;  %v1792_v28 = vcombine.low %v1779_v8, %v1783_v9  ;;  %v1721_v29 = vcombine.low %v1708_v10, %v1712_v11 }
  0x19   :  { %1860 = vrot.lane.b32.xlu0 %v1858_v0, %s3125_s16  ;;  %v3353_v30 = vcombine.low %v1716_v16, %v1720_v17  ;;  %vm947_vm8 = vcmp.lt.s32.totalorder %v3224_v7, 14  ;;  %v1793_v31 = vcombine.low %v1787_v18, %v1791_v19  ;;  %v3357_v32 = vcombine.low %v1610_v22, %v1614_v23 }
  0x1a   :  { %v1618_v33 = vrot.slane %v3042_v20, %v3250_v14  ;;  %v1622_v35 = vrot.slane %v3042_v20, %v3258_v15  ;;  %v1542_v36 = vrot.slane %v3041_v26, %v3246_v12  ;;  %v1546_v37 = vrot.slane %v3041_v26, %v3248_v13 }
  0x1b   :  { %2034 = vrot.lane.b32.xlu1 %v2032_v59, %s3124_s15  ;;  %v1471_v38 = vrot.slane %v3040_v27, %v3246_v12  ;;  %v3039_v40 = vsel %vm1396_vm5, 1.0, %v3120_v2  ;;  %v1475_v41 = vrot.slane %v3040_v27, %v3248_v13  ;;  %v1479_v42 = vrot.slane %v3040_v27, %v3250_v14 }
  0x1c   :  { %v1483_v44 = vrot.slane %v3040_v27, %v3258_v15  ;;  %v1550_v45 = vrot.slane %v3041_v26, %v3250_v14  ;;  %v1554_v46 = vrot.slane %v3041_v26, %v3258_v15  ;;  %v1403_v47 = vrot.slane %v3039_v40, %v3246_v12 }
  0x1d   :  { %1930 = vrot.lane.b32.xlu0 %v1927_v25, %s3126_s17  ;;  %v1407_v48 = vrot.slane %v3039_v40, %v3248_v13  ;;  %vm1185_vm9 = vcmp.lt.s32.totalorder %v3219_v6, 14  ;;  %v1411_v49 = vrot.slane %v3039_v40, %v3250_v14  ;;  %v1415_v51 = vrot.slane %v3039_v40, %v3258_v15 }
  0x1e   :  { %vm1324_vm10 = vmand %vm1185_vm9, %vm947_vm8  ;;  %v3037_v52 = vsel %vm1185_vm9, 1.0, %v3120_v2  ;;  %vm810_vm11 = vcmp.ge.s32.totalorder %v3224_v7, 2  ;;  %v3389_v56 = vsel %vm947_vm8, 1.0, %v3120_v2  ;;  %v1624_v61 = vcombine.low %v1618_v33, %v1622_v35 }
  0x1f   :  { %1928 = vrot.lane.b32.xlu1 %v1926_v21, %s3126_s17  ;;  %v3038_v53 = vsel %vm1324_vm10, 1.0, %v3120_v2  ;;  %v1262_v54 = vrot.slane %v3037_v52, %v3246_v12  ;;  %v1266_v55 = vrot.slane %v3037_v52, %v3248_v13  ;;  %vm1186_vm12 = vmand %vm1185_vm9, %vm810_vm11  ;;  %v3396_v62 = vcombine.low %v1542_v36, %v1546_v37 }
  0x20   :  { %v1331_v57 = vrot.slane %v3038_v53, %v3246_v12  ;;  %v1335_v58 = vrot.slane %v3038_v53, %v3248_v13  ;;  %v1339_v59 = vrot.slane %v3038_v53, %v3250_v14  ;;  %v1343_v60 = vrot.slane %v3038_v53, %v3258_v15 }
  0x21   :  { %1723 = vrot.lane.b32.xlu0 %v1721_v29, %s3127_s18  ;;  %v1484_v63 = vcombine.low %v1471_v38, %v1475_v41  ;;  %v3399_v0 = vsel %vm1186_vm12, 1.0, %v3120_v2  ;;  %v3402_v1 = vcombine.low %v1479_v42, %v1483_v44  ;;  %v3404_v3 = vcombine.low %v1550_v45, %v1554_v46 }
  0x22   :  { %v3406_v4 = vcombine.low %v1403_v47, %v1407_v48  ;;  %v3408_v5 = vcombine.low %v1411_v49, %v1415_v51  ;;  %v3410_v8 = vcombine.low %v1262_v54, %v1266_v55  ;;  %v1270_v9 = vrot.slane %v3037_v52, %v3250_v14 }
  0x23   :  { %1862 = vrot.lane.b32.xlu1 %v1859_v24, %s3125_s16  ;;  %v1274_v10 = vrot.slane %v3037_v52, %v3258_v15  ;;  %v1123_v11 = vrot.slane %v3389_v56, %v3246_v12  ;;  %v3417_v16 = vcombine.low %v1331_v57, %v1335_v58  ;;  %v3419_v17 = vcombine.low %v1339_v59, %v1343_v60 }
  0x24   :  { %v1193_v18 = vrot.slane %v3399_v0, %v3246_v12  ;;  %v1127_v19 = vrot.slane %v3389_v56, %v3248_v13  ;;  %v1197_v20 = vrot.slane %v3399_v0, %v3248_v13  ;;  %v1201_v21 = vrot.slane %v3399_v0, %v3250_v14 }
  0x25   :  { %1796 = vrot.lane.b32.xlu0 %v1793_v31, %s3128_s19  ;;  %v3034_v22 = vsel %vm810_vm11, 1.0, %v3120_v2  ;;  %vm809_vm13 = vcmp.ge.s32.totalorder %v3219_v6, 2  ;;  %vm367_vm15 = vcmp.lt.s32.totalorder %v3224_v7, 15  ;;  %v1205_v31 = vrot.slane %v3399_v0, %v3258_v15 }
  0x26   :  { %v3434_v23 = vcombine.low %v1123_v11, %v1127_v19  ;;  %v1024_v24 = vrot.slane %v3034_v22, %v3246_v12  ;;  %v1028_v25 = vrot.slane %v3034_v22, %v3248_v13  ;;  %vm948_vm14 = vmand %vm809_vm13, %vm947_vm8  ;;  %v1032_v27 = vrot.slane %v3034_v22, %v3250_v14 }
  0x27   :  { %1794 = vrot.lane.b32.xlu1 %v1792_v28, %s3128_s19  ;;  %v3442_v26 = vsel %vm948_vm14, 1.0, %v3120_v2  ;;  %v1036_v29 = vrot.slane %v3034_v22, %v3258_v15  ;;  %v3032_v28 = vsel %vm809_vm13, 1.0, %v3120_v2  ;;  %vm811_vm4 = vmand %vm809_vm13, %vm810_vm11  ;;  %v3451_v33 = vcombine.low %v1270_v9, %v1274_v10 }
  0x28   :  { %v3453_v35 = vcombine.low %v1024_v24, %v1028_v25  ;;  %v963_v36 = vrot.slane %v3442_v26, %v3250_v14  ;;  %vm3461_vm5 = vmand %vm228_vm2, %vm367_vm15  ;;  %v967_v38 = vrot.slane %v3442_v26, %v3258_v15  ;;  %v887_v41 = vrot.slane %v3032_v28, %v3246_v12 }
  0x29   :  { %1627 = vrot.lane.b32.xlu0 %v1624_v61, %s3129_s20  ;;  %v3467_v40 = vcombine.low %v1032_v27, %v1036_v29  ;;  %v891_v42 = vrot.slane %v3032_v28, %v3248_v13  ;;  %v3473_v44 = vcombine.low %v1193_v18, %v1197_v20  ;;  %v3031_v45 = vsel %vm811_vm4, 1.0, %v3120_v2 }
  0x2a   :  { %v895_v46 = vrot.slane %v3032_v28, %v3250_v14  ;;  %v899_v47 = vrot.slane %v3032_v28, %v3258_v15  ;;  %v3478_v48 = vcombine.low %v963_v36, %v967_v38  ;;  %v818_v51 = vrot.slane %v3031_v45, %v3246_v12 }
  0x2b   :  { %1725 = vrot.lane.b32.xlu1 %v3353_v30, %s3127_s18  ;;  %v3480_v49 = vcombine.low %v887_v41, %v891_v42  ;;  %v822_v52 = vrot.slane %v3031_v45, %v3248_v13  ;;  %v826_v30 = vrot.slane %v3031_v45, %v3250_v14  ;;  %v830_v53 = vrot.slane %v3031_v45, %v3258_v15  ;;  %s3149_s18 = smov 116  }
  0x2c   :  { %v3487_v54 = vcombine.low %v895_v46, %v899_v47  ;;  %vm601_vm2 = vcmp.lt.s32.totalorder %v3219_v6, 15  ;;  %v3027_v58 = vsel %vm367_vm15, 1.0, %v3120_v2  ;;  %v3026_v59 = vsel %vm229_vm3, 1.0, %v3120_v2 }
  0x2d   :  { %1486 = vrot.lane.b32.xlu0 %v1484_v63, %s3125_s16  ;;  %v3490_v55 = vcombine.low %v818_v51, %v822_v52  ;;  %vm740_vm8 = vmand %vm601_vm2, %vm367_vm15  ;;  %v3029_v57 = vsel %vm601_vm2, 1.0, %v3120_v2  ;;  %v3502_v60 = vcombine.low %v826_v30, %v830_v53  ;;  %v540_v36 = vrot.slane %v3027_v58, %v3246_v12 }
  0x2e   :  { %v3030_v61 = vsel %vm740_vm8, 1.0, %v3120_v2  ;;  %v677_v63 = vrot.slane %v3029_v57, %v3246_v12  ;;  %v681_v9 = vrot.slane %v3029_v57, %v3248_v13  ;;  %vm602_vm9 = vmand %vm601_vm2, %vm229_vm3  ;;  %v685_v18 = vrot.slane %v3029_v57, %v3250_v14 }
  0x2f   :  { %1625 = vrot.lane.b32.xlu1 %v3357_v32, %s3129_s20  ;;  %v747_v10 = vrot.slane %v3030_v61, %v3246_v12  ;;  %v751_v11 = vrot.slane %v3030_v61, %v3248_v13  ;;  %v689_v19 = vrot.slane %v3029_v57, %v3258_v15  ;;  %v755_v20 = vrot.slane %v3030_v61, %v3250_v14  ;;  %s3151_s20 = smov 124  }
  0x30   :  { %v3515_v32 = vcombine.low %v677_v63, %v681_v9  ;;  %v759_v22 = vrot.slane %v3030_v61, %v3258_v15  ;;  %v3028_v24 = vsel %vm602_vm9, 1.0, %v3120_v2  ;;  %v544_v38 = vrot.slane %v3027_v58, %v3248_v13 }
  0x31   :  { %1559 = vrot.lane.b32.xlu0 %v3404_v3, %s3126_s17  ;;  %v3520_v25 = vcombine.low %v747_v10, %v751_v11  ;;  %v3522_v27 = vcombine.low %v685_v18, %v689_v19  ;;  %v609_v29 = vrot.slane %v3028_v24, %v3246_v12  ;;  %v613_v28 = vrot.slane %v3028_v24, %v3248_v13 }
  0x32   :  { %v3528_v3 = vcombine.low %v755_v20, %v759_v22  ;;  %v548_v41 = vrot.slane %v3027_v58, %v3250_v14  ;;  %v552_v45 = vrot.slane %v3027_v58, %v3258_v15  ;;  %v617_v46 = vrot.slane %v3028_v24, %v3250_v14 }
  0x33   :  { %1557 = vrot.lane.b32.xlu1 %v3396_v62, %s3126_s17  ;;  %v3533_v42 = vcombine.low %v609_v29, %v613_v28  ;;  %v621_v47 = vrot.slane %v3028_v24, %v3258_v15  ;;  %v3540_v62 = vcombine.low %v540_v36, %v544_v38  ;;  %v451_v51 = vrot.slane %v3026_v59, %v3250_v14  ;;  %s3148_s17 = smov 118  }
  0x34   :  { %v455_v52 = vrot.slane %v3026_v59, %v3258_v15  ;;  %v443_v30 = vrot.slane %v3026_v59, %v3246_v12  ;;  %v3545_v53 = vcombine.low %v548_v41, %v552_v45  ;;  %v447_v58 = vrot.slane %v3026_v59, %v3248_v13 }
  0x35   :  { %1346 = vrot.lane.b32.xlu0 %v3417_v16, %s3130_s21  ;;  %v3547_v57 = vcombine.low %v617_v46, %v621_v47  ;;  %v3025_v61 = vsel %vm3461_vm5, 1.0, %v3120_v2  ;;  %v1131_v11 = vrot.slane %v3389_v56, %v3250_v14  ;;  %vm2283_vm3 = vcmp.lt.s32.totalorder %v3219_v6, 8 }
  0x36   :  { %v3555_v16 = vcombine.low %v451_v51, %v455_v52  ;;  %v383_v63 = vrot.slane %v3025_v61, %v3250_v14  ;;  %v387_v9 = vrot.slane %v3025_v61, %v3258_v15  ;;  %v375_v10 = vrot.slane %v3025_v61, %v3246_v12  ;;  %vm2284_vm10 = vmand %vm2283_vm3, %vm1973_vm6 }
  0x37   :  { %1488 = vrot.lane.b32.xlu1 %v3402_v1, %s3125_s16  ;;  %v3562_v18 = vcombine.low %v443_v30, %v447_v58  ;;  %v379_v59 = vrot.slane %v3025_v61, %v3248_v13  ;;  %v1135_v1 = vrot.slane %v3389_v56, %v3258_v15  ;;  %v3053_v19 = vsel %vm2283_vm3, 1.0, %v3120_v2  ;;  %vm2389_vm11 = vmand %vm2283_vm3, %vm2079_vm7  ;;  %s3147_s16 = smov 88  }
  0x38   :  { %v3570_v37 = vcombine.low %v383_v63, %v387_v9  ;;  %v3051_v20 = vsel %vm2079_vm7, 1.0, %v3120_v2  ;;  %v3052_v6 = vsel %vm2284_vm10, 1.0, %v3120_v2  ;;  %v2337_v56 = vrot.slane %v3053_v19, %v3250_v14 }
  0x39   :  { %1420 = vrot.lane.b32.xlu0 %v3408_v5, %s3128_s19  ;;  %v3578_v22 = vcombine.low %v375_v10, %v379_v59  ;;  %v2341_v5 = vrot.slane %v3053_v19, %v3258_v15  ;;  %v2291_v24 = vrot.slane %v3052_v6, %v3246_v12  ;;  %v2295_v29 = vrot.slane %v3052_v6, %v3248_v13 }
  0x3a   :  { %v2299_v28 = vrot.slane %v3052_v6, %v3250_v14  ;;  %v2303_v36 = vrot.slane %v3052_v6, %v3258_v15  ;;  %v3054_v38 = vsel %vm2389_vm11, 1.0, %v3120_v2  ;;  %v2329_v7 = vrot.slane %v3053_v19, %v3246_v12 }
  0x3b   :  { %1418 = vrot.lane.b32.xlu1 %v3406_v4, %s3128_s19  ;;  %v3592_v41 = vcombine.low %v2337_v56, %v2341_v5  ;;  %v2333_v45 = vrot.slane %v3053_v19, %v3248_v13  ;;  %v3597_v4 = vcombine.low %v2291_v24, %v2295_v29  ;;  %v2404_v47 = vrot.slane %v3054_v38, %v3250_v14  ;;  %s3150_s19 = smov 122  }
  0x3c   :  { %v3599_v46 = vcombine.low %v2299_v28, %v2303_v36  ;;  %v2408_v51 = vrot.slane %v3054_v38, %v3258_v15  ;;  %v2396_v52 = vrot.slane %v3054_v38, %v3246_v12  ;;  %v2400_v30 = vrot.slane %v3054_v38, %v3248_v13 }
  0x3d   :  { %1208 = vrot.lane.b32.xlu0 %v3473_v44, %s3131_s22  ;;  %v2342_v58 = vcombine.low %v2329_v7, %v2333_v45  ;;  %v2232_v61 = vrot.slane %v3051_v20, %v3250_v14  ;;  %v2236_v44 = vrot.slane %v3051_v20, %v3258_v15  ;;  %v2224_v9 = vrot.slane %v3051_v20, %v3246_v12 }
  0x3e   :  { %v2410_v63 = vcombine.low %v2404_v47, %v2408_v51  ;;  %v2228_v10 = vrot.slane %v3051_v20, %v3248_v13  ;;  %v1137_v59 = vcombine.low %v1131_v11, %v1135_v1  ;;  %v2409_v19 = vcombine.low %v2396_v52, %v2400_v30 }
  0x3f   :  { %1348 = vrot.lane.b32.xlu1 %v3419_v17, %s3130_s21  ;;  %v955_v6 = vrot.slane %v3442_v26, %v3246_v12  ;;  %v959_v56 = vrot.slane %v3442_v26, %v3248_v13  ;;  %v2238_v5 = vcombine.low %v2232_v61, %v2236_v44  ;;  %v1207_v11 = vcombine.low %v1201_v21, %v1205_v31  ;;  %s3152_s21 = smov 112  }
  0x40   :  { %v2237_v17 = vcombine.low %v2224_v9, %v2228_v10  ;;  %vm194_vm6 = vcmask 125952   ;;  %vm1492_vm7 = vcmask 588800   ;;  %vm1729_vm12 = vcmask 97280  }
  0x41   :  { %1279 = vrot.lane.b32.xlu0 %v3451_v33, %s3132_s23  ;;  %v968_v33 = vcombine.low %v955_v6, %v959_v56  ;;  %195 = vst.msk [vmem:[#allocation2 + $0x18] sm:$0xf] %vm194_vm6, %v3120_v2  ;;  %vm1352_vm13 = vcmask 343040   ;;  %vm1214_vm14 = vcmask 310272   ;;  %vm976_vm15 = vcmask 867328  }
  0x42   :  { %vm839_vm4 = vcmask 834560   ;;  %vm215_vm5 = vcmask 1043520   ;;  %vm216_vm2 = vcmask 1047556   ;;  %vm208_vm9 = vcmask 64512  }
  0x43   :  { %1277 = vrot.lane.b32.xlu1 %v3410_v8, %s3132_s23  ;;  %vm217_vm8 = vmor %vm216_vm2, %vm215_vm5  ;;  %vm220_vm3 = vcmask 60416   ;;  %vm1424_vm10 = vcmask 556032   ;;  %vm1563_vm11 = vcmask 621568   ;;  %vm5404_vm6 = vcmask 973824   ;;  %s3154_s23 = smov 90  }
  0x44   :  { %vm5409_vm5 = vcmask 850944   ;;  %vm5415_vm2 = vcmask 195584  }
  0x45   :  { %1140 = vrot.lane.b32.xlu0 %v1137_v59, %s3133_s24 }
  0x47   :  { %1210 = vrot.lane.b32.xlu1 %v1207_v11, %s3131_s22  ;;  %s3153_s22 = smov 86  }
  0x49   :  { %970 = vrot.lane.b32.xlu0 %v968_v33, %s3134_s25 }
  0x4b   :  { %1138 = vrot.lane.b32.xlu1 %v3434_v23, %s3133_s24  ;;  %s3155_s24 = smov 22  }
  0x4d   :  { %1041 = vrot.lane.b32.xlu0 %v3467_v40, %s3135_s26 }
  0x4f   :  { %1039 = vrot.lane.b32.xlu1 %v3453_v35, %s3135_s26  ;;  %s3157_s26 = smov 103  }
  0x51   :  { %833 = vrot.lane.b32.xlu0 %v3490_v55, %s3136_s27 }
  0x53   :  { %972 = vrot.lane.b32.xlu1 %v3478_v48, %s3134_s25  ;;  %s3156_s25 = smov 26  }
  0x55   :  { %904 = vrot.lane.b32.xlu0 %v3487_v54, %s3137_s28 }
  0x57   :  { %902 = vrot.lane.b32.xlu1 %v3480_v49, %s3137_s28 }
  0x59   :  { %692 = vrot.lane.b32.xlu0 %v3515_v32, %s3138_s29 }
  0x5b   :  { %835 = vrot.lane.b32.xlu1 %v3502_v60, %s3136_s27  ;;  %s3158_s27 = smov 105  }
  0x5d   :  { %764 = vrot.lane.b32.xlu0 %v3528_v3, %s3139_s30 }
  0x5f   :  { %762 = vrot.lane.b32.xlu1 %v3520_v25, %s3139_s30 }
  0x61   :  { %555 = vrot.lane.b32.xlu0 %v3540_v62, %s3140_s9 }
  0x63   :  { %694 = vrot.lane.b32.xlu1 %v3522_v27, %s3138_s29 }
  0x65   :  { %626 = vrot.lane.b32.xlu0 %v3547_v57, %s3141_s10 }
  0x67   :  { %624 = vrot.lane.b32.xlu1 %v3533_v42, %s3141_s10 }
  0x69   :  { %460 = vrot.lane.b32.xlu0 %v3555_v16, %s3142_s11 }
  0x6b   :  { %557 = vrot.lane.b32.xlu1 %v3545_v53, %s3140_s9 }
  0x6d   :  { %392 = vrot.lane.b32.xlu0 %v3570_v37, %s3143_s12 }
  0x6f   :  { %458 = vrot.lane.b32.xlu1 %v3562_v18, %s3142_s11 }
  0x71   :  { %2413 = vrot.lane.b32.xlu0 %v2410_v63, %s3123_s2 }
  0x73   :  { %390 = vrot.lane.b32.xlu1 %v3578_v22, %s3143_s12 }
  0x75   :  { %2346 = vrot.lane.b32.xlu0 %v3592_v41, %s3124_s15 }
  0x77   :  { %2411 = vrot.lane.b32.xlu1 %v2409_v19, %s3123_s2 }
  0x79   :  { %2241 = vrot.lane.b32.xlu0 %v2238_v5, %s3123_s2 }
  0x7b   :  { %2344 = vrot.lane.b32.xlu1 %v2342_v58, %s3124_s15 }
  0x7d   :  { %v3660_v2 = vpop.permute.xlu1 %252 }
  0x7f   :  { %v3662_v12 = vpop.permute.xlu0 %322  ;;  %2239 = vrot.lane.b32.xlu1 %v2237_v17, %s3123_s2  ;;  %s3146_s2 = smov 60  }
  0x80   :  { %5419 = vst [vmem:[#allocation4_spill] sm:$0xff] %v3662_v12 }
  0x81   :  { %v3665_v13 = vpop.permute.xlu1 %254 }
  0x83   :  { %v3667_v14 = vpop.permute.xlu0 %2104 }
  0x85   :  { %v3669_v15 = vpop.permute.xlu1 %320 }
  0x86   :  { %5420 = vst [vmem:[#allocation5_spill] sm:$0xff] %v3669_v15 }
  0x87   :  { %v3671_v0 = vpop.permute.xlu0 %2036 }
  0x89   :  { %v3673_v8 = vpop.permute.xlu1 %2102 }
  0x8b   :  { %v3675_v21 = vpop.permute.xlu0 %1860 }
  0x8c   :  { %v5344_v48 = vrot.slane %v3675_v21, 4 }
  0x8d   :  { %v3677_v23 = vpop.permute.xlu1 %2034 }
  0x8f   :  { %v3679_v26 = vpop.permute.xlu0 %1930 }
  0x91   :  { %v3681_v31 = vpop.permute.xlu1 %1928 }
  0x93   :  { %v3683_v35 = vpop.permute.xlu0 %1723 }
  0x94   :  { %v5343_v3 = vrot.slane %v3683_v35, 4 }
  0x95   :  { %v3685_v40 = vpop.permute.xlu1 %1862 }
  0x96   :  { %v5337_v49 = vrot.slane %v3685_v40, 4 }
  0x97   :  { %v3689_v54 = vpop.permute.xlu0 %1796 }
  0x98   :  { %v1867_v55 = vsel %vm40_vm0, %v5344_v48, %v5337_v49 }
  0x99   :  { %v3698_v60 = vsel %vm1492_vm7, %v1867_v55, %v3685_v40  ;;  %v3700_v32 = vpop.permute.xlu1 %1794 }
  0x9b   :  { %v3702_v25 = vpop.permute.xlu0 %1627 }
  0x9d   :  { %v3704_v27 = vpop.permute.xlu1 %1725 }
  0x9e   :  { %v5336_v42 = vrot.slane %v3704_v27, 4 }
  0x9f   :  { %v3708_v62 = vpop.permute.xlu0 %1486 }
  0xa0   :  { %v1731_v53 = vsel %vm40_vm0, %v5343_v3, %v5336_v42  ;;  %v5342_v22 = vrot.slane %v3708_v62, 4 }
  0xa1   :  { %v3717_v57 = vsel %vm1729_vm12, %v1731_v53, %v3704_v27  ;;  %v3719_v16 = vpop.permute.xlu1 %1625 }
  0xa3   :  { %v3721_v18 = vpop.permute.xlu0 %1559 }
  0xa5   :  { %v3723_v1 = vpop.permute.xlu1 %1557 }
  0xa7   :  { %v3725_v37 = vpop.permute.xlu0 %1346 }
  0xa8   :  { %v5341_v45 = vrot.slane %v3725_v37, 4 }
  0xa9   :  { %v3727_v20 = vpop.permute.xlu1 %1488 }
  0xaa   :  { %5421 = vst [vmem:[#allocation6_spill] sm:$0xff] %v3727_v20  ;;  %v5333_v24 = vrot.slane %v3727_v20, 4 }
  0xab   :  { %v3731_v29 = vpop.permute.xlu0 %1420 }
  0xac   :  { %v1494_v28 = vsel %vm40_vm0, %v5342_v22, %v5333_v24 }
  0xad   :  { %v3740_v36 = vsel %vm1492_vm7, %v1494_v28, %v3727_v20  ;;  %v3742_v38 = vpop.permute.xlu1 %1418 }
  0xaf   :  { %v3744_v41 = vpop.permute.xlu0 %1208 }
  0xb0   :  { %v5340_v44 = vrot.slane %v3744_v41, 4 }
  0xb1   :  { %v3746_v7 = vpop.permute.xlu1 %1348 }
  0xb2   :  { %v5335_v47 = vrot.slane %v3746_v7, 4 }
  0xb3   :  { %v3750_v51 = vpop.permute.xlu0 %1279 }
  0xb4   :  { %v1354_v52 = vsel %vm40_vm0, %v5341_v45, %v5335_v47 }
  0xb5   :  { %v3759_v30 = vsel %vm1352_vm13, %v1354_v52, %v3746_v7  ;;  %v3761_v58 = vpop.permute.xlu1 %1277 }
  0xb7   :  { %v3765_v63 = vpop.permute.xlu0 %1140 }
  0xb9   :  { %v3763_v61 = vpop.permute.xlu1 %1210 }
  0xba   :  { %v5334_v9 = vrot.slane %v3763_v61, 4 }
  0xbb   :  { %v3780_v6 = vpop.permute.xlu0 %970 }
  0xbc   :  { %v1216_v10 = vsel %vm40_vm0, %v5340_v44, %v5334_v9  ;;  %v5339_v33 = vrot.slane %v3780_v6, 4 }
  0xbd   :  { %v3776_v59 = vsel %vm1214_vm14, %v1216_v10, %v3763_v61  ;;  %v3778_v19 = vpop.permute.xlu1 %1138 }
  0xbf   :  { %v3786_v17 = vpop.permute.xlu0 %1041 }
  0xc1   :  { %v3782_v56 = vpop.permute.xlu1 %1039 }
  0xc3   :  { %v3809_v42 = vpop.permute.xlu0 %833 }
  0xc5   :  { %v3784_v5 = vpop.permute.xlu1 %972 }
  0xc6   :  { %5422 = vst [vmem:[#allocation7_spill] sm:$0xff] %v3784_v5  ;;  %v3788_v11 = vpop.f32.mrf.mxu0  ;;  %v5338_v55 = vrot.slane %v3784_v5, 4  ;;  %v3792_v53 = vpop.f32.mrf.mxu1 }
  0xc7   :  { %5423 = vst [vmem:[#allocation8_spill] sm:$0xff] %v3788_v11  ;;  %5424 = vst [vmem:[#allocation9_spill] sm:$0xff] %v3792_v53  ;;  %v3826_v45 = vpop.permute.xlu0 %904 }
  0xc8   :  { %v3794_v28 = vpop.f32.mrf.mxu0  ;;  %v978_v52 = vsel %vm40_vm0, %v5339_v33, %v5338_v55  ;;  %v3807_v47 = vpop.f32.mrf.mxu1  ;;  %v5352_v33 = vrot.slane %v3809_v42, 4 }
  0xc9   :  { %5425 = vst [vmem:[#allocation10_spill] sm:$0xff] %v3794_v28  ;;  %v3801_v10 = vpop.permute.xlu1 %902  ;;  %v200_v24 = vcombine.low %v3788_v11, %v3794_v28  ;;  %v979_v9 = vsel %vm976_vm15, %v978_v52, %v3784_v5  ;;  %5426 = vst [vmem:[#allocation11_spill] sm:$0xff] %v3807_v47  ;;  %v201_v55 = vcombine.low %v3792_v53, %v3807_v47 }
  0xcb   :  { %202 = vrot.lane.b32.xlu0 %v200_v24, %s3124_s15  ;;  %v3828_v22 = vpop.permute.xlu0 %692 }
  0xcc   :  { %5428 = vst [vmem:[#allocation13_spill] sm:$0xff] %v3828_v22 }
  0xcd   :  { %v3812_v49 = vpop.permute.xlu1 %835 }
  0xce   :  { %5427 = vst [vmem:[#allocation12_spill] sm:$0xff] %v3812_v49  ;;  %v5351_v44 = vrot.slane %v3812_v49, 4 }
  0xcf   :  { %204 = vrot.lane.b32.xlu0 %v201_v55, %s3124_s15  ;;  %v3830_v3 = vpop.permute.xlu0 %764 }
  0xd0   :  { %v841_v52 = vsel %vm40_vm0, %v5352_v33, %v5351_v44 }
  0xd1   :  { %v842_v24 = vsel %vm839_vm4, %v841_v52, %v3812_v49  ;;  %v5364_v49 = vrot.slane %v3742_v38, 4 }
  0xd3   :  { %v3832_v48 = vpop.permute.xlu0 %555 }
  0xd4   :  { %5429 = vst [vmem:[#allocation14_spill] sm:$0xff] %v3832_v48 }
  0xd7   :  { %v3834_v47 = vpop.permute.xlu0 %626 }
  0xd8   :  { %5430 = vst [vmem:[#allocation15_spill] sm:$0xff] %v3834_v47  ;;  %v5384_v47 = vrot.slane %v3778_v19, 4 }
  0xdb   :  { %v3836_v55 = vpop.permute.xlu0 %460 }
  0xdc   :  { %5431 = vst [vmem:[#allocation16_spill] sm:$0xff] %v3836_v55 }
  0xdf   :  { %v3838_v53 = vpop.permute.xlu0 %392 }
  0xe0   :  { %5432 = vst [vmem:[#allocation17_spill] sm:$0xff] %v3838_v53 }
  0xe3   :  { %v3840_v11 = vpop.permute.xlu0 %2413 }
  0xe4   :  { %5433 = vst [vmem:[#allocation18_spill] sm:$0xff] %v3840_v11 }
  0xe7   :  { %v3842_v44 = vpop.permute.xlu0 %2346 }
  0xe8   :  { %5434 = vst [vmem:[#allocation19_spill] sm:$0xff] %v3842_v44 }
  0xeb   :  { %v3844_v33 = vpop.permute.xlu0 %2241 }
  0xec   :  { %5435 = vst [vmem:[#allocation20_spill] sm:$0xff] %v3844_v33 }
 0x13d   :  { %v203_v52 = vpop.permute.xlu0 %202 }
 0x13e   :  { %v206_v28 = vrot.slane %v203_v52, 4 }
 0x140   :  { %v209_v12 = vsel %vm208_vm9, %v206_v28, %v203_v52  ;;  %v5363_v52 = vrot.slane %v3731_v29, 4 }
 0x141   :  { %218 = vst.msk [vmem:[#allocation2 + $0x4] sm:$0xff] %vm217_vm8, %v209_v12  ;;  %v205_v15 = vpop.permute.xlu0 %204  ;;  %vm1518_vm8 = vcmask 457728  }
 0x142   :  { %v207_v55 = vrot.slane %v205_v15, 4 }
 0x144   :  { %v210_v53 = vsel %vm40_vm0, %v206_v28, %v207_v55  ;;  %221 = vst.msk [vmem:[#allocation2 + $0x14] sm:$0xf] %vm220_vm3, %v207_v55  ;;  %v1426_v28 = vsel %vm40_vm0, %v5364_v49, %v5363_v52  ;;  %vm1755_vm3 = vcmask 949248  }
 0x145   :  { %v3849_v11 = vsel %vm208_vm9, %v210_v53, %v205_v15 }
 0x146   :  { %219 = vst [vmem:[#allocation2 + $0xc] sm:$0xff] %v3849_v11 }
 0x148   :  { %v3852_v33 = vld [vmem:[#allocation2] sm:$0xff] }
 0x149   :  { %v3854_v44 = vld [vmem:[#allocation2 + $0x4] sm:$0xff]  ;;  %v1998_v12 = vmul.f32 %v3285_v34, %v3852_v33 }
 0x14a   :  { %2195 = vrot.lane.b32.xlu1 %v3854_v44, %s3122_s1  ;;  %v2172_v15 = vmul.f32 %v3296_v43, %v3854_v44  ;;  %v1427_v43 = vsel %vm1424_vm10, %v1426_v28, %v3731_v29 }
 0x14b   :  { %v1671_v53 = vld [vmem:[#allocation2 + $0x14] sm:$0xf]  ;;  %2007 = vst [vmem:[#allocation3 + $0x228] sm:$0xf0] %v1998_v12  ;;  %v2002_v28 = vcombine.low %v1998_v12, %v1998_v12  ;;  %v5369_v12 = vrot.slane %v3679_v26, 4 }
 0x14c   :  { %1685 = vrot.lane.b32.xlu0 %v1671_v53, %s3122_s1  ;;  %2180 = vst [vmem:[#allocation3 + $0x210] sm:$0xf] %v2172_v15  ;;  %v3103_v5 = vld [vmem:[#allocation2 + $0x14] ss:$0 sps:$4 sm:$0xff]   ;;  %v2176_v48 = vcombine.high %v2172_v15, %v2172_v15 }
 0x14d   :  { %v3870_v55 = vld [vmem:[#allocation2 + $0x8] sm:$0xff]  ;;  %2006 = vst [vmem:[#allocation3 + $0x1d8] sm:$0xf0] %v2002_v28  ;;  %v5370_v28 = vrot.slane %v3700_v32, 4 }
 0x14e   :  { %1677 = vrot.lane.b32.xlu1 %v3854_v44, %s3122_s1  ;;  %v3875_v34 = vmul.f32 %v842_v24, %v3870_v55  ;;  %v3880_v53 = vmul.f32 %v979_v9, %v3870_v55  ;;  %v3885_v52 = vmul.f32 %v1427_v43, %v3870_v55  ;;  %v3889_v49 = vmul.f32 %v3740_v36, %v3870_v55  ;;  %v1905_v36 = vld [vmem:[#allocation2 + $0x14] sm:$0xf] }
 0x14f   :  { %v1999_v24 = vmul.f32 %v3291_v39, %v3870_v55  ;;  %v2173_v9 = vmul.f32 %v3305_v50, %v3849_v11  ;;  %v2308_v43 = vmul.f32 %v3597_v4, %v3870_v55  ;;  %2181 = vst [vmem:[#allocation3 + $0x1d0] sm:$0xf] %v2176_v48  ;;  %v3906_v39 = vcombine.low %v3854_v44, %v3854_v44 }
 0x150   :  { %5436 = vst [vmem:[#allocation21_spill] sm:$0xff] %v3875_v34  ;;  %5437 = vst [vmem:[#allocation22_spill] sm:$0xff] %v3880_v53  ;;  %2199 = vrot.lane.b32.xlu0 %v3849_v11, %s3122_s1  ;;  %v5438_v48 = vrot.slane %v3675_v21, 4  ;;  %v1770_v34 = vld [vmem:[#allocation2 + $0x14] sm:$0xf]  ;;  %v257_v53 = vrot.slane %v3665_v13, 4 }
 0x151   :  { %2009 = vst [vmem:[#allocation3 + $0x200] sm:$0xf0] %v1999_v24  ;;  %2182 = vst [vmem:[#allocation3 + $0x168] sm:$0xf] %v2173_v9  ;;  %v2003_v50 = vcombine.low %v1999_v24, %v1999_v24  ;;  %v2177_v15 = vcombine.high %v2173_v9, %v2173_v9  ;;  %v2312_v4 = vcombine.low %v2308_v43, %v2308_v43 }
 0x152   :  { %1094 = vrot.lane.b32.xlu1 %v3854_v44, %s3122_s1  ;;  %2317 = vst [vmem:[#allocation3 + $0x58] sm:$0xf0] %v2308_v43  ;;  %v1942_v24 = vmul.f32 %v5369_v12, %v1905_v36  ;;  %v1800_v43 = vsel %vm1424_vm10, %v5370_v28, %v3700_v32  ;;  %v1255_v36 = vld [vmem:[#allocation2 + $0x14] sm:$0xf] }
 0x153   :  { %2008 = vst [vmem:[#allocation3 + $0x218] sm:$0xf0] %v2003_v50  ;;  %2183 = vst [vmem:[#allocation3 + $0xc0] sm:$0xf] %v2177_v15  ;;  %v5371_v50 = vrot.slane %v3689_v54, 4  ;;  %v3932_v15 = vmul.f32 %v1800_v43, %v3854_v44  ;;  %v5440_v43 = vrot.slane %v3683_v35, 4 }
 0x154   :  { %1681 = vrot.lane.b32.xlu0 %v3849_v11, %s3122_s1  ;;  %2316 = vst [vmem:[#allocation3 + $0x1a0] sm:$0xf0] %v2312_v4  ;;  %v5368_v4 = vrot.slane %v3750_v51, 4  ;;  %v1017_v12 = vld [vmem:[#allocation2 + $0x14] sm:$0xf] }
 0x156   :  { %2201 = vrot.lane.b32.xlu1 %v3103_v5, %s3122_s1  ;;  %v1866_v5 = vsel %vm1492_vm7, %v5438_v48, %v3675_v21  ;;  %v1808_v21 = vmul.f32 %v5371_v50, %v1770_v34  ;;  %v1292_v48 = vmul.f32 %v5368_v4, %v1255_v36  ;;  %v1116_v34 = vld [vmem:[#allocation2 + $0x14] sm:$0xf]  ;;  %v5372_v36 = vrot.slane %v3719_v16, 4 }
 0x157   :  { %v3919_v9 = vmul.f32 %v1866_v5, %v3854_v44  ;;  %v3942_v5 = vcombine.high %v3854_v44, %v3854_v44  ;;  %v5374_v50 = vrot.slane %v3786_v17, 4 }
 0x158   :  { %1956 = vrot.lane.b32.xlu0 %v1942_v24, %s3144_s13  ;;  %v5373_v24 = vrot.slane %v3765_v63, 4 }
 0x159   :  { %5439 = vst [vmem:[#allocation23_spill] sm:$0xff] %v3942_v5 }
 0x15a   :  { %1098 = vrot.lane.b32.xlu1 %v3849_v11, %s3122_s1  ;;  %v1153_v4 = vmul.f32 %v5373_v24, %v1116_v34  ;;  %v5375_v34 = vrot.slane %v3723_v1, 4 }
 0x15c   :  { %1822 = vrot.lane.b32.xlu0 %v1808_v21, %s3146_s2  ;;  %v1730_v21 = vsel %vm1729_vm12, %v5440_v43, %v3683_v35  ;;  %v2321_v35 = vld [vmem:[#allocation2 + $0x10] sm:$0xff]  ;;  %v1054_v43 = vmul.f32 %v5374_v50, %v1017_v12  ;;  %vm2108_vm12 = vcmask 130048  }
 0x15d   :  { %v3956_v28 = vmul.f32 %v1730_v21, %v3854_v44  ;;  %v256_v21 = vrot.slane %v3660_v2, 4  ;;  %v2309_v24 = vmul.f32 %v2321_v35, %v3599_v46  ;;  %v3104_v50 = vld [vmem:[#allocation2 + $0x14] ss:$0 sps:$4 sm:$0xff]   ;;  %v5376_v35 = vrot.slane %v3673_v8, 4 }
 0x15e   :  { %2193 = vrot.lane.b32.xlu1 %v3906_v39, %s3122_s1 }
 0x15f   :  { %2319 = vst [vmem:[#allocation3 + $0x20] sm:$0xf0] %v2309_v24  ;;  %v2313_v12 = vcombine.low %v2309_v24, %v2309_v24 }
 0x160   :  { %1306 = vrot.lane.b32.xlu0 %v1292_v48, %s3147_s16  ;;  %v1631_v48 = vsel %vm36_vm1, %v5372_v36, %v3719_v16 }
 0x161   :  { %v3971_v36 = vmul.f32 %v1631_v48, %v3854_v44  ;;  %v259_v48 = vsel %vm5404_vm6, %v256_v21, %v3660_v2  ;;  %2318 = vst [vmem:[#allocation3 + $0x118] sm:$0xf0] %v2313_v12  ;;  %v2109_v2 = vsel %vm2108_vm12, %v5376_v35, %v3673_v8  ;;  %v5380_v35 = vrot.slane %v3761_v58, 4 }
 0x162   :  { %1883 = vrot.lane.b32.xlu1 %v3919_v9, %s3145_s14 }
 0x164   :  { %1167 = vrot.lane.b32.xlu0 %v1153_v4, %s3148_s17  ;;  %v1564_v4 = vsel %vm1563_vm11, %v5375_v34, %v3723_v1  ;;  %v3995_v34 = vmul.f32 %v3852_v33, %v259_v48  ;;  %v4014_v48 = vmul.f32 %v2109_v2, %v3852_v33  ;;  %v5443_v2 = vrot.slane %v3725_v37, 4 }
 0x165   :  { %v3984_v46 = vmul.f32 %v1564_v4, %v3852_v33  ;;  %v5442_v4 = vrot.slane %v3742_v38, 4 }
 0x166   :  { %1814 = vrot.lane.b32.xlu1 %v3932_v15, %s3146_s2 }
 0x167   :  { %v1425_v12 = vsel %vm1424_vm10, %v5442_v4, %v3742_v38  ;;  %v5381_v38 = vrot.slane %v3681_v31, 4  ;;  %v1353_v4 = vsel %vm1352_vm13, %v5443_v2, %v3725_v37  ;;  %vm1144_vm13 = vcmask 80896  }
 0x168   :  { %1068 = vrot.lane.b32.xlu0 %v1054_v43, %s3150_s19  ;;  %v5441_v43 = vrot.slane %v3708_v62, 4  ;;  %v1145_v22 = vsel %vm1144_vm13, %v5384_v47, %v3778_v19 }
 0x16a   :  { %1679 = vrot.lane.b32.xlu1 %v3942_v5, %s3122_s1  ;;  %v1493_v24 = vsel %vm1492_vm7, %v5441_v43, %v3708_v62  ;;  %v5377_v62 = vrot.slane %v3677_v23, 4  ;;  %vm1283_vm7 = vcmask 326656   ;;  %v4041_v5 = vmul.f32 %v1353_v4, %v3854_v44 }
 0x16b   :  { %v1284_v37 = vsel %vm1283_vm7, %v5380_v35, %v3761_v58  ;;  %v260_v4 = vsel %vm40_vm0, %v256_v21, %v257_v53  ;;  %v5445_v35 = vrot.slane %v3744_v41, 4 }
 0x16c   :  { %1100 = vrot.lane.b32.xlu0 %v3104_v50, %s3122_s1  ;;  %v4002_v50 = vmul.f32 %v1493_v24, %v3852_v33  ;;  %v2040_v43 = vsel %vm208_vm9, %v5377_v62, %v3677_v23  ;;  %v4021_v24 = vmul.f32 %v1425_v12, %v3852_v33  ;;  %v1934_v12 = vsel %vm1563_vm11, %v5381_v38, %v3681_v31 }
 0x16d   :  { %v4034_v62 = vmul.f32 %v2040_v43, %v3852_v33  ;;  %5444 = vst [vmem:[#allocation24_spill] sm:$0xff] %v4041_v5  ;;  %v4053_v43 = vmul.f32 %v1934_v12, %v3854_v44  ;;  %v4056_v2 = vmul.f32 %v1284_v37, %v3854_v44  ;;  %v1215_v38 = vsel %vm1214_vm14, %v5445_v35, %v3744_v41  ;;  %v4070_v37 = vpop.permute.xlu1 %762  ;;  %v227_v35 = vld [vmem:[#allocation2 + $0x10] sm:$0xf] }
 0x16e   :  { %1747 = vrot.lane.b32.xlu1 %v3956_v28, %s3149_s18  ;;  %v261_v12 = vsel %vm5404_vm6, %v260_v4, %v3665_v13  ;;  %v4073_v21 = vmul.f32 %v1215_v38, %v3854_v44  ;;  %v5385_v13 = vrot.slane %v3782_v56, 4  ;;  %vm1045_vm14 = vcmask 48128  }
 0x16f   :  { %v4085_v41 = vmul.f32 %v3870_v55, %v261_v12  ;;  %v4088_v38 = vmul.f32 %v1145_v22, %v3854_v44  ;;  %v267_v12 = vmul.f32 %v257_v53, %v227_v35  ;;  %v5449_v22 = vrot.slane %v3689_v54, 4 }
 0x170   :  { %273 = vrot.lane.b32.xlu0 %v3995_v34, %s3140_s9  ;;  %5446 = vst [vmem:[#allocation25_spill] sm:$0xff] %v4073_v21  ;;  %v1046_v4 = vsel %vm1045_vm14, %v5385_v13, %v3782_v56  ;;  %v5450_v13 = vrot.slane %v3700_v32, 4  ;;  %v5389_v53 = vrot.slane %v3801_v10, 4  ;;  %v4118_v35 = vcombine.low %v3849_v11, %v3849_v11 }
 0x171   :  { %5447 = vst [vmem:[#allocation26_spill] sm:$0xff] %v4085_v41  ;;  %v4101_v47 = vmul.f32 %v1046_v4, %v3854_v44  ;;  %vm1449_vm6 = vcmask 490496  }
 0x172   :  { %1648 = vrot.lane.b32.xlu1 %v3971_v36, %s3151_s20  ;;  %v1801_v20 = vsel %vm40_vm0, %v5450_v13, %v5449_v22  ;;  %v908_v32 = vsel %vm5409_vm5, %v5389_v53, %v3801_v10  ;;  %v1562_v13 = vrot.slane %v3721_v18, 4  ;;  %v2012_v22 = vld [vmem:[#allocation2 + $0x10] sm:$0xf]  ;;  %v2039_v53 = vrot.slane %v3671_v0, 4 }
 0x174   :  { %2126 = vrot.lane.b32.xlu0 %v4014_v48, %s3152_s21 }
 0x176   :  { %1578 = vrot.lane.b32.xlu1 %v3984_v46, %s3144_s13 }
 0x178   :  { %2054 = vrot.lane.b32.xlu0 %v4034_v62, %s3122_s1 }
 0x17a   :  { %1510 = vrot.lane.b32.xlu1 %v4002_v50, %s3145_s14 }
 0x17c   :  { %1948 = vrot.lane.b32.xlu0 %v4053_v43, %s3144_s13 }
 0x17e   :  { %1439 = vrot.lane.b32.xlu1 %v4021_v24, %s3146_s2 }
 0x180   :  { %1092 = vrot.lane.b32.xlu0 %v3906_v39, %s3122_s1  ;;  %v4096_v39 = vpop.permute.xlu1 %694 }
 0x181   :  { %5448 = vst [vmem:[#allocation27_spill] sm:$0xff] %v4096_v39  ;;  %v5451_v39 = vrot.slane %v3780_v6, 4 }
 0x182   :  { %1370 = vrot.lane.b32.xlu1 %v4041_v5, %s3153_s22  ;;  %v2048_v5 = vmul.f32 %v2039_v53, %v2012_v22 }
 0x184   :  { %277 = vrot.lane.b32.xlu0 %v4085_v41, %s3140_s9  ;;  %v977_v41 = vsel %vm976_vm15, %v5451_v39, %v3780_v6  ;;  %v4120_v4 = vpop.permute.xlu1 %624  ;;  %v1802_v6 = vsel %vm1424_vm10, %v1801_v20, %v3689_v54  ;;  %v4140_v39 = vmul.f32 %v908_v32, %v3852_v33  ;;  %v5455_v54 = vrot.slane %v3723_v1, 4 }
 0x185   :  { %vm768_vm15 = vcmask 203776   ;;  %vm1656_vm10 = vcmask 1014784  }
 0x186   :  { %1298 = vrot.lane.b32.xlu1 %v4056_v2, %s3147_s16  ;;  %v1565_v20 = vsel %vm40_vm0, %v5455_v54, %v1562_v13 }
 0x187   :  { %v1566_v54 = vsel %vm1563_vm11, %v1565_v20, %v3721_v18 }
 0x188   :  { %281 = vrot.lane.b32.xlu0 %v267_v12, %s3140_s9  ;;  %v4123_v12 = vmul.f32 %v977_v41, %v3852_v33  ;;  %v4137_v41 = vmul.f32 %v1802_v6, %v3849_v11  ;;  %v5456_v6 = vrot.slane %v3809_v42, 4 }
 0x18a   :  { %1232 = vrot.lane.b32.xlu1 %v4073_v21, %s3154_s23  ;;  %5452 = vst [vmem:[#allocation28_spill] sm:$0xff] %v4123_v12  ;;  %5453 = vst [vmem:[#allocation29_spill] sm:$0xff] %v4137_v41  ;;  %v4145_v21 = vpop.permute.xlu1 %557  ;;  %v840_v32 = vsel %vm839_vm4, %v5456_v6, %v3809_v42  ;;  %v4170_v42 = vmul.f32 %v1566_v54, %v3870_v55  ;;  %v5458_v6 = vrot.slane %v3677_v23, 4  ;;  %v2107_v23 = vrot.slane %v3667_v14, 4  ;;  %v1701_v54 = vld [vmem:[#allocation2 + $0x14] sm:$0xf] }
 0x18b   :  { %5454 = vst [vmem:[#allocation30_spill] sm:$0xff] %v4145_v21  ;;  %v1838_v21 = vld [vmem:[#allocation2 + $0x14] sm:$0xf]  ;;  %vm630_vm4 = vcmask 187392  }
 0x18c   :  { %2197 = vrot.lane.b32.xlu0 %v4118_v35, %s3122_s1 }
 0x18e   :  { %1159 = vrot.lane.b32.xlu1 %v4088_v38, %s3148_s17 }
 0x190   :  { %1818 = vrot.lane.b32.xlu0 %v4137_v41, %s3146_s2  ;;  %v4158_v41 = vmul.f32 %v840_v32, %v3852_v33  ;;  %v5457_v33 = vrot.slane %v3685_v40, 4  ;;  %v2041_v32 = vsel %vm40_vm0, %v5458_v6, %v2039_v53  ;;  %v5460_v53 = vrot.slane %v3681_v31, 4 }
 0x191   :  { %v2042_v40 = vsel %vm208_vm9, %v2041_v32, %v3671_v0  ;;  %v5462_v31 = vrot.slane %v3673_v8, 4 }
 0x192   :  { %1060 = vrot.lane.b32.xlu1 %v4101_v47, %s3150_s19  ;;  %v1874_v22 = vmul.f32 %v5457_v33, %v1838_v21  ;;  %v5459_v21 = vrot.slane %v3679_v26, 4 }
 0x193   :  { %v2110_v32 = vsel %vm40_vm0, %v5462_v31, %v2107_v23  ;;  %v1630_v31 = vrot.slane %v3702_v25, 4 }
 0x194   :  { %2062 = vrot.lane.b32.xlu0 %v2048_v5, %s3122_s1  ;;  %v1880_v18 = vcombine.low %v1874_v22, %v1874_v22  ;;  %v1935_v20 = vsel %vm40_vm0, %v5460_v53, %v5459_v21  ;;  %v5461_v22 = vrot.slane %v3704_v27, 4  ;;  %v5463_v27 = vrot.slane %v3750_v51, 4 }
 0x195   :  { %v1936_v0 = vsel %vm1563_vm11, %v1935_v20, %v3679_v26  ;;  %v2111_v26 = vsel %vm2108_vm12, %v2110_v32, %v3667_v14  ;;  %vm283_vm11 = vcmask 72704  }
 0x196   :  { %994 = vrot.lane.b32.xlu1 %v4123_v12, %s3155_s24  ;;  %v5395_v12 = vrot.slane %v4070_v37, 4  ;;  %v1738_v6 = vmul.f32 %v5461_v22, %v1701_v54  ;;  %v4228_v20 = vmul.f32 %v2111_v26, %v3870_v55  ;;  %v4240_v22 = vmul.f32 %v3698_v60, %v3849_v11 }
 0x197   :  { %v5465_v60 = vrot.slane %v3765_v63, 4 }
 0x198   :  { %v769_v1 = vsel %vm768_vm15, %v5395_v12, %v4070_v37  ;;  %v4177_v12 = vpop.permute.xlu1 %458  ;;  %1582 = vrot.lane.b32.xlu0 %v4170_v42, %s3144_s13  ;;  %v1744_v21 = vcombine.low %v1738_v6, %v1738_v6  ;;  %v1603_v6 = vld [vmem:[#allocation2 + $0x14] sm:$0xf] }
 0x199   :  { %v4180_v5 = vmul.f32 %v769_v1, %v3854_v44  ;;  %v4195_v1 = vmul.f32 %v2042_v40, %v3870_v55  ;;  %v4212_v40 = vmul.f32 %v1936_v0, %v3849_v11  ;;  %v1639_v26 = vmul.f32 %v1630_v31, %v1603_v6 }
 0x19a   :  { %922 = vrot.lane.b32.xlu1 %v4140_v39, %s3138_s29  ;;  %v4268_v6 = vmul.f32 %v3717_v57, %v3849_v11 }
 0x19c   :  { %1889 = vrot.lane.b32.xlu0 %v1880_v18, %s3145_s14  ;;  %v4198_v33 = vpop.permute.xlu1 %390  ;;  %v5464_v18 = vrot.slane %v3761_v58, 4  ;;  %v1533_v58 = vld [vmem:[#allocation2 + $0x10] sm:$0xf] }
 0x19e   :  { %857 = vrot.lane.b32.xlu1 %v4158_v41, %s3156_s25  ;;  %v1285_v8 = vsel %vm40_vm0, %v5464_v18, %v5463_v27  ;;  %v4251_v27 = vcombine.high %v3849_v11, %v3849_v11  ;;  %v5466_v18 = vrot.slane %v3778_v19, 4 }
 0x19f   :  { %v1286_v54 = vsel %vm1283_vm7, %v1285_v8, %v3750_v51  ;;  %v1572_v51 = vmul.f32 %v1562_v13, %v1533_v58  ;;  %vm5411_vm7 = vcmask 990208  }
 0x1a0   :  { %1443 = vrot.lane.b32.xlu0 %v3885_v52, %s3146_s2  ;;  %v4225_v53 = vpop.permute.xlu1 %2411  ;;  %v4236_v0 = vmul.f32 %v1286_v54, %v3849_v11  ;;  %v1146_v8 = vsel %vm40_vm0, %v5466_v18, %v5465_v60  ;;  %v5467_v54 = vrot.slane %v3719_v16, 4  ;;  %v5470_v60 = vrot.slane %v3782_v56, 4 }
 0x1a1   :  { %v5471_v18 = vrot.slane %v3731_v29, 4  ;;  %v4308_v56 = vmul.f32 %v3759_v30, %v3849_v11  ;;  %v4323_v30 = vmul.f32 %v3776_v59, %v3849_v11  ;;  %v271_v59 = vcombine.high %v3995_v34, %v3995_v34 }
 0x1a2   :  { %783 = vrot.lane.b32.xlu1 %v4180_v5, %s3157_s26  ;;  %v1632_v13 = vsel %vm40_vm0, %v5467_v54, %v1630_v31  ;;  %v1393_v31 = vld [vmem:[#allocation2 + $0x10] sm:$0xf] }
 0x1a3   :  { %v1633_v19 = vsel %vm36_vm1, %v1632_v13, %v3702_v25  ;;  %vm326_vm1 = vcmask 982016  }
 0x1a4   :  { %1753 = vrot.lane.b32.xlu0 %v1744_v21, %s3149_s18  ;;  %v4245_v32 = vpop.permute.xlu1 %2344  ;;  %v1645_v21 = vcombine.low %v1639_v26, %v1639_v26  ;;  %v4281_v26 = vmul.f32 %v1633_v19, %v3849_v11  ;;  %v1323_v19 = vld [vmem:[#allocation2 + $0x14] sm:$0xf] }
 0x1a6   :  { %2058 = vrot.lane.b32.xlu1 %v4195_v1, %s3122_s1 }
 0x1a8   :  { %1302 = vrot.lane.b32.xlu0 %v4236_v0, %s3147_s16  ;;  %v4264_v58 = vpop.permute.xlu1 %2239 }
 0x1a9   :  { %5468 = vst [vmem:[#allocation31_spill] sm:$0xff] %v4264_v58  ;;  %v5495_v58 = vld [vmem:[#allocation21_spill] sm:$0xff] }
 0x1aa   :  { %1952 = vrot.lane.b32.xlu1 %v4212_v40, %s3144_s13 }
 0x1ac   :  { %1586 = vrot.lane.b32.xlu0 %v1572_v51, %s3144_s13  ;;  %v1147_v51 = vsel %vm1144_vm13, %v1146_v8, %v3765_v63  ;;  %v5469_v63 = vrot.slane %v3786_v17, 4  ;;  %v1433_v8 = vmul.f32 %v5471_v18, %v1393_v31  ;;  %vm1378_vm13 = vcmask 703488  }
 0x1ad   :  { %v4278_v16 = vmul.f32 %v1147_v51, %v3849_v11 }
 0x1ae   :  { %2130 = vrot.lane.b32.xlu1 %v4228_v20, %s3152_s21  ;;  %v1047_v25 = vsel %vm40_vm0, %v5470_v60, %v5469_v63  ;;  %v5472_v63 = vrot.slane %v3746_v7, 4  ;;  %v5473_v7 = vrot.slane %v3801_v10, 4  ;;  %v5397_v10 = vrot.slane %v3830_v3, 4 }
 0x1af   :  { %v1048_v13 = vsel %vm1045_vm14, %v1047_v25, %v3786_v17  ;;  %v5396_v17 = vrot.slane %v3826_v45, 4  ;;  %vm5410_vm14 = vcmask 916480  }
 0x1b0   :  { %1654 = vrot.lane.b32.xlu0 %v1645_v21, %s3151_s20  ;;  %v4304_v51 = vmul.f32 %v1048_v13, %v3849_v11  ;;  %v1361_v60 = vmul.f32 %v5472_v63, %v1323_v19 }
 0x1b2   :  { %1887 = vrot.lane.b32.xlu1 %v4240_v22, %s3145_s14  ;;  %v1367_v13 = vcombine.low %v1361_v60, %v1361_v60  ;;  %v5474_v60 = vrot.slane %v3763_v61, 4  ;;  %v5475_v61 = vrot.slane %v4070_v37, 4 }
 0x1b4   :  { %1163 = vrot.lane.b32.xlu0 %v4278_v16, %s3148_s17 }
 0x1b6   :  { %1683 = vrot.lane.b32.xlu1 %v4251_v27, %s3122_s1 }
 0x1b8   :  { %1447 = vrot.lane.b32.xlu0 %v1433_v8, %s3146_s2  ;;  %v909_v8 = vsel %vm40_vm0, %v5473_v7, %v5396_v17  ;;  %v2121_v7 = vcombine.low %v4014_v48, %v4014_v48 }
 0x1ba   :  { %1751 = vrot.lane.b32.xlu1 %v4268_v6, %s3149_s18 }
 0x1bc   :  { %v4283_v57 = vpop.permute.xlu1 %2195  ;;  %1064 = vrot.lane.b32.xlu0 %v4304_v51, %s3150_s19 }
 0x1be   :  { %1652 = vrot.lane.b32.xlu1 %v4281_v26, %s3151_s20  ;;  %v4297_v54 = vpop.permute.xlu0 %1685 }
 0x1c0   :  { %v1678_v21 = vpop.permute.xlu1 %1677  ;;  %1096 = vrot.lane.b32.xlu0 %v4118_v35, %s3122_s1  ;;  %v1184_v35 = vld [vmem:[#allocation2 + $0x14] sm:$0xf] }
 0x1c1   :  { %v1223_v34 = vmul.f32 %v5474_v60, %v1184_v35  ;;  %v1812_v35 = vcombine.high %v3932_v15, %v3932_v15  ;;  %v2052_v15 = vcombine.high %v4034_v62, %v4034_v62  ;;  %v1946_v62 = vcombine.high %v4053_v43, %v4053_v43 }
 0x1c2   :  { %1514 = vrot.lane.b32.xlu1 %v3889_v49, %s3145_s14  ;;  %v4317_v31 = vpop.permute.xlu0 %2199 }
 0x1c3   :  { %v1229_v48 = vcombine.low %v1223_v34, %v1223_v34  ;;  %v1576_v34 = vcombine.high %v3984_v46, %v3984_v46 }
 0x1c4   :  { %v4310_v29 = vpop.permute.xlu1 %1094  ;;  %1376 = vrot.lane.b32.xlu0 %v1367_v13, %s3153_s22 }
 0x1c6   :  { %1374 = vrot.lane.b32.xlu1 %v4308_v56, %s3153_s22  ;;  %v4341_v63 = vpop.permute.xlu0 %1681 }
 0x1c8   :  { %v2202_v25 = vpop.permute.xlu1 %2201 }
 0x1c9   :  { %v2206_v18 = vsel %vm326_vm1, %v4317_v31, %v2202_v25  ;;  %v910_v25 = vsel %vm5409_vm5, %v909_v8, %v3826_v45  ;;  %vm1588_vm5 = vcmask 424960  }
 0x1ca   :  { %2214 = vst [vmem:[#allocation3 + $0xc0] sm:$0xf0] %v2206_v18  ;;  %1236 = vrot.lane.b32.xlu1 %v4323_v30, %s3154_s23  ;;  %v4348_v18 = vmul.f32 %v910_v25, %v3870_v55  ;;  %v770_v55 = vsel %vm40_vm0, %v5475_v61, %v5397_v10 }
 0x1cc   :  { %v4338_v19 = vpop.permute.xlu1 %1098  ;;  %926 = vrot.lane.b32.xlu0 %v4348_v18, %s3138_s29 }
 0x1ce   :  { %275 = vrot.lane.b32.xlu1 %v271_v59, %s3140_s9  ;;  %v4364_v59 = vpop.permute.xlu0 %1956 }
 0x1cf   :  { %5476 = vst [vmem:[#allocation32_spill] sm:$0xff] %v4364_v59 }
 0x1d0   :  { %v2194_v17 = vpop.permute.xlu1 %2193  ;;  %1238 = vrot.lane.b32.xlu0 %v1229_v48, %s3154_s23 }
 0x1d1   :  { %v2203_v8 = vsel %vm326_vm1, %v2194_v17, %v4283_v57  ;;  %v2521_v13 = vld [vmem:[#allocation3 + $0xc0] sm:$0xff]  ;;  %v771_v17 = vsel %vm768_vm15, %v770_v55, %v3830_v3  ;;  %vm5412_vm15 = vcmask 56320  }
 0x1d2   :  { %2211 = vst [vmem:[#allocation3 + $0x210] sm:$0xf0] %v2203_v8  ;;  %2613 = vmatprep.subr.mxu1 %v2521_v13  ;;  %2124 = vrot.lane.b32.xlu1 %v2121_v7, %s3152_s21  ;;  %v4375_v60 = vmul.f32 %v771_v17, %v3849_v11  ;;  %v4377_v37 = vpop.permute.xlu0 %1822  ;;  %v1437_v13 = vcombine.high %v4021_v24, %v4021_v24 }
 0x1d3   :  { %5477 = vst [vmem:[#allocation33_spill] sm:$0xff] %v4377_v37  ;;  %v1296_v24 = vcombine.high %v4056_v2, %v4056_v2  ;;  %v1742_v2 = vcombine.low %v3956_v28, %v3956_v28  ;;  %v5494_v37 = vrot.slane %v4120_v4, 4 }
 0x1d4   :  { %v4368_v25 = vpop.permute.xlu1 %1883  ;;  %787 = vrot.lane.b32.xlu0 %v4375_v60, %s3157_s26 }
 0x1d6   :  { %1816 = vrot.lane.b32.xlu1 %v1812_v35, %s3146_s2  ;;  %v4388_v8 = vpop.permute.xlu0 %1306 }
 0x1d7   :  { %5478 = vst [vmem:[#allocation34_spill] sm:$0xff] %v4388_v8 }
 0x1d8   :  { %v4381_v7 = vpop.permute.xlu1 %1814  ;;  %2056 = vrot.lane.b32.xlu0 %v2052_v15, %s3122_s1 }
 0x1da   :  { %1580 = vrot.lane.b32.xlu1 %v1576_v34, %s3144_s13  ;;  %v4399_v48 = vpop.permute.xlu0 %1167  ;;  %v1157_v34 = vcombine.high %v4088_v38, %v4088_v38  ;;  %v5398_v38 = vrot.slane %v4120_v4, 4 }
 0x1db   :  { %5479 = vst [vmem:[#allocation35_spill] sm:$0xff] %v4399_v48 }
 0x1dc   :  { %v1680_v61 = vpop.permute.xlu1 %1679  ;;  %1950 = vrot.lane.b32.xlu0 %v1946_v62, %s3144_s13  ;;  %v631_v62 = vsel %vm630_vm4, %v5398_v38, %v4120_v4 }
 0x1dd   :  { %v1687_v46 = vsel %vm326_vm1, %v1678_v21, %v1680_v61  ;;  %v1688_v55 = vsel %vm326_vm1, %v1680_v61, %v4341_v63  ;;  %v1878_v21 = vcombine.low %v3919_v9, %v3919_v9 }
 0x1de   :  { %1695 = vst [vmem:[#allocation3 + $0x50] sm:$0xf] %v1687_v46  ;;  %1696 = vst [vmem:[#allocation3 + $0x100] sm:$0xf] %v1688_v55  ;;  %1441 = vrot.lane.b32.xlu1 %v1437_v13, %s3146_s2  ;;  %v4409_v17 = vpop.permute.xlu0 %1068  ;;  %v1058_v13 = vcombine.high %v4101_v47, %v4101_v47  ;;  %v1643_v46 = vcombine.low %v3971_v36, %v3971_v36  ;;  %v920_v47 = vcombine.high %v4140_v39, %v4140_v39 }
 0x1df   :  { %5480 = vst [vmem:[#allocation36_spill] sm:$0xff] %v4409_v17  ;;  %v1505_v36 = vcombine.low %v4002_v50, %v4002_v50  ;;  %v781_v39 = vcombine.high %v4180_v5, %v4180_v5  ;;  %v5482_v5 = vld [vmem:[#allocation25_spill] sm:$0xff] }
 0x1e0   :  { %v4403_v35 = vpop.permute.xlu1 %1747  ;;  %1881 = vrot.lane.b32.xlu0 %v1878_v21, %s3145_s14  ;;  %v4447_v21 = vmul.f32 %v631_v62, %v3854_v44  ;;  %v5483_v62 = vld [vmem:[#allocation26_spill] sm:$0xff] }
 0x1e2   :  { %1300 = vrot.lane.b32.xlu1 %v1296_v24, %s3147_s16  ;;  %v1101_v15 = vpop.permute.xlu0 %1100  ;;  %v643_v50 = vcombine.high %v4447_v21, %v4447_v21 }
 0x1e3   :  { %v1105_v9 = vsel %vm326_vm1, %v4338_v19, %v1101_v15 }
 0x1e4   :  { %v4413_v43 = vpop.permute.xlu1 %1648  ;;  %1113 = vst [vmem:[#allocation3 + $0x38] sm:$0xf0] %v1105_v9  ;;  %1745 = vrot.lane.b32.xlu0 %v1742_v2, %s3149_s18  ;;  %v5481_v2 = vld [vmem:[#allocation24_spill] sm:$0xff] }
 0x1e5   :  { %v1365_v15 = vcombine.low %v5481_v2, %v5481_v2  ;;  %v5484_v2 = vld [vmem:[#allocation28_spill] sm:$0xff] }
 0x1e6   :  { %1161 = vrot.lane.b32.xlu1 %v1157_v34, %s3148_s17  ;;  %v4430_v28 = vpop.permute.xlu0 %273 }
 0x1e8   :  { %v4423_v61 = vpop.permute.xlu1 %1578  ;;  %1646 = vrot.lane.b32.xlu0 %v1643_v46, %s3151_s20  ;;  %v1227_v46 = vcombine.low %v5482_v5, %v5482_v5 }
 0x1ea   :  { %1062 = vrot.lane.b32.xlu1 %v1058_v13, %s3150_s19  ;;  %v4444_v24 = vpop.permute.xlu0 %2126 }
 0x1ec   :  { %v4434_v55 = vpop.permute.xlu1 %1510  ;;  %1508 = vrot.lane.b32.xlu0 %v1505_v36, %s3145_s14  ;;  %v272_v36 = vcombine.high %v5483_v62, %v5483_v62 }
 0x1ee   :  { %924 = vrot.lane.b32.xlu1 %v920_v47, %s3138_s29  ;;  %v4457_v13 = vpop.permute.xlu0 %2054 }
 0x1f0   :  { %v4451_v34 = vpop.permute.xlu1 %1439  ;;  %1368 = vrot.lane.b32.xlu0 %v1365_v15, %s3153_s22  ;;  %v989_v15 = vcombine.low %v5484_v2, %v5484_v2  ;;  %v2053_v2 = vcombine.high %v4195_v1, %v4195_v1 }
 0x1f2   :  { %785 = vrot.lane.b32.xlu1 %v781_v39, %s3157_s26  ;;  %v4467_v47 = vpop.permute.xlu0 %1948 }
 0x1f4   :  { %v4461_v9 = vpop.permute.xlu1 %1370  ;;  %1230 = vrot.lane.b32.xlu0 %v1227_v46, %s3154_s23  ;;  %v852_v46 = vcombine.low %v4158_v41, %v4158_v41  ;;  %v1947_v41 = vcombine.high %v4212_v40, %v4212_v40  ;;  %v1743_v40 = vcombine.low %v4268_v6, %v4268_v6  ;;  %v1438_v6 = vcombine.high %v3885_v52, %v3885_v52 }
 0x1f5   :  { %v1366_v52 = vcombine.low %v4308_v56, %v4308_v56  ;;  %v5489_v56 = vld [vmem:[#allocation13_spill] sm:$0xff] }
 0x1f6   :  { %647 = vrot.lane.b32.xlu1 %v643_v50, %s3158_s27  ;;  %v1093_v10 = vpop.permute.xlu0 %1092  ;;  %v2122_v50 = vcombine.low %v4228_v20, %v4228_v20 }
 0x1f7   :  { %v1102_v5 = vsel %vm326_vm1, %v1093_v10, %v4310_v29 }
 0x1f8   :  { %v4471_v39 = vpop.permute.xlu1 %1298  ;;  %1110 = vst [vmem:[#allocation3 + $0x88] sm:$0xf0] %v1102_v5  ;;  %992 = vrot.lane.b32.xlu0 %v989_v15, %s3155_s24  ;;  %v1879_v15 = vcombine.low %v4240_v22, %v4240_v22 }
 0x1fa   :  { %279 = vrot.lane.b32.xlu1 %v272_v36, %s3140_s9  ;;  %v4487_v62 = vpop.permute.xlu0 %277  ;;  %v2078_v36 = vld [vmem:[#allocation2 + $0x10] sm:$0xf] }
 0x1fb   :  { %v2117_v10 = vmul.f32 %v2107_v23, %v2078_v36 }
 0x1fc   :  { %v4481_v38 = vpop.permute.xlu1 %1232  ;;  %855 = vrot.lane.b32.xlu0 %v852_v46, %s3156_s25 }
 0x1fd   :  { %v2123_v1 = vcombine.low %v2117_v10, %v2117_v10 }
 0x1fe   :  { %2128 = vrot.lane.b32.xlu1 %v2122_v50, %s3152_s21  ;;  %v4499_v50 = vpop.permute.xlu0 %281 }
 0x200   :  { %v4491_v20 = vpop.permute.xlu1 %1159  ;;  %1885 = vrot.lane.b32.xlu0 %v1879_v15, %s3145_s14  ;;  %v1577_v15 = vcombine.high %v4170_v42, %v4170_v42  ;;  %v2518_v42 = vld [vmem:[#allocation3 + $0x210] sm:$0xff] }
 0x202   :  { %2060 = vrot.lane.b32.xlu1 %v2053_v2, %s3122_s1  ;;  %v2198_v46 = vpop.permute.xlu0 %2197  ;;  %v5485_v2 = vld [vmem:[#allocation29_spill] sm:$0xff] }
 0x203   :  { %v1813_v14 = vcombine.high %v5485_v2, %v5485_v2  ;;  %v2204_v23 = vsel %vm326_vm1, %v4283_v57, %v2198_v46  ;;  %v2205_v22 = vsel %vm326_vm1, %v2198_v46, %v4317_v31  ;;  %v1644_v31 = vcombine.low %v4281_v26, %v4281_v26 }
 0x204   :  { %v4503_v5 = vpop.permute.xlu1 %1060  ;;  %2212 = vst [vmem:[#allocation3 + $0x1d0] sm:$0xf0] %v2204_v23  ;;  %2213 = vst [vmem:[#allocation3 + $0x168] sm:$0xf0] %v2205_v22  ;;  %2132 = vrot.lane.b32.xlu0 %v2123_v1, %s3152_s21  ;;  %v1297_v22 = vcombine.high %v4236_v0, %v4236_v0  ;;  %v1228_v0 = vcombine.low %v4323_v30, %v4323_v30 }
 0x206   :  { %1954 = vrot.lane.b32.xlu1 %v1947_v41, %s3144_s13  ;;  %v4519_v10 = vpop.permute.xlu0 %1818 }
 0x208   :  { %v4513_v36 = vpop.permute.xlu1 %994  ;;  %1749 = vrot.lane.b32.xlu0 %v1743_v40, %s3149_s18 }
 0x20a   :  { %1820 = vrot.lane.b32.xlu1 %v1813_v14, %s3146_s2  ;;  %v4529_v41 = vpop.permute.xlu0 %2062  ;;  %v1506_v14 = vcombine.low %v3889_v49, %v3889_v49  ;;  %v1158_v49 = vcombine.high %v4278_v16, %v4278_v16  ;;  %v1059_v16 = vcombine.high %v4304_v51, %v4304_v51  ;;  %v5491_v51 = vld [vmem:[#allocation15_spill] sm:$0xff] }
 0x20b   :  { %5486 = vst [vmem:[#allocation24_spill] sm:$0xff] %v4529_v41  ;;  %v2519_v1 = vld [vmem:[#allocation3 + $0x1d0] sm:$0xff]  ;;  %v2520_v46 = vld [vmem:[#allocation3 + $0x168] sm:$0xff]  ;;  %v5401_v48 = vrot.slane %v5491_v51, 4  ;;  %v853_v41 = vcombine.low %v5495_v58, %v5495_v58 }
 0x20c   :  { %v4523_v57 = vpop.permute.xlu1 %922  ;;  %1650 = vrot.lane.b32.xlu0 %v1644_v31, %s3151_s20  ;;  %2536 = vmatprep.subr.mxu0 %v2519_v1  ;;  %v5487_v1 = vld [vmem:[#allocation6_spill] sm:$0xff] }
 0x20d   :  { %2614 = vmatpush1.msra.mxu1 %v2520_v46  ;;  %2537 = vmatpush1.msra.mxu0 %v2518_v42  ;;  %v5488_v46 = vrot.slane %v5487_v1, 4  ;;  %v632_v59 = vsel %vm40_vm0, %v5494_v37, %v5401_v48 }
 0x20e   :  { %1584 = vrot.lane.b32.xlu1 %v1577_v15, %s3144_s13  ;;  %v4538_v23 = vpop.permute.xlu0 %1582  ;;  %v1464_v15 = vld [vmem:[#allocation2 + $0x10] sm:$0xf]  ;;  %v633_v37 = vsel %vm630_vm4, %v632_v59, %v5491_v51  ;;  %vm5416_vm4 = vcmask 736256  }
 0x210   :  { %v4531_v2 = vpop.permute.xlu1 %857  ;;  %1512 = vrot.lane.b32.xlu0 %v1506_v14, %s3145_s14  ;;  %v696_v14 = vrot.slane %v5489_v56, 4 }
 0x212   :  { %1445 = vrot.lane.b32.xlu1 %v1438_v6, %s3146_s2  ;;  %v1890_v40 = vpop.permute.xlu0 %1889  ;;  %v1501_v6 = vmul.f32 %v5488_v46, %v1464_v15  ;;  %v699_v30 = vsel %vm5415_vm2, %v696_v14, %v5489_v56  ;;  %v5490_v46 = vld [vmem:[#allocation27_spill] sm:$0xff] }
 0x213   :  { %v5400_v17 = vrot.slane %v5490_v46, 4 }
 0x214   :  { %v4541_v26 = vpop.permute.xlu1 %783  ;;  %1372 = vrot.lane.b32.xlu0 %v1366_v52, %s3153_s22  ;;  %v1507_v52 = vcombine.low %v1501_v6, %v1501_v6 }
 0x216   :  { %1304 = vrot.lane.b32.xlu1 %v1297_v22, %s3147_s16  ;;  %v4558_v42 = vpop.permute.xlu0 %1443 }
 0x218   :  { %v4549_v31 = vpop.permute.xlu1 %2058  ;;  %1234 = vrot.lane.b32.xlu0 %v1228_v0, %s3154_s23  ;;  %v5492_v0 = vld [vmem:[#allocation22_spill] sm:$0xff] }
 0x219   :  { %v990_v6 = vcombine.low %v5492_v0, %v5492_v0 }
 0x21a   :  { %1165 = vrot.lane.b32.xlu1 %v1158_v49, %s3148_s17  ;;  %v1754_v1 = vpop.permute.xlu0 %1753  ;;  %v4573_v49 = vmul.f32 %v699_v30, %v3854_v44  ;;  %v700_v30 = vsel %vm40_vm0, %v696_v14, %v5400_v17 }
 0x21b   :  { %v701_v4 = vsel %vm5415_vm2, %v700_v30, %v5490_v46 }
 0x21c   :  { %v4562_v22 = vpop.permute.xlu1 %1952  ;;  %1516 = vrot.lane.b32.xlu0 %v1507_v52, %s3145_s14 }
 0x21e   :  { %1066 = vrot.lane.b32.xlu1 %v1059_v16, %s3150_s19  ;;  %v4580_v8 = vpop.permute.xlu0 %1302  ;;  %v921_v16 = vcombine.high %v4348_v18, %v4348_v18 }
 0x220   :  { %v4570_v15 = vpop.permute.xlu1 %2130  ;;  %996 = vrot.lane.b32.xlu0 %v990_v6, %s3155_s24 }
 0x222   :  { %716 = vrot.lane.b32.xlu1 %v4573_v49, %s3137_s28  ;;  %v4601_v18 = vpop.permute.xlu0 %1586 }
 0x223   :  { %5496 = vst [vmem:[#allocation26_spill] sm:$0xff] %v4601_v18  ;;  %v5503_v18 = vld [vmem:[#allocation23_spill] sm:$0xff] }
 0x224   :  { %v4584_v56 = vpop.permute.xlu1 %1887  ;;  %859 = vrot.lane.b32.xlu0 %v853_v41, %s3156_s25  ;;  %v4617_v41 = vmul.f32 %v701_v4, %v3849_v11  ;;  %v5499_v4 = vrot.slane %v3826_v45, 4  ;;  %v5505_v45 = vld [vmem:[#allocation30_spill] sm:$0xff] }
 0x225   :  { %5493 = vst [vmem:[#allocation25_spill] sm:$0xff] %v4584_v56  ;;  %v1894_v52 = vsel %vm1518_vm8, %v4584_v56, %v1890_v40 }
 0x226   :  { %1902 = vst [vmem:[#allocation3 + $0x230] sm:$0xf0] %v1894_v52  ;;  %928 = vrot.lane.b32.xlu1 %v921_v16, %s3138_s29  ;;  %v4614_v16 = vmul.f32 %v633_v37, %v3849_v11  ;;  %v1655_v52 = vpop.permute.xlu0 %1654  ;;  %v712_v59 = vcombine.low %v4617_v41, %v4617_v41  ;;  %v5498_v11 = vld [vmem:[#allocation14_spill] sm:$0xff] }
 0x228   :  { %v1684_v6 = vpop.permute.xlu1 %1683  ;;  %649 = vrot.lane.b32.xlu0 %v4614_v16, %s3158_s27 }
 0x229   :  { %v1689_v40 = vsel %vm326_vm1, %v4341_v63, %v1684_v6  ;;  %v1690_v14 = vsel %vm326_vm1, %v1684_v6, %v4297_v54  ;;  %v880_v6 = vld [vmem:[#allocation2 + $0x10] sm:$0xf] }
 0x22a   :  { %1697 = vst [vmem:[#allocation3 + $0x30] sm:$0xf] %v1689_v40  ;;  %1698 = vst [vmem:[#allocation3 + $0x1b0] sm:$0xf] %v1690_v14  ;;  %998 = vrot.lane.b32.xlu1 %v5492_v0, %s3155_s24  ;;  %v4629_v30 = vpop.permute.xlu0 %1163  ;;  %v559_v0 = vrot.slane %v5498_v11, 4  ;;  %v916_v37 = vmul.f32 %v5499_v4, %v880_v6 }
 0x22b   :  { %v946_v40 = vld [vmem:[#allocation2 + $0x10] sm:$0xf] }
 0x22c   :  { %v4621_v54 = vpop.permute.xlu1 %1751  ;;  %718 = vrot.lane.b32.xlu0 %v712_v59, %s3137_s28 }
 0x22d   :  { %5497 = vst [vmem:[#allocation28_spill] sm:$0xff] %v4621_v54  ;;  %v1759_v63 = vsel %vm1755_vm3, %v4621_v54, %v1754_v1  ;;  %v561_v54 = vsel %vm283_vm11, %v559_v0, %v5498_v11  ;;  %v5406_v11 = vrot.slane %v4198_v33, 4 }
 0x22e   :  { %1767 = vst [vmem:[#allocation3 + $0x1b0] sm:$0xf0] %v1759_v63  ;;  %645 = vrot.lane.b32.xlu1 %v4447_v21, %s3158_s27  ;;  %v5500_v63 = vld [vmem:[#allocation7_spill] sm:$0xff]  ;;  %v4643_v21 = vpop.permute.xlu0 %1447  ;;  %v4652_v59 = vmul.f32 %v561_v54, %v3854_v44  ;;  %v711_v54 = vcombine.low %v4573_v49, %v4573_v49 }
 0x22f   :  { %v5501_v17 = vrot.slane %v5500_v63, 4  ;;  %5502 = vst [vmem:[#allocation29_spill] sm:$0xff] %v4643_v21 }
 0x230   :  { %v4634_v14 = vpop.permute.xlu1 %1652  ;;  %930 = vrot.lane.b32.xlu0 %v916_v37, %s3138_s29 }
 0x231   :  { %v1660_v1 = vsel %vm1656_vm10, %v4634_v14, %v1655_v52  ;;  %v985_v48 = vmul.f32 %v5501_v17, %v946_v40  ;;  %v5405_v52 = vrot.slane %v5505_v45, 4 }
 0x232   :  { %1668 = vst [vmem:[#allocation3 + $0x160] sm:$0xf0] %v1660_v1  ;;  %511 = vrot.lane.b32.xlu1 %v5503_v18, %s3122_s1  ;;  %v4656_v1 = vpop.permute.xlu0 %1064  ;;  %v782_v18 = vcombine.high %v4375_v60, %v4375_v60 }
 0x233   :  { %v991_v6 = vcombine.low %v985_v48, %v985_v48  ;;  %v562_v44 = vsel %vm40_vm0, %v559_v0, %v5405_v52  ;;  %v397_v0 = vsel %vm5411_vm7, %v5406_v11, %v4198_v33 }
 0x234   :  { %v4649_v56 = vpop.permute.xlu1 %1514  ;;  %v563_v49 = vsel %vm283_vm11, %v562_v44, %v5505_v45 }
 0x235   :  { %5504 = vst [vmem:[#allocation6_spill] sm:$0xff] %v4649_v56  ;;  %1000 = vrot.lane.b32.xlu0 %v991_v6, %s3155_s24 }
 0x236   :  { %578 = vrot.lane.b32.xlu1 %v4652_v59, %s3121_s0  ;;  %v1097_v48 = vpop.permute.xlu0 %1096 }
 0x237   :  { %v1103_v40 = vsel %vm326_vm1, %v4310_v29, %v1097_v48  ;;  %v1104_v60 = vsel %vm326_vm1, %v1097_v48, %v4338_v19  ;;  %v3115_v29 = vld [vmem:[#allocation2 + $0xc] sm:$0xff] }
 0x238   :  { %v4660_v17 = vpop.permute.xlu1 %1374  ;;  %1111 = vst [vmem:[#allocation3] sm:$0xf0] %v1103_v40  ;;  %1112 = vst [vmem:[#allocation3 + $0x188] sm:$0xf0] %v1104_v60  ;;  %v4685_v37 = vmul.f32 %v3115_v29, %v563_v49  ;;  %v4705_v60 = vld [vmem:[#allocation2 + $0x4] sm:$0xff]  ;;  %v462_v49 = vrot.slane %v4177_v12, 4 }
 0x239   :  { %5506 = vst [vmem:[#allocation13_spill] sm:$0xff] %v4660_v17  ;;  %714 = vrot.lane.b32.xlu0 %v711_v54, %s3137_s28 }
 0x23a   :  { %789 = vrot.lane.b32.xlu1 %v782_v18, %s3157_s26  ;;  %v1377_v19 = vpop.permute.xlu0 %1376  ;;  %v4691_v18 = vld [vmem:[#allocation2] sm:$0xff] }
 0x23b   :  { %v1382_v63 = vsel %vm1378_vm13, %v4660_v17, %v1377_v19  ;;  %v4694_v44 = vmul.f32 %v4691_v18, %v397_v0  ;;  %v808_v0 = vld [vmem:[#allocation2 + $0x10] sm:$0xf]  ;;  %v5509_v17 = vrot.slane %v3830_v3, 4  ;;  %v5510_v3 = vld [vmem:[#allocation16_spill] sm:$0xff] }
 0x23c   :  { %v4676_v4 = vpop.permute.xlu1 %1236  ;;  %1390 = vst [vmem:[#allocation3 + $0x170] sm:$0xf0] %v1382_v63 }
 0x23d   :  { %513 = vrot.lane.b32.xlu0 %v3115_v29, %s3122_s1  ;;  %v409_v19 = vcombine.high %v4694_v44, %v4694_v44 }
 0x23e   :  { %861 = vrot.lane.b32.xlu1 %v5495_v58, %s3156_s25  ;;  %v574_v58 = vcombine.low %v4685_v37, %v4685_v37  ;;  %v4703_v40 = vpop.permute.xlu0 %926 }
 0x240   :  { %v276_v6 = vpop.permute.xlu1 %275 }
 0x241   :  { %v284_v54 = vsel %vm283_vm11, %v4430_v28, %v276_v6  ;;  %v285_v48 = vsel %vm283_vm11, %v276_v6, %v4487_v62  ;;  %v739_v28 = vld [vmem:[#allocation2 + $0x14] sm:$0xf]  ;;  %580 = vrot.lane.b32.xlu0 %v574_v58, %s3121_s0  ;;  %v464_v6 = vsel %vm5412_vm15, %v462_v49, %v4177_v12 }
 0x242   :  { %292 = vst [vmem:[#allocation3 + $0xc8] sm:$0xf] %v284_v54  ;;  %293 = vst [vmem:[#allocation3 + $0x8] sm:$0xf] %v285_v48  ;;  %509 = vrot.lane.b32.xlu1 %v4705_v60, %s3122_s1  ;;  %v5507_v54 = vld [vmem:[#allocation12_spill] sm:$0xff]  ;;  %v1239_v11 = vpop.permute.xlu0 %1238  ;;  %v777_v56 = vmul.f32 %v5509_v17, %v739_v28  ;;  %v463_v17 = vrot.slane %v5510_v3, 4 }
 0x243   :  { %v5508_v48 = vrot.slane %v5507_v54, 4  ;;  %v1244_v58 = vsel %vm5416_vm4, %v4676_v4, %v1239_v11  ;;  %v5511_v28 = vld [vmem:[#allocation17_spill] sm:$0xff]  ;;  %v5512_v54 = vrot.slane %v4198_v33, 4 }
 0x244   :  { %v2125_v29 = vpop.permute.xlu1 %2124  ;;  %1252 = vst [vmem:[#allocation3 + $0x1c8] sm:$0xf0] %v1244_v58  ;;  %v395_v11 = vrot.slane %v5511_v28, 4 }
 0x245   :  { %v2135_v63 = vsel %vm5410_vm14, %v2125_v29, %v4444_v24  ;;  %v848_v52 = vmul.f32 %v5508_v48, %v808_v0  ;;  %v4725_v29 = vmul.f32 %v4705_v60, %v464_v6  ;;  %791 = vrot.lane.b32.xlu0 %v777_v56, %s3157_s26  ;;  %v573_v48 = vcombine.low %v4652_v59, %v4652_v59 }
 0x246   :  { %2143 = vst [vmem:[#allocation3 + $0x10] sm:$0xf0] %v2135_v63  ;;  %413 = vrot.lane.b32.xlu1 %v409_v19, %s3142_s11  ;;  %v4734_v63 = vpop.permute.xlu0 %787  ;;  %vm1308_vm14 = vcmask 719872  }
 0x247   :  { %v854_v19 = vcombine.low %v848_v52, %v848_v52  ;;  %v465_v52 = vsel %vm40_vm0, %v462_v49, %v463_v17 }
 0x248   :  { %v1817_v21 = vpop.permute.xlu1 %1816 }
 0x249   :  { %v1824_v12 = vsel %vm1449_vm6, %v4381_v7, %v1817_v21  ;;  %v1825_v0 = vsel %vm1449_vm6, %v1817_v21, %v4519_v10  ;;  %v644_v7 = vcombine.high %v4614_v16, %v4614_v16  ;;  %863 = vrot.lane.b32.xlu0 %v854_v19, %s3156_s25  ;;  %v398_v16 = vsel %vm40_vm0, %v5512_v54, %v395_v11  ;;  %v4760_v19 = vld [vmem:[#allocation2 + $0xc] sm:$0xff] }
 0x24a   :  { %1832 = vst [vmem:[#allocation3 + $0x90] sm:$0xf] %v1824_v12  ;;  %1833 = vst [vmem:[#allocation3 + $0x130] sm:$0xf] %v1825_v0  ;;  %481 = vrot.lane.b32.xlu1 %v4725_v29, %s3143_s12  ;;  %v2057_v58 = vpop.permute.xlu0 %2056  ;;  %v365_v0 = vld [vmem:[#allocation2 + $0x8] sm:$0xff] }
 0x24b   :  { %v2065_v12 = vsel %vm326_vm1, %v2057_v58, %v4549_v31 }
 0x24c   :  { %v1581_v56 = vpop.permute.xlu1 %1580  ;;  %2073 = vst [vmem:[#allocation3 + $0x128] sm:$0xf] %v2065_v12 }
 0x24d   :  { %v1589_v21 = vsel %vm1588_vm5, %v4423_v61, %v1581_v56  ;;  %v1590_v6 = vsel %vm1588_vm5, %v1581_v56, %v4538_v23  ;;  %v2064_v61 = vsel %vm326_vm1, %v4457_v13, %v2057_v58  ;;  %576 = vrot.lane.b32.xlu0 %v573_v48, %s3121_s0  ;;  %v466_v13 = vsel %vm5412_vm15, %v465_v52, %v5510_v3 }
 0x24e   :  { %1597 = vst [vmem:[#allocation3 + $0x48] sm:$0xf] %v1589_v21  ;;  %1598 = vst [vmem:[#allocation3 + $0x98] sm:$0xf] %v1590_v6  ;;  %651 = vrot.lane.b32.xlu1 %v644_v7, %s3158_s27  ;;  %v399_v56 = vsel %vm5411_vm7, %v398_v16, %v5511_v28  ;;  %v1951_v7 = vpop.permute.xlu0 %1950  ;;  %v4774_v6 = vmul.f32 %v466_v13, %v4760_v19  ;;  %vm1169_vm7 = vcmask 965632   ;;  %vm5413_vm15 = vcmask 998400  }
 0x24f   :  { %2072 = vst [vmem:[#allocation3 + $0x10] sm:$0xf] %v2064_v61  ;;  %v4771_v21 = vmul.f32 %v399_v56, %v365_v0  ;;  %v1958_v52 = vsel %vm1588_vm5, %v4467_v47, %v1951_v7  ;;  %v1959_v16 = vsel %vm1588_vm5, %v1951_v7, %v4562_v22 }
 0x250   :  { %v1442_v49 = vpop.permute.xlu1 %1441  ;;  %1966 = vst [vmem:[#allocation3 + $0x1d8] sm:$0xf] %v1958_v52  ;;  %1967 = vst [vmem:[#allocation3 + $0x228] sm:$0xf] %v1959_v16  ;;  %v477_v12 = vcombine.low %v4774_v6, %v4774_v6  ;;  %v5515_v52 = vrot.slane %v5491_v51, 4 }
 0x251   :  { %v1450_v33 = vsel %vm1449_vm6, %v4451_v34, %v1442_v49  ;;  %v1451_v59 = vsel %vm1449_vm6, %v1442_v49, %v4558_v42  ;;  %v5513_v34 = vld [vmem:[#allocation5_spill] sm:$0xff]  ;;  %415 = vrot.lane.b32.xlu0 %v4771_v21, %s3142_s11 }
 0x252   :  { %1458 = vst [vmem:[#allocation3 + $0x198] sm:$0xf] %v1450_v33  ;;  %1459 = vst [vmem:[#allocation3 + $0xe0] sm:$0xf] %v1451_v59  ;;  %720 = vrot.lane.b32.xlu1 %v4617_v41, %s3137_s28  ;;  %v324_v54 = vrot.slane %v5513_v34, 4  ;;  %v1882_v47 = vpop.permute.xlu0 %1881 }
 0x253   :  { %v1891_v0 = vsel %vm1518_vm8, %v1882_v47, %v4368_v25  ;;  %v670_v33 = vld [vmem:[#allocation2 + $0x14] sm:$0xf] }
 0x254   :  { %v1301_v48 = vpop.permute.xlu1 %1300  ;;  %v327_v61 = vsel %vm326_vm1, %v324_v54, %v5513_v34  ;;  %1899 = vst [vmem:[#allocation3 + $0x90] sm:$0xf0] %v1891_v0 }
 0x255   :  { %v1309_v58 = vsel %vm1308_vm14, %v4471_v39, %v1301_v48  ;;  %v1310_v41 = vsel %vm1308_vm14, %v1301_v48, %v4580_v8  ;;  %v600_v39 = vld [vmem:[#allocation2 + $0x14] sm:$0xf]  ;;  %v333_v59 = vmul.f32 %v4691_v18, %v327_v61  ;;  %483 = vrot.lane.b32.xlu0 %v477_v12, %s3143_s12  ;;  %v5516_v18 = vrot.slane %v5490_v46, 4 }
 0x256   :  { %1317 = vst [vmem:[#allocation3 + $0x80] sm:$0xf] %v1309_v58  ;;  %1318 = vst [vmem:[#allocation3 + $0xf8] sm:$0xf] %v1310_v41  ;;  %411 = vrot.lane.b32.xlu1 %v4694_v44, %s3142_s11  ;;  %v5514_v44 = vld [vmem:[#allocation4_spill] sm:$0xff]  ;;  %v1746_v34 = vpop.permute.xlu0 %1745  ;;  %v639_v16 = vmul.f32 %v5515_v52, %v600_v39 }
 0x257   :  { %v325_v7 = vrot.slane %v5514_v44, 4  ;;  %v707_v48 = vmul.f32 %v5516_v18, %v670_v33  ;;  %v476_v33 = vcombine.low %v4725_v29, %v4725_v29  ;;  %v366_v18 = vld [vmem:[#allocation2 + $0x10] sm:$0xf]  ;;  %v436_v29 = vld [vmem:[#allocation2 + $0x14] sm:$0xf] }
 0x258   :  { %v1162_v49 = vpop.permute.xlu1 %1161 }
 0x259   :  { %v1170_v13 = vsel %vm1169_vm7, %v4491_v20, %v1162_v49  ;;  %v1171_v56 = vsel %vm1169_vm7, %v1162_v49, %v4629_v30  ;;  %v1756_v20 = vsel %vm1755_vm3, %v1746_v34, %v4403_v35  ;;  %653 = vrot.lane.b32.xlu0 %v639_v16, %s3158_s27  ;;  %v328_v46 = vsel %vm40_vm0, %v324_v54, %v325_v7 }
 0x25a   :  { %1178 = vst [vmem:[#allocation3 + $0x1a8] sm:$0xf] %v1170_v13  ;;  %1179 = vst [vmem:[#allocation3 + $0x220] sm:$0xf] %v1171_v56  ;;  %344 = vrot.lane.b32.xlu1 %v333_v59, %s3124_s15  ;;  %v1647_v51 = vpop.permute.xlu0 %1646  ;;  %v713_v47 = vcombine.low %v707_v48, %v707_v48  ;;  %v329_v54 = vsel %vm326_vm1, %v328_v46, %v5514_v44  ;;  %v339_v34 = vcombine.low %v333_v59, %v333_v59  ;;  %v5517_v48 = vld [vmem:[#allocation18_spill] sm:$0xff] }
 0x25b   :  { %1764 = vst [vmem:[#allocation3 + $0x50] sm:$0xf0] %v1756_v20  ;;  %v1657_v12 = vsel %vm1656_vm10, %v1647_v51, %v4413_v43  ;;  %v2415_v59 = vrot.slane %v4225_v53, 4 }
 0x25c   :  { %v1063_v58 = vpop.permute.xlu1 %1062  ;;  %1665 = vst [vmem:[#allocation3 + $0x48] sm:$0xf0] %v1657_v12  ;;  %v405_v12 = vmul.f32 %v395_v11, %v366_v18 }
 0x25d   :  { %v1071_v41 = vsel %vm5413_vm15, %v4503_v5, %v1063_v58  ;;  %v1072_v61 = vsel %vm5413_vm15, %v1063_v58, %v4656_v1  ;;  %722 = vrot.lane.b32.xlu0 %v713_v47, %s3137_s28  ;;  %vm5414_vm15 = vcmask 842752   ;;  %v533_v47 = vld [vmem:[#allocation2 + $0x14] sm:$0xf] }
 0x25e   :  { %1079 = vst [vmem:[#allocation3 + $0x88] sm:$0xf] %v1071_v41  ;;  %1080 = vst [vmem:[#allocation3] sm:$0xf] %v1072_v61  ;;  %515 = vrot.lane.b32.xlu1 %v4251_v27, %s3122_s1  ;;  %v4830_v27 = vld [vmem:[#allocation2 + $0x8] sm:$0xff]  ;;  %v1509_v13 = vpop.permute.xlu0 %1508  ;;  %v5518_v41 = vld [vmem:[#allocation19_spill] sm:$0xff] }
 0x25f   :  { %v4833_v49 = vmul.f32 %v4830_v27, %v329_v54  ;;  %v2349_v61 = vrot.slane %v5518_v41, 4 }
 0x260   :  { %v925_v0 = vpop.permute.xlu1 %924 }
 0x261   :  { %v932_v5 = vsel %vm5415_vm2, %v4523_v57, %v925_v0  ;;  %v933_v39 = vsel %vm5415_vm2, %v925_v0, %v4703_v40  ;;  %v1519_v57 = vsel %vm1518_vm8, %v1509_v13, %v4434_v55  ;;  %479 = vrot.lane.b32.xlu0 %v476_v33, %s3143_s12  ;;  %v340_v20 = vcombine.low %v4833_v49, %v4833_v49  ;;  %v503_v13 = vld [vmem:[#allocation2 + $0x14] sm:$0xf] }
 0x262   :  { %940 = vst [vmem:[#allocation3 + $0xd0] sm:$0xf] %v932_v5  ;;  %941 = vst [vmem:[#allocation3 + $0x138] sm:$0xf] %v933_v39  ;;  %582 = vrot.lane.b32.xlu1 %v4685_v37, %s3121_s0  ;;  %v2416_v37 = vrot.slane %v5517_v48, 4  ;;  %v1369_v58 = vpop.permute.xlu0 %1368  ;;  %v472_v0 = vmul.f32 %v463_v17, %v436_v29  ;;  %v5519_v39 = vrot.slane %v5505_v45, 4 }
 0x263   :  { %1527 = vst [vmem:[#allocation3 + $0x198] sm:$0xf0] %v1519_v57  ;;  %v1379_v46 = vsel %vm1378_vm13, %v1369_v58, %v4461_v9  ;;  %v3119_v29 = vld [vmem:[#allocation2 + $0x10] sm:$0xff]  ;;  %vm5520_vm2 = vcmask 916480  }
 0x264   :  { %v786_v56 = vpop.permute.xlu1 %785  ;;  %1387 = vst [vmem:[#allocation3 + $0x80] sm:$0xf0] %v1379_v46  ;;  %v569_v54 = vmul.f32 %v5519_v39, %v533_v47  ;;  %v2418_v33 = vsel %vm40_vm0, %v2415_v59, %v2416_v37  ;;  %v478_v57 = vcombine.low %v472_v0, %v472_v0  ;;  %v2417_v47 = vsel %vm2108_vm12, %v2415_v59, %v4225_v53  ;;  %v5522_v59 = vld [vmem:[#allocation24_spill] sm:$0xff] }
 0x265   :  { %v794_v52 = vsel %vm5414_vm15, %v4541_v26, %v786_v56  ;;  %v795_v16 = vsel %vm5414_vm15, %v786_v56, %v4734_v63  ;;  %v2348_v26 = vrot.slane %v4245_v32, 4  ;;  %346 = vrot.lane.b32.xlu0 %v340_v20, %s3124_s15  ;;  %vm1002_vm15 = vcmask 179200  }
 0x266   :  { %802 = vst [vmem:[#allocation3 + $0x180] sm:$0xf] %v794_v52  ;;  %803 = vst [vmem:[#allocation3 + $0x190] sm:$0xf] %v795_v16  ;;  %342 = vrot.lane.b32.xlu1 %v339_v34, %s3124_s15  ;;  %v1231_v5 = vpop.permute.xlu0 %1230  ;;  %v575_v34 = vcombine.low %v569_v54, %v569_v54  ;;  %v2419_v16 = vsel %vm2108_vm12, %v2418_v33, %v5517_v48  ;;  %v410_v0 = vcombine.high %v4771_v21, %v4771_v21 }
 0x267   :  { %v2351_v28 = vsel %vm40_vm0, %v2348_v26, %v2349_v61  ;;  %v1241_v11 = vsel %vm5416_vm4, %v1231_v5, %v4481_v38  ;;  %vm5521_vm4 = vmmov %vm5520_vm2  ;;  %v4892_v46 = vmul.f32 %v3119_v29, %v2419_v16  ;;  %v2423_v54 = vmul.f32 %v4830_v27, %v2417_v47  ;;  %v5526_v16 = vld [vmem:[#allocation32_spill] sm:$0xff] }
 0x268   :  { %v4855_v51 = vpop.permute.xlu1 %647  ;;  %1249 = vst [vmem:[#allocation3 + $0x1a8] sm:$0xf0] %v1241_v11  ;;  %v2352_v52 = vsel %vm208_vm9, %v2351_v28, %v5518_v41  ;;  %v298_v28 = vld [vmem:[#allocation2 + $0x10] sm:$0xf]  ;;  %v5523_v11 = vld [vmem:[#allocation20_spill] sm:$0xff] }
 0x269   :  { %517 = vrot.lane.b32.xlu0 %v503_v13, %s3122_s1  ;;  %v4885_v20 = vmul.f32 %v3119_v29, %v2352_v52  ;;  %v2430_v33 = vcombine.low %v4892_v46, %v4892_v46  ;;  %v2244_v13 = vrot.slane %v5523_v11, 4  ;;  %v2429_v52 = vcombine.low %v2423_v54, %v2423_v54  ;;  %v2511_v29 = vld [vmem:[#allocation3 + $0x228] sm:$0xff] }
 0x26a   :  { %419 = vrot.lane.b32.xlu1 %v405_v12, %s3142_s11  ;;  %v993_v56 = vpop.permute.xlu0 %992 }
 0x26b   :  { %v1003_v18 = vsel %vm1002_vm15, %v993_v56, %v4513_v36  ;;  %v2490_v48 = vld [vmem:[#allocation3 + $0x80] sm:$0xff] }
 0x26c   :  { %v280_v3 = vpop.permute.xlu1 %279  ;;  %1011 = vst [vmem:[#allocation3 + $0xd0] sm:$0xf0] %v1003_v18 }
 0x26d   :  { %v286_v45 = vsel %vm283_vm11, %v4487_v62, %v280_v3  ;;  %v287_v17 = vsel %vm283_vm11, %v280_v3, %v4499_v50  ;;  %584 = vrot.lane.b32.xlu0 %v575_v34, %s3121_s0  ;;  %vm865_vm11 = vcmask 211968   ;;  %v5524_v3 = vld [vmem:[#allocation31_spill] sm:$0xff]  ;;  %v335_v34 = vmul.f32 %v325_v7, %v298_v28 }
 0x26e   :  { %294 = vst [vmem:[#allocation3 + $0x40] sm:$0xf] %v286_v45  ;;  %295 = vst [vmem:[#allocation3 + $0x28] sm:$0xf] %v287_v17  ;;  %487 = vrot.lane.b32.xlu1 %v478_v57, %s3143_s12  ;;  %v856_v12 = vpop.permute.xlu0 %855  ;;  %v2243_v45 = vrot.slane %v5524_v3, 4  ;;  %v5525_v17 = vld [vmem:[#allocation25_spill] sm:$0xff] }
 0x26f   :  { %v866_v5 = vsel %vm865_vm11, %v856_v12, %v4531_v2  ;;  %v341_v47 = vcombine.low %v335_v34, %v335_v34 }
 0x270   :  { %v2129_v62 = vpop.permute.xlu1 %2128  ;;  %874 = vst [vmem:[#allocation3 + $0x180] sm:$0xf0] %v866_v5 }
 0x271   :  { %v2136_v50 = vsel %vm5520_vm2, %v4444_v24, %v2129_v62  ;;  %v2137_v58 = vsel %vm5521_vm4, %v2129_v62, %v4570_v15  ;;  %v2350_v24 = vsel %vm208_vm9, %v2348_v26, %v4245_v32  ;;  %417 = vrot.lane.b32.xlu0 %v410_v0, %s3142_s11  ;;  %v2514_v62 = vld [vmem:[#allocation3 + $0x10] sm:$0xff]  ;;  %v5527_v0 = vld [vmem:[#allocation33_spill] sm:$0xff]  ;;  %vm5543_vm4 = vcmask 842752  }
 0x272   :  { %2144 = vst [vmem:[#allocation3 + $0x128] sm:$0xf0] %v2136_v50  ;;  %2145 = vst [vmem:[#allocation3 + $0x178] sm:$0xf0] %v2137_v58  ;;  %2368 = vrot.lane.b32.xlu1 %v4885_v20, %s3122_s1  ;;  %v4913_v32 = vmul.f32 %v4830_v27, %v2350_v24  ;;  %v1886_v26 = vpop.permute.xlu0 %1885  ;;  %v2510_v58 = vld [vmem:[#allocation3 + $0x1d8] sm:$0xff] }
 0x273   :  { %v1893_v57 = vsel %vm1518_vm8, %v1886_v26, %v5525_v17 }
 0x274   :  { %v2061_v39 = vpop.permute.xlu1 %2060  ;;  %1901 = vst [vmem:[#allocation3 + $0x68] sm:$0xf0] %v1893_v57  ;;  %v2362_v44 = vcombine.high %v4913_v32, %v4913_v32 }
 0x275   :  { %v2066_v53 = vsel %vm326_vm1, %v4549_v31, %v2061_v39  ;;  %v2067_v21 = vsel %vm326_vm1, %v2061_v39, %v5522_v59  ;;  %v1892_v31 = vsel %vm1518_vm8, %v4368_v25, %v1886_v26  ;;  %485 = vrot.lane.b32.xlu0 %v4774_v6, %s3143_s12  ;;  %v5528_v39 = vld [vmem:[#allocation28_spill] sm:$0xff]  ;;  %v5529_v26 = vld [vmem:[#allocation26_spill] sm:$0xff] }
 0x276   :  { %2074 = vst [vmem:[#allocation3 + $0x178] sm:$0xf] %v2066_v53  ;;  %2075 = vst [vmem:[#allocation3 + $0x208] sm:$0xf] %v2067_v21  ;;  %2436 = vrot.lane.b32.xlu1 %v2430_v33, %s3152_s21  ;;  %v2133_v7 = vpop.permute.xlu0 %2132  ;;  %v2506_v33 = vld [vmem:[#allocation3 + $0x90] sm:$0xff] }
 0x277   :  { %1900 = vst [vmem:[#allocation3 + $0x130] sm:$0xf0] %v1892_v31  ;;  %v2138_v6 = vsel %vm5520_vm2, %v4570_v15, %v2133_v7 }
 0x278   :  { %v1955_v56 = vpop.permute.xlu1 %1954  ;;  %2146 = vst [vmem:[#allocation3 + $0x208] sm:$0xf0] %v2138_v6 }
 0x279   :  { %v1960_v27 = vsel %vm1588_vm5, %v4562_v22, %v1955_v56  ;;  %v1961_v18 = vsel %vm1588_vm5, %v1955_v56, %v5526_v16  ;;  %v2515_v25 = vld [vmem:[#allocation3 + $0x128] sm:$0xff]  ;;  %v2246_v22 = vsel %vm40_vm0, %v2243_v45, %v2244_v13  ;;  %2366 = vrot.lane.b32.xlu0 %v2362_v44, %s3122_s1  ;;  %v2363_v16 = vcombine.high %v4885_v20, %v4885_v20  ;;  %v5531_v20 = vld [vmem:[#allocation6_spill] sm:$0xff] }
 0x27a   :  { %1968 = vst [vmem:[#allocation3 + $0x218] sm:$0xf] %v1960_v27  ;;  %1969 = vst [vmem:[#allocation3 + $0x200] sm:$0xf] %v1961_v18  ;;  %2538 = vmatprep.subr.mxu0 %v2515_v25  ;;  %2432 = vrot.lane.b32.xlu1 %v2429_v52, %s3152_s21  ;;  %v1750_v5 = vpop.permute.xlu0 %1749 }
 0x27b   :  { %2539 = vmatpush1.msra.mxu0 %v2514_v62  ;;  %v1757_v15 = vsel %vm1755_vm3, %v4403_v35, %v1750_v5  ;;  %v1758_v53 = vsel %vm1755_vm3, %v1750_v5, %v5528_v39  ;;  %vm5537_vm3 = vcmask 998400  }
 0x27c   :  { %2540 = vmatprep.subr.mxu0 %v2511_v29  ;;  %v1821_v50 = vpop.permute.xlu1 %1820  ;;  %1765 = vst [vmem:[#allocation3 + $0x100] sm:$0xf0] %v1757_v15  ;;  %1766 = vst [vmem:[#allocation3 + $0x30] sm:$0xf0] %v1758_v53  ;;  %v5534_v53 = vld [vmem:[#allocation35_spill] sm:$0xff] }
 0x27d   :  { %v1826_v12 = vsel %vm1449_vm6, %v4519_v10, %v1821_v50  ;;  %v1827_v24 = vsel %vm1449_vm6, %v1821_v50, %v5527_v0  ;;  %2541 = vmatpush1.msra.mxu0 %v2510_v58  ;;  %v2247_v10 = vsel %vm2108_vm12, %v2246_v22, %v5523_v11  ;;  %2434 = vrot.lane.b32.xlu0 %v2423_v54, %s3152_s21  ;;  %v2516_v57 = vld [vmem:[#allocation3 + $0x178] sm:$0xff]  ;;  %v2505_v58 = vld [vmem:[#allocation3 + $0x1b0] sm:$0xff] }
 0x27e   :  { %1834 = vst [vmem:[#allocation3 + $0x68] sm:$0xf] %v1826_v12  ;;  %1835 = vst [vmem:[#allocation3 + $0x230] sm:$0xf] %v1827_v24  ;;  %350 = vrot.lane.b32.xlu1 %v341_v47, %s3124_s15  ;;  %v2507_v59 = vld [vmem:[#allocation3 + $0x130] sm:$0xff]  ;;  %v4956_v31 = vmul.f32 %v2247_v10, %v4760_v19  ;;  %v1651_v17 = vpop.permute.xlu0 %1650  ;;  %v2245_v54 = vsel %vm2108_vm12, %v2243_v45, %v5524_v3  ;;  %v5530_v3 = vld [vmem:[#allocation29_spill] sm:$0xff] }
 0x27f   :  { %2542 = vmatprep.subr.mxu0 %v2507_v59  ;;  %v1659_v56 = vsel %vm1656_vm10, %v1651_v17, %v4634_v14  ;;  %v2517_v34 = vld [vmem:[#allocation3 + $0x208] sm:$0xff]  ;;  %v2251_v45 = vmul.f32 %v4705_v60, %v2245_v54  ;;  %v2502_v60 = vld [vmem:[#allocation3 + $0x50] sm:$0xff]  ;;  %v2388_v10 = vld [vmem:[#allocation2 + $0x18] sm:$0xf] }
 0x280   :  { %v1585_v21 = vpop.permute.xlu1 %1584  ;;  %2543 = vmatpush1.msra.mxu0 %v2506_v33  ;;  %1667 = vst [vmem:[#allocation3 + $0x238] sm:$0xf0] %v1659_v56  ;;  %2615 = vmatprep.subr.mxu1 %v2517_v34  ;;  %v5533_v47 = vld [vmem:[#allocation13_spill] sm:$0xff]  ;;  %v2322_v33 = vld [vmem:[#allocation2 + $0x18] sm:$0xf] }
 0x281   :  { %v1591_v28 = vsel %vm1588_vm5, %v4538_v23, %v1585_v21  ;;  %v1592_v35 = vsel %vm1588_vm5, %v1585_v21, %v5529_v26  ;;  %v1658_v23 = vsel %vm1656_vm10, %v4413_v43, %v1651_v17  ;;  %v2513_v19 = vld [vmem:[#allocation3 + $0x200] sm:$0xff]  ;;  %2364 = vrot.lane.b32.xlu0 %v4913_v32, %s3122_s1  ;;  %v2512_v52 = vld [vmem:[#allocation3 + $0x218] sm:$0xff]  ;;  %2616 = vmatpush1.msra.mxu1 %v2516_v57  ;;  %v2498_v24 = vld [vmem:[#allocation3 + $0x48] sm:$0xff] }
 0x282   :  { %1599 = vst [vmem:[#allocation3 + $0x238] sm:$0xf] %v1591_v28  ;;  %1600 = vst [vmem:[#allocation3 + $0x160] sm:$0xf] %v1592_v35  ;;  %2263 = vrot.lane.b32.xlu1 %v4956_v31, %s3152_s21  ;;  %v1513_v18 = vpop.permute.xlu0 %1512  ;;  %2617 = vmatprep.subr.mxu1 %v2513_v19  ;;  %v2257_v6 = vcombine.high %v2251_v45, %v2251_v45  ;;  %v5538_v57 = vld [vmem:[#allocation36_spill] sm:$0xff] }
 0x283   :  { %1666 = vst [vmem:[#allocation3 + $0x98] sm:$0xf0] %v1658_v23  ;;  %v1520_v25 = vsel %vm1518_vm8, %v4434_v55, %v1513_v18  ;;  %v1521_v62 = vsel %vm1518_vm8, %v1513_v18, %v5531_v20  ;;  %v2503_v44 = vld [vmem:[#allocation3 + $0x100] sm:$0xff]  ;;  %2618 = vmatpush1.msra.mxu1 %v2512_v52  ;;  %v5532_v55 = vld [vmem:[#allocation34_spill] sm:$0xff]  ;;  %vm5539_vm10 = vmmov %vm5537_vm3  ;;  %v2358_v23 = vmul.f32 %v2349_v61, %v2322_v33 }
 0x284   :  { %v1446_v27 = vpop.permute.xlu1 %1445  ;;  %1528 = vst [vmem:[#allocation3 + $0xe0] sm:$0xf0] %v1520_v25  ;;  %1529 = vst [vmem:[#allocation3 + $0x1e0] sm:$0xf0] %v1521_v62  ;;  %2544 = vmatprep.subr.mxu0 %v2503_v44  ;;  %v2504_v5 = vld [vmem:[#allocation3 + $0x30] sm:$0xff]  ;;  %v2482_v18 = vld [vmem:[#allocation3 + $0x88] sm:$0xff] }
 0x285   :  { %v1452_v43 = vsel %vm1449_vm6, %v4558_v42, %v1446_v27  ;;  %v1453_v14 = vsel %vm1449_vm6, %v1446_v27, %v5530_v3  ;;  %v2509_v32 = vld [vmem:[#allocation3 + $0x230] sm:$0xff]  ;;  %v2508_v42 = vld [vmem:[#allocation3 + $0x68] sm:$0xff]  ;;  %348 = vrot.lane.b32.xlu0 %v4833_v49, %s3124_s15  ;;  %2545 = vmatpush1.msra.mxu0 %v2502_v60  ;;  %vm5535_vm6 = vcmask 736256   ;;  %v2217_v27 = vld [vmem:[#allocation2 + $0x14] sm:$0xf] }
 0x286   :  { %1460 = vst [vmem:[#allocation3 + $0x1e0] sm:$0xf] %v1452_v43  ;;  %1461 = vst [vmem:[#allocation3 + $0x1f0] sm:$0xf] %v1453_v14  ;;  %2370 = vrot.lane.b32.xlu1 %v2363_v16, %s3122_s1  ;;  %2619 = vmatprep.subr.mxu1 %v2509_v32  ;;  %v1373_v50 = vpop.permute.xlu0 %1372  ;;  %v2486_v16 = vld [vmem:[#allocation3 + $0x1a8] sm:$0xff]  ;;  %v2483_v3 = vld [vmem:[#allocation3] sm:$0xff] }
 0x287   :  { %2620 = vmatpush1.msra.mxu1 %v2508_v42  ;;  %v1380_v49 = vsel %vm1378_vm13, %v4461_v9, %v1373_v50  ;;  %v1381_v12 = vsel %vm1378_vm13, %v1373_v50, %v5533_v47  ;;  %vm5536_vm5 = vmmov %vm5535_vm6  ;;  %vm5541_vm13 = vcmask 850944  }
 0x288   :  { %v1305_v7 = vpop.permute.xlu1 %1304  ;;  %2621 = vmatprep.subr.mxu1 %v2505_v58  ;;  %1388 = vst [vmem:[#allocation3 + $0xf8] sm:$0xf0] %v1380_v49  ;;  %1389 = vst [vmem:[#allocation3 + $0x78] sm:$0xf0] %v1381_v12  ;;  %v2474_v12 = vld [vmem:[#allocation3 + $0x180] sm:$0xff] }
 0x289   :  { %v1311_v29 = vsel %vm1308_vm14, %v4580_v8, %v1305_v7  ;;  %v1312_v22 = vsel %vm1308_vm14, %v1305_v7, %v5532_v55  ;;  %v2501_v8 = vld [vmem:[#allocation3 + $0x160] sm:$0xff]  ;;  %2261 = vrot.lane.b32.xlu0 %v2257_v6, %s3152_s21  ;;  %v2500_v15 = vld [vmem:[#allocation3 + $0x238] sm:$0xff]  ;;  %2622 = vmatpush1.msra.mxu1 %v2504_v5  ;;  %vm5544_vm2 = vmmov %vm5541_vm13 }
 0x28a   :  { %1319 = vst [vmem:[#allocation3 + $0x78] sm:$0xf] %v1311_v29  ;;  %1320 = vst [vmem:[#allocation3 + $0x170] sm:$0xf] %v1312_v22  ;;  %2438 = vrot.lane.b32.xlu1 %v4892_v46, %s3152_s21  ;;  %v2499_v0 = vld [vmem:[#allocation3 + $0x98] sm:$0xff]  ;;  %v2258_v46 = vcombine.high %v4956_v31, %v4956_v31  ;;  %v1235_v21 = vpop.permute.xlu0 %1234  ;;  %2623 = vmatprep.subr.mxu1 %v2501_v8  ;;  %v2478_v29 = vld [vmem:[#allocation3 + $0xd0] sm:$0xff] }
 0x28b   :  { %2546 = vmatprep.subr.mxu0 %v2499_v0  ;;  %v1242_v28 = vsel %vm5535_vm6, %v4481_v38, %v1235_v21  ;;  %v1243_v26 = vsel %vm5536_vm5, %v1235_v21, %v4676_v4  ;;  %v2495_v35 = vld [vmem:[#allocation3 + $0xe0] sm:$0xff]  ;;  %2624 = vmatpush1.msra.mxu1 %v2500_v15  ;;  %v2455_v38 = vld [vmem:[%s5327_s3 + $0x8] sm:$0xff]  ;;  %v2425_v4 = vmul.f32 %v2416_v37, %v2388_v10  ;;  %vm5546_vm6 = vmmov %vm5543_vm4 }
 0x28c   :  { %v1166_v39 = vpop.permute.xlu1 %1165  ;;  %2547 = vmatpush1.msra.mxu0 %v2498_v24  ;;  %1250 = vst [vmem:[#allocation3 + $0x220] sm:$0xf0] %v1242_v28  ;;  %1251 = vst [vmem:[#allocation3 + $0x1e8] sm:$0xf0] %v1243_v26  ;;  %3055 = vmatprep.mubr.msk.f32.mxu0 %vm2108_vm12, %v2455_v38 }
 0x28d   :  { %v1172_v9 = vsel %vm1169_vm7, %v4629_v30, %v1166_v39  ;;  %v1173_v59 = vsel %vm1169_vm7, %v1166_v39, %v5534_v53  ;;  %2259 = vrot.lane.b32.xlu0 %v2251_v45, %s3152_s21  ;;  %2548 = vmatprep.subr.mxu0 %v2495_v35  ;;  %v2494_v30 = vld [vmem:[#allocation3 + $0x198] sm:$0xff]  ;;  %v2431_v41 = vcombine.low %v2425_v4, %v2425_v4  ;;  %vm655_vm7 = vcmask 859136  }
 0x28e   :  { %1180 = vst [vmem:[#allocation3 + $0x1e8] sm:$0xf] %v1172_v9  ;;  %1181 = vst [vmem:[#allocation3 + $0x1c8] sm:$0xf] %v1173_v59  ;;  %2265 = vrot.lane.b32.xlu1 %v2258_v46, %s3152_s21  ;;  %2549 = vmatpush1.msra.mxu0 %v2494_v30  ;;  %v1517_v56 = vpop.permute.xlu0 %1516 }
 0x28f   :  { %3057 = vmatprep.mubr.msk.f32.mxu1 %vm2108_vm12, %v2455_v38  ;;  %v2491_v34 = vld [vmem:[#allocation3 + $0xf8] sm:$0xff] }
 0x290   :  { %v1067_v31 = vpop.permute.xlu1 %1066  ;;  %2550 = vmatprep.subr.mxu0 %v2491_v34 }
 0x291   :  { %v1073_v17 = vsel %vm5537_vm3, %v4656_v1, %v1067_v31  ;;  %v1074_v54 = vsel %vm5539_vm10, %v1067_v31, %v5538_v57  ;;  %v1522_v1 = vsel %vm1518_vm8, %v5531_v20, %v1517_v56  ;;  %2372 = vrot.lane.b32.xlu0 %v2358_v23, %s3122_s1  ;;  %2551 = vmatpush1.msra.mxu0 %v2490_v48  ;;  %vm5540_vm8 = vcmask 195584   ;;  %v2496_v20 = vld [vmem:[#allocation3 + $0x1e0] sm:$0xff]  ;;  %v2493_v62 = vld [vmem:[#allocation3 + $0x170] sm:$0xff]  ;;  %vm5548_vm3 = vmmov %vm5544_vm2 }
 0x292   :  { %1081 = vst [vmem:[#allocation3 + $0x188] sm:$0xf] %v1073_v17  ;;  %1082 = vst [vmem:[#allocation3 + $0x38] sm:$0xf] %v1074_v54  ;;  %v997_v61 = vpop.permute.xlu0 %996  ;;  %vm5549_vm10 = vcmask 56320  }
 0x293   :  { %1530 = vst [vmem:[#allocation3 + $0x1f0] sm:$0xf0] %v1522_v1  ;;  %v1004_v19 = vsel %vm1002_vm15, %v4513_v36, %v997_v61  ;;  %v2487_v52 = vld [vmem:[#allocation3 + $0x220] sm:$0xff]  ;;  %v2253_v36 = vmul.f32 %v2244_v13, %v2217_v27  ;;  %v2492_v13 = vld [vmem:[#allocation3 + $0x78] sm:$0xff]  ;;  %vm5542_vm14 = vmmov %vm5540_vm8 }
 0x294   :  { %v5021_v37 = vpop.permute.xlu1 %716  ;;  %1012 = vst [vmem:[#allocation3 + $0x138] sm:$0xf0] %v1004_v19  ;;  %2552 = vmatprep.subr.mxu0 %v2487_v52 }
 0x295   :  { %2440 = vrot.lane.b32.xlu0 %v2431_v41, %s3152_s21  ;;  %2553 = vmatpush1.msra.mxu0 %v2486_v16  ;;  %v2489_v60 = vld [vmem:[#allocation3 + $0x1c8] sm:$0xff] }
 0x296   :  { %v5028_v45 = vpop.permute.xlu0 %859  ;;  %2554 = vmatprep.subr.mxu0 %v2483_v3  ;;  %v2488_v55 = vld [vmem:[#allocation3 + $0x1e8] sm:$0xff] }
 0x297   :  { %v867_v32 = vsel %vm865_vm11, %v4531_v2, %v5028_v45  ;;  %2555 = vmatpush1.msra.mxu0 %v2482_v18 }
 0x298   :  { %v929_v43 = vpop.permute.xlu1 %928  ;;  %875 = vst [vmem:[#allocation3 + $0x190] sm:$0xf0] %v867_v32 }
 0x299   :  { %v934_v14 = vsel %vm5540_vm8, %v4703_v40, %v929_v43  ;;  %2267 = vrot.lane.b32.xlu0 %v2253_v36, %s3152_s21  ;;  %v2485_v7 = vld [vmem:[#allocation3 + $0x38] sm:$0xff]  ;;  %v2484_v58 = vld [vmem:[#allocation3 + $0x188] sm:$0xff]  ;;  %vm5551_vm8 = vcmask 990208  }
 0x29a   :  { %942 = vst [vmem:[#allocation3 + $0x60] sm:$0xf] %v934_v14  ;;  %v2497_v25 = vld [vmem:[#allocation3 + $0x1f0] sm:$0xff]  ;;  %v5037_v11 = vpop.permute.xlu0 %649 }
 0x29b   :  { %2625 = vmatprep.subr.mxu1 %v2497_v25  ;;  %v657_v2 = vsel %vm655_vm7, %v4855_v51, %v5037_v11  ;;  %v2479_v42 = vld [vmem:[#allocation3 + $0x138] sm:$0xff] }
 0x29c   :  { %v999_v40 = vpop.permute.xlu1 %998  ;;  %2626 = vmatpush1.msra.mxu1 %v2496_v20  ;;  %665 = vst [vmem:[#allocation3 + $0x110] sm:$0xf] %v657_v2  ;;  %2556 = vmatprep.subr.mxu0 %v2479_v42 }
 0x29d   :  { %v1005_v44 = vsel %vm1002_vm15, %v997_v61, %v999_v40  ;;  %2627 = vmatprep.subr.mxu1 %v2493_v62  ;;  %2557 = vmatpush1.msra.mxu0 %v2478_v29 }
 0x29e   :  { %1013 = vst [vmem:[#allocation3 + $0x60] sm:$0xf0] %v1005_v44  ;;  %2628 = vmatpush1.msra.mxu1 %v2492_v13  ;;  %v5044_v50 = vpop.permute.xlu0 %718 }
 0x29f   :  { %2629 = vmatprep.subr.mxu1 %v2489_v60  ;;  %v726_v49 = vsel %vm5541_vm13, %v5021_v37, %v5044_v50  ;;  %v2475_v47 = vld [vmem:[#allocation3 + $0x190] sm:$0xff]  ;;  %vm5552_vm13 = vmmov %vm5544_vm2 }
 0x2a0   :  { %v646_v22 = vpop.permute.xlu1 %645  ;;  %2630 = vmatpush1.msra.mxu1 %v2488_v55  ;;  %734 = vst [vmem:[#allocation3 + $0x110] sm:$0xf0] %v726_v49  ;;  %2558 = vmatprep.subr.mxu0 %v2475_v47 }
 0x2a1   :  { %v656_v6 = vsel %vm655_vm7, %v646_v22, %v4855_v51  ;;  %2631 = vmatprep.subr.mxu1 %v2485_v7  ;;  %2559 = vmatpush1.msra.mxu0 %v2474_v12 }
 0x2a2   :  { %664 = vst [vmem:[#allocation3 + $0x108] sm:$0xf] %v656_v6  ;;  %2632 = vmatpush1.msra.mxu1 %v2484_v58  ;;  %v931_v8 = vpop.permute.xlu0 %930 }
 0x2a3   :  { %v935_v24 = vsel %vm5542_vm14, %v929_v43, %v931_v8 }
 0x2a4   :  { %v512_v0 = vpop.permute.xlu1 %511  ;;  %943 = vst [vmem:[#allocation3 + $0x1b8] sm:$0xf] %v935_v24 }
 0x2a5   :  { %v2480_v35 = vld [vmem:[#allocation3 + $0x60] sm:$0xff] }
 0x2a7   :  { %v1001_v5 = vpop.permute.xlu0 %1000  ;;  %v2471_v39 = vld [vmem:[#allocation3 + $0x110] sm:$0xff] }
 0x2a8   :  { %v579_v51 = vpop.permute.xlu1 %578  ;;  %v1006_v15 = vsel %vm1002_vm15, %v999_v40, %v1001_v5  ;;  %2560 = vmatprep.subr.mxu0 %v2471_v39  ;;  %vm5545_vm15 = vcmask 973824  }
 0x2a9   :  { %1014 = vst [vmem:[#allocation3 + $0x1b8] sm:$0xf0] %v1006_v15  ;;  %vm5547_vm5 = vmmov %vm5545_vm15 }
 0x2aa   :  { %vm5553_vm14 = vmmov %vm5547_vm5 }
 0x2ab   :  { %v715_v53 = vpop.permute.xlu0 %714 }
 0x2ac   :  { %v790_v46 = vpop.permute.xlu1 %789  ;;  %v725_v59 = vsel %vm5544_vm2, %v715_v53, %v5021_v37  ;;  %vm5556_vm2 = vmmov %vm5549_vm10 }
 0x2ad   :  { %v796_v9 = vsel %vm5543_vm4, %v4734_v63, %v790_v46  ;;  %733 = vst [vmem:[#allocation3 + $0x108] sm:$0xf0] %v725_v59  ;;  %vm5554_vm4 = vmmov %vm5551_vm8 }
 0x2ae   :  { %804 = vst [vmem:[#allocation3 + $0x140] sm:$0xf] %v796_v9 }
 0x2af   :  { %v514_v33 = vpop.permute.xlu0 %513 }
 0x2b0   :  { %v862_v21 = vpop.permute.xlu1 %861  ;;  %v520_v28 = vsel %vm326_vm1, %v512_v0, %v514_v33  ;;  %v2481_v26 = vld [vmem:[#allocation3 + $0x1b8] sm:$0xff] }
 0x2b1   :  { %v868_v10 = vsel %vm865_vm11, %v5028_v45, %v862_v21  ;;  %528 = vst [vmem:[#allocation3 + $0x18] sm:$0xf] %v520_v28  ;;  %2633 = vmatprep.subr.mxu1 %v2481_v26 }
 0x2b2   :  { %876 = vst [vmem:[#allocation3 + $0x140] sm:$0xf0] %v868_v10  ;;  %2634 = vmatpush1.msra.mxu1 %v2480_v35 }
 0x2b3   :  { %v581_v31 = vpop.permute.xlu0 %580 }
 0x2b4   :  { %v510_v30 = vpop.permute.xlu1 %509  ;;  %v587_v17 = vsel %vm5545_vm15, %v579_v51, %v581_v31  ;;  %v2470_v57 = vld [vmem:[#allocation3 + $0x108] sm:$0xff]  ;;  %vm5557_vm15 = vmmov %vm5556_vm2 }
 0x2b5   :  { %v519_v63 = vsel %vm326_vm1, %v510_v30, %v512_v0  ;;  %595 = vst [vmem:[#allocation3 + $0x18] sm:$0xf0] %v587_v17  ;;  %2561 = vmatpush1.msra.mxu0 %v2470_v57 }
 0x2b6   :  { %527 = vst [vmem:[#allocation3 + $0xd8] sm:$0xf] %v519_v63 }
 0x2b7   :  { %v792_v38 = vpop.permute.xlu0 %791 }
 0x2b8   :  { %v414_v54 = vpop.permute.xlu1 %413  ;;  %v797_v4 = vsel %vm5546_vm6, %v790_v46, %v792_v38  ;;  %vm5558_vm6 = vmmov %vm5554_vm4 }
 0x2b9   :  { %805 = vst [vmem:[#allocation3 + $0x1c0] sm:$0xf] %v797_v4  ;;  %v2476_v3 = vld [vmem:[#allocation3 + $0x140] sm:$0xff] }
 0x2bb   :  { %v864_v56 = vpop.permute.xlu0 %863 }
 0x2bc   :  { %v482_v23 = vpop.permute.xlu1 %481  ;;  %v869_v1 = vsel %vm865_vm11, %v862_v21, %v864_v56  ;;  %v2467_v34 = vld [vmem:[#allocation3 + $0x18] sm:$0xff]  ;;  %vm5550_vm11 = vmmov %vm5549_vm10 }
 0x2bd   :  { %877 = vst [vmem:[#allocation3 + $0x1c0] sm:$0xf0] %v869_v1  ;;  %2562 = vmatprep.subr.mxu0 %v2467_v34 }
 0x2bf   :  { %v577_v41 = vpop.permute.xlu0 %576 }
 0x2c0   :  { %v652_v48 = vpop.permute.xlu1 %651  ;;  %v586_v61 = vsel %vm5547_vm5, %v577_v41, %v579_v51 }
 0x2c1   :  { %v658_v37 = vsel %vm655_vm7, %v5037_v11, %v652_v48  ;;  %594 = vst [vmem:[#allocation3 + $0xd8] sm:$0xf0] %v586_v61 }
 0x2c2   :  { %666 = vst [vmem:[#allocation3 + $0x1f8] sm:$0xf] %v658_v37 }
 0x2c3   :  { %v416_v27 = vpop.permute.xlu0 %415 }
 0x2c4   :  { %v721_v19 = vpop.permute.xlu1 %720  ;;  %v423_v16 = vsel %vm5549_vm10, %v414_v54, %v416_v27  ;;  %v2477_v43 = vld [vmem:[#allocation3 + $0x1c0] sm:$0xff] }
 0x2c5   :  { %v727_v52 = vsel %vm5548_vm3, %v5044_v50, %v721_v19  ;;  %431 = vst [vmem:[#allocation3 + $0xf0] sm:$0xf] %v423_v16  ;;  %2635 = vmatprep.subr.mxu1 %v2477_v43  ;;  %vm5560_vm3 = vcmask 916480  }
 0x2c6   :  { %735 = vst [vmem:[#allocation3 + $0x1f8] sm:$0xf0] %v727_v52  ;;  %2636 = vmatpush1.msra.mxu1 %v2476_v3  ;;  %vm5561_vm10 = vmmov %vm5560_vm3 }
 0x2c7   :  { %v484_v18 = vpop.permute.xlu0 %483 }
 0x2c8   :  { %v412_v14 = vpop.permute.xlu1 %411  ;;  %v490_v36 = vsel %vm5551_vm8, %v482_v23, %v484_v18  ;;  %v2466_v32 = vld [vmem:[#allocation3 + $0xd8] sm:$0xff]  ;;  %vm5563_vm8 = vmmov %vm5560_vm3 }
 0x2c9   :  { %v422_v45 = vsel %vm5550_vm11, %v412_v14, %v414_v54  ;;  %498 = vst [vmem:[#allocation3 + $0xf0] sm:$0xf0] %v490_v36  ;;  %2563 = vmatpush1.msra.mxu0 %v2466_v32  ;;  %vm5562_vm11 = vmmov %vm5560_vm3 }
 0x2ca   :  { %430 = vst [vmem:[#allocation3 + $0xe8] sm:$0xf] %v422_v45 }
 0x2cb   :  { %v654_v20 = vpop.permute.xlu0 %653 }
 0x2cc   :  { %v345_v25 = vpop.permute.xlu1 %344  ;;  %v659_v40 = vsel %vm655_vm7, %v652_v48, %v654_v20  ;;  %vm5555_vm7 = vmmov %vm5547_vm5 }
 0x2cd   :  { %667 = vst [vmem:[#allocation3 + $0xb8] sm:$0xf] %v659_v40  ;;  %v2472_v49 = vld [vmem:[#allocation3 + $0x1f8] sm:$0xff]  ;;  %vm5559_vm5 = vmmov %vm5554_vm4 }
 0x2cf   :  { %v723_v11 = vpop.permute.xlu0 %722 }
 0x2d0   :  { %v516_v62 = vpop.permute.xlu1 %515  ;;  %v728_v13 = vsel %vm5552_vm13, %v721_v19, %v723_v11  ;;  %v2463_v2 = vld [vmem:[#allocation3 + $0xf0] sm:$0xff]  ;;  %vm5564_vm13 = vmmov %vm5560_vm3 }
 0x2d1   :  { %v521_v44 = vsel %vm326_vm1, %v514_v33, %v516_v62  ;;  %736 = vst [vmem:[#allocation3 + $0xb8] sm:$0xf0] %v728_v13  ;;  %2564 = vmatprep.subr.mxu0 %v2463_v2  ;;  %v2454_v13 = vld [vmem:[%s5327_s3] sm:$0xff] }
 0x2d2   :  { %529 = vst [vmem:[#allocation3 + $0xb0] sm:$0xf] %v521_v44 }
 0x2d3   :  { %v480_v7 = vpop.permute.xlu0 %479 }
 0x2d4   :  { %v583_v42 = vpop.permute.xlu1 %582  ;;  %v489_v29 = vsel %vm5554_vm4, %v480_v7, %v482_v23 }
 0x2d5   :  { %v588_v60 = vsel %vm5553_vm14, %v581_v31, %v583_v42  ;;  %497 = vst [vmem:[#allocation3 + $0xe8] sm:$0xf0] %v489_v29  ;;  %vm5566_vm14 = vmmov %vm5560_vm3  ;;  %v2456_v29 = vld [vmem:[%s5327_s3 + $0x10] sm:$0xff] }
 0x2d6   :  { %596 = vst [vmem:[#allocation3 + $0xb0] sm:$0xf0] %v588_v60  ;;  %v2457_v60 = vld [vmem:[%s5327_s3 + $0x18] sm:$0xff] }
 0x2d7   :  { %v347_v6 = vpop.permute.xlu0 %346 }
 0x2d8   :  { %v343_v55 = vpop.permute.xlu1 %342  ;;  %v353_v50 = vsel %vm208_vm9, %v345_v25, %v347_v6  ;;  %v2473_v58 = vld [vmem:[#allocation3 + $0xb8] sm:$0xff] }
 0x2d9   :  { %v352_v22 = vsel %vm208_vm9, %v343_v55, %v345_v25  ;;  %361 = vst [vmem:[#allocation3 + $0x8] sm:$0xf0] %v353_v50  ;;  %2637 = vmatprep.subr.mxu1 %v2473_v58 }
 0x2da   :  { %360 = vst [vmem:[#allocation3 + $0xc8] sm:$0xf0] %v352_v22  ;;  %2638 = vmatpush1.msra.mxu1 %v2472_v49  ;;  %v3159_v49 = vmov 0  }
 0x2db   :  { %v518_v12 = vpop.permute.xlu0 %517  ;;  %3100 = vset.pattern.permute.xlu1 %v3159_v49  ;;  %3099 = vset.pattern.permute.xlu0 %v3159_v49 }
 0x2dc   :  { %v420_v47 = vpop.permute.xlu1 %419  ;;  %v522_v0 = vsel %vm326_vm1, %v516_v62, %v518_v12  ;;  %v2462_v8 = vld [vmem:[#allocation3 + $0xe8] sm:$0xff] }
 0x2dd   :  { %530 = vst [vmem:[#allocation3 + $0x158] sm:$0xf] %v522_v0  ;;  %2565 = vmatpush1.msra.mxu0 %v2462_v8  ;;  %v2468_v35 = vld [vmem:[#allocation3 + $0xb0] sm:$0xff] }
 0x2df   :  { %v585_v51 = vpop.permute.xlu0 %584 }
 0x2e0   :  { %v488_v24 = vpop.permute.xlu1 %487  ;;  %v589_v15 = vsel %vm5555_vm7, %v583_v42, %v585_v51  ;;  %v2459_v39 = vld [vmem:[#allocation3 + $0x8] sm:$0xff] }
 0x2e1   :  { %v2458_v5 = vld [vmem:[#allocation3 + $0xc8] sm:$0xff]  ;;  %597 = vst [vmem:[#allocation3 + $0x158] sm:$0xf0] %v589_v15  ;;  %2566 = vmatprep.subr.mxu0 %v2459_v39 }
 0x2e2   :  { %2567 = vmatpush1.msra.mxu0 %v2458_v5 }
 0x2e3   :  { %v418_v9 = vpop.permute.xlu0 %417 }
 0x2e4   :  { %v2369_v46 = vpop.permute.xlu1 %2368  ;;  %v424_v53 = vsel %vm5556_vm2, %v416_v27, %v418_v9  ;;  %v425_v59 = vsel %vm5557_vm15, %v418_v9, %v420_v47 }
 0x2e5   :  { %432 = vst [vmem:[#allocation3 + $0x70] sm:$0xf] %v424_v53  ;;  %433 = vst [vmem:[#allocation3 + $0x120] sm:$0xf] %v425_v59 }
 0x2e7   :  { %v486_v10 = vpop.permute.xlu0 %485 }
 0x2e8   :  { %v2437_v21 = vpop.permute.xlu1 %2436  ;;  %v491_v33 = vsel %vm5558_vm6, %v484_v18, %v486_v10  ;;  %v492_v28 = vsel %vm5559_vm5, %v486_v10, %v488_v24  ;;  %v2469_v26 = vld [vmem:[#allocation3 + $0x158] sm:$0xff] }
 0x2e9   :  { %499 = vst [vmem:[#allocation3 + $0x70] sm:$0xf0] %v491_v33  ;;  %500 = vst [vmem:[#allocation3 + $0x120] sm:$0xf0] %v492_v28  ;;  %2639 = vmatprep.subr.mxu1 %v2469_v26 }
 0x2ea   :  { %2640 = vmatpush1.msra.mxu1 %v2468_v35 }
 0x2eb   :  { %v2367_v63 = vpop.permute.xlu0 %2366 }
 0x2ec   :  { %v2433_v30 = vpop.permute.xlu1 %2432  ;;  %v2375_v31 = vsel %vm326_vm1, %v2367_v63, %v2369_v46 }
 0x2ed   :  { %2383 = vst [vmem:[#allocation3 + $0xa8] sm:$0xf] %v2375_v31  ;;  %v2691_v31 = vld [vmem:[%s5328_s4 + $0x8] sm:$0xff] }
 0x2ef   :  { %v2435_v57 = vpop.permute.xlu0 %2434 }
 0x2f0   :  { %v351_v17 = vpop.permute.xlu1 %350  ;;  %v2443_v54 = vsel %vm5560_vm3, %v2435_v57, %v2437_v21  ;;  %v2442_v38 = vsel %vm5561_vm10, %v2433_v30, %v2435_v57  ;;  %v2465_v4 = vld [vmem:[#allocation3 + $0x120] sm:$0xff]  ;;  %v2464_v23 = vld [vmem:[#allocation3 + $0x70] sm:$0xff] }
 0x2f1   :  { %2451 = vst [vmem:[#allocation3 + $0xa8] sm:$0xf0] %v2443_v54  ;;  %2450 = vst [vmem:[#allocation3 + $0x148] sm:$0xf0] %v2442_v38  ;;  %2641 = vmatprep.subr.mxu1 %v2465_v4  ;;  %v2690_v57 = vld [vmem:[%s5328_s4] sm:$0xff] }
 0x2f2   :  { %2642 = vmatpush1.msra.mxu1 %v2464_v23 }
 0x2f3   :  { %v2365_v1 = vpop.permute.xlu0 %2364 }
 0x2f4   :  { %v2264_v56 = vpop.permute.xlu1 %2263  ;;  %v2374_v34 = vsel %vm326_vm1, %v2365_v1, %v2367_v63 }
 0x2f5   :  { %2382 = vst [vmem:[#allocation3 + $0x148] sm:$0xf] %v2374_v34 }
 0x2f7   :  { %v349_v41 = vpop.permute.xlu0 %348 }
 0x2f8   :  { %v2371_v48 = vpop.permute.xlu1 %2370  ;;  %v354_v61 = vsel %vm208_vm9, %v347_v6, %v349_v41  ;;  %v355_v19 = vsel %vm208_vm9, %v349_v41, %v351_v17  ;;  %v2527_v52 = vld [vmem:[#allocation3 + $0xa8] sm:$0xff]  ;;  %vm5565_vm9 = vmmov %vm5560_vm3 }
 0x2f9   :  { %v2376_v37 = vsel %vm326_vm1, %v2369_v46, %v2371_v48  ;;  %362 = vst [vmem:[#allocation3 + $0x40] sm:$0xf0] %v354_v61  ;;  %363 = vst [vmem:[#allocation3 + $0x28] sm:$0xf0] %v355_v19  ;;  %2596 = vmatprep.subr.mxu0 %v2527_v52  ;;  %v2692_v17 = vld [vmem:[%s5329_s5] sm:$0xff] }
 0x2fa   :  { %2384 = vst [vmem:[#allocation3 + $0x150] sm:$0xf] %v2376_v37  ;;  %v5568_v37 = vld [vmem:[#allocation10_spill] sm:$0xff]  ;;  %v5569_v19 = vld [vmem:[#allocation8_spill] sm:$0xff] }
 0x2fb   :  { %v2262_v43 = vpop.permute.xlu0 %2261  ;;  %v2800_v41 = vsel %vm40_vm0, %v5568_v37, 0.0  ;;  %v2810_v61 = vmul.f32 %v5568_v37, %v5568_v37  ;;  %v2799_v52 = vsel %vm40_vm0, %v5569_v19, 0.0 }
 0x2fc   :  { %v2439_v27 = vpop.permute.xlu1 %2438  ;;  %v2270_v3 = vsel %vm5563_vm8, %v2262_v43, %v2264_v56  ;;  %v2526_v14 = vld [vmem:[#allocation3 + $0x148] sm:$0xff] }
 0x2fd   :  { %v2444_v16 = vsel %vm5562_vm11, %v2437_v21, %v2439_v27  ;;  %2278 = vst [vmem:[#allocation3 + $0x58] sm:$0xf] %v2270_v3  ;;  %2597 = vmatpush2.msra.mxu0 %v2526_v14  ;;  %v5570_v3 = vld [vmem:[#allocation9_spill] sm:$0xff] }
 0x2fe   :  { %2452 = vst [vmem:[#allocation3 + $0x150] sm:$0xf0] %v2444_v16  ;;  %v2801_v16 = vadd.f32 %v2800_v41, %v2799_v52  ;;  %v2802_v14 = vsel %vm40_vm0, %v5570_v3, 0.0 }
 0x2ff   :  { %v2260_v36 = vpop.permute.xlu0 %2259 }
 0x300   :  { %v2266_v45 = vpop.permute.xlu1 %2265  ;;  %v2269_v32 = vsel %vm5565_vm9, %v2260_v36, %v2262_v43  ;;  %v2461_v25 = vld [vmem:[#allocation3 + $0x28] sm:$0xff]  ;;  %v2460_v20 = vld [vmem:[#allocation3 + $0x40] sm:$0xff]  ;;  %v2814_v43 = vsel %vm40_vm0, %v2810_v61, 0.0  ;;  %v2803_v36 = vadd.f32 %v2802_v14, %v2801_v16 }
 0x301   :  { %v2271_v18 = vsel %vm5564_vm13, %v2264_v56, %v2266_v45  ;;  %2277 = vst [vmem:[#allocation3 + $0x1a0] sm:$0xf] %v2269_v32  ;;  %2643 = vmatprep.subr.mxu1 %v2461_v25 }
 0x302   :  { %2279 = vst [vmem:[#allocation3 + $0x118] sm:$0xf] %v2271_v18  ;;  %2644 = vmatpush1.msra.mxu1 %v2460_v20  ;;  %v5571_v20 = vld [vmem:[#allocation11_spill] sm:$0xff] }
 0x303   :  { %v2373_v40 = vpop.permute.xlu0 %2372 }
 0x304   :  { %v2377_v62 = vsel %vm326_vm1, %v2371_v48, %v2373_v40  ;;  %v2523_v44 = vld [vmem:[#allocation3 + $0x58] sm:$0xff]  ;;  %vm5567_vm1 = vmmov %vm5560_vm3  ;;  %v2693_v48 = vld [vmem:[%s5329_s5 + $0x8] sm:$0xff]  ;;  %v2812_v40 = vmul.f32 %v5571_v20, %v5571_v20 }
 0x305   :  { %2385 = vst [vmem:[#allocation3 + $0xa0] sm:$0xf] %v2377_v62  ;;  %2598 = vmatprep.subr.mxu0 %v2523_v44  ;;  %v2528_v6 = vld [vmem:[#allocation3 + $0x150] sm:$0xff]  ;;  %v2804_v62 = vsel %vm40_vm0, %v5571_v20, 0.0 }
 0x306   :  { %v2805_v44 = vadd.f32 %v2804_v62, %v2803_v36  ;;  %v2863_v62 = vld [vmem:[%s5330_s6 + $0xc] sm:$0xff] }
 0x307   :  { %v2441_v11 = vpop.permute.xlu0 %2440 }
 0x308   :  { %v2445_v2 = vsel %vm5566_vm14, %v2439_v27, %v2441_v11  ;;  %v2522_v42 = vld [vmem:[#allocation3 + $0x1a0] sm:$0xff]  ;;  %v2809_v27 = vmul.f32 %v5569_v19, %v5569_v19 }
 0x309   :  { %2453 = vst [vmem:[#allocation3 + $0xa0] sm:$0xf0] %v2445_v2  ;;  %2599 = vmatpush2.msra.mxu0 %v2522_v42  ;;  %v2524_v58 = vld [vmem:[#allocation3 + $0x118] sm:$0xff] }
 0x30a   :  { %2601 = vmatmul.mubr.f32.vlgmr.msra.gmra.mxu0 %v2454_v13  ;;  %v2813_v18 = vsel %vm40_vm0, %v2809_v27, 0.0 }
 0x30b   :  { %v2268_v7 = vpop.permute.xlu0 %2267  ;;  %3056 = vmatprep.mubr.msk.f32.mxu0 %vm2108_vm12, %v2457_v60  ;;  %v2815_v32 = vadd.f32 %v2814_v43, %v2813_v18 }
 0x30c   :  { %v2272_v55 = vsel %vm5567_vm1, %v2266_v45, %v2268_v7  ;;  %v2811_v45 = vmul.f32 %v5570_v3, %v5570_v3 }
 0x30d   :  { %2280 = vst [vmem:[#allocation3 + $0x20] sm:$0xf] %v2272_v55 }
 0x30e   :  { %2607 = vmatmul.mubr.f32.gmra.mxu0 %v2456_v29  ;;  %v2816_v25 = vsel %vm40_vm0, %v2811_v45, 0.0 }
 0x30f   :  { %v2817_v11 = vadd.f32 %v2816_v25, %v2815_v32  ;;  %v2862_v25 = vld [vmem:[%s5330_s6 + $0x4] sm:$0xff] }
 0x310   :  { %v2529_v22 = vld [vmem:[#allocation3 + $0xa0] sm:$0xff] }
 0x311   :  { %2673 = vmatprep.subr.mxu1 %v2529_v22 }
 0x312   :  { %2674 = vmatpush2.msra.mxu1 %v2528_v6 }
 0x314   :  { %v2525_v50 = vld [vmem:[#allocation3 + $0x20] sm:$0xff] }
 0x315   :  { %2675 = vmatprep.subr.mxu1 %v2525_v50 }
 0x316   :  { %2676 = vmatpush2.msra.mxu1 %v2524_v58 }
 0x317   :  { %2678 = vmatmul.mubr.f32.vlgmr.msra.gmra.mxu1 %v2454_v13  ;;  %v2818_v13 = vsel %vm40_vm0, %v2812_v40, 0.0 }
 0x318   :  { %3058 = vmatprep.mubr.msk.f32.mxu1 %vm2108_vm12, %v2457_v60  ;;  %v2819_v2 = vadd.f32 %v2818_v13, %v2817_v11 }
 0x31b   :  { %2684 = vmatmul.mubr.f32.gmra.mxu1 %v2456_v29 }
 0x3ca   :  { %v5108_v47 = vpop.f32.mrf.mxu0 }
 0x3cb   :  { %v2707_v5 = vmul.f32 %v5108_v47, %v5108_v47 }
 0x3cc   :  { %v5110_v12 = vpop.f32.mrf.mxu0 }
 0x3cd   :  { %v2694_v8 = vadd.f32 %v5110_v12, %v5108_v47  ;;  %v2708_v15 = vmul.f32 %v5110_v12, %v5110_v12 }
 0x3ce   :  { %v5112_v0 = vpop.f32.mrf.mxu0 }
 0x3cf   :  { %v2715_v10 = vadd.f32 %v2708_v15, %v2707_v5  ;;  %v2711_v54 = vmul.f32 %v5112_v0, %v5112_v0 }
 0x3d0   :  { %v5116_v24 = vpop.f32.mrf.mxu0 }
 0x3d1   :  { %v2699_v9 = vadd.f32 %v5116_v24, %v5112_v0  ;;  %v2712_v38 = vmul.f32 %v5116_v24, %v5116_v24 }
 0x3d3   :  { %v2720_v23 = vadd.f32 %v2712_v38, %v2711_v54 }
 0x3d7   :  { %v5118_v51 = vpop.f32.mrf.mxu1 }
 0x3d8   :  { %v2695_v39 = vadd.f32 %v2694_v8, %v5118_v51  ;;  %v2709_v53 = vmul.f32 %v5118_v51, %v5118_v51 }
 0x3d9   :  { %v5125_v46 = vpop.f32.mrf.mxu1 }
 0x3da   :  { %v2696_v59 = vadd.f32 %v2695_v39, %v5125_v46  ;;  %v2716_v26 = vadd.f32 %v2715_v10, %v2709_v53  ;;  %v2710_v35 = vmul.f32 %v5125_v46, %v5125_v46 }
 0x3db   :  { %v5132_v21 = vpop.f32.mrf.mxu1 }
 0x3dc   :  { %v2700_v33 = vadd.f32 %v2699_v9, %v5132_v21  ;;  %2697 = vadd.xlane.f32.xlu1 %v2696_v59  ;;  %v2717_v63 = vadd.f32 %v2716_v26, %v2710_v35  ;;  %v2713_v4 = vmul.f32 %v5132_v21, %v5132_v21 }
 0x3dd   :  { %v5135_v28 = vpop.f32.mrf.mxu1 }
 0x3de   :  { %v2701_v30 = vadd.f32 %v2700_v33, %v5135_v28  ;;  %v2721_v56 = vadd.f32 %v2720_v23, %v2713_v4  ;;  %v2714_v1 = vmul.f32 %v5135_v28, %v5135_v28 }
 0x3e0   :  { %2702 = vadd.xlane.f32.xlu0 %v2701_v30  ;;  %v2722_v34 = vadd.f32 %v2721_v56, %v2714_v1 }
 0x3e4   :  { %2718 = vadd.xlane.f32.xlu0 %v2717_v63 }
 0x3ed   :  { %2760 = vperm.xlu1 %3100, %v2691_v31  }
 0x3f1   :  { %2773 = vperm.xlu1 %3100, %v2692_v17  }
 0x3fa   :  { %2755 = vperm.xlu0 %3099, %v2690_v57  }
 0x415   :  { %2723 = vadd.xlane.f32.xlu1 %v2722_v34 }
 0x426   :  { %2778 = vperm.xlu1 %3100, %v2693_v48  }
 0x44a   :  { %2806 = vadd.xlane.f32.xlu1 %v2805_v44 }
 0x44e   :  { %2820 = vadd.xlane.f32.xlu1 %v2819_v2 }
 0x465   :  { %v2698_v42 = vpop.xlane.xlu1 %2697 }
 0x466   :  { %v2705_v7 = vmul.f32 0.001953125, %v2698_v42 }
 0x468   :  { %v2727_v55 = vmul.f32 %v2705_v7, %v2705_v7  ;;  %v2733_v8 = vsub.f32 %v5108_v47, %v2705_v7  ;;  %v2734_v5 = vsub.f32 %v5110_v12, %v2705_v7  ;;  %v2735_v15 = vsub.f32 %v5118_v51, %v2705_v7 }
 0x469   :  { %v2703_v60 = vpop.xlane.xlu0 %2702  ;;  %v2761_v49 = vpop.permute.xlu1 %2760  ;;  %v2736_v39 = vsub.f32 %v5125_v46, %v2705_v7 }
 0x46a   :  { %v2706_v43 = vmul.f32 0.001953125, %v2703_v60 }
 0x46c   :  { %v2728_v18 = vmul.f32 %v2706_v43, %v2706_v43  ;;  %v2737_v44 = vsub.f32 %v5112_v0, %v2706_v43  ;;  %v2738_v11 = vsub.f32 %v5116_v24, %v2706_v43  ;;  %v2739_v13 = vsub.f32 %v5132_v21, %v2706_v43 }
 0x46d   :  { %v2719_v29 = vpop.xlane.xlu0 %2718  ;;  %v2774_v17 = vpop.permute.xlu1 %2773  ;;  %v2740_v2 = vsub.f32 %v5135_v28, %v2706_v43 }
 0x46e   :  { %v2725_v22 = vmul.f32 0.001953125, %v2719_v29 }
 0x470   :  { %v2729_v6 = vsub.f32 %v2725_v22, %v2727_v55 }
 0x472   :  { %v2731_v50 = vmax.f32 %v2729_v6, 0.0 }
 0x474   :  { %v2741_v58 = vadd.f32 1e-05, %v2731_v50 }
 0x475   :  { %v2756_v53 = vpop.permute.xlu0 %2755 }
 0x476   :  { %3105 = vrsqrt.f32 %v2741_v58 }
 0x483   :  { %v3106_v9 = vpop.eup %3105 }
 0x484   :  { %v2745_v59 = vmul.f32 %v3106_v9, %v2733_v8  ;;  %v2746_v10 = vmul.f32 %v3106_v9, %v2734_v5  ;;  %v2747_v33 = vmul.f32 %v3106_v9, %v2735_v15  ;;  %v2748_v26 = vmul.f32 %v3106_v9, %v2736_v39 }
 0x486   :  { %v2763_v35 = vmul.f32 %v2756_v53, %v2745_v59  ;;  %v2764_v30 = vmul.f32 %v2756_v53, %v2746_v10  ;;  %v2765_v63 = vmul.f32 %v2756_v53, %v2747_v33  ;;  %v2766_v31 = vmul.f32 %v2756_v53, %v2748_v26 }
 0x488   :  { %v2781_v57 = vadd.f32 %v2774_v17, %v2763_v35  ;;  %v2782_v54 = vadd.f32 %v2774_v17, %v2764_v30  ;;  %v2783_v47 = vadd.f32 %v2774_v17, %v2765_v63  ;;  %v2784_v38 = vadd.f32 %v2774_v17, %v2766_v31  ;;  %v2797_v17 = vld [vmem:[%s5330_s6] sm:$0xf] }
 0x48a   :  { %v5184_v12 = vmax.f32 %v2781_v57, 0.0  ;;  %v5186_v51 = vmax.f32 %v2782_v54, 0.0  ;;  %v5188_v46 = vmax.f32 %v2783_v47, 0.0  ;;  %v5196_v1 = vmax.f32 %v2784_v38, 0.0  ;;  %v2864_v57 = vld [vmem:[%s5331_s7 + $0x4] sm:$0xff]  ;;  %v2865_v54 = vld [vmem:[%s5331_s7 + $0xc] sm:$0xff] }
 0x48b   :  { %v2798_v47 = vld [vmem:[%s5331_s7] sm:$0xf] }
 0x48c   :  { %v2866_v4 = vadd.f32 %v5186_v51, %v5184_v12  ;;  %v2878_v23 = vmul.f32 %v5184_v12, %v5184_v12  ;;  %v2879_v56 = vmul.f32 %v5186_v51, %v5186_v51  ;;  %v2880_v48 = vmul.f32 %v5188_v46, %v5188_v46 }
 0x48d   :  { %v2881_v27 = vmul.f32 %v5196_v1, %v5196_v1 }
 0x48e   :  { %v2867_v34 = vadd.f32 %v2866_v4, %v5188_v46  ;;  %v2886_v41 = vadd.f32 %v2879_v56, %v2878_v23 }
 0x490   :  { %v2868_v61 = vadd.f32 %v2867_v34, %v5196_v1  ;;  %v2887_v52 = vadd.f32 %v2886_v41, %v2880_v48 }
 0x492   :  { %2869 = vadd.xlane.f32.xlu1 %v2868_v61  ;;  %v2888_v16 = vadd.f32 %v2887_v52, %v2881_v27 }
 0x496   :  { %2889 = vadd.xlane.f32.xlu1 %v2888_v16 }
 0x49e   :  { %v2724_v14 = vpop.xlane.xlu1 %2723 }
 0x49f   :  { %v2726_v45 = vmul.f32 0.001953125, %v2724_v14 }
 0x4a1   :  { %v2730_v36 = vsub.f32 %v2726_v45, %v2728_v18 }
 0x4a2   :  { %v2779_v8 = vpop.permute.xlu1 %2778 }
 0x4a3   :  { %v2732_v32 = vmax.f32 %v2730_v36, 0.0 }
 0x4a5   :  { %v2742_v40 = vadd.f32 1e-05, %v2732_v32 }
 0x4a7   :  { %3107 = vrsqrt.f32 %v2742_v40  ;;  %2926 = vperm.xlu1 %3100, %v2862_v25  }
 0x4ab   :  { %2931 = vperm.xlu1 %3100, %v2863_v62  }
 0x4b4   :  { %v3108_v42 = vpop.eup %3107 }
 0x4b5   :  { %v2749_v60 = vmul.f32 %v3108_v42, %v2737_v44  ;;  %v2750_v7 = vmul.f32 %v3108_v42, %v2738_v11  ;;  %v2751_v29 = vmul.f32 %v3108_v42, %v2739_v13  ;;  %v2752_v55 = vmul.f32 %v3108_v42, %v2740_v2 }
 0x4b7   :  { %v2767_v22 = vmul.f32 %v2761_v49, %v2749_v60  ;;  %v2768_v6 = vmul.f32 %v2761_v49, %v2750_v7  ;;  %v2769_v50 = vmul.f32 %v2761_v49, %v2751_v29  ;;  %v2770_v58 = vmul.f32 %v2761_v49, %v2752_v55 }
 0x4b9   :  { %v2785_v5 = vadd.f32 %v2779_v8, %v2767_v22  ;;  %v2786_v15 = vadd.f32 %v2779_v8, %v2768_v6  ;;  %v2787_v39 = vadd.f32 %v2779_v8, %v2769_v50  ;;  %v2788_v0 = vadd.f32 %v2779_v8, %v2770_v58 }
 0x4bb   :  { %v5214_v9 = vmax.f32 %v2785_v5, 0.0  ;;  %v5216_v24 = vmax.f32 %v2786_v15, 0.0  ;;  %v5218_v21 = vmax.f32 %v2787_v39, 0.0  ;;  %v5222_v53 = vmax.f32 %v2788_v0, 0.0 }
 0x4bd   :  { %v2871_v28 = vadd.f32 %v5216_v24, %v5214_v9  ;;  %v2882_v10 = vmul.f32 %v5214_v9, %v5214_v9  ;;  %v2883_v33 = vmul.f32 %v5216_v24, %v5216_v24  ;;  %v2884_v35 = vmul.f32 %v5218_v21, %v5218_v21 }
 0x4be   :  { %v2885_v63 = vmul.f32 %v5222_v53, %v5222_v53 }
 0x4bf   :  { %v2872_v59 = vadd.f32 %v2871_v28, %v5218_v21  ;;  %v2891_v26 = vadd.f32 %v2883_v33, %v2882_v10 }
 0x4c1   :  { %v2873_v49 = vadd.f32 %v2872_v59, %v5222_v53  ;;  %v2892_v30 = vadd.f32 %v2891_v26, %v2884_v35 }
 0x4c3   :  { %2874 = vadd.xlane.f32.xlu0 %v2873_v49  ;;  %v2893_v31 = vadd.f32 %v2892_v30, %v2885_v63 }
 0x4cf   :  { %2894 = vadd.xlane.f32.xlu1 %v2893_v31 }
 0x4d3   :  { %v2807_v38 = vpop.xlane.xlu1 %2806 }
 0x4d4   :  { %v2808_v61 = vmul.f32 0.001953125, %v2807_v38 }
 0x4d6   :  { %v2823_v16 = vmul.f32 %v2808_v61, %v2808_v61  ;;  %v2826_v50 = vsub.f32 %v5569_v19, %v2808_v61 }
 0x4d7   :  { %v2821_v4 = vpop.xlane.xlu1 %2820 }
 0x4d8   :  { %v2822_v27 = vmul.f32 0.001953125, %v2821_v4 }
 0x4d9   :  { %2838 = vperm.xlu0 %3099, %v2797_v17  }
 0x4da   :  { %v2824_v14 = vsub.f32 %v2822_v27, %v2823_v16 }
 0x4dc   :  { %v2825_v18 = vmax.f32 %v2824_v14, 0.0 }
 0x4dd   :  { %2944 = vperm.xlu0 %3099, %v2864_v57  }
 0x4de   :  { %v2830_v36 = vadd.f32 1e-05, %v2825_v18 }
 0x4e0   :  { %2949 = vperm.xlu1 %3100, %v2865_v54  }
 0x4e1   :  { %2847 = vperm.xlu0 %3099, %v2798_v47  }
 0x51b   :  { %v2870_v23 = vpop.xlane.xlu1 %2869 }
 0x51c   :  { %v2876_v34 = vmul.f32 0.001953125, %v2870_v23 }
 0x51e   :  { %v2898_v41 = vmul.f32 %v2876_v34, %v2876_v34  ;;  %v2904_v62 = vsub.f32 %v5184_v12, %v2876_v34  ;;  %v2905_v44 = vsub.f32 %v5186_v51, %v2876_v34  ;;  %v2906_v11 = vsub.f32 %v5188_v46, %v2876_v34 }
 0x51f   :  { %v2890_v56 = vpop.xlane.xlu1 %2889  ;;  %v2907_v13 = vsub.f32 %v5196_v1, %v2876_v34  ;;  %v2827_v12 = vsub.f32 %v5568_v37, %v2808_v61  ;;  %v2828_v51 = vsub.f32 %v5570_v3, %v2808_v61  ;;  %v2829_v1 = vsub.f32 %v5571_v20, %v2808_v61 }
 0x520   :  { %v2896_v48 = vmul.f32 0.001953125, %v2890_v56 }
 0x522   :  { %v2900_v52 = vsub.f32 %v2896_v48, %v2898_v41 }
 0x523   :  { %v2927_v32 = vpop.permute.xlu1 %2926 }
 0x524   :  { %v2902_v43 = vmax.f32 %v2900_v52, 0.0 }
 0x526   :  { %v2912_v45 = vadd.f32 1e-05, %v2902_v43 }
 0x527   :  { %v5250_v29 = vpop.permute.xlu1 %2931 }
 0x528   :  { %3109 = vrsqrt.f32 %v2912_v45 }
 0x529   :  { %3111 = vrsqrt.f32 %v2830_v36 }
 0x535   :  { %v3110_v25 = vpop.eup %3109 }
 0x536   :  { %v2916_v2 = vmul.f32 %v3110_v25, %v2904_v62  ;;  %v2917_v42 = vmul.f32 %v3110_v25, %v2905_v44  ;;  %v2918_v60 = vmul.f32 %v3110_v25, %v2906_v11  ;;  %v2919_v7 = vmul.f32 %v3110_v25, %v2907_v13  ;;  %v3112_v6 = vpop.eup %3111 }
 0x537   :  { %v2832_v28 = vmul.f32 %v3112_v6, %v2826_v50  ;;  %v2833_v59 = vmul.f32 %v3112_v6, %v2827_v12  ;;  %v2834_v26 = vmul.f32 %v3112_v6, %v2828_v51  ;;  %v2835_v3 = vmul.f32 %v3112_v6, %v2829_v1 }
 0x538   :  { %v2934_v58 = vmul.f32 %v2927_v32, %v2916_v2  ;;  %v2935_v46 = vmul.f32 %v2927_v32, %v2917_v42  ;;  %v2936_v8 = vmul.f32 %v2927_v32, %v2918_v60  ;;  %v2937_v5 = vmul.f32 %v2927_v32, %v2919_v7 }
 0x54c   :  { %v2875_v40 = vpop.xlane.xlu0 %2874 }
 0x54d   :  { %v5252_v55 = vmul.f32 0.001953125, %v2875_v40 }
 0x54f   :  { %v2899_v39 = vmul.f32 %v5252_v55, %v5252_v55  ;;  %v2908_v36 = vsub.f32 %v5214_v9, %v5252_v55  ;;  %v2909_v32 = vsub.f32 %v5216_v24, %v5252_v55  ;;  %v2910_v25 = vsub.f32 %v5218_v21, %v5252_v55 }
 0x550   :  { %v2911_v40 = vsub.f32 %v5222_v53, %v5252_v55 }
 0x554   :  { %v2839_v22 = vpop.permute.xlu0 %2838 }
 0x555   :  { %v2841_v35 = vmul.f32 %v2839_v22, %v2832_v28  ;;  %v2842_v57 = vmul.f32 %v2839_v22, %v2833_v59  ;;  %v2843_v54 = vmul.f32 %v2839_v22, %v2834_v26  ;;  %v2844_v47 = vmul.f32 %v2839_v22, %v2835_v3 }
 0x558   :  { %v2895_v15 = vpop.xlane.xlu1 %2894  ;;  %v2945_v0 = vpop.permute.xlu0 %2944 }
 0x559   :  { %v2897_v49 = vmul.f32 0.001953125, %v2895_v15  ;;  %v2952_v10 = vadd.f32 %v2945_v0, %v2934_v58  ;;  %v2953_v19 = vadd.f32 %v2945_v0, %v2935_v46  ;;  %v2954_v33 = vadd.f32 %v2945_v0, %v2936_v8 }
 0x55a   :  { %v2955_v37 = vadd.f32 %v2945_v0, %v2937_v5 }
 0x55b   :  { %v2901_v30 = vsub.f32 %v2897_v49, %v2899_v39  ;;  %v2960_v63 = vmax.f32 %v2952_v10, 0.0  ;;  %v2961_v31 = vmax.f32 %v2953_v19, 0.0  ;;  %v2962_v20 = vmax.f32 %v2954_v33, 0.0 }
 0x55c   :  { %v2963_v17 = vmax.f32 %v2955_v37, 0.0  ;;  %v2848_v38 = vpop.permute.xlu0 %2847  ;;  %v2950_v24 = vpop.permute.xlu1 %2949 }
 0x55d   :  { %v2903_v4 = vmax.f32 %v2901_v30, 0.0  ;;  %v2976_v23 = vrot.slane %v2960_v63, 4  ;;  %v2977_v56 = vrot.slane %v2961_v31, 4  ;;  %v2978_v34 = vrot.slane %v2962_v20, 4 }
 0x55e   :  { %v2979_v48 = vrot.slane %v2963_v17, 4  ;;  %v2850_v41 = vadd.f32 %v2848_v38, %v2841_v35  ;;  %v2851_v61 = vadd.f32 %v2848_v38, %v2842_v57  ;;  %v2852_v52 = vadd.f32 %v2848_v38, %v2843_v54 }
 0x55f   :  { %v2913_v27 = vadd.f32 1e-05, %v2903_v4  ;;  %3000 = vst [vmem:[%s5332_s8] sm:$0xf0] %v2976_v23  ;;  %3001 = vst [vmem:[%s5332_s8 + $0x8] sm:$0xf0] %v2977_v56  ;;  %v2853_v16 = vadd.f32 %v2848_v38, %v2844_v47 }
 0x560   :  { %3002 = vst [vmem:[%s5332_s8 + $0x10] sm:$0xf0] %v2978_v34  ;;  %3003 = vst [vmem:[%s5332_s8 + $0x18] sm:$0xf0] %v2979_v48  ;;  %v2854_v43 = vmax.f32 %v2850_v41, 0.0  ;;  %v2855_v14 = vmax.f32 %v2851_v61, 0.0 }
 0x561   :  { %v2856_v45 = vmax.f32 %v2852_v52, 0.0  ;;  %3113 = vrsqrt.f32 %v2913_v27  ;;  %v2857_v18 = vmax.f32 %v2853_v16, 0.0 }
 0x562   :  { %2858 = vst [vmem:[%s5332_s8] sm:$0xf] %v2854_v43  ;;  %2859 = vst [vmem:[%s5332_s8 + $0x8] sm:$0xf] %v2855_v14 }
 0x563   :  { %2860 = vst [vmem:[%s5332_s8 + $0x10] sm:$0xf] %v2856_v45  ;;  %2861 = vst [vmem:[%s5332_s8 + $0x18] sm:$0xf] %v2857_v18 }
 0x56e   :  { %v3114_v62 = vpop.eup %3113 }
 0x56f   :  { %v2920_v44 = vmul.f32 %v3114_v62, %v2908_v36  ;;  %v2921_v11 = vmul.f32 %v3114_v62, %v2909_v32  ;;  %v2922_v13 = vmul.f32 %v3114_v62, %v2910_v25  ;;  %v2923_v2 = vmul.f32 %v3114_v62, %v2911_v40 }
 0x571   :  { %v2938_v42 = vmul.f32 %v5250_v29, %v2920_v44  ;;  %v2939_v60 = vmul.f32 %v5250_v29, %v2921_v11  ;;  %v2940_v9 = vmul.f32 %v5250_v29, %v2922_v13  ;;  %v2941_v7 = vmul.f32 %v5250_v29, %v2923_v2 }
 0x573   :  { %v2956_v22 = vadd.f32 %v2950_v24, %v2938_v42  ;;  %v2957_v6 = vadd.f32 %v2950_v24, %v2939_v60  ;;  %v2958_v21 = vadd.f32 %v2950_v24, %v2940_v9  ;;  %v2959_v50 = vadd.f32 %v2950_v24, %v2941_v7 }
 0x575   :  { %v2964_v12 = vmax.f32 %v2956_v22, 0.0  ;;  %v2965_v53 = vmax.f32 %v2957_v6, 0.0  ;;  %v2966_v55 = vmax.f32 %v2958_v21, 0.0  ;;  %v2967_v51 = vmax.f32 %v2959_v50, 0.0 }
 0x577   :  { %v2980_v58 = vrot.slane %v2964_v12, 4  ;;  %v2982_v46 = vrot.slane %v2965_v53, 4  ;;  %v2984_v8 = vrot.slane %v2966_v55, 4  ;;  %v2986_v1 = vrot.slane %v2967_v51, 4 }
 0x579   :  { %v2981_v5 = vsel %vm40_vm0, %v2976_v23, %v2980_v58  ;;  %v2983_v15 = vsel %vm40_vm0, %v2977_v56, %v2982_v46  ;;  %v2985_v39 = vsel %vm40_vm0, %v2978_v34, %v2984_v8  ;;  %v2987_v29 = vsel %vm40_vm0, %v2979_v48, %v2986_v1  ;;  %3008 = vst [vmem:[%s5332_s8 + $0x40] sm:$0xf] %v2980_v58 }
 0x57a   :  { %3009 = vst [vmem:[%s5332_s8 + $0x48] sm:$0xf] %v2982_v46  ;;  %3010 = vst [vmem:[%s5332_s8 + $0x50] sm:$0xf] %v2984_v8 }
 0x57b   :  { %3011 = vst [vmem:[%s5332_s8 + $0x58] sm:$0xf] %v2986_v1  ;;  %3004 = vst [vmem:[%s5332_s8 + $0x20] sm:$0xff] %v2981_v5 }
 0x57c   :  { %3005 = vst [vmem:[%s5332_s8 + $0x28] sm:$0xff] %v2983_v15  ;;  %3006 = vst [vmem:[%s5332_s8 + $0x30] sm:$0xff] %v2985_v39 }
 0x57d   :  { %3007 = vst [vmem:[%s5332_s8 + $0x38] sm:$0xff] %v2987_v29 }

// kernel: cloudnet_forward.4
= control target key start
LH: loop header
LB: loop body
LE: loop exit
PB: predicated region body
PF: predicated region fallthrough
CT: control target
= control target key end

     0   :  { %13 = vsyncpa [#allocation5], 0  ;;  %s3168_s27 = smov [#allocation4]   ;;  %s5418_s0 = inlined_call_operand.vmem [shape: f32[20,512], index: 0, kind: input, shape index: {}]   ;;  %s5419_s1 = inlined_call_operand.vmem [shape: s32[2,512], index: 1, kind: input, shape index: {}]   ;;  %s5420_s2 = inlined_call_operand.vmem [shape: f32[4,20], index: 2, kind: input, shape index: {}]   ;;  %s5421_s3 = inlined_call_operand.hbm [shape: f32[16,144], index: 3, kind: input, shape index: {}]   ;;  %s5422_s4 = inlined_call_operand.vmem [shape: f32[16,1], index: 4, kind: input, shape index: {}]   ;;  %s5423_s5 = inlined_call_operand.vmem [shape: f32[16,1], index: 5, kind: input, shape index: {}]   ;;  %s5424_s6 = inlined_call_operand.vmem [shape: f32[20,1], index: 6, kind: input, shape index: {}]   ;;  %s5425_s7 = inlined_call_operand.vmem [shape: f32[20,1], index: 7, kind: input, shape index: {}]   ;;  %s5426_s8 = inlined_call_operand.vmem [shape: f32[20,512], index: 8, kind: output, shape index: {}]  }
   0x1   :  { %s25_s28 = sshll.u32 %s3168_s27, 4  ;;  %s26_s28 = int_to_ptr.vmem [resolvable:$true] %s25_s28 }
   0x2   :  { %s3154_s29 = scalar_lea.vmem %s26_s28, 512  ;;  %p3159_p1 = scmp.lt.s32.totalorder %s26_s28, %s26_s28 }
   0x3   :  { %p3155_p0 = scmp.ne.s32.totalorder %s26_s28, %s3154_s29  ;;  %p3160_p2 = scmp.lt.s32.totalorder %s3154_s29, %s3154_s29 }
   0x5   :  { %p3161_p3 = por %p3160_p2, %p3159_p1 }
   0x7   :  { %p3162_p4 = pnand %p3161_p3, %p3155_p0 }
   0x9   :  { %3165 = shalt.err (!%p3162_p4)
}
   0xa   :  { %s3169_s30 = smov 256   ;;  %s3170_s9 = smov 16  }
   0xb   :  { %31 = dma.hbm_to_vmem [thread:$0]  %s5421_s3, 512, %s26_s28, [#allocation5], %s3169_s30, %s3169_s30, %s3170_s9  }
   0xc   :  { %3166 = dma.done.wait [#allocation5], 512  }
   0xd   :  { %3167 = vsyncadd [#allocation5], 4294966784  ;;  %v3171_v0 = vmov 0.0   ;;  %v258_v1 = vlaneseq  ;;  %vm60_vm0 = vcmask 1043456   ;;  %v53_v3 = vld [vmem:[%s5418_s0 + $0x48] sm:$0xf] }
   0xe   :  { %137 = vmatprep.mubr.f32.mxu0 %v3171_v0  ;;  %215 = vst [vmem:[#allocation2] sm:$0xff] %v3171_v0  ;;  %216 = vst [vmem:[#allocation2 + $0x8] sm:$0xff] %v3171_v0  ;;  %208 = vmatprep.mubr.f32.mxu1 %v3171_v0  ;;  %v52_v4 = vld [vmem:[%s5418_s0 + $0x40] sm:$0xf]  ;;  %v49_v5 = vld [vmem:[%s5418_s0 + $0x28] sm:$0xff]  ;;  %vm56_vm1 = vcmask 162816  }
   0xf   :  { %217 = vst [vmem:[#allocation2 + $0x10] sm:$0xff] %v3171_v0  ;;  %v259_v2 = vshrl.u32 %v258_v1, 7  ;;  %3042 = vmatprep.subr.msk.mxu0 %vm60_vm0, %v53_v3  ;;  %v55_v6 = vld [vmem:[%s5418_s0 + $0x58] sm:$0xf]  ;;  %v48_v7 = vld [vmem:[%s5418_s0 + $0x20] sm:$0xff]  ;;  %v45_v9 = vld [vmem:[%s5418_s0 + $0x8] sm:$0xff] }
  0x10   :  { %v54_v8 = vld [vmem:[%s5418_s0 + $0x50] sm:$0xf]  ;;  %3043 = vmatpush1.msk.msra.mxu0 %vm60_vm0, %v52_v4  ;;  %3045 = vmatprep.subr.msk.mxu1 %vm60_vm0, %v55_v6  ;;  %v51_v10 = vld [vmem:[%s5418_s0 + $0x38] sm:$0xff]  ;;  %v44_v11 = vld [vmem:[%s5418_s0] sm:$0xff]  ;;  %s3175_s19 = smov 72   ;;  %s3176_s20 = smov 76  }
  0x11   :  { %101 = vmatprep.subr.mxu0 %v49_v5  ;;  %3046 = vmatpush1.msk.msra.mxu1 %vm60_vm0, %v54_v8  ;;  %v50_v12 = vld [vmem:[%s5418_s0 + $0x30] sm:$0xff]  ;;  %v47_v13 = vld [vmem:[%s5418_s0 + $0x18] sm:$0xff]  ;;  %v3301_v14 = vsub.s32 0, %v259_v2  ;;  %v3303_v15 = vsub.s32 1, %v259_v2  ;;  %v3305_v16 = vsub.s32 2, %v259_v2  ;;  %v3324_v21 = vsub.s32 3, %v259_v2 }
  0x12   :  { %102 = vmatpush1.msra.mxu0 %v48_v7  ;;  %172 = vmatprep.subr.mxu1 %v51_v10  ;;  %v43_v17 = vld [vmem:[%s5420_s2] sm:$0xf]  ;;  %v46_v18 = vld [vmem:[%s5418_s0 + $0x10] sm:$0xff]  ;;  %s3172_s0 = smov 120   ;;  %s3174_s2 = smov 8  }
  0x13   :  { %v3316_v19 = vld [vmem:[%s5419_s1] ss:$2 sm:$0xf]  ;;  %103 = vmatprep.subr.mxu0 %v45_v9  ;;  %173 = vmatpush1.msra.mxu1 %v50_v12  ;;  %v3322_v20 = vld [vmem:[%s5419_s1 + $0x1] ss:$2 sm:$0xf] }
  0x14   :  { %vm252_vm2 = vcmp.ge.s32.totalorder %v3316_v19, 1  ;;  %vm1997_vm3 = vcmp.ge.s32.totalorder %v3316_v19, 8  ;;  %104 = vmatpush1.msra.mxu0 %v44_v11  ;;  %174 = vmatprep.subr.mxu1 %v47_v13  ;;  %vm253_vm4 = vcmp.ge.s32.totalorder %v3322_v20, 1  ;;  %vm1998_vm5 = vcmp.ge.s32.totalorder %v3322_v20, 8  ;;  %s3173_s1 = smov 119   ;;  %s3177_s21 = smov 12  }
  0x15   :  { %v3050_v22 = vsel %vm252_vm2, 1.0, %v3171_v0  ;;  %vm2104_vm6 = vcmp.lt.s32.totalorder %v3322_v20, 8  ;;  %3044 = vmatmul.mubr.msk.f32.vlgmr.msra.gmra.mxu0 %vm56_vm1, %v43_v17  ;;  %175 = vmatpush1.msra.mxu1 %v46_v18  ;;  %vm254_vm7 = vmand %vm252_vm2, %vm253_vm4  ;;  %v3076_v26 = vsel %vm1998_vm5, 1.0, %v3171_v0  ;;  %vm1796_vm10 = vcmp.lt.s32.totalorder %v3316_v19, 12  ;;  %s3178_s22 = smov 68   ;;  %s3179_s23 = smov 4  }
  0x16   :  { %v329_v23 = vrot.slane %v3050_v22, %v3301_v14  ;;  %v333_v24 = vrot.slane %v3050_v22, %v3303_v15  ;;  %v337_v25 = vrot.slane %v3050_v22, %v3305_v16  ;;  %3047 = vmatmul.mubr.msk.f32.vlgmr.msra.gmra.mxu1 %vm56_vm1, %v43_v17  ;;  %v3049_v27 = vsel %vm254_vm7, 1.0, %v3171_v0  ;;  %vm1999_vm8 = vmand %vm1997_vm3, %vm1998_vm5  ;;  %s3180_s24 = smov 42   ;;  %s3181_s25 = smov 38  }
  0x17   :  { %v341_v28 = vrot.slane %v3050_v22, %v3324_v21  ;;  %v2180_v29 = vrot.slane %v3076_v26, %v3301_v14  ;;  %v2184_v30 = vrot.slane %v3076_v26, %v3303_v15  ;;  %v261_v32 = vrot.slane %v3049_v27, %v3301_v14  ;;  %vm2105_vm9 = vmand %vm1997_vm3, %vm2104_vm6  ;;  %s3182_s26 = smov 40   ;;  %s3183_s27 = smov 10  }
  0x18   :  { %v342_v31 = vcombine.low %v329_v23, %v333_v24  ;;  %v265_v33 = vrot.slane %v3049_v27, %v3303_v15  ;;  %v269_v34 = vrot.slane %v3049_v27, %v3305_v16  ;;  %v273_v35 = vrot.slane %v3049_v27, %v3324_v21  ;;  %s3184_s28 = smov 106   ;;  %s3185_s29 = smov 6  }
  0x19   :  { %v343_v36 = vcombine.low %v337_v25, %v341_v28  ;;  %v3073_v37 = vsel %vm1999_vm8, 1.0, %v3171_v0  ;;  %v3075_v38 = vsel %vm2105_vm9, 1.0, %v3171_v0  ;;  %v2188_v47 = vrot.slane %v3076_v26, %v3305_v16  ;;  %s3186_s30 = smov 102   ;;  %s3187_s10 = smov 104  }
  0x1a   :  { %344 = vrot.lane.b32.xlu1 %v342_v31, %s3172_s0  ;;  %v274_v39 = vcombine.low %v261_v32, %v265_v33  ;;  %v2006_v40 = vrot.slane %v3073_v37, %v3301_v14  ;;  %v2010_v41 = vrot.slane %v3073_v37, %v3303_v15  ;;  %v2014_v42 = vrot.slane %v3073_v37, %v3305_v16  ;;  %s3188_s11 = smov 24   ;;  %s3189_s12 = smov 25  }
  0x1b   :  { %v275_v43 = vcombine.low %v269_v34, %v273_v35  ;;  %346 = vrot.lane.b32.xlu0 %v343_v36, %s3172_s0  ;;  %v2018_v44 = vrot.slane %v3073_v37, %v3324_v21  ;;  %v2112_v45 = vrot.slane %v3075_v38, %v3301_v14  ;;  %v2192_v48 = vrot.slane %v3076_v26, %v3324_v21  ;;  %s3190_s13 = smov 9   ;;  %s3191_s3 = smov 23  }
  0x1c   :  { %v3371_v46 = vcombine.low %v2006_v40, %v2010_v41  ;;  %v3375_v49 = vcombine.low %v2180_v29, %v2184_v30  ;;  %v2116_v51 = vrot.slane %v3075_v38, %v3303_v15  ;;  %v3074_v52 = vsel %vm1997_vm3, 1.0, %v3171_v0  ;;  %s3192_s14 = smov 7   ;;  %s3193_s15 = smov 121  }
  0x1d   :  { %v3377_v50 = vcombine.low %v2014_v42, %v2018_v44  ;;  %v2120_v53 = vrot.slane %v3075_v38, %v3305_v16  ;;  %v3385_v54 = vcombine.low %v2188_v47, %v2192_v48  ;;  %v2052_v55 = vrot.slane %v3074_v52, %v3305_v16  ;;  %s3195_s16 = smov 56   ;;  %s3196_s17 = smov 60  }
  0x1e   :  { %276 = vrot.lane.b32.xlu1 %v274_v39, %s3173_s1  ;;  %v2056_v56 = vrot.slane %v3074_v52, %v3324_v21  ;;  %v2044_v57 = vrot.slane %v3074_v52, %v3301_v14  ;;  %v2048_v58 = vrot.slane %v3074_v52, %v3303_v15  ;;  %v2124_v59 = vrot.slane %v3075_v38, %v3324_v21  ;;  %s3197_s18 = smov 88  }
  0x1f   :  { %vm1558_vm11 = vcmp.lt.s32.totalorder %v3322_v20, 12  ;;  %v3071_v60 = vsel %vm1796_vm10, 1.0, %v3171_v0  ;;  %v2125_v1 = vcombine.low %v2112_v45, %v2116_v51  ;;  %vm1419_vm13 = vcmp.ge.s32.totalorder %v3322_v20, 4 }
  0x20   :  { %v2058_v61 = vcombine.low %v2052_v55, %v2056_v56  ;;  %vm1931_vm12 = vmand %vm1796_vm10, %vm1558_vm11  ;;  %v1870_v62 = vrot.slane %v3071_v60, %v3301_v14  ;;  %v1874_v63 = vrot.slane %v3071_v60, %v3303_v15  ;;  %v1878_v3 = vrot.slane %v3071_v60, %v3305_v16 }
  0x21   :  { %v3072_v2 = vsel %vm1931_vm12, 1.0, %v3171_v0  ;;  %v1882_v4 = vrot.slane %v3071_v60, %v3324_v21  ;;  %v2126_v5 = vcombine.low %v2120_v53, %v2124_v59  ;;  %v2057_v8 = vcombine.low %v2044_v57, %v2048_v58  ;;  %vm1797_vm14 = vmand %vm1796_vm10, %vm1419_vm13 }
  0x22   :  { %278 = vrot.lane.b32.xlu1 %v275_v43, %s3173_s1  ;;  %2061 = vrot.lane.b32.xlu0 %v2058_v61, %s3174_s2  ;;  %v1938_v6 = vrot.slane %v3072_v2, %v3301_v14  ;;  %v1942_v7 = vrot.slane %v3072_v2, %v3303_v15  ;;  %v1946_v9 = vrot.slane %v3072_v2, %v3305_v16  ;;  %v3069_v11 = vsel %vm1558_vm11, 1.0, %v3171_v0 }
  0x23   :  { %v1950_v10 = vrot.slane %v3072_v2, %v3324_v21  ;;  %v1883_v12 = vcombine.low %v1870_v62, %v1874_v63  ;;  %v3070_v13 = vsel %vm1797_vm14, 1.0, %v3171_v0  ;;  %v1733_v17 = vrot.slane %v3069_v11, %v3301_v14 }
  0x24   :  { %v1737_v18 = vrot.slane %v3069_v11, %v3303_v15  ;;  %v3422_v22 = vcombine.low %v1878_v3, %v1882_v4  ;;  %v1804_v23 = vrot.slane %v3070_v13, %v3301_v14  ;;  %v1808_v24 = vrot.slane %v3070_v13, %v3303_v15 }
  0x25   :  { %v1741_v25 = vrot.slane %v3069_v11, %v3305_v16  ;;  %v1951_v26 = vcombine.low %v1938_v6, %v1942_v7  ;;  %v1745_v27 = vrot.slane %v3069_v11, %v3324_v21  ;;  %v1812_v28 = vrot.slane %v3070_v13, %v3305_v16 }
  0x26   :  { %2127 = vrot.lane.b32.xlu1 %v2125_v1, %s3170_s9  ;;  %2129 = vrot.lane.b32.xlu0 %v2126_v5, %s3170_s9  ;;  %v3068_v29 = vsel %vm1419_vm13, 1.0, %v3171_v0  ;;  %v1952_v30 = vcombine.low %v1946_v9, %v1950_v10  ;;  %v1816_v31 = vrot.slane %v3070_v13, %v3324_v21  ;;  %v3437_v34 = vcombine.low %v1804_v23, %v1808_v24 }
  0x27   :  { %v1634_v32 = vrot.slane %v3068_v29, %v3301_v14  ;;  %v1638_v33 = vrot.slane %v3068_v29, %v3303_v15  ;;  %v1746_v35 = vcombine.low %v1733_v17, %v1737_v18  ;;  %v3439_v36 = vcombine.low %v1741_v25, %v1745_v27 }
  0x28   :  { %vm1418_vm15 = vcmp.ge.s32.totalorder %v3316_v19, 4  ;;  %v3442_v37 = vcombine.low %v1812_v28, %v1816_v31  ;;  %v1642_v38 = vrot.slane %v3068_v29, %v3305_v16  ;;  %v1646_v39 = vrot.slane %v3068_v29, %v3324_v21 }
  0x29   :  { %vm1559_vm1 = vmand %vm1418_vm15, %vm1558_vm11  ;;  %v3066_v40 = vsel %vm1418_vm15, 1.0, %v3171_v0  ;;  %v3451_v41 = vcombine.low %v1634_v32, %v1638_v33  ;;  %vm971_vm7 = vcmp.lt.s32.totalorder %v3322_v20, 14  ;;  %vm1209_vm8 = vcmp.lt.s32.totalorder %v3316_v19, 14 }
  0x2a   :  { %2059 = vrot.lane.b32.xlu1 %v2057_v8, %s3174_s2  ;;  %1885 = vrot.lane.b32.xlu0 %v1883_v12, %s3175_s19  ;;  %v3067_v42 = vsel %vm1559_vm1, 1.0, %v3171_v0  ;;  %v1495_v43 = vrot.slane %v3066_v40, %v3301_v14  ;;  %v1499_v44 = vrot.slane %v3066_v40, %v3303_v15  ;;  %vm1420_vm3 = vmand %vm1418_vm15, %vm1419_vm13  ;;  %v1503_v48 = vrot.slane %v3066_v40, %v3305_v16 }
  0x2b   :  { %v1566_v45 = vrot.slane %v3067_v42, %v3301_v14  ;;  %v1570_v47 = vrot.slane %v3067_v42, %v3303_v15  ;;  %v1507_v51 = vrot.slane %v3066_v40, %v3324_v21  ;;  %v1574_v52 = vrot.slane %v3067_v42, %v3305_v16  ;;  %vm1348_vm9 = vmand %vm1209_vm8, %vm971_vm7 }
  0x2c   :  { %v1578_v53 = vrot.slane %v3067_v42, %v3324_v21  ;;  %v3065_v55 = vsel %vm1420_vm3, 1.0, %v3171_v0  ;;  %v3466_v56 = vcombine.low %v1642_v38, %v1646_v39  ;;  %v3470_v58 = vcombine.low %v1495_v43, %v1499_v44 }
  0x2d   :  { %v3468_v57 = vcombine.low %v1566_v45, %v1570_v47  ;;  %v3472_v59 = vcombine.low %v1503_v48, %v1507_v51  ;;  %v1427_v61 = vrot.slane %v3065_v55, %v3301_v14  ;;  %v1431_v62 = vrot.slane %v3065_v55, %v3303_v15 }
  0x2e   :  { %1953 = vrot.lane.b32.xlu1 %v1951_v26, %s3176_s20  ;;  %1955 = vrot.lane.b32.xlu0 %v1952_v30, %s3176_s20  ;;  %v3476_v60 = vcombine.low %v1574_v52, %v1578_v53  ;;  %v1435_v63 = vrot.slane %v3065_v55, %v3305_v16  ;;  %v1439_v1 = vrot.slane %v3065_v55, %v3324_v21  ;;  %v3063_v2 = vsel %vm1209_vm8, 1.0, %v3171_v0 }
  0x2f   :  { %vm834_vm10 = vcmp.ge.s32.totalorder %v3322_v20, 2  ;;  %v3064_v3 = vsel %vm1348_vm9, 1.0, %v3171_v0  ;;  %v1286_v4 = vrot.slane %v3063_v2, %v3301_v14  ;;  %v1290_v5 = vrot.slane %v3063_v2, %v3303_v15 }
  0x30   :  { %vm1210_vm11 = vmand %vm1209_vm8, %vm834_vm10  ;;  %v3495_v6 = vsel %vm971_vm7, 1.0, %v3171_v0  ;;  %v1355_v7 = vrot.slane %v3064_v3, %v3301_v14  ;;  %v1359_v8 = vrot.slane %v3064_v3, %v3303_v15  ;;  %v1363_v9 = vrot.slane %v3064_v3, %v3305_v16 }
  0x31   :  { %v1367_v10 = vrot.slane %v3064_v3, %v3324_v21  ;;  %v3504_v11 = vcombine.low %v1427_v61, %v1431_v62  ;;  %v3507_v12 = vsel %vm1210_vm11, 1.0, %v3171_v0  ;;  %v1294_v13 = vrot.slane %v3063_v2, %v3305_v16 }
  0x32   :  { %1887 = vrot.lane.b32.xlu1 %v3422_v22, %s3175_s19  ;;  %1748 = vrot.lane.b32.xlu0 %v1746_v35, %s3177_s21  ;;  %v1298_v17 = vrot.slane %v3063_v2, %v3324_v21  ;;  %v3511_v18 = vcombine.low %v1435_v63, %v1439_v1  ;;  %v3513_v23 = vcombine.low %v1286_v4, %v1290_v5  ;;  %v3060_v38 = vsel %vm834_vm10, 1.0, %v3171_v0 }
  0x33   :  { %v1217_v24 = vrot.slane %v3507_v12, %v3301_v14  ;;  %v1221_v22 = vrot.slane %v3507_v12, %v3303_v15  ;;  %v3519_v25 = vcombine.low %v1355_v7, %v1359_v8  ;;  %v3521_v26 = vcombine.low %v1363_v9, %v1367_v10 }
  0x34   :  { %v1225_v27 = vrot.slane %v3507_v12, %v3305_v16  ;;  %v1147_v28 = vrot.slane %v3495_v6, %v3301_v14  ;;  %v1229_v30 = vrot.slane %v3507_v12, %v3324_v21  ;;  %v3531_v31 = vcombine.low %v1294_v13, %v1298_v17 }
  0x35   :  { %v3527_v29 = vcombine.low %v1217_v24, %v1221_v22  ;;  %v1151_v32 = vrot.slane %v3495_v6, %v3303_v15  ;;  %v1155_v33 = vrot.slane %v3495_v6, %v3305_v16  ;;  %v1159_v35 = vrot.slane %v3495_v6, %v3324_v21 }
  0x36   :  { %1819 = vrot.lane.b32.xlu1 %v3437_v34, %s3178_s22  ;;  %1821 = vrot.lane.b32.xlu0 %v3442_v37, %s3178_s22  ;;  %vm833_vm12 = vcmp.ge.s32.totalorder %v3316_v19, 2  ;;  %v1048_v40 = vrot.slane %v3060_v38, %v3301_v14  ;;  %v1052_v34 = vrot.slane %v3060_v38, %v3303_v15  ;;  %vm391_vm14 = vcmp.lt.s32.totalorder %v3322_v20, 15 }
  0x37   :  { %v3547_v39 = vcombine.low %v1147_v28, %v1151_v32  ;;  %vm972_vm13 = vmand %vm833_vm12, %vm971_vm7  ;;  %v1056_v42 = vrot.slane %v3060_v38, %v3305_v16  ;;  %v1060_v43 = vrot.slane %v3060_v38, %v3324_v21  ;;  %v3058_v44 = vsel %vm833_vm12, 1.0, %v3171_v0 }
  0x38   :  { %v3059_v37 = vsel %vm972_vm13, 1.0, %v3171_v0  ;;  %vm835_vm15 = vmand %vm833_vm12, %vm834_vm10  ;;  %v3560_v45 = vcombine.low %v1048_v40, %v1052_v34  ;;  %v911_v61 = vrot.slane %v3058_v44, %v3301_v14  ;;  %v915_v1 = vrot.slane %v3058_v44, %v3303_v15 }
  0x39   :  { %v979_v47 = vrot.slane %v3059_v37, %v3301_v14  ;;  %v983_v48 = vrot.slane %v3059_v37, %v3303_v15  ;;  %v987_v51 = vrot.slane %v3059_v37, %v3305_v16  ;;  %vm3569_vm1 = vmand %vm252_vm2, %vm391_vm14  ;;  %v991_v53 = vrot.slane %v3059_v37, %v3324_v21 }
  0x3a   :  { %1750 = vrot.lane.b32.xlu1 %v3439_v36, %s3177_s21  ;;  %1651 = vrot.lane.b32.xlu0 %v3466_v56, %s3179_s23  ;;  %v3577_v55 = vcombine.low %v1056_v42, %v1060_v43  ;;  %v3057_v62 = vsel %vm835_vm15, 1.0, %v3171_v0  ;;  %v919_v5 = vrot.slane %v3058_v44, %v3305_v16  ;;  %v3591_v7 = vcombine.low %v911_v61, %v915_v1  ;;  %s3200_s21 = smov 122  }
  0x3b   :  { %v3581_v63 = vcombine.low %v979_v47, %v983_v48  ;;  %v842_v2 = vrot.slane %v3057_v62, %v3301_v14  ;;  %v846_v3 = vrot.slane %v3057_v62, %v3303_v15  ;;  %v3586_v36 = vcombine.low %v987_v51, %v991_v53 }
  0x3c   :  { %v850_v56 = vrot.slane %v3057_v62, %v3305_v16  ;;  %v854_v4 = vrot.slane %v3057_v62, %v3324_v21  ;;  %v923_v9 = vrot.slane %v3058_v44, %v3324_v21  ;;  %vm625_vm2 = vcmp.lt.s32.totalorder %v3316_v19, 15 }
  0x3d   :  { %v3593_v8 = vcombine.low %v842_v2, %v846_v3  ;;  %vm764_vm3 = vmand %vm625_vm2, %vm391_vm14  ;;  %v3055_v13 = vsel %vm625_vm2, 1.0, %v3171_v0  ;;  %v3053_v17 = vsel %vm391_vm14, 1.0, %v3171_v0  ;;  %v3052_v24 = vsel %vm253_vm4, 1.0, %v3171_v0 }
  0x3e   :  { %1649 = vrot.lane.b32.xlu1 %v3451_v41, %s3179_s23  ;;  %1510 = vrot.lane.b32.xlu0 %v3470_v58, %s3175_s19  ;;  %v3600_v10 = vcombine.low %v850_v56, %v854_v4  ;;  %v3611_v22 = vcombine.low %v919_v5, %v923_v9  ;;  %v3056_v41 = vsel %vm764_vm3, 1.0, %v3171_v0  ;;  %v701_v58 = vrot.slane %v3055_v13, %v3301_v14  ;;  %vm626_vm7 = vmand %vm625_vm2, %vm253_vm4  ;;  %s3202_s23 = smov 112  }
  0x3f   :  { %v705_v28 = vrot.slane %v3055_v13, %v3303_v15  ;;  %v771_v32 = vrot.slane %v3056_v41, %v3301_v14  ;;  %v775_v38 = vrot.slane %v3056_v41, %v3303_v15  ;;  %v709_v40 = vrot.slane %v3055_v13, %v3305_v16 }
  0x40   :  { %v713_v34 = vrot.slane %v3055_v13, %v3324_v21  ;;  %v779_v42 = vrot.slane %v3056_v41, %v3305_v16  ;;  %v783_v43 = vrot.slane %v3056_v41, %v3324_v21  ;;  %v3054_v44 = vsel %vm626_vm7, 1.0, %v3171_v0 }
  0x41   :  { %v3622_v37 = vcombine.low %v701_v58, %v705_v28  ;;  %v3631_v47 = vcombine.low %v771_v32, %v775_v38  ;;  %v633_v51 = vrot.slane %v3054_v44, %v3301_v14  ;;  %v3051_v53 = vsel %vm3569_vm1, 1.0, %v3171_v0 }
  0x42   :  { %1581 = vrot.lane.b32.xlu1 %v3468_v57, %s3176_s20  ;;  %1583 = vrot.lane.b32.xlu0 %v3476_v60, %s3176_s20  ;;  %v3633_v48 = vcombine.low %v709_v40, %v713_v34  ;;  %v3639_v61 = vcombine.low %v779_v42, %v783_v43  ;;  %v637_v62 = vrot.slane %v3054_v44, %v3303_v15  ;;  %vm2308_vm4 = vcmp.lt.s32.totalorder %v3316_v19, 8  ;;  %s3199_s20 = smov 116  }
  0x43   :  { %v564_v1 = vrot.slane %v3053_v17, %v3301_v14  ;;  %v568_v57 = vrot.slane %v3053_v17, %v3303_v15  ;;  %v572_v60 = vrot.slane %v3053_v17, %v3305_v16  ;;  %v576_v2 = vrot.slane %v3053_v17, %v3324_v21  ;;  %vm2309_vm8 = vmand %vm2308_vm4, %vm1998_vm5 }
  0x44   :  { %v641_v3 = vrot.slane %v3054_v44, %v3305_v16  ;;  %v645_v56 = vrot.slane %v3054_v44, %v3324_v21  ;;  %v3648_v4 = vcombine.low %v633_v51, %v637_v62  ;;  %v475_v5 = vrot.slane %v3052_v24, %v3305_v16  ;;  %vm2414_vm9 = vmand %vm2308_vm4, %vm2104_vm6 }
  0x45   :  { %v3650_v52 = vcombine.low %v564_v1, %v568_v57  ;;  %v479_v9 = vrot.slane %v3052_v24, %v3324_v21  ;;  %v3658_v13 = vcombine.low %v572_v60, %v576_v2  ;;  %v467_v41 = vrot.slane %v3052_v24, %v3301_v14 }
  0x46   :  { %1512 = vrot.lane.b32.xlu1 %v3472_v59, %s3175_s19  ;;  %1370 = vrot.lane.b32.xlu0 %v3519_v25, %s3180_s24  ;;  %v3660_v17 = vcombine.low %v641_v3, %v645_v56  ;;  %v471_v28 = vrot.slane %v3052_v24, %v3303_v15  ;;  %v407_v32 = vrot.slane %v3051_v53, %v3305_v16  ;;  %v3078_v40 = vsel %vm2309_vm8, 1.0, %v3171_v0  ;;  %s3198_s19 = smov 118  }
  0x47   :  { %v3664_v58 = vcombine.low %v475_v5, %v479_v9  ;;  %v411_v59 = vrot.slane %v3051_v53, %v3324_v21  ;;  %v399_v25 = vrot.slane %v3051_v53, %v3301_v14  ;;  %v403_v38 = vrot.slane %v3051_v53, %v3303_v15 }
  0x48   :  { %v3079_v19 = vsel %vm2308_vm4, 1.0, %v3171_v0  ;;  %v3677_v34 = vcombine.low %v467_v41, %v471_v28  ;;  %v2316_v42 = vrot.slane %v3078_v40, %v3301_v14  ;;  %v2320_v43 = vrot.slane %v3078_v40, %v3303_v15 }
  0x49   :  { %v3679_v24 = vcombine.low %v407_v32, %v411_v59  ;;  %v3687_v44 = vcombine.low %v399_v25, %v403_v38  ;;  %v2324_v51 = vrot.slane %v3078_v40, %v3305_v16  ;;  %v2328_v53 = vrot.slane %v3078_v40, %v3324_v21 }
  0x4a   :  { %1442 = vrot.lane.b32.xlu1 %v3504_v11, %s3178_s22  ;;  %1444 = vrot.lane.b32.xlu0 %v3511_v18, %s3178_s22  ;;  %v3080_v62 = vsel %vm2414_vm9, 1.0, %v3171_v0  ;;  %v3692_v1 = vcombine.low %v2316_v42, %v2320_v43  ;;  %v2362_v3 = vrot.slane %v3079_v19, %v3305_v16  ;;  %v2366_v56 = vrot.slane %v3079_v19, %v3324_v21  ;;  %s3201_s22 = smov 124  }
  0x4b   :  { %v2429_v57 = vrot.slane %v3080_v62, %v3305_v16  ;;  %v2433_v60 = vrot.slane %v3080_v62, %v3324_v21  ;;  %v2421_v2 = vrot.slane %v3080_v62, %v3301_v14  ;;  %v3697_v11 = vcombine.low %v2324_v51, %v2328_v53 }
  0x4c   :  { %v2425_v18 = vrot.slane %v3080_v62, %v3303_v15  ;;  %v2354_v9 = vrot.slane %v3079_v19, %v3301_v14  ;;  %v2358_v41 = vrot.slane %v3079_v19, %v3303_v15  ;;  %v3077_v28 = vsel %vm2104_vm6, 1.0, %v3171_v0 }
  0x4d   :  { %v2435_v5 = vcombine.low %v2429_v57, %v2433_v60  ;;  %v2368_v59 = vcombine.low %v2362_v3, %v2366_v56  ;;  %v2257_v25 = vrot.slane %v3077_v28, %v3305_v16  ;;  %v2261_v40 = vrot.slane %v3077_v28, %v3324_v21 }
  0x4e   :  { %1372 = vrot.lane.b32.xlu1 %v3521_v26, %s3180_s24  ;;  %1232 = vrot.lane.b32.xlu0 %v3527_v29, %s3181_s25  ;;  %v2434_v32 = vcombine.low %v2421_v2, %v2425_v18  ;;  %v2367_v38 = vcombine.low %v2354_v9, %v2358_v41  ;;  %v2249_v42 = vrot.slane %v3077_v28, %v3301_v14  ;;  %vm218_vm5 = vcmask 125952   ;;  %s3203_s24 = smov 86  }
  0x4f   :  { %v2253_v19 = vrot.slane %v3077_v28, %v3303_v15  ;;  %v2263_v43 = vcombine.low %v2257_v25, %v2261_v40  ;;  %v1231_v26 = vcombine.low %v1225_v27, %v1229_v30  ;;  %v1161_v14 = vcombine.low %v1155_v33, %v1159_v35  ;;  %219 = vst.msk [vmem:[#allocation2 + $0x18] sm:$0xf] %vm218_vm5, %v3171_v0 }
  0x50   :  { %vm1516_vm6 = vcmask 588800   ;;  %vm1754_vm10 = vcmask 97280   ;;  %vm1655_vm11 = vcmask 31744   ;;  %vm1376_vm12 = vcmask 343040  }
  0x51   :  { %v2262_v20 = vcombine.low %v2249_v42, %v2253_v19  ;;  %vm1238_vm13 = vcmask 310272   ;;  %vm1000_vm14 = vcmask 867328   ;;  %vm863_vm15 = vcmask 834560  }
  0x52   :  { %1301 = vrot.lane.b32.xlu1 %v3513_v23, %s3182_s26  ;;  %1303 = vrot.lane.b32.xlu0 %v3531_v31, %s3182_s26  ;;  %vm239_vm1 = vcmask 1043520   ;;  %vm240_vm2 = vcmask 1047556   ;;  %vm232_vm7 = vcmask 64512   ;;  %vm244_vm4 = vcmask 60416   ;;  %s3205_s26 = smov 22  }
  0x53   :  { %vm241_vm3 = vmor %vm240_vm2, %vm239_vm1  ;;  %vm1448_vm8 = vcmask 556032   ;;  %vm1587_vm9 = vcmask 621568   ;;  %vm5507_vm5 = vcmask 973824   ;;  %vm350_vm1 = vcmask 982016  }
  0x54   :  { %vm654_vm2 = vcmask 187392  }
  0x56   :  { %1234 = vrot.lane.b32.xlu1 %v1231_v26, %s3181_s25  ;;  %1164 = vrot.lane.b32.xlu0 %v1161_v14, %s3183_s27  ;;  %s3204_s25 = smov 90  }
  0x5a   :  { %1162 = vrot.lane.b32.xlu1 %v3547_v39, %s3183_s27  ;;  %994 = vrot.lane.b32.xlu0 %v3581_v63, %s3184_s28  ;;  %s3206_s27 = smov 26  }
  0x5e   :  { %1063 = vrot.lane.b32.xlu1 %v3560_v45, %s3185_s29  ;;  %1065 = vrot.lane.b32.xlu0 %v3577_v55, %s3185_s29  ;;  %s3208_s29 = smov 105  }
  0x62   :  { %996 = vrot.lane.b32.xlu1 %v3586_v36, %s3184_s28  ;;  %857 = vrot.lane.b32.xlu0 %v3593_v8, %s3186_s30  ;;  %s3207_s28 = smov 103  }
  0x66   :  { %926 = vrot.lane.b32.xlu1 %v3591_v7, %s3187_s10  ;;  %928 = vrot.lane.b32.xlu0 %v3611_v22, %s3187_s10 }
  0x6a   :  { %859 = vrot.lane.b32.xlu1 %v3600_v10, %s3186_s30  ;;  %716 = vrot.lane.b32.xlu0 %v3622_v37, %s3188_s11 }
  0x6e   :  { %786 = vrot.lane.b32.xlu1 %v3631_v47, %s3189_s12  ;;  %788 = vrot.lane.b32.xlu0 %v3639_v61, %s3189_s12 }
  0x72   :  { %718 = vrot.lane.b32.xlu1 %v3633_v48, %s3188_s11  ;;  %579 = vrot.lane.b32.xlu0 %v3650_v52, %s3190_s13 }
  0x76   :  { %648 = vrot.lane.b32.xlu1 %v3648_v4, %s3191_s3  ;;  %650 = vrot.lane.b32.xlu0 %v3660_v17, %s3191_s3 }
  0x7a   :  { %581 = vrot.lane.b32.xlu1 %v3658_v13, %s3190_s13  ;;  %484 = vrot.lane.b32.xlu0 %v3664_v58, %s3192_s14 }
  0x7e   :  { %482 = vrot.lane.b32.xlu1 %v3677_v34, %s3192_s14  ;;  %416 = vrot.lane.b32.xlu0 %v3679_v24, %s3193_s15 }
  0x82   :  { %414 = vrot.lane.b32.xlu1 %v3687_v44, %s3193_s15  ;;  %2438 = vrot.lane.b32.xlu0 %v2435_v5, %s3170_s9 }
  0x86   :  { %2436 = vrot.lane.b32.xlu1 %v2434_v32, %s3170_s9  ;;  %2371 = vrot.lane.b32.xlu0 %v2368_v59, %s3174_s2 }
  0x8a   :  { %2369 = vrot.lane.b32.xlu1 %v2367_v38, %s3174_s2  ;;  %2266 = vrot.lane.b32.xlu0 %v2263_v43, %s3170_s9 }
  0x8c   :  { %v3765_v0 = vpop.permute.xlu1 %344 }
  0x8d   :  { %5517 = vst [vmem:[#allocation7_spill] sm:$0xff] %v3765_v0  ;;  %v3768_v15 = vpop.permute.xlu0 %346 }
  0x8e   :  { %2264 = vrot.lane.b32.xlu1 %v2262_v20, %s3170_s9  ;;  %5518 = vst [vmem:[#allocation8_spill] sm:$0xff] %v3768_v15  ;;  %s3194_s9 = smov 52  }
  0x90   :  { %v3770_v16 = vpop.permute.xlu1 %276 }
  0x94   :  { %v3772_v21 = vpop.permute.xlu1 %278  ;;  %v3774_v6 = vpop.permute.xlu0 %2061 }
  0x98   :  { %v3776_v12 = vpop.permute.xlu1 %2127  ;;  %v3778_v23 = vpop.permute.xlu0 %2129 }
  0x9c   :  { %v3780_v27 = vpop.permute.xlu1 %2059  ;;  %v3782_v29 = vpop.permute.xlu0 %1885 }
  0x9d   :  { %v5440_v39 = vrot.slane %v3782_v29, 4 }
  0xa0   :  { %v3784_v30 = vpop.permute.xlu1 %1953  ;;  %v3786_v31 = vpop.permute.xlu0 %1955 }
  0xa4   :  { %v3788_v33 = vpop.permute.xlu1 %1887  ;;  %v3790_v35 = vpop.permute.xlu0 %1748 }
  0xa5   :  { %v5432_v45 = vrot.slane %v3788_v33, 4  ;;  %v5439_v22 = vrot.slane %v3790_v35, 4 }
  0xa7   :  { %v1892_v55 = vsel %vm60_vm0, %v5440_v39, %v5432_v45 }
  0xa8   :  { %v3801_v63 = vsel %vm1516_vm6, %v1892_v55, %v3788_v33  ;;  %v3803_v36 = vpop.permute.xlu1 %1819  ;;  %v3805_v7 = vpop.permute.xlu0 %1821 }
  0xac   :  { %v3807_v8 = vpop.permute.xlu1 %1750  ;;  %v3809_v10 = vpop.permute.xlu0 %1651 }
  0xad   :  { %v5431_v37 = vrot.slane %v3807_v8, 4  ;;  %v5430_v48 = vrot.slane %v3809_v10, 4 }
  0xaf   :  { %v1756_v47 = vsel %vm60_vm0, %v5439_v22, %v5431_v37 }
  0xb0   :  { %v3821_v61 = vsel %vm1754_vm10, %v1756_v47, %v3807_v8  ;;  %v3823_v4 = vpop.permute.xlu1 %1649  ;;  %v3825_v52 = vpop.permute.xlu0 %1510 }
  0xb1   :  { %v5438_v13 = vrot.slane %v3823_v4, 4  ;;  %v5437_v53 = vrot.slane %v3825_v52, 4 }
  0xb3   :  { %v1657_v17 = vsel %vm60_vm0, %v5438_v13, %v5430_v48 }
  0xb4   :  { %v3835_v58 = vsel %vm1655_vm11, %v1657_v17, %v3809_v10  ;;  %v3837_v34 = vpop.permute.xlu1 %1581  ;;  %v3839_v24 = vpop.permute.xlu0 %1583 }
  0xb8   :  { %v3841_v44 = vpop.permute.xlu1 %1512  ;;  %v3843_v51 = vpop.permute.xlu0 %1370 }
  0xb9   :  { %5519 = vst [vmem:[#allocation9_spill] sm:$0xff] %v3841_v44  ;;  %v5427_v62 = vrot.slane %v3841_v44, 4  ;;  %v5434_v5 = vrot.slane %v3843_v51, 4 }
  0xbb   :  { %v1518_v57 = vsel %vm60_vm0, %v5437_v53, %v5427_v62 }
  0xbc   :  { %v3854_v60 = vsel %vm1516_vm6, %v1518_v57, %v3841_v44  ;;  %v3856_v2 = vpop.permute.xlu1 %1442  ;;  %v3858_v18 = vpop.permute.xlu0 %1444 }
  0xc0   :  { %v3860_v3 = vpop.permute.xlu1 %1372  ;;  %v3862_v56 = vpop.permute.xlu0 %1232 }
  0xc1   :  { %v5429_v9 = vrot.slane %v3860_v3, 4  ;;  %v5433_v40 = vrot.slane %v3862_v56, 4 }
  0xc3   :  { %v1378_v41 = vsel %vm60_vm0, %v5434_v5, %v5429_v9 }
  0xc4   :  { %v3873_v28 = vsel %vm1376_vm12, %v1378_v41, %v3860_v3  ;;  %v3875_v32 = vpop.permute.xlu1 %1301  ;;  %v3877_v59 = vpop.permute.xlu0 %1303 }
  0xc8   :  { %v3879_v25 = vpop.permute.xlu1 %1234  ;;  %v3881_v38 = vpop.permute.xlu0 %1164 }
  0xc9   :  { %v5428_v42 = vrot.slane %v3879_v25, 4 }
  0xcb   :  { %v1240_v19 = vsel %vm60_vm0, %v5433_v40, %v5428_v42 }
  0xcc   :  { %v3892_v43 = vsel %vm1238_vm13, %v1240_v19, %v3879_v25  ;;  %v3894_v20 = vpop.permute.xlu1 %1162  ;;  %v3896_v26 = vpop.permute.xlu0 %994 }
  0xcd   :  { %v5436_v17 = vrot.slane %v3896_v26, 4  ;;  %v5479_v44 = vrot.slane %v3894_v20, 4 }
  0xd0   :  { %v3898_v14 = vpop.permute.xlu1 %1063  ;;  %v3902_v47 = vpop.permute.xlu0 %1065 }
  0xd4   :  { %v3900_v55 = vpop.permute.xlu1 %996  ;;  %v3925_v40 = vpop.permute.xlu0 %857 }
  0xd5   :  { %5520 = vst [vmem:[#allocation10_spill] sm:$0xff] %v3900_v55  ;;  %v5435_v57 = vrot.slane %v3900_v55, 4  ;;  %v3906_v41 = vpop.f32.mrf.mxu0 }
  0xd6   :  { %5521 = vst [vmem:[#allocation11_spill] sm:$0xff] %v3906_v41  ;;  %v3908_v62 = vpop.f32.mrf.mxu1 }
  0xd7   :  { %5522 = vst [vmem:[#allocation12_spill] sm:$0xff] %v3908_v62  ;;  %v1002_v19 = vsel %vm60_vm0, %v5436_v17, %v5435_v57  ;;  %v3915_v42 = vpop.f32.mrf.mxu0  ;;  %v5450_v17 = vrot.slane %v3925_v40, 4 }
  0xd8   :  { %5523 = vst [vmem:[#allocation13_spill] sm:$0xff] %v3915_v42  ;;  %v1003_v9 = vsel %vm1000_vm14, %v1002_v19, %v3900_v55  ;;  %v3919_v48 = vpop.permute.xlu1 %926  ;;  %v224_v37 = vcombine.low %v3906_v41, %v3915_v42  ;;  %v3923_v45 = vpop.f32.mrf.mxu1  ;;  %v5461_v55 = vrot.slane %v3856_v2, 4 }
  0xd9   :  { %5524 = vst [vmem:[#allocation14_spill] sm:$0xff] %v3923_v45  ;;  %v225_v57 = vcombine.low %v3908_v62, %v3923_v45  ;;  %v3942_v13 = vpop.permute.xlu0 %928 }
  0xda   :  { %226 = vrot.lane.b32.xlu0 %v224_v37, %s3174_s2 }
  0xdc   :  { %v3928_v5 = vpop.permute.xlu1 %859 }
  0xdd   :  { %5525 = vst [vmem:[#allocation15_spill] sm:$0xff] %v3928_v5  ;;  %v5449_v19 = vrot.slane %v3928_v5, 4  ;;  %v3944_v22 = vpop.permute.xlu0 %716 }
  0xde   :  { %228 = vrot.lane.b32.xlu0 %v225_v57, %s3174_s2 }
  0xdf   :  { %v865_v53 = vsel %vm60_vm0, %v5450_v17, %v5449_v19 }
  0xe0   :  { %v866_v37 = vsel %vm863_vm15, %v865_v53, %v3928_v5 }
  0xe1   :  { %v3946_v39 = vpop.permute.xlu0 %788 }
  0xe5   :  { %v3948_v45 = vpop.permute.xlu0 %579 }
  0xe6   :  { %5526 = vst [vmem:[#allocation16_spill] sm:$0xff] %v3948_v45 }
  0xe9   :  { %v3950_v62 = vpop.permute.xlu0 %650 }
  0xed   :  { %v3952_v57 = vpop.permute.xlu0 %484 }
  0xee   :  { %5527 = vst [vmem:[#allocation17_spill] sm:$0xff] %v3952_v57 }
  0xf1   :  { %v3954_v41 = vpop.permute.xlu0 %416 }
  0xf2   :  { %5528 = vst [vmem:[#allocation18_spill] sm:$0xff] %v3954_v41 }
  0xf5   :  { %v3956_v42 = vpop.permute.xlu0 %2438 }
  0xf6   :  { %5529 = vst [vmem:[#allocation19_spill] sm:$0xff] %v3956_v42 }
  0xf9   :  { %v3958_v19 = vpop.permute.xlu0 %2371 }
  0xfa   :  { %5530 = vst [vmem:[#allocation20_spill] sm:$0xff] %v3958_v19 }
  0xfd   :  { %v3960_v17 = vpop.permute.xlu0 %2266 }
  0xfe   :  { %5531 = vst [vmem:[#allocation21_spill] sm:$0xff] %v3960_v17 }
 0x14c   :  { %v227_v53 = vpop.permute.xlu0 %226 }
 0x14d   :  { %v230_v15 = vrot.slane %v227_v53, 4 }
 0x14f   :  { %v233_v0 = vsel %vm232_vm7, %v230_v15, %v227_v53  ;;  %v5460_v53 = vrot.slane %v3858_v18, 4 }
 0x150   :  { %242 = vst.msk [vmem:[#allocation2 + $0x4] sm:$0xff] %vm241_vm3, %v233_v0  ;;  %v229_v5 = vpop.permute.xlu0 %228  ;;  %vm1542_vm3 = vcmask 457728  }
 0x151   :  { %v231_v57 = vrot.slane %v229_v5, 4 }
 0x153   :  { %v234_v41 = vsel %vm60_vm0, %v230_v15, %v231_v57  ;;  %245 = vst.msk [vmem:[#allocation2 + $0x14] sm:$0xf] %vm244_vm4, %v231_v57  ;;  %vm1780_vm4 = vcmask 949248  }
 0x154   :  { %v3965_v42 = vsel %vm232_vm7, %v234_v41, %v229_v5  ;;  %v1450_v41 = vsel %vm60_vm0, %v5461_v55, %v5460_v53 }
 0x155   :  { %243 = vst [vmem:[#allocation2 + $0xc] sm:$0xff] %v3965_v42 }
 0x157   :  { %v3968_v17 = vld [vmem:[#allocation2] sm:$0xff] }
 0x158   :  { %v3970_v19 = vld [vmem:[#allocation2 + $0x4] sm:$0xff]  ;;  %v2023_v0 = vmul.f32 %v3371_v46, %v3968_v17 }
 0x159   :  { %2220 = vrot.lane.b32.xlu1 %v3970_v19, %s3172_s0  ;;  %v2197_v15 = vmul.f32 %v3375_v49, %v3970_v19  ;;  %v1451_v49 = vsel %vm1448_vm8, %v1450_v41, %v3858_v18 }
 0x15a   :  { %v1696_v5 = vld [vmem:[#allocation2 + $0x14] sm:$0xf]  ;;  %2032 = vst [vmem:[#allocation3 + $0x228] sm:$0xf0] %v2023_v0  ;;  %v2027_v41 = vcombine.low %v2023_v0, %v2023_v0 }
 0x15b   :  { %1710 = vrot.lane.b32.xlu0 %v1696_v5, %s3172_s0  ;;  %2205 = vst [vmem:[#allocation3 + $0x210] sm:$0xf] %v2197_v15  ;;  %v3129_v45 = vld [vmem:[#allocation2 + $0x14] ss:$0 sps:$4 sm:$0xff]  }
 0x15c   :  { %v3986_v57 = vld [vmem:[#allocation2 + $0x8] sm:$0xff]  ;;  %2031 = vst [vmem:[#allocation3 + $0x1d8] sm:$0xf0] %v2027_v41  ;;  %v5467_v41 = vrot.slane %v3803_v36, 4 }
 0x15d   :  { %1702 = vrot.lane.b32.xlu1 %v3970_v19, %s3172_s0  ;;  %v3991_v46 = vmul.f32 %v866_v37, %v3986_v57  ;;  %v3996_v5 = vmul.f32 %v1003_v9, %v3986_v57  ;;  %v4001_v53 = vmul.f32 %v1451_v49, %v3986_v57  ;;  %v4005_v55 = vmul.f32 %v3854_v60, %v3986_v57  ;;  %v1930_v60 = vld [vmem:[#allocation2 + $0x14] sm:$0xf] }
 0x15e   :  { %v2024_v37 = vmul.f32 %v3377_v50, %v3986_v57  ;;  %v2198_v9 = vmul.f32 %v3385_v54, %v3965_v42  ;;  %v2333_v49 = vmul.f32 %v3692_v1, %v3986_v57  ;;  %v4022_v50 = vcombine.low %v3970_v19, %v3970_v19 }
 0x15f   :  { %5532 = vst [vmem:[#allocation22_spill] sm:$0xff] %v3991_v46  ;;  %5533 = vst [vmem:[#allocation23_spill] sm:$0xff] %v3996_v5  ;;  %2224 = vrot.lane.b32.xlu0 %v3965_v42, %s3172_s0  ;;  %v2201_v46 = vcombine.high %v2197_v15, %v2197_v15  ;;  %v5466_v1 = vrot.slane %v3786_v31, 4  ;;  %v1795_v5 = vld [vmem:[#allocation2 + $0x14] sm:$0xf] }
 0x160   :  { %2034 = vst [vmem:[#allocation3 + $0x200] sm:$0xf0] %v2024_v37  ;;  %2207 = vst [vmem:[#allocation3 + $0x168] sm:$0xf] %v2198_v9  ;;  %v2028_v54 = vcombine.low %v2024_v37, %v2024_v37  ;;  %v2202_v0 = vcombine.high %v2198_v9, %v2198_v9  ;;  %v2337_v15 = vcombine.low %v2333_v49, %v2333_v49 }
 0x161   :  { %1118 = vrot.lane.b32.xlu1 %v3970_v19, %s3172_s0  ;;  %2206 = vst [vmem:[#allocation3 + $0x1d0] sm:$0xf] %v2201_v46  ;;  %2342 = vst [vmem:[#allocation3 + $0x58] sm:$0xf0] %v2333_v49  ;;  %v1967_v37 = vmul.f32 %v5466_v1, %v1930_v60  ;;  %v1825_v49 = vsel %vm1448_vm8, %v5467_v41, %v3803_v36  ;;  %v1279_v60 = vld [vmem:[#allocation2 + $0x14] sm:$0xf] }
 0x162   :  { %2033 = vst [vmem:[#allocation3 + $0x218] sm:$0xf0] %v2028_v54  ;;  %2208 = vst [vmem:[#allocation3 + $0xc0] sm:$0xf] %v2202_v0  ;;  %v5468_v54 = vrot.slane %v3805_v7, 4  ;;  %v4048_v0 = vmul.f32 %v1825_v49, %v3970_v19  ;;  %v5536_v49 = vrot.slane %v3790_v35, 4 }
 0x163   :  { %1706 = vrot.lane.b32.xlu0 %v3965_v42, %s3172_s0  ;;  %2341 = vst [vmem:[#allocation3 + $0x1a0] sm:$0xf0] %v2337_v15  ;;  %v5465_v15 = vrot.slane %v3877_v59, 4  ;;  %v5537_v41 = vrot.slane %v3823_v4, 4 }
 0x165   :  { %2226 = vrot.lane.b32.xlu1 %v3129_v45, %s3172_s0  ;;  %v5534_v45 = vrot.slane %v3782_v29, 4 }
 0x167   :  { %v1891_v46 = vsel %vm1516_vm6, %v5534_v45, %v3782_v29  ;;  %1981 = vrot.lane.b32.xlu0 %v1967_v37, %s3194_s9  ;;  %v1833_v29 = vmul.f32 %v5468_v54, %v1795_v5  ;;  %v1316_v45 = vmul.f32 %v5465_v15, %v1279_v60  ;;  %v1140_v5 = vld [vmem:[#allocation2 + $0x14] sm:$0xf]  ;;  %v5470_v37 = vrot.slane %v3881_v38, 4 }
 0x168   :  { %v4035_v9 = vmul.f32 %v1891_v46, %v3970_v19  ;;  %v4058_v46 = vcombine.high %v3970_v19, %v3970_v19  ;;  %v1041_v15 = vld [vmem:[#allocation2 + $0x14] sm:$0xf]  ;;  %v5469_v54 = vrot.slane %v3902_v47, 4 }
 0x169   :  { %1122 = vrot.lane.b32.xlu1 %v3965_v42, %s3172_s0  ;;  %v1177_v60 = vmul.f32 %v5470_v37, %v1140_v5  ;;  %v5473_v5 = vrot.slane %v3837_v34, 4 }
 0x16a   :  { %5535 = vst [vmem:[#allocation24_spill] sm:$0xff] %v4058_v46 }
 0x16b   :  { %1847 = vrot.lane.b32.xlu0 %v1833_v29, %s3196_s17  ;;  %v1755_v29 = vsel %vm1754_vm10, %v5536_v49, %v3790_v35  ;;  %v2346_v35 = vld [vmem:[#allocation2 + $0x10] sm:$0xff]  ;;  %v1078_v49 = vmul.f32 %v5469_v54, %v1041_v15  ;;  %vm2133_vm10 = vcmask 130048  }
 0x16c   :  { %v4071_v1 = vmul.f32 %v1755_v29, %v3970_v19  ;;  %v280_v29 = vrot.slane %v3770_v16, 4  ;;  %v3130_v15 = vld [vmem:[#allocation2 + $0x14] ss:$0 sps:$4 sm:$0xff]  }
 0x16d   :  { %2218 = vrot.lane.b32.xlu1 %v4022_v50, %s3172_s0 }
 0x16f   :  { %1330 = vrot.lane.b32.xlu0 %v1316_v45, %s3197_s18  ;;  %v1656_v45 = vsel %vm1655_vm11, %v5537_v41, %v3823_v4  ;;  %v1588_v41 = vsel %vm1587_vm9, %v5473_v5, %v3837_v34  ;;  %vm1168_vm11 = vcmask 80896  }
 0x170   :  { %v4086_v4 = vmul.f32 %v1656_v45, %v3970_v19  ;;  %v283_v45 = vsel %vm5507_vm5, %v280_v29, %v3770_v16  ;;  %v4099_v37 = vmul.f32 %v1588_v41, %v3968_v17  ;;  %v5541_v41 = vrot.slane %v3856_v2, 4 }
 0x171   :  { %1908 = vrot.lane.b32.xlu1 %v4035_v9, %s3195_s16 }
 0x172   :  { %5538 = vst [vmem:[#allocation25_spill] sm:$0xff] %v4086_v4 }
 0x173   :  { %1191 = vrot.lane.b32.xlu0 %v1177_v60, %s3198_s19  ;;  %v2334_v60 = vmul.f32 %v2346_v35, %v3697_v11  ;;  %v5539_v11 = vrot.slane %v3825_v52, 4 }
 0x175   :  { %1839 = vrot.lane.b32.xlu1 %v4048_v0, %s3196_s17  ;;  %2344 = vst [vmem:[#allocation3 + $0x20] sm:$0xf0] %v2334_v60  ;;  %v2338_v54 = vcombine.low %v2334_v60, %v2334_v60  ;;  %v1517_v35 = vsel %vm1516_vm6, %v5539_v11, %v3825_v52  ;;  %v4110_v60 = vmul.f32 %v3968_v17, %v283_v45  ;;  %v5472_v52 = vrot.slane %v3780_v27, 4 }
 0x176   :  { %vm1307_vm6 = vcmask 326656  }
 0x177   :  { %1092 = vrot.lane.b32.xlu0 %v1078_v49, %s3200_s21  ;;  %2343 = vst [vmem:[#allocation3 + $0x118] sm:$0xf0] %v2338_v54  ;;  %v5471_v49 = vrot.slane %v3776_v12, 4  ;;  %v4117_v54 = vmul.f32 %v1517_v35, %v3968_v17  ;;  %v2065_v11 = vsel %vm232_vm7, %v5472_v52, %v3780_v27 }
 0x178   :  { %v4149_v52 = vmul.f32 %v2065_v11, %v3968_v17 }
 0x179   :  { %1704 = vrot.lane.b32.xlu1 %v4058_v46, %s3172_s0  ;;  %v2134_v16 = vsel %vm2133_vm10, %v5471_v49, %v3776_v12  ;;  %5540 = vst [vmem:[#allocation26_spill] sm:$0xff] %v4117_v54  ;;  %v5475_v49 = vrot.slane %v3875_v32, 4  ;;  %v281_v46 = vrot.slane %v3772_v21, 4 }
 0x17a   :  { %v4129_v45 = vmul.f32 %v2134_v16, %v3968_v17  ;;  %v5542_v16 = vrot.slane %v3843_v51, 4 }
 0x17b   :  { %1124 = vrot.lane.b32.xlu0 %v3130_v15, %s3172_s0  ;;  %v1449_v15 = vsel %vm1448_vm8, %v5541_v41, %v3856_v2  ;;  %v5476_v2 = vrot.slane %v3784_v30, 4 }
 0x17c   :  { %v4136_v35 = vmul.f32 %v1449_v15, %v3968_v17  ;;  %v1377_v41 = vsel %vm1376_vm12, %v5542_v16, %v3843_v51  ;;  %v1308_v51 = vsel %vm1307_vm6, %v5475_v49, %v3875_v32  ;;  %v5544_v49 = vrot.slane %v3862_v56, 4 }
 0x17d   :  { %1772 = vrot.lane.b32.xlu1 %v4071_v1, %s3199_s20  ;;  %v1959_v15 = vsel %vm1587_vm9, %v5476_v2, %v3784_v30  ;;  %v4156_v5 = vmul.f32 %v1377_v41, %v3970_v19  ;;  %v4171_v16 = vmul.f32 %v1308_v51, %v3970_v19  ;;  %v284_v41 = vsel %vm60_vm0, %v280_v29, %v281_v46  ;;  %v4185_v51 = vpop.permute.xlu1 %786 }
 0x17e   :  { %v4168_v11 = vmul.f32 %v1959_v15, %v3970_v19  ;;  %v1239_v2 = vsel %vm1238_vm13, %v5544_v49, %v3862_v56  ;;  %v285_v15 = vsel %vm5507_vm5, %v284_v41, %v3772_v21  ;;  %v5480_v21 = vrot.slane %v3898_v14, 4  ;;  %v251_v49 = vld [vmem:[#allocation2 + $0x10] sm:$0xf] }
 0x17f   :  { %297 = vrot.lane.b32.xlu0 %v4110_v60, %s3190_s13  ;;  %5543 = vst [vmem:[#allocation27_spill] sm:$0xff] %v4156_v5  ;;  %v4188_v29 = vmul.f32 %v1239_v2, %v3970_v19  ;;  %v4200_v56 = vmul.f32 %v3986_v57, %v285_v15  ;;  %vm1069_vm12 = vcmask 48128   ;;  %v291_v15 = vmul.f32 %v281_v46, %v251_v49 }
 0x180   :  { %v1070_v41 = vsel %vm1069_vm12, %v5480_v21, %v3898_v14  ;;  %v5549_v21 = vrot.slane %v3803_v36, 4  ;;  %v5484_v46 = vrot.slane %v3919_v48, 4  ;;  %v4233_v49 = vcombine.low %v3965_v42, %v3965_v42 }
 0x181   :  { %1673 = vrot.lane.b32.xlu1 %v4086_v4, %s3201_s22  ;;  %5545 = vst [vmem:[#allocation28_spill] sm:$0xff] %v4188_v29  ;;  %5546 = vst [vmem:[#allocation29_spill] sm:$0xff] %v4200_v56  ;;  %vm5508_vm13 = vcmask 850944   ;;  %vm1473_vm5 = vcmask 490496  }
 0x182   :  { %v932_v36 = vsel %vm5508_vm13, %v5484_v46, %v3919_v48  ;;  %v2064_v46 = vrot.slane %v3774_v6, 4 }
 0x183   :  { %2151 = vrot.lane.b32.xlu0 %v4129_v45, %s3202_s23 }
 0x185   :  { %1602 = vrot.lane.b32.xlu1 %v4099_v37, %s3194_s9 }
 0x187   :  { %2079 = vrot.lane.b32.xlu0 %v4149_v52, %s3172_s0 }
 0x189   :  { %1534 = vrot.lane.b32.xlu1 %v4117_v54, %s3195_s16 }
 0x18b   :  { %1973 = vrot.lane.b32.xlu0 %v4168_v11, %s3194_s9 }
 0x18d   :  { %1463 = vrot.lane.b32.xlu1 %v4136_v35, %s3196_s17 }
 0x18f   :  { %1116 = vrot.lane.b32.xlu0 %v4022_v50, %s3172_s0  ;;  %v4211_v50 = vpop.permute.xlu1 %718 }
 0x190   :  { %5547 = vst [vmem:[#allocation30_spill] sm:$0xff] %v4211_v50  ;;  %v5550_v50 = vrot.slane %v3896_v26, 4 }
 0x191   :  { %1394 = vrot.lane.b32.xlu1 %v4156_v5, %s3203_s24  ;;  %v1169_v5 = vsel %vm1168_vm11, %v5479_v44, %v3894_v20  ;;  %v4216_v44 = vmul.f32 %v1070_v41, %v3970_v19 }
 0x192   :  { %v4203_v2 = vmul.f32 %v1169_v5, %v3970_v19  ;;  %v5548_v5 = vrot.slane %v3805_v7, 4 }
 0x193   :  { %301 = vrot.lane.b32.xlu0 %v4200_v56, %s3190_s13  ;;  %v4235_v41 = vpop.permute.xlu1 %648 }
 0x194   :  { %v1826_v56 = vsel %vm60_vm0, %v5549_v21, %v5548_v5  ;;  %v1586_v21 = vrot.slane %v3839_v24, 4  ;;  %v2037_v5 = vld [vmem:[#allocation2 + $0x10] sm:$0xf] }
 0x195   :  { %1322 = vrot.lane.b32.xlu1 %v4171_v16, %s3197_s18  ;;  %v2073_v4 = vmul.f32 %v2064_v46, %v2037_v5  ;;  %v5556_v5 = vrot.slane %v3788_v33, 4 }
 0x197   :  { %305 = vrot.lane.b32.xlu0 %v291_v15, %s3190_s13  ;;  %v4260_v54 = vpop.permute.xlu1 %581 }
 0x198   :  { %5553 = vst [vmem:[#allocation33_spill] sm:$0xff] %v4260_v54  ;;  %v1863_v54 = vld [vmem:[#allocation2 + $0x14] sm:$0xf] }
 0x199   :  { %1256 = vrot.lane.b32.xlu1 %v4188_v29, %s3204_s25  ;;  %v1001_v29 = vsel %vm1000_vm14, %v5550_v50, %v3896_v26  ;;  %v1827_v26 = vsel %vm1448_vm8, %v1826_v56, %v3805_v7  ;;  %v4255_v50 = vmul.f32 %v932_v36, %v3968_v17  ;;  %v5554_v7 = vrot.slane %v3837_v34, 4 }
 0x19a   :  { %v4238_v15 = vmul.f32 %v1001_v29, %v3968_v17  ;;  %v4252_v29 = vmul.f32 %v1827_v26, %v3965_v42  ;;  %v5555_v26 = vrot.slane %v3925_v40, 4  ;;  %vm792_vm14 = vcmask 203776  }
 0x19b   :  { %2222 = vrot.lane.b32.xlu0 %v4233_v49, %s3172_s0  ;;  %v1589_v56 = vsel %vm60_vm0, %v5554_v7, %v1586_v21  ;;  %vm307_vm8 = vcmask 72704  }
 0x19c   :  { %5551 = vst [vmem:[#allocation31_spill] sm:$0xff] %v4238_v15  ;;  %5552 = vst [vmem:[#allocation32_spill] sm:$0xff] %v4252_v29  ;;  %v864_v36 = vsel %vm863_vm15, %v5555_v26, %v3925_v40  ;;  %v1590_v7 = vsel %vm1587_vm9, %v1589_v56, %v3839_v24  ;;  %v5493_v40 = vrot.slane %v3944_v22, 4  ;;  %v1899_v26 = vmul.f32 %v5556_v5, %v1863_v54 }
 0x19d   :  { %1183 = vrot.lane.b32.xlu1 %v4203_v2, %s3198_s19  ;;  %vm5513_vm15 = vcmask 195584   ;;  %v5558_v54 = vrot.slane %v3780_v27, 4  ;;  %v5496_v27 = vrot.slane %v3778_v23, 4 }
 0x19e   :  { %v723_v24 = vsel %vm5513_vm15, %v5493_v40, %v3944_v22  ;;  %v1905_v33 = vcombine.low %v1899_v26, %v1899_v26 }
 0x19f   :  { %1843 = vrot.lane.b32.xlu0 %v4252_v29, %s3196_s17  ;;  %v4273_v29 = vmul.f32 %v864_v36, %v3968_v17  ;;  %v4286_v17 = vmul.f32 %v1590_v7, %v3986_v57  ;;  %v4290_v36 = vpop.permute.xlu1 %482  ;;  %v2066_v56 = vsel %vm60_vm0, %v5558_v54, %v2064_v46  ;;  %v1726_v7 = vld [vmem:[#allocation2 + $0x14] sm:$0xf]  ;;  %v5560_v46 = vrot.slane %v3786_v31, 4 }
 0x1a0   :  { %5557 = vst [vmem:[#allocation34_spill] sm:$0xff] %v4290_v36  ;;  %v2067_v26 = vsel %vm232_vm7, %v2066_v56, %v3774_v6 }
 0x1a1   :  { %1084 = vrot.lane.b32.xlu1 %v4216_v44, %s3200_s21 }
 0x1a3   :  { %2087 = vrot.lane.b32.xlu0 %v2073_v4, %s3172_s0  ;;  %v4310_v5 = vpop.permute.xlu1 %414 }
 0x1a5   :  { %1018 = vrot.lane.b32.xlu1 %v4238_v15, %s3205_s26  ;;  %v5490_v15 = vrot.slane %v4185_v51, 4 }
 0x1a7   :  { %v793_v34 = vsel %vm792_vm14, %v5490_v15, %v4185_v51  ;;  %1606 = vrot.lane.b32.xlu0 %v4286_v17, %s3194_s9  ;;  %v5559_v15 = vrot.slane %v3807_v8, 4  ;;  %v5562_v8 = vrot.slane %v3877_v59, 4 }
 0x1a8   :  { %v4293_v4 = vmul.f32 %v793_v34, %v3970_v19  ;;  %v4307_v34 = vmul.f32 %v723_v24, %v3970_v19  ;;  %v5561_v24 = vrot.slane %v3784_v30, 4 }
 0x1a9   :  { %946 = vrot.lane.b32.xlu1 %v4255_v50, %s3188_s11  ;;  %v1763_v36 = vmul.f32 %v5559_v15, %v1726_v7  ;;  %v5563_v15 = vrot.slane %v3875_v32, 4  ;;  %v5564_v7 = vrot.slane %v3776_v12, 4 }
 0x1aa   :  { %v1960_v54 = vsel %vm60_vm0, %v5561_v24, %v5560_v46  ;;  %v4343_v46 = vpop.permute.xlu1 %2436 }
 0x1ab   :  { %1914 = vrot.lane.b32.xlu0 %v1905_v33, %s3195_s16  ;;  %v4325_v33 = vmul.f32 %v2067_v26, %v3986_v57  ;;  %v1961_v6 = vsel %vm1587_vm9, %v1960_v54, %v3786_v31  ;;  %v1309_v30 = vsel %vm60_vm0, %v5563_v15, %v5562_v8  ;;  %v1769_v56 = vcombine.low %v1763_v36, %v1763_v36  ;;  %v1557_v36 = vld [vmem:[#allocation2 + $0x10] sm:$0xf] }
 0x1ac   :  { %v2135_v26 = vsel %vm60_vm0, %v5564_v7, %v5496_v27  ;;  %v4346_v24 = vmul.f32 %v1961_v6, %v3965_v42  ;;  %v1310_v31 = vsel %vm1307_vm6, %v1309_v30, %v3877_v59  ;;  %v1627_v6 = vld [vmem:[#allocation2 + $0x14] sm:$0xf]  ;;  %v1596_v59 = vmul.f32 %v1586_v21, %v1557_v36  ;;  %v5584_v27 = vld [vmem:[#allocation29_spill] sm:$0xff] }
 0x1ad   :  { %881 = vrot.lane.b32.xlu1 %v4273_v29, %s3206_s27  ;;  %v2136_v32 = vsel %vm2133_vm10, %v2135_v26, %v3778_v23  ;;  %v4356_v12 = vmul.f32 %v1310_v31, %v3965_v42  ;;  %v5565_v15 = vrot.slane %v3809_v10, 4  ;;  %v5566_v7 = vrot.slane %v3881_v38, 4 }
 0x1ae   :  { %v4359_v54 = vmul.f32 %v2136_v32, %v3986_v57  ;;  %v4363_v8 = vpop.permute.xlu1 %2369  ;;  %v5567_v26 = vrot.slane %v3894_v20, 4  ;;  %v4385_v10 = vcombine.high %v3965_v42, %v3965_v42  ;;  %v1417_v20 = vld [vmem:[#allocation2 + $0x10] sm:$0xf]  ;;  %vm1681_vm9 = vcmask 1014784  }
 0x1af   :  { %1467 = vrot.lane.b32.xlu0 %v4001_v53, %s3196_s17  ;;  %v1664_v30 = vmul.f32 %v5565_v15, %v1627_v6  ;;  %v4397_v6 = vmul.f32 %v3821_v61, %v3965_v42  ;;  %v5569_v15 = vrot.slane %v3898_v14, 4  ;;  %v4414_v61 = vmul.f32 %v3835_v58, %v3965_v42 }
 0x1b0   :  { %v1170_v31 = vsel %vm60_vm0, %v5567_v26, %v5566_v7  ;;  %v5570_v7 = vrot.slane %v3858_v18, 4  ;;  %v5492_v58 = vrot.slane %v3942_v13, 4  ;;  %vm5509_vm6 = vcmask 990208  }
 0x1b1   :  { %807 = vrot.lane.b32.xlu1 %v4293_v4, %s3207_s28  ;;  %v1670_v32 = vcombine.low %v1664_v30, %v1664_v30 }
 0x1b2   :  { %v4381_v21 = vpop.permute.xlu1 %2264  ;;  %v1457_v26 = vmul.f32 %v5570_v7, %v1417_v20  ;;  %v1347_v20 = vld [vmem:[#allocation2 + $0x14] sm:$0xf] }
 0x1b3   :  { %1778 = vrot.lane.b32.xlu0 %v1769_v56, %s3199_s20  ;;  %v4371_v56 = vmul.f32 %v3801_v63, %v3965_v42  ;;  %v1171_v63 = vsel %vm1168_vm11, %v1170_v31, %v3881_v38  ;;  %v5568_v38 = vrot.slane %v3902_v47, 4  ;;  %vm1402_vm11 = vcmask 703488  }
 0x1b4   :  { %v4393_v36 = vmul.f32 %v1171_v63, %v3965_v42 }
 0x1b5   :  { %740 = vrot.lane.b32.xlu1 %v4307_v34, %s3187_s10  ;;  %v1071_v30 = vsel %vm60_vm0, %v5569_v15, %v5568_v38 }
 0x1b6   :  { %v1072_v63 = vsel %vm1069_vm12, %v1071_v30, %v3902_v47  ;;  %v5571_v47 = vrot.slane %v3860_v3, 4  ;;  %v4441_v30 = vmul.f32 %v3873_v28, %v3965_v42  ;;  %v5572_v3 = vrot.slane %v3919_v48, 4 }
 0x1b7   :  { %1326 = vrot.lane.b32.xlu0 %v4356_v12, %s3197_s18  ;;  %v4426_v14 = vmul.f32 %v1072_v63, %v3965_v42  ;;  %v4456_v28 = vmul.f32 %v3892_v43, %v3965_v42  ;;  %v5495_v48 = vrot.slane %v3946_v39, 4  ;;  %v5573_v43 = vrot.slane %v3879_v25, 4 }
 0x1b8   :  { %v1385_v15 = vmul.f32 %v5571_v47, %v1347_v20  ;;  %v933_v63 = vsel %vm60_vm0, %v5572_v3, %v5492_v58  ;;  %v295_v58 = vcombine.high %v4110_v60, %v4110_v60  ;;  %v5574_v25 = vrot.slane %v4185_v51, 4 }
 0x1b9   :  { %2083 = vrot.lane.b32.xlu1 %v4325_v33, %s3172_s0  ;;  %v652_v60 = vrot.slane %v4235_v41, 4  ;;  %vm5510_vm12 = vcmask 56320  }
 0x1ba   :  { %v1391_v20 = vcombine.low %v1385_v15, %v1385_v15 }
 0x1bb   :  { %1610 = vrot.lane.b32.xlu0 %v1596_v59, %s3194_s9 }
 0x1bd   :  { %1977 = vrot.lane.b32.xlu1 %v4346_v24, %s3194_s9 }
 0x1bf   :  { %1679 = vrot.lane.b32.xlu0 %v1670_v32, %s3201_s22 }
 0x1c1   :  { %2155 = vrot.lane.b32.xlu1 %v4359_v54, %s3202_s23 }
 0x1c3   :  { %1187 = vrot.lane.b32.xlu0 %v4393_v36, %s3198_s19 }
 0x1c5   :  { %1912 = vrot.lane.b32.xlu1 %v4371_v56, %s3195_s16 }
 0x1c7   :  { %1471 = vrot.lane.b32.xlu0 %v1457_v26, %s3196_s17 }
 0x1c9   :  { %1708 = vrot.lane.b32.xlu1 %v4385_v10, %s3172_s0 }
 0x1cb   :  { %v4399_v59 = vpop.permute.xlu1 %2220  ;;  %1088 = vrot.lane.b32.xlu0 %v4426_v14, %s3200_s21 }
 0x1cd   :  { %1776 = vrot.lane.b32.xlu1 %v4397_v6, %s3199_s20  ;;  %v4419_v32 = vpop.permute.xlu0 %1710 }
 0x1cf   :  { %v4416_v31 = vpop.permute.xlu1 %1702  ;;  %1120 = vrot.lane.b32.xlu0 %v4233_v49, %s3172_s0  ;;  %v1208_v49 = vld [vmem:[#allocation2 + $0x14] sm:$0xf] }
 0x1d0   :  { %v1247_v3 = vmul.f32 %v5573_v43, %v1208_v49  ;;  %v5494_v49 = vrot.slane %v3950_v62, 4 }
 0x1d1   :  { %1677 = vrot.lane.b32.xlu1 %v4414_v61, %s3201_s22  ;;  %v4435_v38 = vpop.permute.xlu0 %2224 }
 0x1d2   :  { %v1253_v43 = vcombine.low %v1247_v3, %v1247_v3  ;;  %v656_v51 = vsel %vm60_vm0, %v652_v60, %v5494_v49 }
 0x1d3   :  { %v4428_v18 = vpop.permute.xlu1 %1118  ;;  %1400 = vrot.lane.b32.xlu0 %v1391_v20, %s3203_s24 }
 0x1d5   :  { %1538 = vrot.lane.b32.xlu1 %v4005_v55, %s3195_s16 }
 0x1d7   :  { %v2227_v7 = vpop.permute.xlu1 %2226 }
 0x1d8   :  { %v2231_v26 = vsel %vm350_vm1, %v4435_v38, %v2227_v7  ;;  %v4461_v7 = vpop.permute.xlu0 %1706 }
 0x1d9   :  { %2239 = vst [vmem:[#allocation3 + $0xc0] sm:$0xf0] %v2231_v26  ;;  %1398 = vrot.lane.b32.xlu1 %v4441_v30, %s3203_s24  ;;  %v934_v26 = vsel %vm5508_vm13, %v933_v63, %v3942_v13  ;;  %vm1612_vm13 = vcmask 424960  }
 0x1da   :  { %v4469_v15 = vmul.f32 %v934_v26, %v3986_v57  ;;  %v794_v57 = vsel %vm60_vm0, %v5574_v25, %v5495_v48 }
 0x1db   :  { %v4458_v47 = vpop.permute.xlu1 %1122 }
 0x1dc   :  { %950 = vrot.lane.b32.xlu0 %v4469_v15, %s3188_s11  ;;  %v4487_v26 = vpop.permute.xlu0 %1981 }
 0x1dd   :  { %1260 = vrot.lane.b32.xlu1 %v4456_v28, %s3204_s25  ;;  %5575 = vst [vmem:[#allocation35_spill] sm:$0xff] %v4487_v26 }
 0x1df   :  { %v2219_v20 = vpop.permute.xlu1 %2218 }
 0x1e0   :  { %v2228_v63 = vsel %vm350_vm1, %v2219_v20, %v4399_v59  ;;  %v2546_v40 = vld [vmem:[#allocation3 + $0xc0] sm:$0xff]  ;;  %v2146_v20 = vcombine.low %v4129_v45, %v4129_v45  ;;  %1262 = vrot.lane.b32.xlu0 %v1253_v43, %s3204_s25  ;;  %v4503_v3 = vpop.permute.xlu0 %1847  ;;  %v1837_v45 = vcombine.high %v4048_v0, %v4048_v0 }
 0x1e1   :  { %2236 = vst [vmem:[#allocation3 + $0x210] sm:$0xf0] %v2228_v63  ;;  %2638 = vmatprep.subr.mxu1 %v2546_v40  ;;  %299 = vrot.lane.b32.xlu1 %v295_v58, %s3190_s13  ;;  %v795_v40 = vsel %vm792_vm14, %v794_v57, %v3946_v39  ;;  %5576 = vst [vmem:[#allocation36_spill] sm:$0xff] %v4503_v3  ;;  %v657_v57 = vsel %vm654_vm2, %v656_v51, %v3950_v62  ;;  %vm1264_vm14 = vcmask 736256  }
 0x1e2   :  { %v4501_v58 = vmul.f32 %v795_v40, %v3965_v42  ;;  %v4515_v43 = vmul.f32 %v657_v57, %v3965_v42  ;;  %v1600_v40 = vcombine.high %v4099_v37, %v4099_v37  ;;  %v1461_v37 = vcombine.high %v4136_v35, %v4136_v35 }
 0x1e3   :  { %v4491_v63 = vpop.permute.xlu1 %1908  ;;  %v1903_v35 = vcombine.low %v4035_v9, %v4035_v9  ;;  %v1082_v9 = vcombine.high %v4216_v44, %v4216_v44  ;;  %v5581_v44 = vld [vmem:[#allocation26_spill] sm:$0xff] }
 0x1e4   :  { %811 = vrot.lane.b32.xlu0 %v4501_v58, %s3207_s28 }
 0x1e5   :  { %2149 = vrot.lane.b32.xlu1 %v2146_v20, %s3202_s23  ;;  %v4517_v20 = vpop.permute.xlu0 %1330 }
 0x1e6   :  { %5577 = vst [vmem:[#allocation37_spill] sm:$0xff] %v4517_v20 }
 0x1e7   :  { %v4507_v25 = vpop.permute.xlu1 %1839 }
 0x1e8   :  { %673 = vrot.lane.b32.xlu0 %v4515_v43, %s3208_s29 }
 0x1e9   :  { %1841 = vrot.lane.b32.xlu1 %v1837_v45, %s3196_s17  ;;  %v2077_v45 = vcombine.high %v4149_v52, %v4149_v52  ;;  %v4530_v57 = vpop.permute.xlu0 %1191 }
 0x1ea   :  { %5578 = vst [vmem:[#allocation38_spill] sm:$0xff] %v4530_v57 }
 0x1eb   :  { %v1705_v49 = vpop.permute.xlu1 %1704 }
 0x1ec   :  { %v1712_v0 = vsel %vm350_vm1, %v4416_v31, %v1705_v49  ;;  %v1713_v51 = vsel %vm350_vm1, %v1705_v49, %v4461_v7  ;;  %2081 = vrot.lane.b32.xlu0 %v2077_v45, %s3172_s0  ;;  %v1971_v31 = vcombine.high %v4168_v11, %v4168_v11 }
 0x1ed   :  { %1720 = vst [vmem:[#allocation3 + $0x50] sm:$0xf] %v1712_v0  ;;  %1721 = vst [vmem:[#allocation3 + $0x100] sm:$0xf] %v1713_v51  ;;  %1604 = vrot.lane.b32.xlu1 %v1600_v40, %s3194_s9  ;;  %v4540_v49 = vpop.permute.xlu0 %1092  ;;  %v1320_v40 = vcombine.high %v4171_v16, %v4171_v16  ;;  %v1181_v51 = vcombine.high %v4203_v2, %v4203_v2  ;;  %v1767_v16 = vcombine.low %v4071_v1, %v4071_v1  ;;  %v5580_v2 = vld [vmem:[#allocation25_spill] sm:$0xff] }
 0x1ee   :  { %5579 = vst [vmem:[#allocation39_spill] sm:$0xff] %v4540_v49 }
 0x1ef   :  { %v4534_v48 = vpop.permute.xlu1 %1772 }
 0x1f0   :  { %1975 = vrot.lane.b32.xlu0 %v1971_v31, %s3194_s9 }
 0x1f1   :  { %1465 = vrot.lane.b32.xlu1 %v1461_v37, %s3196_s17  ;;  %v1125_v0 = vpop.permute.xlu0 %1124 }
 0x1f2   :  { %v1129_v11 = vsel %vm350_vm1, %v4458_v47, %v1125_v0  ;;  %v944_v0 = vcombine.high %v4255_v50, %v4255_v50  ;;  %v805_v50 = vcombine.high %v4293_v4, %v4293_v4  ;;  %v5583_v4 = vld [vmem:[#allocation28_spill] sm:$0xff] }
 0x1f3   :  { %v4544_v52 = vpop.permute.xlu1 %1673  ;;  %1137 = vst [vmem:[#allocation3 + $0x38] sm:$0xf0] %v1129_v11  ;;  %v1529_v11 = vcombine.low %v5581_v44, %v5581_v44 }
 0x1f4   :  { %1906 = vrot.lane.b32.xlu0 %v1903_v35, %s3195_s16 }
 0x1f5   :  { %1324 = vrot.lane.b32.xlu1 %v1320_v40, %s3197_s18  ;;  %v4560_v37 = vpop.permute.xlu0 %297  ;;  %v1668_v40 = vcombine.low %v5580_v2, %v5580_v2 }
 0x1f7   :  { %v4554_v45 = vpop.permute.xlu1 %1602 }
 0x1f8   :  { %1770 = vrot.lane.b32.xlu0 %v1767_v16, %s3199_s20 }
 0x1f9   :  { %1185 = vrot.lane.b32.xlu1 %v1181_v51, %s3198_s19  ;;  %v4570_v35 = vpop.permute.xlu0 %2151  ;;  %v655_v51 = vsel %vm654_vm2, %v652_v60, %v4235_v41  ;;  %v5582_v41 = vld [vmem:[#allocation27_spill] sm:$0xff]  ;;  %vm2159_vm2 = vcmask 916480  }
 0x1fa   :  { %v1389_v60 = vcombine.low %v5582_v41, %v5582_v41 }
 0x1fb   :  { %v4564_v31 = vpop.permute.xlu1 %1534 }
 0x1fc   :  { %1671 = vrot.lane.b32.xlu0 %v1668_v40, %s3201_s22 }
 0x1fd   :  { %1086 = vrot.lane.b32.xlu1 %v1082_v9, %s3200_s21  ;;  %v4582_v16 = vpop.permute.xlu0 %2079  ;;  %v4585_v9 = vmul.f32 %v655_v51, %v3970_v19  ;;  %v1251_v51 = vcombine.low %v5583_v4, %v5583_v4  ;;  %v2147_v4 = vcombine.low %v4359_v54, %v4359_v54  ;;  %v5586_v54 = vrot.slane %v3778_v23, 4 }
 0x1ff   :  { %v4574_v1 = vpop.permute.xlu1 %1463 }
 0x200   :  { %1532 = vrot.lane.b32.xlu0 %v1529_v11, %s3195_s16 }
 0x201   :  { %948 = vrot.lane.b32.xlu1 %v944_v0, %s3188_s11  ;;  %v4595_v40 = vpop.permute.xlu0 %1973  ;;  %v667_v0 = vcombine.high %v4585_v9, %v4585_v9 }
 0x203   :  { %v4589_v2 = vpop.permute.xlu1 %1394 }
 0x204   :  { %1392 = vrot.lane.b32.xlu0 %v1389_v60, %s3203_s24  ;;  %v5585_v60 = vld [vmem:[#allocation31_spill] sm:$0xff] }
 0x205   :  { %809 = vrot.lane.b32.xlu1 %v805_v50, %s3207_s28  ;;  %v1117_v11 = vpop.permute.xlu0 %1116  ;;  %v296_v50 = vcombine.high %v5584_v27, %v5584_v27  ;;  %v876_v27 = vcombine.low %v4273_v29, %v4273_v29  ;;  %v1972_v29 = vcombine.high %v4346_v24, %v4346_v24 }
 0x206   :  { %v1126_v41 = vsel %vm350_vm1, %v1117_v11, %v4428_v18  ;;  %v2103_v11 = vld [vmem:[#allocation2 + $0x10] sm:$0xf] }
 0x207   :  { %v4599_v44 = vpop.permute.xlu1 %1322  ;;  %1134 = vst [vmem:[#allocation3 + $0x88] sm:$0xf0] %v1126_v41  ;;  %v2078_v41 = vcombine.high %v4325_v33, %v4325_v33 }
 0x208   :  { %1254 = vrot.lane.b32.xlu0 %v1251_v51, %s3204_s25 }
 0x209   :  { %671 = vrot.lane.b32.xlu1 %v667_v0, %s3208_s29  ;;  %v1013_v0 = vcombine.low %v5585_v60, %v5585_v60  ;;  %v4615_v57 = vpop.permute.xlu0 %301  ;;  %v2142_v60 = vmul.f32 %v5586_v54, %v2103_v11 }
 0x20b   :  { %v4609_v49 = vpop.permute.xlu1 %1256  ;;  %v2148_v23 = vcombine.low %v2142_v60, %v2142_v60  ;;  %v1601_v60 = vcombine.high %v4286_v17, %v4286_v17  ;;  %v1530_v17 = vcombine.low %v4005_v55, %v4005_v55  ;;  %v1182_v55 = vcombine.high %v4393_v36, %v4393_v36 }
 0x20c   :  { %1016 = vrot.lane.b32.xlu0 %v1013_v0, %s3205_s26  ;;  %v1904_v0 = vcombine.low %v4371_v56, %v4371_v56 }
 0x20d   :  { %303 = vrot.lane.b32.xlu1 %v296_v50, %s3190_s13  ;;  %v4625_v51 = vpop.permute.xlu0 %305 }
 0x20f   :  { %v4619_v20 = vpop.permute.xlu1 %1183 }
 0x210   :  { %879 = vrot.lane.b32.xlu0 %v876_v27, %s3206_s27  ;;  %v5587_v27 = vld [vmem:[#allocation32_spill] sm:$0xff] }
 0x211   :  { %2153 = vrot.lane.b32.xlu1 %v2147_v4, %s3202_s23  ;;  %v2223_v4 = vpop.permute.xlu0 %2222  ;;  %v1838_v24 = vcombine.high %v5587_v27, %v5587_v27 }
 0x212   :  { %v2229_v3 = vsel %vm350_vm1, %v4399_v59, %v2223_v4  ;;  %v2230_v33 = vsel %vm350_vm1, %v2223_v4, %v4435_v38  ;;  %v1768_v59 = vcombine.low %v4397_v6, %v4397_v6  ;;  %v1669_v4 = vcombine.low %v4414_v61, %v4414_v61 }
 0x213   :  { %v4627_v50 = vpop.permute.xlu1 %1084  ;;  %2237 = vst [vmem:[#allocation3 + $0x1d0] sm:$0xf0] %v2229_v3  ;;  %2238 = vst [vmem:[#allocation3 + $0x168] sm:$0xf0] %v2230_v33  ;;  %v1462_v33 = vcombine.high %v4001_v53, %v4001_v53  ;;  %v1321_v61 = vcombine.high %v4356_v12, %v4356_v12  ;;  %v1488_v53 = vld [vmem:[#allocation2 + $0x10] sm:$0xf] }
 0x214   :  { %1910 = vrot.lane.b32.xlu0 %v1904_v0, %s3195_s16  ;;  %v2543_v0 = vld [vmem:[#allocation3 + $0x210] sm:$0xff] }
 0x215   :  { %2085 = vrot.lane.b32.xlu1 %v2078_v41, %s3172_s0  ;;  %v4647_v56 = vpop.permute.xlu0 %1843 }
 0x217   :  { %v4643_v26 = vpop.permute.xlu1 %1018 }
 0x218   :  { %2157 = vrot.lane.b32.xlu0 %v2148_v23, %s3202_s23 }
 0x219   :  { %1979 = vrot.lane.b32.xlu1 %v1972_v29, %s3194_s9  ;;  %v4657_v38 = vpop.permute.xlu0 %2087 }
 0x21a   :  { %5588 = vst [vmem:[#allocation25_spill] sm:$0xff] %v4657_v38  ;;  %v2544_v3 = vld [vmem:[#allocation3 + $0x1d0] sm:$0xff]  ;;  %v2545_v41 = vld [vmem:[#allocation3 + $0x168] sm:$0xff] }
 0x21b   :  { %v4651_v11 = vpop.permute.xlu1 %946  ;;  %2561 = vmatprep.subr.mxu0 %v2544_v3  ;;  %2639 = vmatpush1.msra.mxu1 %v2545_v41  ;;  %v5591_v41 = vld [vmem:[#allocation9_spill] sm:$0xff] }
 0x21c   :  { %1774 = vrot.lane.b32.xlu0 %v1768_v59, %s3199_s20  ;;  %2562 = vmatpush1.msra.mxu0 %v2543_v0  ;;  %v1252_v0 = vcombine.low %v4456_v28, %v4456_v28  ;;  %v945_v28 = vcombine.high %v4469_v15, %v4469_v15 }
 0x21d   :  { %1845 = vrot.lane.b32.xlu1 %v1838_v24, %s3196_s17  ;;  %v4666_v29 = vpop.permute.xlu0 %1606  ;;  %v1390_v24 = vcombine.low %v4441_v30, %v4441_v30 }
 0x21f   :  { %v4659_v54 = vpop.permute.xlu1 %881 }
 0x220   :  { %5589 = vst [vmem:[#allocation26_spill] sm:$0xff] %v4659_v54  ;;  %1675 = vrot.lane.b32.xlu0 %v1669_v4, %s3201_s22 }
 0x221   :  { %1608 = vrot.lane.b32.xlu1 %v1601_v60, %s3194_s9  ;;  %v1915_v23 = vpop.permute.xlu0 %1914  ;;  %v5592_v60 = vrot.slane %v5591_v41, 4  ;;  %v5595_v41 = vld [vmem:[#allocation23_spill] sm:$0xff] }
 0x223   :  { %v4669_v6 = vpop.permute.xlu1 %807  ;;  %v1525_v12 = vmul.f32 %v5592_v60, %v1488_v53  ;;  %v1014_v60 = vcombine.low %v5595_v41, %v5595_v41 }
 0x224   :  { %1536 = vrot.lane.b32.xlu0 %v1530_v17, %s3195_s16  ;;  %v5593_v17 = vld [vmem:[#allocation30_spill] sm:$0xff] }
 0x225   :  { %1469 = vrot.lane.b32.xlu1 %v1462_v33, %s3196_s17  ;;  %v4684_v59 = vpop.permute.xlu0 %1467  ;;  %v1083_v33 = vcombine.high %v4426_v14, %v4426_v14  ;;  %v5497_v36 = vrot.slane %v5593_v17, 4  ;;  %v5594_v14 = vrot.slane %v3944_v22, 4 }
 0x227   :  { %v4677_v27 = vpop.permute.xlu1 %740 }
 0x228   :  { %5590 = vst [vmem:[#allocation27_spill] sm:$0xff] %v4677_v27  ;;  %1396 = vrot.lane.b32.xlu0 %v1390_v24, %s3203_s24 }
 0x229   :  { %1328 = vrot.lane.b32.xlu1 %v1321_v61, %s3197_s18  ;;  %v1779_v4 = vpop.permute.xlu0 %1778  ;;  %v1531_v61 = vcombine.low %v1525_v12, %v1525_v12 }
 0x22b   :  { %v4687_v3 = vpop.permute.xlu1 %2083 }
 0x22c   :  { %1258 = vrot.lane.b32.xlu0 %v1252_v0, %s3204_s25 }
 0x22d   :  { %1189 = vrot.lane.b32.xlu1 %v1182_v55, %s3198_s19  ;;  %v4703_v24 = vpop.permute.xlu0 %1326  ;;  %v724_v55 = vsel %vm60_vm0, %v5594_v14, %v5497_v36 }
 0x22f   :  { %v4697_v30 = vpop.permute.xlu1 %1977 }
 0x230   :  { %1540 = vrot.lane.b32.xlu0 %v1531_v61, %s3195_s16  ;;  %v5598_v61 = vld [vmem:[#allocation22_spill] sm:$0xff] }
 0x231   :  { %1090 = vrot.lane.b32.xlu1 %v1083_v33, %s3200_s21  ;;  %v4718_v12 = vpop.permute.xlu0 %1610  ;;  %v725_v33 = vsel %vm5513_vm15, %v724_v55, %v5593_v17  ;;  %v877_v14 = vcombine.low %v5598_v61, %v5598_v61 }
 0x232   :  { %5596 = vst [vmem:[#allocation28_spill] sm:$0xff] %v4718_v12  ;;  %v4729_v22 = vmul.f32 %v725_v33, %v3965_v42  ;;  %v904_v33 = vld [vmem:[#allocation2 + $0x10] sm:$0xf] }
 0x233   :  { %v4706_v53 = vpop.permute.xlu1 %2155 }
 0x234   :  { %1020 = vrot.lane.b32.xlu0 %v1014_v60, %s3205_s26  ;;  %v736_v42 = vcombine.low %v4729_v22, %v4729_v22 }
 0x235   :  { %952 = vrot.lane.b32.xlu1 %v945_v28, %s3188_s11  ;;  %v1680_v36 = vpop.permute.xlu0 %1679 }
 0x237   :  { %v4721_v0 = vpop.permute.xlu1 %1912 }
 0x238   :  { %5597 = vst [vmem:[#allocation29_spill] sm:$0xff] %v4721_v0  ;;  %v1919_v15 = vsel %vm1542_vm3, %v4721_v0, %v1915_v23  ;;  %883 = vrot.lane.b32.xlu0 %v877_v14, %s3206_s27  ;;  %v970_v14 = vld [vmem:[#allocation2 + $0x10] sm:$0xf]  ;;  %v5605_v0 = vld [vmem:[#allocation24_spill] sm:$0xff] }
 0x239   :  { %1927 = vst [vmem:[#allocation3 + $0x230] sm:$0xf0] %v1919_v15  ;;  %1022 = vrot.lane.b32.xlu1 %v5595_v41, %s3205_s26  ;;  %v4742_v60 = vpop.permute.xlu0 %1187  ;;  %v5599_v41 = vld [vmem:[#allocation16_spill] sm:$0xff] }
 0x23a   :  { %v583_v15 = vrot.slane %v5599_v41, 4 }
 0x23b   :  { %v1709_v28 = vpop.permute.xlu1 %1708 }
 0x23c   :  { %v1714_v23 = vsel %vm350_vm1, %v4461_v7, %v1709_v28  ;;  %v1715_v55 = vsel %vm350_vm1, %v1709_v28, %v4419_v32  ;;  %742 = vrot.lane.b32.xlu0 %v736_v42, %s3187_s10  ;;  %v5601_v7 = vrot.slane %v3942_v13, 4  ;;  %v585_v38 = vsel %vm307_vm8, %v583_v15, %v5599_v41 }
 0x23d   :  { %1722 = vst [vmem:[#allocation3 + $0x30] sm:$0xf] %v1714_v23  ;;  %1723 = vst [vmem:[#allocation3 + $0x1b0] sm:$0xf] %v1715_v55  ;;  %669 = vrot.lane.b32.xlu1 %v4585_v9, %s3208_s29  ;;  %v5602_v23 = vld [vmem:[#allocation10_spill] sm:$0xff]  ;;  %v4756_v12 = vpop.permute.xlu0 %1471 }
 0x23e   :  { %v940_v28 = vmul.f32 %v5601_v7, %v904_v33  ;;  %v5603_v55 = vrot.slane %v5602_v23, 4  ;;  %5604 = vst [vmem:[#allocation32_spill] sm:$0xff] %v4756_v12  ;;  %v5607_v33 = vld [vmem:[#allocation33_spill] sm:$0xff] }
 0x23f   :  { %v4747_v27 = vpop.permute.xlu1 %1776 }
 0x240   :  { %5600 = vst [vmem:[#allocation31_spill] sm:$0xff] %v4747_v27  ;;  %v1784_v32 = vsel %vm1780_vm4, %v4747_v27, %v1779_v4  ;;  %v1009_v9 = vmul.f32 %v5603_v55, %v970_v14  ;;  %v4765_v4 = vmul.f32 %v585_v38, %v3970_v19  ;;  %954 = vrot.lane.b32.xlu0 %v940_v28, %s3188_s11  ;;  %v5500_v14 = vrot.slane %v5607_v33, 4 }
 0x241   :  { %1792 = vst [vmem:[#allocation3 + $0x1b0] sm:$0xf0] %v1784_v32  ;;  %535 = vrot.lane.b32.xlu1 %v5605_v0, %s3172_s0  ;;  %v4771_v7 = vpop.permute.xlu0 %1088  ;;  %v806_v19 = vcombine.high %v4501_v58, %v4501_v58  ;;  %v5501_v28 = vrot.slane %v4310_v5, 4  ;;  %v5613_v27 = vrot.slane %v3946_v39, 4 }
 0x242   :  { %v1015_v32 = vcombine.low %v1009_v9, %v1009_v9  ;;  %v586_v38 = vsel %vm60_vm0, %v583_v15, %v5500_v14 }
 0x243   :  { %v4762_v42 = vpop.permute.xlu1 %1677  ;;  %v421_v15 = vsel %vm5509_vm6, %v5501_v28, %v4310_v5 }
 0x244   :  { %5606 = vst [vmem:[#allocation9_spill] sm:$0xff] %v4762_v42  ;;  %v1685_v13 = vsel %vm1681_vm9, %v4762_v42, %v1680_v36  ;;  %1024 = vrot.lane.b32.xlu0 %v1015_v32, %s3205_s26  ;;  %v735_v36 = vcombine.low %v4307_v34, %v4307_v34  ;;  %v587_v34 = vsel %vm307_vm8, %v586_v38, %v5607_v33 }
 0x245   :  { %1693 = vst [vmem:[#allocation3 + $0x160] sm:$0xf0] %v1685_v13  ;;  %602 = vrot.lane.b32.xlu1 %v4765_v4, %s3173_s1  ;;  %v1121_v41 = vpop.permute.xlu0 %1120 }
 0x246   :  { %v1127_v23 = vsel %vm350_vm1, %v4428_v18, %v1121_v41  ;;  %v1128_v58 = vsel %vm350_vm1, %v1121_v41, %v4458_v47  ;;  %v3141_v18 = vld [vmem:[#allocation2 + $0xc] sm:$0xff] }
 0x247   :  { %v4775_v0 = vpop.permute.xlu1 %1538  ;;  %1135 = vst [vmem:[#allocation3] sm:$0xf0] %v1127_v23  ;;  %1136 = vst [vmem:[#allocation3 + $0x188] sm:$0xf0] %v1128_v58  ;;  %v4800_v9 = vmul.f32 %v3141_v18, %v587_v34  ;;  %v4818_v23 = vld [vmem:[#allocation2 + $0x4] sm:$0xff] }
 0x248   :  { %5608 = vst [vmem:[#allocation30_spill] sm:$0xff] %v4775_v0  ;;  %738 = vrot.lane.b32.xlu0 %v735_v36, %s3187_s10  ;;  %v832_v34 = vld [vmem:[#allocation2 + $0x10] sm:$0xf] }
 0x249   :  { %813 = vrot.lane.b32.xlu1 %v806_v19, %s3207_s28  ;;  %v1401_v47 = vpop.permute.xlu0 %1400  ;;  %v4808_v19 = vld [vmem:[#allocation2] sm:$0xff]  ;;  %v598_v36 = vcombine.low %v4800_v9, %v4800_v9 }
 0x24a   :  { %v4811_v38 = vmul.f32 %v4808_v19, %v421_v15 }
 0x24b   :  { %v4791_v55 = vpop.permute.xlu1 %1398 }
 0x24c   :  { %5609 = vst [vmem:[#allocation23_spill] sm:$0xff] %v4791_v55  ;;  %v1406_v13 = vsel %vm1402_vm11, %v4791_v55, %v1401_v47  ;;  %537 = vrot.lane.b32.xlu0 %v3141_v18, %s3172_s0  ;;  %v763_v47 = vld [vmem:[#allocation2 + $0x14] sm:$0xf]  ;;  %v433_v18 = vcombine.high %v4811_v38, %v4811_v38  ;;  %v5611_v55 = vld [vmem:[#allocation15_spill] sm:$0xff] }
 0x24d   :  { %885 = vrot.lane.b32.xlu1 %v5598_v61, %s3206_s27  ;;  %1414 = vst [vmem:[#allocation3 + $0x170] sm:$0xf0] %v1406_v13  ;;  %v5610_v61 = vld [vmem:[#allocation34_spill] sm:$0xff]  ;;  %v5612_v0 = vrot.slane %v5611_v55, 4 }
 0x24e   :  { %v4816_v41 = vpop.permute.xlu0 %950  ;;  %v486_v58 = vrot.slane %v5610_v61, 4 }
 0x24f   :  { %v4806_v32 = vpop.permute.xlu1 %1260  ;;  %v872_v12 = vmul.f32 %v5612_v0, %v832_v34  ;;  %v5614_v0 = vld [vmem:[#allocation17_spill] sm:$0xff] }
 0x250   :  { %604 = vrot.lane.b32.xlu0 %v598_v36, %s3173_s1  ;;  %v488_v28 = vsel %vm5510_vm12, %v486_v58, %v5610_v61  ;;  %v801_v36 = vmul.f32 %v5613_v27, %v763_v47  ;;  %v487_v39 = vrot.slane %v5614_v0, 4  ;;  %v5615_v27 = vld [vmem:[#allocation18_spill] sm:$0xff] }
 0x251   :  { %533 = vrot.lane.b32.xlu1 %v4818_v23, %s3172_s0  ;;  %v419_v55 = vrot.slane %v5615_v27, 4  ;;  %v878_v61 = vcombine.low %v872_v12, %v872_v12 }
 0x252   :  { %v1263_v42 = vpop.permute.xlu0 %1262  ;;  %v489_v12 = vsel %vm60_vm0, %v486_v58, %v487_v39 }
 0x253   :  { %v300_v15 = vpop.permute.xlu1 %299 }
 0x254   :  { %v308_v13 = vsel %vm307_vm8, %v4560_v37, %v300_v15  ;;  %v309_v14 = vsel %vm307_vm8, %v300_v15, %v4615_v57  ;;  %v1268_v37 = vsel %vm1264_vm14, %v4806_v32, %v1263_v42  ;;  %v4840_v15 = vmul.f32 %v4818_v23, %v488_v28  ;;  %815 = vrot.lane.b32.xlu0 %v801_v36, %s3207_s28  ;;  %v389_v36 = vld [vmem:[#allocation2 + $0x8] sm:$0xff] }
 0x255   :  { %316 = vst [vmem:[#allocation3 + $0xc8] sm:$0xf] %v308_v13  ;;  %317 = vst [vmem:[#allocation3 + $0x8] sm:$0xf] %v309_v14  ;;  %437 = vrot.lane.b32.xlu1 %v433_v18, %s3192_s14  ;;  %v668_v28 = vcombine.high %v4515_v43, %v4515_v43  ;;  %v5616_v18 = vrot.slane %v4310_v5, 4  ;;  %v597_v13 = vcombine.low %v4765_v4, %v4765_v4 }
 0x256   :  { %1276 = vst [vmem:[#allocation3 + $0x1c8] sm:$0xf0] %v1268_v37  ;;  %v4847_v34 = vpop.permute.xlu0 %811 }
 0x257   :  { %v2150_v54 = vpop.permute.xlu1 %2149  ;;  %v422_v43 = vsel %vm60_vm0, %v5616_v18, %v419_v55 }
 0x258   :  { %v2160_v14 = vsel %vm2159_vm2, %v2150_v54, %v4570_v35  ;;  %887 = vrot.lane.b32.xlu0 %v878_v61, %s3206_s27  ;;  %v490_v61 = vsel %vm5510_vm12, %v489_v12, %v5614_v0  ;;  %v423_v4 = vsel %vm5509_vm6, %v422_v43, %v5615_v27  ;;  %vm5511_vm6 = vcmask 719872  }
 0x259   :  { %2168 = vst [vmem:[#allocation3 + $0x10] sm:$0xf0] %v2160_v14  ;;  %505 = vrot.lane.b32.xlu1 %v4840_v15, %s3193_s15  ;;  %v4871_v14 = vld [vmem:[#allocation2 + $0xc] sm:$0xff]  ;;  %vm1193_vm12 = vcmask 965632  }
 0x25b   :  { %v1842_v42 = vpop.permute.xlu1 %1841 }
 0x25c   :  { %v1849_v54 = vsel %vm1473_vm5, %v4507_v25, %v1842_v42  ;;  %v1850_v47 = vsel %vm1473_vm5, %v1842_v42, %v4647_v56  ;;  %v4868_v25 = vpop.permute.xlu0 %673  ;;  %600 = vrot.lane.b32.xlu0 %v597_v13, %s3173_s1 }
 0x25d   :  { %1857 = vst [vmem:[#allocation3 + $0x90] sm:$0xf] %v1849_v54  ;;  %1858 = vst [vmem:[#allocation3 + $0x130] sm:$0xf] %v1850_v47  ;;  %675 = vrot.lane.b32.xlu1 %v668_v28, %s3208_s29  ;;  %v4882_v28 = vmul.f32 %v423_v4, %v389_v36  ;;  %v4885_v54 = vmul.f32 %v490_v61, %v4871_v14  ;;  %v694_v4 = vld [vmem:[#allocation2 + $0x14] sm:$0xf] }
 0x25f   :  { %v1605_v37 = vpop.permute.xlu1 %1604 }
 0x260   :  { %v1613_v58 = vsel %vm1612_vm13, %v4554_v45, %v1605_v37  ;;  %v1614_v5 = vsel %vm1612_vm13, %v1605_v37, %v4666_v29  ;;  %v2082_v42 = vpop.permute.xlu0 %2081  ;;  %v5617_v45 = vld [vmem:[#allocation7_spill] sm:$0xff]  ;;  %439 = vrot.lane.b32.xlu0 %v4882_v28, %s3192_s14  ;;  %v501_v37 = vcombine.low %v4885_v54, %v4885_v54 }
 0x261   :  { %1621 = vst [vmem:[#allocation3 + $0x48] sm:$0xf] %v1613_v58  ;;  %1622 = vst [vmem:[#allocation3 + $0x98] sm:$0xf] %v1614_v5  ;;  %744 = vrot.lane.b32.xlu1 %v4729_v22, %s3187_s10  ;;  %v348_v47 = vrot.slane %v5617_v45, 4  ;;  %v2089_v18 = vsel %vm350_vm1, %v4582_v16, %v2082_v42  ;;  %v2090_v12 = vsel %vm350_vm1, %v2082_v42, %v4687_v3 }
 0x262   :  { %2097 = vst [vmem:[#allocation3 + $0x10] sm:$0xf] %v2089_v18  ;;  %2098 = vst [vmem:[#allocation3 + $0x128] sm:$0xf] %v2090_v12  ;;  %v624_v5 = vld [vmem:[#allocation2 + $0x14] sm:$0xf] }
 0x263   :  { %v1466_v43 = vpop.permute.xlu1 %1465  ;;  %v351_v36 = vsel %vm350_vm1, %v348_v47, %v5617_v45 }
 0x264   :  { %v1474_v13 = vsel %vm1473_vm5, %v4574_v1, %v1466_v43  ;;  %v1475_v22 = vsel %vm1473_vm5, %v1466_v43, %v4684_v59  ;;  %v1976_v16 = vpop.permute.xlu0 %1975  ;;  %v357_v42 = vmul.f32 %v4808_v19, %v351_v36  ;;  %507 = vrot.lane.b32.xlu0 %v501_v37, %s3193_s15  ;;  %v5619_v43 = vrot.slane %v3950_v62, 4 }
 0x265   :  { %1482 = vst [vmem:[#allocation3 + $0x198] sm:$0xf] %v1474_v13  ;;  %1483 = vst [vmem:[#allocation3 + $0xe0] sm:$0xf] %v1475_v22  ;;  %435 = vrot.lane.b32.xlu1 %v4811_v38, %s3192_s14  ;;  %v1983_v58 = vsel %vm1612_vm13, %v4595_v40, %v1976_v16  ;;  %v1984_v1 = vsel %vm1612_vm13, %v1976_v16, %v4697_v30  ;;  %v5618_v40 = vld [vmem:[#allocation8_spill] sm:$0xff]  ;;  %v5620_v19 = vrot.slane %v5593_v17, 4 }
 0x266   :  { %1991 = vst [vmem:[#allocation3 + $0x1d8] sm:$0xf] %v1983_v58  ;;  %1992 = vst [vmem:[#allocation3 + $0x228] sm:$0xf] %v1984_v1  ;;  %v349_v18 = vrot.slane %v5618_v40, 4  ;;  %v663_v13 = vmul.f32 %v5619_v43, %v624_v5  ;;  %v363_v43 = vcombine.low %v357_v42, %v357_v42 }
 0x267   :  { %v1325_v61 = vpop.permute.xlu1 %1324  ;;  %v731_v22 = vmul.f32 %v5620_v19, %v694_v4  ;;  %v4943_v4 = vld [vmem:[#allocation2 + $0x8] sm:$0xff] }
 0x268   :  { %v1333_v45 = vsel %vm5511_vm6, %v4599_v44, %v1325_v61  ;;  %v1334_v38 = vsel %vm5511_vm6, %v1325_v61, %v4703_v24  ;;  %v1907_v12 = vpop.permute.xlu0 %1906  ;;  %677 = vrot.lane.b32.xlu0 %v663_v13, %s3208_s29  ;;  %vm5512_vm6 = vcmask 998400   ;;  %v352_v62 = vsel %vm60_vm0, %v348_v47, %v349_v18 }
 0x269   :  { %1341 = vst [vmem:[#allocation3 + $0x80] sm:$0xf] %v1333_v45  ;;  %1342 = vst [vmem:[#allocation3 + $0xf8] sm:$0xf] %v1334_v38  ;;  %368 = vrot.lane.b32.xlu1 %v357_v42, %s3174_s2  ;;  %v1916_v44 = vsel %vm1542_vm3, %v1907_v12, %v4491_v63  ;;  %v737_v58 = vcombine.low %v731_v22, %v731_v22  ;;  %v353_v47 = vsel %vm350_vm1, %v352_v62, %v5618_v40  ;;  %v390_v22 = vld [vmem:[#allocation2 + $0x10] sm:$0xf] }
 0x26a   :  { %1924 = vst [vmem:[#allocation3 + $0x90] sm:$0xf0] %v1916_v44  ;;  %v500_v45 = vcombine.low %v4840_v15, %v4840_v15  ;;  %v460_v15 = vld [vmem:[#allocation2 + $0x14] sm:$0xf]  ;;  %v2373_v62 = vrot.slane %v4363_v8, 4 }
 0x26b   :  { %v1186_v36 = vpop.permute.xlu1 %1185 }
 0x26c   :  { %v1194_v16 = vsel %vm1193_vm12, %v4619_v20, %v1186_v36  ;;  %v1195_v37 = vsel %vm1193_vm12, %v1186_v36, %v4742_v60  ;;  %v1771_v17 = vpop.permute.xlu0 %1770  ;;  %746 = vrot.lane.b32.xlu0 %v737_v58, %s3187_s10 }
 0x26d   :  { %1202 = vst [vmem:[#allocation3 + $0x1a8] sm:$0xf] %v1194_v16  ;;  %1203 = vst [vmem:[#allocation3 + $0x220] sm:$0xf] %v1195_v37  ;;  %539 = vrot.lane.b32.xlu1 %v4385_v10, %s3172_s0  ;;  %v1781_v1 = vsel %vm1780_vm4, %v1771_v17, %v4534_v48  ;;  %v4946_v10 = vmul.f32 %v4943_v4, %v353_v47  ;;  %v2440_v16 = vrot.slane %v4343_v46, 4  ;;  %v5622_v37 = vld [vmem:[#allocation20_spill] sm:$0xff] }
 0x26e   :  { %1789 = vst [vmem:[#allocation3 + $0x50] sm:$0xf0] %v1781_v1  ;;  %v557_v1 = vld [vmem:[#allocation2 + $0x14] sm:$0xf]  ;;  %v496_v47 = vmul.f32 %v487_v39, %v460_v15 }
 0x26f   :  { %v1087_v5 = vpop.permute.xlu1 %1086  ;;  %v364_v36 = vcombine.low %v4946_v10, %v4946_v10 }
 0x270   :  { %v1095_v20 = vsel %vm5512_vm6, %v4627_v50, %v1087_v5  ;;  %v1096_v61 = vsel %vm5512_vm6, %v1087_v5, %v4771_v7  ;;  %v1672_v38 = vpop.permute.xlu0 %1671  ;;  %503 = vrot.lane.b32.xlu0 %v500_v45, %s3193_s15  ;;  %vm5514_vm6 = vcmask 842752   ;;  %v429_v5 = vmul.f32 %v419_v55, %v390_v22 }
 0x271   :  { %1103 = vst [vmem:[#allocation3 + $0x88] sm:$0xf] %v1095_v20  ;;  %1104 = vst [vmem:[#allocation3] sm:$0xf] %v1096_v61  ;;  %606 = vrot.lane.b32.xlu1 %v4800_v9, %s3173_s1  ;;  %v1682_v50 = vsel %vm1681_vm9, %v1672_v38, %v4544_v52  ;;  %v5621_v9 = vld [vmem:[#allocation19_spill] sm:$0xff]  ;;  %v5623_v38 = vrot.slane %v5607_v33, 4  ;;  %v502_v39 = vcombine.low %v496_v47, %v496_v47 }
 0x272   :  { %1690 = vst [vmem:[#allocation3 + $0x48] sm:$0xf0] %v1682_v50  ;;  %v2441_v44 = vrot.slane %v5621_v9, 4  ;;  %v527_v50 = vld [vmem:[#allocation2 + $0x14] sm:$0xf]  ;;  %v2442_v22 = vsel %vm2133_vm10, %v2440_v16, %v4343_v46 }
 0x273   :  { %v949_v12 = vpop.permute.xlu1 %948  ;;  %v593_v27 = vmul.f32 %v5623_v38, %v557_v1  ;;  %v2448_v47 = vmul.f32 %v4943_v4, %v2442_v22 }
 0x274   :  { %v956_v13 = vsel %vm5513_vm15, %v4651_v11, %v949_v12  ;;  %v957_v19 = vsel %vm5513_vm15, %v949_v12, %v4816_v41  ;;  %v1533_v42 = vpop.permute.xlu0 %1532  ;;  %v2374_v11 = vrot.slane %v5622_v37, 4  ;;  %370 = vrot.lane.b32.xlu0 %v364_v36, %s3174_s2  ;;  %vm679_vm15 = vcmask 859136  }
 0x275   :  { %964 = vst [vmem:[#allocation3 + $0xd0] sm:$0xf] %v956_v13  ;;  %965 = vst [vmem:[#allocation3 + $0x138] sm:$0xf] %v957_v19  ;;  %366 = vrot.lane.b32.xlu1 %v363_v43, %s3174_s2  ;;  %v1543_v17 = vsel %vm1542_vm3, %v1533_v42, %v4564_v31  ;;  %v2443_v0 = vsel %vm60_vm0, %v2440_v16, %v2441_v44  ;;  %v599_v13 = vcombine.low %v593_v27, %v593_v27 }
 0x276   :  { %1551 = vst [vmem:[#allocation3 + $0x198] sm:$0xf0] %v1543_v17  ;;  %v2376_v55 = vsel %vm60_vm0, %v2373_v62, %v2374_v11  ;;  %v2444_v15 = vsel %vm2133_vm10, %v2443_v0, %v5621_v9  ;;  %v3145_v17 = vld [vmem:[#allocation2 + $0x10] sm:$0xff] }
 0x277   :  { %v810_v58 = vpop.permute.xlu1 %809  ;;  %v2377_v19 = vsel %vm232_vm7, %v2376_v55, %v5622_v37  ;;  %v5010_v16 = vmul.f32 %v3145_v17, %v2444_v15  ;;  %v5624_v55 = vld [vmem:[#allocation21_spill] sm:$0xff]  ;;  %v5625_v0 = vld [vmem:[#allocation26_spill] sm:$0xff] }
 0x278   :  { %v818_v20 = vsel %vm5514_vm6, %v4669_v6, %v810_v58  ;;  %v819_v61 = vsel %vm5514_vm6, %v810_v58, %v4847_v34  ;;  %v1393_v45 = vpop.permute.xlu0 %1392  ;;  %541 = vrot.lane.b32.xlu0 %v527_v50, %s3172_s0  ;;  %v5003_v58 = vmul.f32 %v3145_v17, %v2377_v19  ;;  %vm1026_vm6 = vcmask 179200  }
 0x279   :  { %826 = vst [vmem:[#allocation3 + $0x180] sm:$0xf] %v818_v20  ;;  %827 = vst [vmem:[#allocation3 + $0x190] sm:$0xf] %v819_v61  ;;  %443 = vrot.lane.b32.xlu1 %v429_v5, %s3192_s14  ;;  %v1403_v6 = vsel %vm1402_vm11, %v1393_v45, %v4589_v2  ;;  %v434_v20 = vcombine.high %v4882_v28, %v4882_v28  ;;  %v2375_v61 = vsel %vm232_vm7, %v2373_v62, %v4363_v8  ;;  %v322_v8 = vld [vmem:[#allocation2 + $0x10] sm:$0xf] }
 0x27a   :  { %1411 = vst [vmem:[#allocation3 + $0x80] sm:$0xf0] %v1403_v6  ;;  %v2455_v38 = vcombine.low %v5010_v16, %v5010_v16  ;;  %v2381_v62 = vmul.f32 %v4943_v4, %v2375_v61  ;;  %v2269_v6 = vrot.slane %v5624_v55, 4  ;;  %v2268_v50 = vrot.slane %v4381_v21, 4  ;;  %v2536_v61 = vld [vmem:[#allocation3 + $0x228] sm:$0xff] }
 0x27b   :  { %v4985_v12 = vpop.permute.xlu1 %671 }
 0x27c   :  { %v681_v33 = vsel %vm679_vm15, %v4985_v12, %v4868_v25  ;;  %v1255_v43 = vpop.permute.xlu0 %1254  ;;  %608 = vrot.lane.b32.xlu0 %v599_v13, %s3173_s1  ;;  %v5626_v13 = vld [vmem:[#allocation25_spill] sm:$0xff]  ;;  %v2387_v22 = vcombine.high %v2381_v62, %v2381_v62 }
 0x27d   :  { %689 = vst [vmem:[#allocation3 + $0x110] sm:$0xf] %v681_v33  ;;  %511 = vrot.lane.b32.xlu1 %v502_v39, %s3193_s15  ;;  %v1265_v36 = vsel %vm1264_vm14, %v1255_v43, %v4609_v49  ;;  %v359_v39 = vmul.f32 %v349_v18, %v322_v8  ;;  %v2454_v43 = vcombine.low %v2448_v47, %v2448_v47  ;;  %v5627_v18 = vld [vmem:[#allocation29_spill] sm:$0xff]  ;;  %v2519_v9 = vld [vmem:[#allocation3 + $0x198] sm:$0xff] }
 0x27e   :  { %1273 = vst [vmem:[#allocation3 + $0x1a8] sm:$0xf0] %v1265_v36 }
 0x27f   :  { %v304_v42 = vpop.permute.xlu1 %303 }
 0x280   :  { %v310_v1 = vsel %vm307_vm8, %v4615_v57, %v304_v42  ;;  %v311_v46 = vsel %vm307_vm8, %v304_v42, %v4625_v51  ;;  %v1017_v5 = vpop.permute.xlu0 %1016  ;;  %441 = vrot.lane.b32.xlu0 %v434_v20, %s3192_s14  ;;  %vm889_vm8 = vcmask 211968  }
 0x281   :  { %318 = vst [vmem:[#allocation3 + $0x40] sm:$0xf] %v310_v1  ;;  %319 = vst [vmem:[#allocation3 + $0x28] sm:$0xf] %v311_v46  ;;  %2393 = vrot.lane.b32.xlu1 %v5003_v58, %s3172_s0  ;;  %v1027_v57 = vsel %vm1026_vm6, %v1017_v5, %v4643_v26  ;;  %v5628_v1 = vld [vmem:[#allocation35_spill] sm:$0xff]  ;;  %v2539_v5 = vld [vmem:[#allocation3 + $0x10] sm:$0xff] }
 0x282   :  { %1035 = vst [vmem:[#allocation3 + $0xd0] sm:$0xf0] %v1027_v57 }
 0x283   :  { %v2154_v51 = vpop.permute.xlu1 %2153 }
 0x284   :  { %v2161_v45 = vsel %vm2159_vm2, %v4570_v35, %v2154_v51  ;;  %v2162_v28 = vsel %vm2159_vm2, %v2154_v51, %v4706_v53  ;;  %v880_v27 = vpop.permute.xlu0 %879  ;;  %509 = vrot.lane.b32.xlu0 %v4885_v54, %s3193_s15  ;;  %v365_v54 = vcombine.low %v359_v39, %v359_v39 }
 0x285   :  { %2169 = vst [vmem:[#allocation3 + $0x128] sm:$0xf0] %v2161_v45  ;;  %2170 = vst [vmem:[#allocation3 + $0x178] sm:$0xf0] %v2162_v28  ;;  %2461 = vrot.lane.b32.xlu1 %v2455_v38, %s3202_s23  ;;  %v890_v35 = vsel %vm889_vm8, %v880_v27, %v5625_v0  ;;  %v2535_v45 = vld [vmem:[#allocation3 + $0x1d8] sm:$0xff]  ;;  %v5629_v38 = vld [vmem:[#allocation36_spill] sm:$0xff] }
 0x286   :  { %898 = vst [vmem:[#allocation3 + $0x180] sm:$0xf0] %v890_v35  ;;  %v2270_v35 = vsel %vm2133_vm10, %v2268_v50, %v4381_v21 }
 0x287   :  { %v2086_v33 = vpop.permute.xlu1 %2085 }
 0x288   :  { %v2091_v4 = vsel %vm350_vm1, %v4687_v3, %v2086_v33  ;;  %v2092_v19 = vsel %vm350_vm1, %v2086_v33, %v5626_v13  ;;  %v1911_v15 = vpop.permute.xlu0 %1910  ;;  %v2271_v3 = vsel %vm60_vm0, %v2268_v50, %v2269_v6  ;;  %2391 = vrot.lane.b32.xlu0 %v2387_v22, %s3172_s0  ;;  %v5631_v50 = vld [vmem:[#allocation28_spill] sm:$0xff]  ;;  %v2276_v13 = vmul.f32 %v4818_v23, %v2270_v35 }
 0x289   :  { %2099 = vst [vmem:[#allocation3 + $0x178] sm:$0xf] %v2091_v4  ;;  %2100 = vst [vmem:[#allocation3 + $0x208] sm:$0xf] %v2092_v19  ;;  %2457 = vrot.lane.b32.xlu1 %v2454_v43, %s3202_s23  ;;  %v1917_v40 = vsel %vm1542_vm3, %v4491_v63, %v1911_v15  ;;  %v1918_v36 = vsel %vm1542_vm3, %v1911_v15, %v5627_v18  ;;  %v2388_v4 = vcombine.high %v5003_v58, %v5003_v58  ;;  %v5632_v15 = vld [vmem:[#allocation9_spill] sm:$0xff] }
 0x28a   :  { %1925 = vst [vmem:[#allocation3 + $0x130] sm:$0xf0] %v1917_v40  ;;  %1926 = vst [vmem:[#allocation3 + $0x68] sm:$0xf0] %v1918_v36 }
 0x28b   :  { %v1980_v42 = vpop.permute.xlu1 %1979 }
 0x28c   :  { %v1985_v17 = vsel %vm1612_vm13, %v4697_v30, %v1980_v42  ;;  %v1986_v46 = vsel %vm1612_vm13, %v1980_v42, %v5628_v1  ;;  %v2540_v63 = vld [vmem:[#allocation3 + $0x128] sm:$0xff]  ;;  %v2158_v20 = vpop.permute.xlu0 %2157  ;;  %v2272_v30 = vsel %vm2133_vm10, %v2271_v3, %v5624_v55  ;;  %2459 = vrot.lane.b32.xlu0 %v2448_v47, %s3202_s23  ;;  %v2282_v3 = vcombine.high %v2276_v13, %v2276_v13  ;;  %v5634_v1 = vld [vmem:[#allocation30_spill] sm:$0xff] }
 0x28d   :  { %1993 = vst [vmem:[#allocation3 + $0x218] sm:$0xf] %v1985_v17  ;;  %1994 = vst [vmem:[#allocation3 + $0x200] sm:$0xf] %v1986_v46  ;;  %2563 = vmatprep.subr.mxu0 %v2540_v63  ;;  %374 = vrot.lane.b32.xlu1 %v365_v54, %s3174_s2  ;;  %v2163_v57 = vsel %vm2159_vm2, %v4706_v53, %v2158_v20  ;;  %v5066_v27 = vmul.f32 %v2272_v30, %v4871_v14  ;;  %v2531_v14 = vld [vmem:[#allocation3 + $0x90] sm:$0xff]  ;;  %v5633_v42 = vld [vmem:[#allocation32_spill] sm:$0xff] }
 0x28e   :  { %2564 = vmatpush1.msra.mxu0 %v2539_v5  ;;  %2171 = vst [vmem:[#allocation3 + $0x208] sm:$0xf0] %v2163_v57  ;;  %v2527_v5 = vld [vmem:[#allocation3 + $0x50] sm:$0xff] }
 0x28f   :  { %2565 = vmatprep.subr.mxu0 %v2536_v61  ;;  %v1846_v51 = vpop.permute.xlu1 %1845  ;;  %v5636_v61 = vld [vmem:[#allocation37_spill] sm:$0xff] }
 0x290   :  { %v1851_v28 = vsel %vm1473_vm5, %v4647_v56, %v1846_v51  ;;  %v1852_v8 = vsel %vm1473_vm5, %v1846_v51, %v5629_v38  ;;  %2566 = vmatpush1.msra.mxu0 %v2535_v45  ;;  %v1775_v53 = vpop.permute.xlu0 %1774  ;;  %v5630_v56 = vld [vmem:[#allocation31_spill] sm:$0xff]  ;;  %2389 = vrot.lane.b32.xlu0 %v2381_v62, %s3172_s0  ;;  %v2541_v22 = vld [vmem:[#allocation3 + $0x178] sm:$0xff] }
 0x291   :  { %1859 = vst [vmem:[#allocation3 + $0x68] sm:$0xf] %v1851_v28  ;;  %1860 = vst [vmem:[#allocation3 + $0x230] sm:$0xf] %v1852_v8  ;;  %2288 = vrot.lane.b32.xlu1 %v5066_v27, %s3202_s23  ;;  %v1782_v47 = vsel %vm1780_vm4, %v4534_v48, %v1775_v53  ;;  %v1783_v33 = vsel %vm1780_vm4, %v1775_v53, %v5630_v56  ;;  %v2532_v39 = vld [vmem:[#allocation3 + $0x130] sm:$0xff]  ;;  %v5638_v8 = vld [vmem:[#allocation23_spill] sm:$0xff] }
 0x292   :  { %1790 = vst [vmem:[#allocation3 + $0x100] sm:$0xf0] %v1782_v47  ;;  %1791 = vst [vmem:[#allocation3 + $0x30] sm:$0xf0] %v1783_v33  ;;  %2567 = vmatprep.subr.mxu0 %v2532_v39  ;;  %v2413_v51 = vld [vmem:[#allocation2 + $0x18] sm:$0xf] }
 0x293   :  { %v1609_v43 = vpop.permute.xlu1 %1608  ;;  %2568 = vmatpush1.msra.mxu0 %v2531_v14  ;;  %v2347_v45 = vld [vmem:[#allocation2 + $0x18] sm:$0xf]  ;;  %v2530_v28 = vld [vmem:[#allocation3 + $0x1b0] sm:$0xff]  ;;  %v2480_v39 = vld [vmem:[#allocation4 + $0x8] sm:$0xff]  ;;  %vm5640_vm4 = vcmask 998400  }
 0x294   :  { %v1615_v21 = vsel %vm1612_vm13, %v4666_v29, %v1609_v43  ;;  %v1616_v48 = vsel %vm1612_vm13, %v1609_v43, %v5631_v50  ;;  %v1676_v19 = vpop.permute.xlu0 %1675  ;;  %v2538_v18 = vld [vmem:[#allocation3 + $0x200] sm:$0xff]  ;;  %372 = vrot.lane.b32.xlu0 %v4946_v10, %s3174_s2  ;;  %v2537_v29 = vld [vmem:[#allocation3 + $0x218] sm:$0xff]  ;;  %3081 = vmatprep.mubr.msk.f32.mxu0 %vm2133_vm10, %v2480_v39 }
 0x295   :  { %1623 = vst [vmem:[#allocation3 + $0x238] sm:$0xf] %v1615_v21  ;;  %1624 = vst [vmem:[#allocation3 + $0x160] sm:$0xf] %v1616_v48  ;;  %2395 = vrot.lane.b32.xlu1 %v2388_v4, %s3172_s0  ;;  %v1683_v62 = vsel %vm1681_vm9, %v4544_v52, %v1676_v19  ;;  %v1684_v58 = vsel %vm1681_vm9, %v1676_v19, %v5632_v15  ;;  %v2542_v40 = vld [vmem:[#allocation3 + $0x208] sm:$0xff]  ;;  %v5639_v14 = vld [vmem:[#allocation38_spill] sm:$0xff]  ;;  %v2450_v4 = vmul.f32 %v2441_v44, %v2413_v51 }
 0x296   :  { %1691 = vst [vmem:[#allocation3 + $0x98] sm:$0xf0] %v1683_v62  ;;  %1692 = vst [vmem:[#allocation3 + $0x238] sm:$0xf0] %v1684_v58  ;;  %2640 = vmatprep.subr.mxu1 %v2542_v40  ;;  %v2383_v21 = vmul.f32 %v2374_v11, %v2347_v45  ;;  %3083 = vmatprep.mubr.msk.f32.mxu1 %vm2133_vm10, %v2480_v39  ;;  %v5641_v11 = vld [vmem:[#allocation39_spill] sm:$0xff] }
 0x297   :  { %v1470_v23 = vpop.permute.xlu1 %1469  ;;  %2641 = vmatpush1.msra.mxu1 %v2541_v22  ;;  %vm5642_vm9 = vmmov %vm5640_vm4  ;;  %v2456_v19 = vcombine.low %v2450_v4, %v2450_v4  ;;  %v2242_v15 = vld [vmem:[#allocation2 + $0x14] sm:$0xf]  ;;  %v2515_v58 = vld [vmem:[#allocation3 + $0x80] sm:$0xff] }
 0x298   :  { %v1476_v36 = vsel %vm1473_vm5, %v4684_v59, %v1470_v23  ;;  %v1477_v52 = vsel %vm1473_vm5, %v1470_v23, %v5633_v42  ;;  %v1537_v54 = vpop.permute.xlu0 %1536  ;;  %2642 = vmatprep.subr.mxu1 %v2538_v18  ;;  %v2534_v17 = vld [vmem:[#allocation3 + $0x230] sm:$0xff]  ;;  %v2533_v59 = vld [vmem:[#allocation3 + $0x68] sm:$0xff]  ;;  %2286 = vrot.lane.b32.xlu0 %v2282_v3, %s3202_s23  ;;  %vm5635_vm5 = vcmask 719872   ;;  %v2508_v3 = vld [vmem:[#allocation3] sm:$0xff] }
 0x299   :  { %1484 = vst [vmem:[#allocation3 + $0x1e0] sm:$0xf] %v1476_v36  ;;  %1485 = vst [vmem:[#allocation3 + $0x1f0] sm:$0xf] %v1477_v52  ;;  %2463 = vrot.lane.b32.xlu1 %v5010_v16, %s3202_s23  ;;  %v1544_v10 = vsel %vm1542_vm3, %v4564_v31, %v1537_v54  ;;  %v1545_v46 = vsel %vm1542_vm3, %v1537_v54, %v5634_v1  ;;  %v2528_v63 = vld [vmem:[#allocation3 + $0x100] sm:$0xff]  ;;  %2643 = vmatpush1.msra.mxu1 %v2537_v29  ;;  %v2529_v47 = vld [vmem:[#allocation3 + $0x30] sm:$0xff] }
 0x29a   :  { %1552 = vst [vmem:[#allocation3 + $0xe0] sm:$0xf0] %v1544_v10  ;;  %1553 = vst [vmem:[#allocation3 + $0x1e0] sm:$0xf0] %v1545_v46  ;;  %2569 = vmatprep.subr.mxu0 %v2528_v63  ;;  %v2283_v16 = vcombine.high %v5066_v27, %v5066_v27  ;;  %2644 = vmatprep.subr.mxu1 %v2534_v17  ;;  %v2278_v29 = vmul.f32 %v2269_v6, %v2242_v15  ;;  %v2511_v42 = vld [vmem:[#allocation3 + $0x1a8] sm:$0xff] }
 0x29b   :  { %v1329_v20 = vpop.permute.xlu1 %1328  ;;  %2570 = vmatpush1.msra.mxu0 %v2527_v5  ;;  %vm5637_vm13 = vmmov %vm5635_vm5  ;;  %2645 = vmatpush1.msra.mxu1 %v2533_v59  ;;  %v2507_v17 = vld [vmem:[#allocation3 + $0x88] sm:$0xff]  ;;  %v5644_v5 = vld [vmem:[#allocation27_spill] sm:$0xff] }
 0x29c   :  { %v1335_v31 = vsel %vm5635_vm5, %v4703_v24, %v1329_v20  ;;  %v1336_v57 = vsel %vm5637_vm13, %v1329_v20, %v5636_v61  ;;  %v1397_v30 = vpop.permute.xlu0 %1396  ;;  %v2523_v24 = vld [vmem:[#allocation3 + $0x48] sm:$0xff]  ;;  %2646 = vmatprep.subr.mxu1 %v2530_v28  ;;  %v2526_v35 = vld [vmem:[#allocation3 + $0x160] sm:$0xff]  ;;  %2284 = vrot.lane.b32.xlu0 %v2276_v13, %s3202_s23  ;;  %v2503_v61 = vld [vmem:[#allocation3 + $0xd0] sm:$0xff] }
 0x29d   :  { %1343 = vst [vmem:[#allocation3 + $0x78] sm:$0xf] %v1335_v31  ;;  %1344 = vst [vmem:[#allocation3 + $0x170] sm:$0xf] %v1336_v57  ;;  %2290 = vrot.lane.b32.xlu1 %v2283_v16, %s3202_s23  ;;  %v1404_v38 = vsel %vm1402_vm11, %v4589_v2, %v1397_v30  ;;  %v1405_v27 = vsel %vm1402_vm11, %v1397_v30, %v5638_v8  ;;  %v2524_v53 = vld [vmem:[#allocation3 + $0x98] sm:$0xff]  ;;  %2647 = vmatpush1.msra.mxu1 %v2529_v47  ;;  %vm5643_vm11 = vcmask 195584  }
 0x29e   :  { %1412 = vst [vmem:[#allocation3 + $0xf8] sm:$0xf0] %v1404_v38  ;;  %1413 = vst [vmem:[#allocation3 + $0x78] sm:$0xf0] %v1405_v27  ;;  %2571 = vmatprep.subr.mxu0 %v2524_v53  ;;  %v2525_v56 = vld [vmem:[#allocation3 + $0x238] sm:$0xff]  ;;  %2648 = vmatprep.subr.mxu1 %v2526_v35  ;;  %v2499_v38 = vld [vmem:[#allocation3 + $0x180] sm:$0xff] }
 0x29f   :  { %v1190_v33 = vpop.permute.xlu1 %1189  ;;  %2572 = vmatpush1.msra.mxu0 %v2523_v24  ;;  %2649 = vmatpush1.msra.mxu1 %v2525_v56 }
 0x2a0   :  { %v1196_v2 = vsel %vm1193_vm12, %v4742_v60, %v1190_v33  ;;  %v1197_v43 = vsel %vm1193_vm12, %v1190_v33, %v5639_v14  ;;  %v1259_v50 = vpop.permute.xlu0 %1258  ;;  %2397 = vrot.lane.b32.xlu0 %v2383_v21, %s3172_s0  ;;  %vm5646_vm12 = vmmov %vm5643_vm11 }
 0x2a1   :  { %1204 = vst [vmem:[#allocation3 + $0x1e8] sm:$0xf] %v1196_v2  ;;  %1205 = vst [vmem:[#allocation3 + $0x1c8] sm:$0xf] %v1197_v43  ;;  %v1266_v48 = vsel %vm1264_vm14, %v4609_v49, %v1259_v50  ;;  %v1267_v60 = vsel %vm1264_vm14, %v1259_v50, %v4806_v32  ;;  %v2520_v13 = vld [vmem:[#allocation3 + $0xe0] sm:$0xff]  ;;  %vm5647_vm14 = vcmask 842752  }
 0x2a2   :  { %1274 = vst [vmem:[#allocation3 + $0x220] sm:$0xf0] %v1266_v48  ;;  %1275 = vst [vmem:[#allocation3 + $0x1e8] sm:$0xf0] %v1267_v60  ;;  %2573 = vmatprep.subr.mxu0 %v2520_v13  ;;  %v2521_v6 = vld [vmem:[#allocation3 + $0x1e0] sm:$0xff] }
 0x2a3   :  { %v1091_v44 = vpop.permute.xlu1 %1090  ;;  %2574 = vmatpush1.msra.mxu0 %v2519_v9  ;;  %vm5650_vm13 = vmmov %vm5647_vm14 }
 0x2a4   :  { %v1097_v37 = vsel %vm5640_vm4, %v4771_v7, %v1091_v44  ;;  %v1098_v49 = vsel %vm5642_vm9, %v1091_v44, %v5641_v11  ;;  %v1541_v32 = vpop.permute.xlu0 %1540  ;;  %2465 = vrot.lane.b32.xlu0 %v2456_v19, %s3202_s23 }
 0x2a5   :  { %1105 = vst [vmem:[#allocation3 + $0x188] sm:$0xf] %v1097_v37  ;;  %1106 = vst [vmem:[#allocation3 + $0x38] sm:$0xf] %v1098_v49  ;;  %v1546_v22 = vsel %vm1542_vm3, %v5634_v1, %v1541_v32  ;;  %v2516_v62 = vld [vmem:[#allocation3 + $0xf8] sm:$0xff]  ;;  %v2518_v1 = vld [vmem:[#allocation3 + $0x170] sm:$0xff] }
 0x2a6   :  { %1554 = vst [vmem:[#allocation3 + $0x1f0] sm:$0xf0] %v1546_v22  ;;  %2575 = vmatprep.subr.mxu0 %v2516_v62  ;;  %v2517_v59 = vld [vmem:[#allocation3 + $0x78] sm:$0xff]  ;;  %vm5645_vm3 = vcmask 850944  }
 0x2a7   :  { %v953_v40 = vpop.permute.xlu1 %952  ;;  %2576 = vmatpush1.msra.mxu0 %v2515_v58  ;;  %vm5648_vm5 = vmmov %vm5645_vm3 }
 0x2a8   :  { %v958_v7 = vsel %vm5643_vm11, %v4816_v41, %v953_v40  ;;  %v1021_v18 = vpop.permute.xlu0 %1020  ;;  %2292 = vrot.lane.b32.xlu0 %v2278_v29, %s3202_s23  ;;  %v2514_v16 = vld [vmem:[#allocation3 + $0x1c8] sm:$0xff]  ;;  %vm5652_vm9 = vmmov %vm5645_vm3  ;;  %vm5653_vm11 = vcmask 56320  }
 0x2a9   :  { %966 = vst [vmem:[#allocation3 + $0x60] sm:$0xf] %v958_v7  ;;  %v1028_v23 = vsel %vm1026_vm6, %v4643_v26, %v1021_v18  ;;  %v2512_v36 = vld [vmem:[#allocation3 + $0x220] sm:$0xff]  ;;  %v2513_v57 = vld [vmem:[#allocation3 + $0x1e8] sm:$0xff] }
 0x2aa   :  { %1036 = vst [vmem:[#allocation3 + $0x138] sm:$0xf0] %v1028_v23  ;;  %2577 = vmatprep.subr.mxu0 %v2512_v36 }
 0x2ab   :  { %v1023_v52 = vpop.permute.xlu1 %1022  ;;  %2578 = vmatpush1.msra.mxu0 %v2511_v42 }
 0x2ac   :  { %v1029_v54 = vsel %vm1026_vm6, %v1021_v18, %v1023_v52  ;;  %v884_v41 = vpop.permute.xlu0 %883  ;;  %2579 = vmatprep.subr.mxu0 %v2508_v3  ;;  %v2510_v31 = vld [vmem:[#allocation3 + $0x38] sm:$0xff]  ;;  %v2509_v45 = vld [vmem:[#allocation3 + $0x188] sm:$0xff] }
 0x2ad   :  { %1037 = vst [vmem:[#allocation3 + $0x60] sm:$0xf0] %v1029_v54  ;;  %v891_v55 = vsel %vm889_vm8, %v5625_v0, %v884_v41  ;;  %2580 = vmatpush1.msra.mxu0 %v2507_v17  ;;  %v2522_v26 = vld [vmem:[#allocation3 + $0x1f0] sm:$0xff] }
 0x2ae   :  { %899 = vst [vmem:[#allocation3 + $0x190] sm:$0xf0] %v891_v55  ;;  %2650 = vmatprep.subr.mxu1 %v2522_v26 }
 0x2af   :  { %v670_v10 = vpop.permute.xlu1 %669  ;;  %2651 = vmatpush1.msra.mxu1 %v2521_v6 }
 0x2b0   :  { %v680_v46 = vsel %vm679_vm15, %v670_v10, %v4985_v12  ;;  %v5148_v63 = vpop.permute.xlu0 %742  ;;  %2652 = vmatprep.subr.mxu1 %v2518_v1 }
 0x2b1   :  { %688 = vst [vmem:[#allocation3 + $0x108] sm:$0xf] %v680_v46  ;;  %v750_v0 = vsel %vm5645_vm3, %v5644_v5, %v5148_v63  ;;  %2653 = vmatpush1.msra.mxu1 %v2517_v59  ;;  %v2504_v20 = vld [vmem:[#allocation3 + $0x138] sm:$0xff]  ;;  %vm5655_vm3 = vcmask 990208  }
 0x2b2   :  { %758 = vst [vmem:[#allocation3 + $0x110] sm:$0xf0] %v750_v0  ;;  %2581 = vmatprep.subr.mxu0 %v2504_v20  ;;  %2654 = vmatprep.subr.mxu1 %v2514_v16 }
 0x2b3   :  { %v536_v51 = vpop.permute.xlu1 %535  ;;  %2582 = vmatpush1.msra.mxu0 %v2503_v61  ;;  %2655 = vmatpush1.msra.mxu1 %v2513_v57 }
 0x2b4   :  { %v955_v12 = vpop.permute.xlu0 %954  ;;  %2656 = vmatprep.subr.mxu1 %v2510_v31  ;;  %v2505_v21 = vld [vmem:[#allocation3 + $0x60] sm:$0xff] }
 0x2b5   :  { %v959_v30 = vsel %vm5646_vm12, %v953_v40, %v955_v12  ;;  %2657 = vmatpush1.msra.mxu1 %v2509_v45  ;;  %v2500_v28 = vld [vmem:[#allocation3 + $0x190] sm:$0xff]  ;;  %vm5656_vm12 = vmmov %vm5648_vm5 }
 0x2b6   :  { %967 = vst [vmem:[#allocation3 + $0x1b8] sm:$0xf] %v959_v30  ;;  %2583 = vmatprep.subr.mxu0 %v2500_v28 }
 0x2b7   :  { %v603_v8 = vpop.permute.xlu1 %602  ;;  %2584 = vmatpush1.msra.mxu0 %v2499_v38 }
 0x2b8   :  { %v1025_v27 = vpop.permute.xlu0 %1024 }
 0x2b9   :  { %v1030_v53 = vsel %vm1026_vm6, %v1023_v52, %v1025_v27  ;;  %v2496_v24 = vld [vmem:[#allocation3 + $0x110] sm:$0xff]  ;;  %vm5649_vm6 = vcmask 973824  }
 0x2ba   :  { %1038 = vst [vmem:[#allocation3 + $0x1b8] sm:$0xf0] %v1030_v53  ;;  %2585 = vmatprep.subr.mxu0 %v2496_v24  ;;  %vm5651_vm4 = vmmov %vm5649_vm6 }
 0x2bb   :  { %v814_v35 = vpop.permute.xlu1 %813 }
 0x2bc   :  { %v820_v47 = vsel %vm5647_vm14, %v4847_v34, %v814_v35  ;;  %v739_v56 = vpop.permute.xlu0 %738  ;;  %vm5657_vm14 = vmmov %vm5651_vm4 }
 0x2bd   :  { %828 = vst [vmem:[#allocation3 + $0x140] sm:$0xf] %v820_v47  ;;  %v749_v33 = vsel %vm5648_vm5, %v739_v56, %v5644_v5  ;;  %vm5658_vm5 = vmmov %vm5655_vm3 }
 0x2be   :  { %757 = vst [vmem:[#allocation3 + $0x108] sm:$0xf0] %v749_v33 }
 0x2bf   :  { %v886_v39 = vpop.permute.xlu1 %885 }
 0x2c0   :  { %v892_v2 = vsel %vm889_vm8, %v884_v41, %v886_v39  ;;  %v538_v14 = vpop.permute.xlu0 %537 }
 0x2c1   :  { %900 = vst [vmem:[#allocation3 + $0x140] sm:$0xf0] %v892_v2  ;;  %v544_v43 = vsel %vm350_vm1, %v536_v51, %v538_v14  ;;  %v2506_v4 = vld [vmem:[#allocation3 + $0x1b8] sm:$0xff] }
 0x2c2   :  { %552 = vst [vmem:[#allocation3 + $0x18] sm:$0xf] %v544_v43  ;;  %2658 = vmatprep.subr.mxu1 %v2506_v4 }
 0x2c3   :  { %v534_v50 = vpop.permute.xlu1 %533  ;;  %2659 = vmatpush1.msra.mxu1 %v2505_v21 }
 0x2c4   :  { %v543_v34 = vsel %vm350_vm1, %v534_v50, %v536_v51  ;;  %v605_v48 = vpop.permute.xlu0 %604 }
 0x2c5   :  { %551 = vst [vmem:[#allocation3 + $0xd8] sm:$0xf] %v543_v34  ;;  %v611_v60 = vsel %vm5649_vm6, %v603_v8, %v605_v48  ;;  %v2495_v13 = vld [vmem:[#allocation3 + $0x108] sm:$0xff] }
 0x2c6   :  { %619 = vst [vmem:[#allocation3 + $0x18] sm:$0xf0] %v611_v60  ;;  %2586 = vmatpush1.msra.mxu0 %v2495_v13 }
 0x2c7   :  { %v438_v9 = vpop.permute.xlu1 %437 }
 0x2c8   :  { %v816_v44 = vpop.permute.xlu0 %815  ;;  %v2501_v36 = vld [vmem:[#allocation3 + $0x140] sm:$0xff] }
 0x2c9   :  { %v821_v37 = vsel %vm5650_vm13, %v814_v35, %v816_v44 }
 0x2ca   :  { %829 = vst [vmem:[#allocation3 + $0x1c0] sm:$0xf] %v821_v37 }
 0x2cb   :  { %v506_v11 = vpop.permute.xlu1 %505 }
 0x2cc   :  { %v888_v49 = vpop.permute.xlu0 %887 }
 0x2cd   :  { %v893_v19 = vsel %vm889_vm8, %v886_v39, %v888_v49  ;;  %v2492_v32 = vld [vmem:[#allocation3 + $0x18] sm:$0xff]  ;;  %vm5654_vm8 = vmmov %vm5653_vm11 }
 0x2ce   :  { %901 = vst [vmem:[#allocation3 + $0x1c0] sm:$0xf0] %v893_v19  ;;  %2587 = vmatprep.subr.mxu0 %v2492_v32  ;;  %vm5660_vm6 = vmmov %vm5654_vm8 }
 0x2cf   :  { %v676_v22 = vpop.permute.xlu1 %675  ;;  %vm5661_vm13 = vmmov %vm5660_vm6 }
 0x2d0   :  { %v682_v62 = vsel %vm679_vm15, %v4868_v25, %v676_v22  ;;  %v601_v15 = vpop.permute.xlu0 %600 }
 0x2d1   :  { %690 = vst [vmem:[#allocation3 + $0x1f8] sm:$0xf] %v682_v62  ;;  %v610_v58 = vsel %vm5651_vm4, %v601_v15, %v603_v8 }
 0x2d2   :  { %618 = vst [vmem:[#allocation3 + $0xd8] sm:$0xf0] %v610_v58 }
 0x2d3   :  { %v745_v40 = vpop.permute.xlu1 %744 }
 0x2d4   :  { %v751_v7 = vsel %vm5652_vm9, %v5148_v63, %v745_v40  ;;  %v440_v18 = vpop.permute.xlu0 %439  ;;  %vm5663_vm9 = vmmov %vm5655_vm3 }
 0x2d5   :  { %759 = vst [vmem:[#allocation3 + $0x1f8] sm:$0xf0] %v751_v7  ;;  %v447_v29 = vsel %vm5653_vm11, %v438_v9, %v440_v18  ;;  %v2502_v23 = vld [vmem:[#allocation3 + $0x1c0] sm:$0xff] }
 0x2d6   :  { %455 = vst [vmem:[#allocation3 + $0xf0] sm:$0xf] %v447_v29  ;;  %2660 = vmatprep.subr.mxu1 %v2502_v23 }
 0x2d7   :  { %v436_v42 = vpop.permute.xlu1 %435  ;;  %2661 = vmatpush1.msra.mxu1 %v2501_v36 }
 0x2d8   :  { %v446_v25 = vsel %vm5654_vm8, %v436_v42, %v438_v9  ;;  %v508_v52 = vpop.permute.xlu0 %507 }
 0x2d9   :  { %454 = vst [vmem:[#allocation3 + $0xe8] sm:$0xf] %v446_v25  ;;  %v514_v3 = vsel %vm5655_vm3, %v506_v11, %v508_v52  ;;  %v2491_v54 = vld [vmem:[#allocation3 + $0xd8] sm:$0xff] }
 0x2da   :  { %522 = vst [vmem:[#allocation3 + $0xf0] sm:$0xf0] %v514_v3  ;;  %2588 = vmatpush1.msra.mxu0 %v2491_v54 }
 0x2db   :  { %v369_v41 = vpop.permute.xlu1 %368 }
 0x2dc   :  { %v678_v17 = vpop.permute.xlu0 %677  ;;  %v2497_v51 = vld [vmem:[#allocation3 + $0x1f8] sm:$0xff] }
 0x2dd   :  { %v683_v55 = vsel %vm679_vm15, %v676_v22, %v678_v17  ;;  %vm5659_vm15 = vmmov %vm5651_vm4 }
 0x2de   :  { %691 = vst [vmem:[#allocation3 + $0xb8] sm:$0xf] %v683_v55  ;;  %vm5662_vm4 = vmmov %vm5655_vm3 }
 0x2df   :  { %v540_v26 = vpop.permute.xlu1 %539 }
 0x2e0   :  { %v545_v6 = vsel %vm350_vm1, %v538_v14, %v540_v26  ;;  %v747_v10 = vpop.permute.xlu0 %746 }
 0x2e1   :  { %553 = vst [vmem:[#allocation3 + $0xb0] sm:$0xf] %v545_v6  ;;  %v752_v1 = vsel %vm5656_vm12, %v745_v40, %v747_v10  ;;  %v2488_v46 = vld [vmem:[#allocation3 + $0xf0] sm:$0xff] }
 0x2e2   :  { %760 = vst [vmem:[#allocation3 + $0xb8] sm:$0xf0] %v752_v1  ;;  %2589 = vmatprep.subr.mxu0 %v2488_v46  ;;  %v2479_v1 = vld [vmem:[#allocation4] sm:$0xff] }
 0x2e3   :  { %v607_v63 = vpop.permute.xlu1 %606 }
 0x2e4   :  { %v612_v59 = vsel %vm5657_vm14, %v605_v48, %v607_v63  ;;  %v504_v5 = vpop.permute.xlu0 %503 }
 0x2e5   :  { %620 = vst [vmem:[#allocation3 + $0xb0] sm:$0xf0] %v612_v59  ;;  %v513_v0 = vsel %vm5658_vm5, %v504_v5, %v506_v11  ;;  %v2482_v59 = vld [vmem:[#allocation4 + $0x18] sm:$0xff] }
 0x2e6   :  { %521 = vst [vmem:[#allocation3 + $0xe8] sm:$0xf0] %v513_v0  ;;  %v2481_v0 = vld [vmem:[#allocation4 + $0x10] sm:$0xff] }
 0x2e7   :  { %v367_v20 = vpop.permute.xlu1 %366 }
 0x2e8   :  { %v376_v16 = vsel %vm232_vm7, %v367_v20, %v369_v41  ;;  %v371_v31 = vpop.permute.xlu0 %370 }
 0x2e9   :  { %384 = vst [vmem:[#allocation3 + $0xc8] sm:$0xf0] %v376_v16  ;;  %v377_v61 = vsel %vm232_vm7, %v369_v41, %v371_v31  ;;  %v2498_v57 = vld [vmem:[#allocation3 + $0xb8] sm:$0xff] }
 0x2ea   :  { %385 = vst [vmem:[#allocation3 + $0x8] sm:$0xf0] %v377_v61  ;;  %2662 = vmatprep.subr.mxu1 %v2498_v57 }
 0x2eb   :  { %v444_v12 = vpop.permute.xlu1 %443  ;;  %2663 = vmatpush1.msra.mxu1 %v2497_v51  ;;  %v3209_v51 = vmov 0  }
 0x2ec   :  { %v542_v45 = vpop.permute.xlu0 %541  ;;  %v2493_v21 = vld [vmem:[#allocation3 + $0xb0] sm:$0xff]  ;;  %3128 = vset.pattern.permute.xlu1 %v3209_v51  ;;  %3127 = vset.pattern.permute.xlu0 %v3209_v51 }
 0x2ed   :  { %v546_v30 = vsel %vm350_vm1, %v540_v26, %v542_v45  ;;  %v2487_v28 = vld [vmem:[#allocation3 + $0xe8] sm:$0xff] }
 0x2ee   :  { %554 = vst [vmem:[#allocation3 + $0x158] sm:$0xf] %v546_v30  ;;  %2590 = vmatpush1.msra.mxu0 %v2487_v28 }
 0x2ef   :  { %v512_v38 = vpop.permute.xlu1 %511 }
 0x2f0   :  { %v609_v8 = vpop.permute.xlu0 %608  ;;  %v2483_v27 = vld [vmem:[#allocation3 + $0xc8] sm:$0xff] }
 0x2f1   :  { %v613_v53 = vsel %vm5659_vm15, %v607_v63, %v609_v8  ;;  %v2484_v24 = vld [vmem:[#allocation3 + $0x8] sm:$0xff] }
 0x2f2   :  { %621 = vst [vmem:[#allocation3 + $0x158] sm:$0xf0] %v613_v53  ;;  %2591 = vmatprep.subr.mxu0 %v2484_v24 }
 0x2f3   :  { %v2394_v35 = vpop.permute.xlu1 %2393  ;;  %2592 = vmatpush1.msra.mxu0 %v2483_v27 }
 0x2f4   :  { %v442_v47 = vpop.permute.xlu0 %441 }
 0x2f5   :  { %v448_v56 = vsel %vm5660_vm6, %v440_v18, %v442_v47  ;;  %v449_v33 = vsel %vm5661_vm13, %v442_v47, %v444_v12 }
 0x2f6   :  { %456 = vst [vmem:[#allocation3 + $0x70] sm:$0xf] %v448_v56  ;;  %457 = vst [vmem:[#allocation3 + $0x120] sm:$0xf] %v449_v33 }
 0x2f7   :  { %v2462_v39 = vpop.permute.xlu1 %2461 }
 0x2f8   :  { %v510_v2 = vpop.permute.xlu0 %509 }
 0x2f9   :  { %v515_v14 = vsel %vm5662_vm4, %v508_v52, %v510_v2  ;;  %v516_v43 = vsel %vm5663_vm9, %v510_v2, %v512_v38  ;;  %v2494_v4 = vld [vmem:[#allocation3 + $0x158] sm:$0xff] }
 0x2fa   :  { %523 = vst [vmem:[#allocation3 + $0x70] sm:$0xf0] %v515_v14  ;;  %524 = vst [vmem:[#allocation3 + $0x120] sm:$0xf0] %v516_v43  ;;  %2664 = vmatprep.subr.mxu1 %v2494_v4 }
 0x2fb   :  { %v2458_v50 = vpop.permute.xlu1 %2457  ;;  %2665 = vmatpush1.msra.mxu1 %v2493_v21 }
 0x2fc   :  { %v2392_v34 = vpop.permute.xlu0 %2391 }
 0x2fd   :  { %v2400_v48 = vsel %vm350_vm1, %v2392_v34, %v2394_v35 }
 0x2fe   :  { %2408 = vst [vmem:[#allocation3 + $0xa8] sm:$0xf] %v2400_v48  ;;  %v2716_v48 = vld [vmem:[%s5422_s4 + $0x8] sm:$0xff] }
 0x2ff   :  { %v375_v60 = vpop.permute.xlu1 %374 }
 0x300   :  { %v2460_v13 = vpop.permute.xlu0 %2459 }
 0x301   :  { %v2468_v9 = vsel %vm2159_vm2, %v2460_v13, %v2462_v39  ;;  %v2467_v44 = vsel %vm2159_vm2, %v2458_v50, %v2460_v13  ;;  %v2490_v37 = vld [vmem:[#allocation3 + $0x120] sm:$0xff]  ;;  %v2489_v11 = vld [vmem:[#allocation3 + $0x70] sm:$0xff] }
 0x302   :  { %2476 = vst [vmem:[#allocation3 + $0xa8] sm:$0xf0] %v2468_v9  ;;  %2475 = vst [vmem:[#allocation3 + $0x148] sm:$0xf0] %v2467_v44  ;;  %2666 = vmatprep.subr.mxu1 %v2490_v37  ;;  %v2715_v13 = vld [vmem:[%s5422_s4] sm:$0xff] }
 0x303   :  { %v2289_v49 = vpop.permute.xlu1 %2288  ;;  %2667 = vmatpush1.msra.mxu1 %v2489_v11 }
 0x304   :  { %v2390_v19 = vpop.permute.xlu0 %2389 }
 0x305   :  { %v2399_v32 = vsel %vm350_vm1, %v2390_v19, %v2392_v34 }
 0x306   :  { %2407 = vst [vmem:[#allocation3 + $0x148] sm:$0xf] %v2399_v32 }
 0x307   :  { %v2396_v22 = vpop.permute.xlu1 %2395 }
 0x308   :  { %v2401_v62 = vsel %vm350_vm1, %v2394_v35, %v2396_v22  ;;  %v373_v15 = vpop.permute.xlu0 %372 }
 0x309   :  { %2409 = vst [vmem:[#allocation3 + $0x150] sm:$0xf] %v2401_v62  ;;  %v378_v58 = vsel %vm232_vm7, %v371_v31, %v373_v15  ;;  %v379_v40 = vsel %vm232_vm7, %v373_v15, %v375_v60  ;;  %v2552_v7 = vld [vmem:[#allocation3 + $0xa8] sm:$0xff]  ;;  %v5664_v62 = vld [vmem:[#allocation13_spill] sm:$0xff] }
 0x30a   :  { %386 = vst [vmem:[#allocation3 + $0x40] sm:$0xf0] %v378_v58  ;;  %387 = vst [vmem:[#allocation3 + $0x28] sm:$0xf0] %v379_v40  ;;  %2621 = vmatprep.subr.mxu0 %v2552_v7  ;;  %v2717_v60 = vld [vmem:[%s5423_s5] sm:$0xff]  ;;  %v2825_v15 = vsel %vm60_vm0, %v5664_v62, 0.0  ;;  %v2835_v58 = vmul.f32 %v5664_v62, %v5664_v62 }
 0x30b   :  { %v2464_v18 = vpop.permute.xlu1 %2463  ;;  %v5665_v40 = vld [vmem:[#allocation11_spill] sm:$0xff] }
 0x30c   :  { %v2469_v29 = vsel %vm2159_vm2, %v2462_v39, %v2464_v18  ;;  %v2287_v23 = vpop.permute.xlu0 %2286  ;;  %v2824_v7 = vsel %vm60_vm0, %v5665_v40, 0.0 }
 0x30d   :  { %2477 = vst [vmem:[#allocation3 + $0x150] sm:$0xf0] %v2469_v29  ;;  %v2295_v36 = vsel %vm2159_vm2, %v2287_v23, %v2289_v49  ;;  %v2551_v42 = vld [vmem:[#allocation3 + $0x148] sm:$0xff]  ;;  %v2826_v29 = vadd.f32 %v2825_v15, %v2824_v7 }
 0x30e   :  { %2303 = vst [vmem:[#allocation3 + $0x58] sm:$0xf] %v2295_v36  ;;  %2622 = vmatpush2.msra.mxu0 %v2551_v42  ;;  %v5666_v36 = vld [vmem:[#allocation12_spill] sm:$0xff] }
 0x30f   :  { %v2291_v25 = vpop.permute.xlu1 %2290  ;;  %v2827_v42 = vsel %vm60_vm0, %v5666_v36, 0.0 }
 0x310   :  { %v2296_v52 = vsel %vm2159_vm2, %v2289_v49, %v2291_v25  ;;  %v2285_v3 = vpop.permute.xlu0 %2284 }
 0x311   :  { %2304 = vst [vmem:[#allocation3 + $0x118] sm:$0xf] %v2296_v52  ;;  %v2294_v54 = vsel %vm2159_vm2, %v2285_v3, %v2287_v23  ;;  %v2486_v41 = vld [vmem:[#allocation3 + $0x28] sm:$0xff]  ;;  %v2485_v17 = vld [vmem:[#allocation3 + $0x40] sm:$0xff]  ;;  %v2839_v23 = vsel %vm60_vm0, %v2835_v58, 0.0  ;;  %v2828_v3 = vadd.f32 %v2827_v42, %v2826_v29 }
 0x312   :  { %2302 = vst [vmem:[#allocation3 + $0x1a0] sm:$0xf] %v2294_v54  ;;  %2668 = vmatprep.subr.mxu1 %v2486_v41 }
 0x313   :  { %2669 = vmatpush1.msra.mxu1 %v2485_v17  ;;  %v5667_v17 = vld [vmem:[#allocation14_spill] sm:$0xff] }
 0x314   :  { %v2398_v55 = vpop.permute.xlu0 %2397  ;;  %v2553_v31 = vld [vmem:[#allocation3 + $0x150] sm:$0xff] }
 0x315   :  { %v2402_v26 = vsel %vm350_vm1, %v2396_v22, %v2398_v55  ;;  %v2548_v6 = vld [vmem:[#allocation3 + $0x58] sm:$0xff]  ;;  %v2718_v22 = vld [vmem:[%s5423_s5 + $0x8] sm:$0xff]  ;;  %v2837_v55 = vmul.f32 %v5667_v17, %v5667_v17 }
 0x316   :  { %2410 = vst [vmem:[#allocation3 + $0xa0] sm:$0xf] %v2402_v26  ;;  %2623 = vmatprep.subr.mxu0 %v2548_v6  ;;  %v2829_v26 = vsel %vm60_vm0, %v5667_v17, 0.0 }
 0x317   :  { %v2830_v6 = vadd.f32 %v2829_v26, %v2828_v3  ;;  %v2888_v26 = vld [vmem:[%s5424_s6 + $0xc] sm:$0xff] }
 0x318   :  { %v2466_v10 = vpop.permute.xlu0 %2465  ;;  %v2549_v57 = vld [vmem:[#allocation3 + $0x118] sm:$0xff] }
 0x319   :  { %v2470_v46 = vsel %vm2159_vm2, %v2464_v18, %v2466_v10  ;;  %v2547_v63 = vld [vmem:[#allocation3 + $0x1a0] sm:$0xff]  ;;  %v2834_v18 = vmul.f32 %v5665_v40, %v5665_v40 }
 0x31a   :  { %2478 = vst [vmem:[#allocation3 + $0xa0] sm:$0xf0] %v2470_v46  ;;  %2624 = vmatpush2.msra.mxu0 %v2547_v63 }
 0x31b   :  { %2626 = vmatmul.mubr.f32.vlgmr.msra.gmra.mxu0 %v2479_v1  ;;  %v2838_v52 = vsel %vm60_vm0, %v2834_v18, 0.0 }
 0x31c   :  { %v2293_v5 = vpop.permute.xlu0 %2292  ;;  %3082 = vmatprep.mubr.msk.f32.mxu0 %vm2133_vm10, %v2482_v59  ;;  %v2840_v54 = vadd.f32 %v2839_v23, %v2838_v52 }
 0x31d   :  { %v2297_v20 = vsel %vm2159_vm2, %v2291_v25, %v2293_v5  ;;  %v2836_v25 = vmul.f32 %v5666_v36, %v5666_v36 }
 0x31e   :  { %2305 = vst [vmem:[#allocation3 + $0x20] sm:$0xf] %v2297_v20 }
 0x31f   :  { %2632 = vmatmul.mubr.f32.gmra.mxu0 %v2481_v0  ;;  %v2841_v41 = vsel %vm60_vm0, %v2836_v25, 0.0 }
 0x320   :  { %v2842_v10 = vadd.f32 %v2841_v41, %v2840_v54  ;;  %v2887_v41 = vld [vmem:[%s5424_s6 + $0x4] sm:$0xff] }
 0x321   :  { %v2554_v16 = vld [vmem:[#allocation3 + $0xa0] sm:$0xff] }
 0x322   :  { %2698 = vmatprep.subr.mxu1 %v2554_v16 }
 0x323   :  { %2699 = vmatpush2.msra.mxu1 %v2553_v31 }
 0x325   :  { %v2550_v61 = vld [vmem:[#allocation3 + $0x20] sm:$0xff] }
 0x326   :  { %2700 = vmatprep.subr.mxu1 %v2550_v61 }
 0x327   :  { %2701 = vmatpush2.msra.mxu1 %v2549_v57 }
 0x328   :  { %2703 = vmatmul.mubr.f32.vlgmr.msra.gmra.mxu1 %v2479_v1  ;;  %v2843_v1 = vsel %vm60_vm0, %v2837_v55, 0.0 }
 0x329   :  { %3084 = vmatprep.mubr.msk.f32.mxu1 %vm2133_vm10, %v2482_v59  ;;  %v2844_v46 = vadd.f32 %v2843_v1, %v2842_v10 }
 0x32c   :  { %2709 = vmatmul.mubr.f32.gmra.mxu1 %v2481_v0 }
 0x3db   :  { %v5202_v12 = vpop.f32.mrf.mxu0 }
 0x3dc   :  { %v2732_v27 = vmul.f32 %v5202_v12, %v5202_v12 }
 0x3dd   :  { %v5204_v45 = vpop.f32.mrf.mxu0 }
 0x3de   :  { %v2719_v28 = vadd.f32 %v5204_v45, %v5202_v12  ;;  %v2733_v53 = vmul.f32 %v5204_v45, %v5204_v45 }
 0x3df   :  { %v5206_v30 = vpop.f32.mrf.mxu0 }
 0x3e0   :  { %v2740_v2 = vadd.f32 %v2733_v53, %v2732_v27  ;;  %v2736_v9 = vmul.f32 %v5206_v30, %v5206_v30 }
 0x3e1   :  { %v5210_v38 = vpop.f32.mrf.mxu0 }
 0x3e2   :  { %v2724_v47 = vadd.f32 %v5210_v38, %v5206_v30  ;;  %v2737_v44 = vmul.f32 %v5210_v38, %v5210_v38 }
 0x3e4   :  { %v2745_v11 = vadd.f32 %v2737_v44, %v2736_v9 }
 0x3e8   :  { %v5212_v8 = vpop.f32.mrf.mxu1 }
 0x3e9   :  { %v2720_v24 = vadd.f32 %v2719_v28, %v5212_v8  ;;  %v2734_v56 = vmul.f32 %v5212_v8, %v5212_v8 }
 0x3ea   :  { %v5219_v35 = vpop.f32.mrf.mxu1 }
 0x3eb   :  { %v2721_v33 = vadd.f32 %v2720_v24, %v5219_v35  ;;  %v2741_v4 = vadd.f32 %v2740_v2, %v2734_v56  ;;  %v2735_v21 = vmul.f32 %v5219_v35, %v5219_v35 }
 0x3ec   :  { %v5226_v39 = vpop.f32.mrf.mxu1 }
 0x3ed   :  { %v2725_v14 = vadd.f32 %v2724_v47, %v5226_v39  ;;  %2722 = vadd.xlane.f32.xlu1 %v2721_v33  ;;  %v2742_v34 = vadd.f32 %v2741_v4, %v2735_v21  ;;  %v2738_v37 = vmul.f32 %v5226_v39, %v5226_v39 }
 0x3ee   :  { %v5229_v43 = vpop.f32.mrf.mxu1 }
 0x3ef   :  { %v2726_v50 = vadd.f32 %v2725_v14, %v5229_v43  ;;  %v2746_v49 = vadd.f32 %v2745_v11, %v2738_v37  ;;  %v2739_v19 = vmul.f32 %v5229_v43, %v5229_v43 }
 0x3f1   :  { %2727 = vadd.xlane.f32.xlu0 %v2726_v50  ;;  %v2747_v32 = vadd.f32 %v2746_v49, %v2739_v19 }
 0x3f5   :  { %2743 = vadd.xlane.f32.xlu0 %v2742_v34 }
 0x3fe   :  { %2785 = vperm.xlu1 %3128, %v2716_v48  }
 0x402   :  { %2798 = vperm.xlu1 %3128, %v2717_v60  }
 0x40b   :  { %2780 = vperm.xlu0 %3127, %v2715_v13  }
 0x426   :  { %2748 = vadd.xlane.f32.xlu1 %v2747_v32 }
 0x437   :  { %2803 = vperm.xlu1 %3128, %v2718_v22  }
 0x45b   :  { %2831 = vadd.xlane.f32.xlu1 %v2830_v6 }
 0x45f   :  { %2845 = vadd.xlane.f32.xlu1 %v2844_v46 }
 0x476   :  { %v2723_v63 = vpop.xlane.xlu1 %2722 }
 0x477   :  { %v2730_v5 = vmul.f32 0.001953125, %v2723_v63 }
 0x479   :  { %v2752_v20 = vmul.f32 %v2730_v5, %v2730_v5  ;;  %v2758_v28 = vsub.f32 %v5202_v12, %v2730_v5  ;;  %v2759_v27 = vsub.f32 %v5204_v45, %v2730_v5  ;;  %v2760_v53 = vsub.f32 %v5212_v8, %v2730_v5 }
 0x47a   :  { %v2728_v59 = vpop.xlane.xlu0 %2727  ;;  %v2786_v51 = vpop.permute.xlu1 %2785  ;;  %v2761_v24 = vsub.f32 %v5219_v35, %v2730_v5 }
 0x47b   :  { %v2731_v23 = vmul.f32 0.001953125, %v2728_v59 }
 0x47d   :  { %v2753_v52 = vmul.f32 %v2731_v23, %v2731_v23  ;;  %v2762_v6 = vsub.f32 %v5206_v30, %v2731_v23  ;;  %v2763_v10 = vsub.f32 %v5210_v38, %v2731_v23  ;;  %v2764_v1 = vsub.f32 %v5226_v39, %v2731_v23 }
 0x47e   :  { %v2744_v0 = vpop.xlane.xlu0 %2743  ;;  %v2799_v60 = vpop.permute.xlu1 %2798  ;;  %v2765_v46 = vsub.f32 %v5229_v43, %v2731_v23 }
 0x47f   :  { %v2750_v16 = vmul.f32 0.001953125, %v2744_v0 }
 0x481   :  { %v2754_v31 = vsub.f32 %v2750_v16, %v2752_v20 }
 0x483   :  { %v2756_v61 = vmax.f32 %v2754_v31, 0.0 }
 0x485   :  { %v2766_v57 = vadd.f32 1e-05, %v2756_v61 }
 0x486   :  { %v2781_v56 = vpop.permute.xlu0 %2780 }
 0x487   :  { %3131 = vrsqrt.f32 %v2766_v57 }
 0x494   :  { %v3132_v47 = vpop.eup %3131 }
 0x495   :  { %v2770_v33 = vmul.f32 %v3132_v47, %v2758_v28  ;;  %v2771_v2 = vmul.f32 %v3132_v47, %v2759_v27  ;;  %v2772_v14 = vmul.f32 %v3132_v47, %v2760_v53  ;;  %v2773_v4 = vmul.f32 %v3132_v47, %v2761_v24 }
 0x497   :  { %v2788_v21 = vmul.f32 %v2781_v56, %v2770_v33  ;;  %v2789_v50 = vmul.f32 %v2781_v56, %v2771_v2  ;;  %v2790_v34 = vmul.f32 %v2781_v56, %v2772_v14  ;;  %v2791_v48 = vmul.f32 %v2781_v56, %v2773_v4 }
 0x499   :  { %v2806_v13 = vadd.f32 %v2799_v60, %v2788_v21  ;;  %v2807_v9 = vadd.f32 %v2799_v60, %v2789_v50  ;;  %v2808_v12 = vadd.f32 %v2799_v60, %v2790_v34  ;;  %v2809_v44 = vadd.f32 %v2799_v60, %v2791_v48  ;;  %v2822_v60 = vld [vmem:[%s5424_s6] sm:$0xf] }
 0x49b   :  { %v5278_v45 = vmax.f32 %v2806_v13, 0.0  ;;  %v5280_v8 = vmax.f32 %v2807_v9, 0.0  ;;  %v5282_v35 = vmax.f32 %v2808_v12, 0.0  ;;  %v5290_v19 = vmax.f32 %v2809_v44, 0.0  ;;  %v2889_v13 = vld [vmem:[%s5425_s7 + $0x4] sm:$0xff]  ;;  %v2890_v9 = vld [vmem:[%s5425_s7 + $0xc] sm:$0xff] }
 0x49c   :  { %v2823_v12 = vld [vmem:[%s5425_s7] sm:$0xf] }
 0x49d   :  { %v2891_v37 = vadd.f32 %v5280_v8, %v5278_v45  ;;  %v2903_v11 = vmul.f32 %v5278_v45, %v5278_v45  ;;  %v2904_v49 = vmul.f32 %v5280_v8, %v5280_v8  ;;  %v2905_v22 = vmul.f32 %v5282_v35, %v5282_v35 }
 0x49e   :  { %v2906_v18 = vmul.f32 %v5290_v19, %v5290_v19 }
 0x49f   :  { %v2892_v32 = vadd.f32 %v2891_v37, %v5282_v35  ;;  %v2911_v15 = vadd.f32 %v2904_v49, %v2903_v11 }
 0x4a1   :  { %v2893_v58 = vadd.f32 %v2892_v32, %v5290_v19  ;;  %v2912_v7 = vadd.f32 %v2911_v15, %v2905_v22 }
 0x4a3   :  { %2894 = vadd.xlane.f32.xlu1 %v2893_v58  ;;  %v2913_v29 = vadd.f32 %v2912_v7, %v2906_v18 }
 0x4a7   :  { %2914 = vadd.xlane.f32.xlu1 %v2913_v29 }
 0x4af   :  { %v2749_v42 = vpop.xlane.xlu1 %2748 }
 0x4b0   :  { %v2751_v25 = vmul.f32 0.001953125, %v2749_v42 }
 0x4b2   :  { %v2755_v3 = vsub.f32 %v2751_v25, %v2753_v52 }
 0x4b3   :  { %v2804_v28 = vpop.permute.xlu1 %2803 }
 0x4b4   :  { %v2757_v54 = vmax.f32 %v2755_v3, 0.0 }
 0x4b6   :  { %v2767_v55 = vadd.f32 1e-05, %v2757_v54 }
 0x4b8   :  { %3133 = vrsqrt.f32 %v2767_v55  ;;  %2951 = vperm.xlu1 %3128, %v2887_v41  }
 0x4bc   :  { %2956 = vperm.xlu1 %3128, %v2888_v26  }
 0x4c5   :  { %v3134_v63 = vpop.eup %3133 }
 0x4c6   :  { %v2774_v59 = vmul.f32 %v3134_v63, %v2762_v6  ;;  %v2775_v5 = vmul.f32 %v3134_v63, %v2763_v10  ;;  %v2776_v0 = vmul.f32 %v3134_v63, %v2764_v1  ;;  %v2777_v20 = vmul.f32 %v3134_v63, %v2765_v46 }
 0x4c8   :  { %v2792_v16 = vmul.f32 %v2786_v51, %v2774_v59  ;;  %v2793_v31 = vmul.f32 %v2786_v51, %v2775_v5  ;;  %v2794_v61 = vmul.f32 %v2786_v51, %v2776_v0  ;;  %v2795_v57 = vmul.f32 %v2786_v51, %v2777_v20 }
 0x4ca   :  { %v2810_v27 = vadd.f32 %v2804_v28, %v2792_v16  ;;  %v2811_v53 = vadd.f32 %v2804_v28, %v2793_v31  ;;  %v2812_v24 = vadd.f32 %v2804_v28, %v2794_v61  ;;  %v2813_v30 = vadd.f32 %v2804_v28, %v2795_v57 }
 0x4cc   :  { %v5308_v47 = vmax.f32 %v2810_v27, 0.0  ;;  %v5310_v38 = vmax.f32 %v2811_v53, 0.0  ;;  %v5312_v39 = vmax.f32 %v2812_v24, 0.0  ;;  %v5316_v56 = vmax.f32 %v2813_v30, 0.0 }
 0x4ce   :  { %v2896_v43 = vadd.f32 %v5310_v38, %v5308_v47  ;;  %v2907_v2 = vmul.f32 %v5308_v47, %v5308_v47  ;;  %v2908_v14 = vmul.f32 %v5310_v38, %v5310_v38  ;;  %v2909_v21 = vmul.f32 %v5312_v39, %v5312_v39 }
 0x4cf   :  { %v2910_v34 = vmul.f32 %v5316_v56, %v5316_v56 }
 0x4d0   :  { %v2897_v33 = vadd.f32 %v2896_v43, %v5312_v39  ;;  %v2916_v4 = vadd.f32 %v2908_v14, %v2907_v2 }
 0x4d2   :  { %v2898_v51 = vadd.f32 %v2897_v33, %v5316_v56  ;;  %v2917_v50 = vadd.f32 %v2916_v4, %v2909_v21 }
 0x4d4   :  { %2899 = vadd.xlane.f32.xlu0 %v2898_v51  ;;  %v2918_v48 = vadd.f32 %v2917_v50, %v2910_v34 }
 0x4e0   :  { %2919 = vadd.xlane.f32.xlu1 %v2918_v48 }
 0x4e4   :  { %v2832_v44 = vpop.xlane.xlu1 %2831 }
 0x4e5   :  { %v2833_v58 = vmul.f32 0.001953125, %v2832_v44 }
 0x4e7   :  { %v2848_v29 = vmul.f32 %v2833_v58, %v2833_v58  ;;  %v2851_v61 = vsub.f32 %v5665_v40, %v2833_v58 }
 0x4e8   :  { %v2846_v37 = vpop.xlane.xlu1 %2845 }
 0x4e9   :  { %v2847_v18 = vmul.f32 0.001953125, %v2846_v37 }
 0x4ea   :  { %2863 = vperm.xlu0 %3127, %v2822_v60  }
 0x4eb   :  { %v2849_v42 = vsub.f32 %v2847_v18, %v2848_v29 }
 0x4ed   :  { %v2850_v52 = vmax.f32 %v2849_v42, 0.0 }
 0x4ee   :  { %2969 = vperm.xlu0 %3127, %v2889_v13  }
 0x4ef   :  { %v2855_v3 = vadd.f32 1e-05, %v2850_v52 }
 0x4f1   :  { %2974 = vperm.xlu1 %3128, %v2890_v9  }
 0x4f2   :  { %2872 = vperm.xlu0 %3127, %v2823_v12  }
 0x52c   :  { %v2895_v11 = vpop.xlane.xlu1 %2894 }
 0x52d   :  { %v2901_v32 = vmul.f32 0.001953125, %v2895_v11 }
 0x52f   :  { %v2923_v15 = vmul.f32 %v2901_v32, %v2901_v32  ;;  %v2929_v26 = vsub.f32 %v5278_v45, %v2901_v32  ;;  %v2930_v6 = vsub.f32 %v5280_v8, %v2901_v32  ;;  %v2931_v10 = vsub.f32 %v5282_v35, %v2901_v32 }
 0x530   :  { %v2915_v49 = vpop.xlane.xlu1 %2914  ;;  %v2932_v1 = vsub.f32 %v5290_v19, %v2901_v32  ;;  %v2852_v45 = vsub.f32 %v5664_v62, %v2833_v58  ;;  %v2853_v8 = vsub.f32 %v5666_v36, %v2833_v58  ;;  %v2854_v19 = vsub.f32 %v5667_v17, %v2833_v58 }
 0x531   :  { %v2921_v22 = vmul.f32 0.001953125, %v2915_v49 }
 0x533   :  { %v2925_v7 = vsub.f32 %v2921_v22, %v2923_v15 }
 0x534   :  { %v2952_v54 = vpop.permute.xlu1 %2951 }
 0x535   :  { %v2927_v23 = vmax.f32 %v2925_v7, 0.0 }
 0x537   :  { %v2937_v25 = vadd.f32 1e-05, %v2927_v23 }
 0x538   :  { %v5344_v0 = vpop.permute.xlu1 %2956 }
 0x539   :  { %3135 = vrsqrt.f32 %v2937_v25 }
 0x53a   :  { %3137 = vrsqrt.f32 %v2855_v3 }
 0x546   :  { %v3136_v41 = vpop.eup %3135 }
 0x547   :  { %v2941_v46 = vmul.f32 %v3136_v41, %v2929_v26  ;;  %v2942_v63 = vmul.f32 %v3136_v41, %v2930_v6  ;;  %v2943_v59 = vmul.f32 %v3136_v41, %v2931_v10  ;;  %v2944_v5 = vmul.f32 %v3136_v41, %v2932_v1  ;;  %v3138_v31 = vpop.eup %3137 }
 0x548   :  { %v2857_v43 = vmul.f32 %v3138_v31, %v2851_v61  ;;  %v2858_v33 = vmul.f32 %v3138_v31, %v2852_v45  ;;  %v2859_v4 = vmul.f32 %v3138_v31, %v2853_v8  ;;  %v2860_v36 = vmul.f32 %v3138_v31, %v2854_v19 }
 0x549   :  { %v2959_v57 = vmul.f32 %v2952_v54, %v2941_v46  ;;  %v2960_v35 = vmul.f32 %v2952_v54, %v2942_v63  ;;  %v2961_v28 = vmul.f32 %v2952_v54, %v2943_v59  ;;  %v2962_v27 = vmul.f32 %v2952_v54, %v2944_v5 }
 0x55d   :  { %v2900_v55 = vpop.xlane.xlu0 %2899 }
 0x55e   :  { %v5346_v20 = vmul.f32 0.001953125, %v2900_v55 }
 0x560   :  { %v2924_v24 = vmul.f32 %v5346_v20, %v5346_v20  ;;  %v2933_v3 = vsub.f32 %v5308_v47, %v5346_v20  ;;  %v2934_v54 = vsub.f32 %v5310_v38, %v5346_v20  ;;  %v2935_v41 = vsub.f32 %v5312_v39, %v5346_v20 }
 0x561   :  { %v2936_v55 = vsub.f32 %v5316_v56, %v5346_v20 }
 0x565   :  { %v2864_v16 = vpop.permute.xlu0 %2863 }
 0x566   :  { %v2866_v21 = vmul.f32 %v2864_v16, %v2857_v43  ;;  %v2867_v13 = vmul.f32 %v2864_v16, %v2858_v33  ;;  %v2868_v9 = vmul.f32 %v2864_v16, %v2859_v4  ;;  %v2869_v12 = vmul.f32 %v2864_v16, %v2860_v36 }
 0x569   :  { %v2920_v53 = vpop.xlane.xlu1 %2919  ;;  %v2970_v30 = vpop.permute.xlu0 %2969 }
 0x56a   :  { %v2922_v51 = vmul.f32 0.001953125, %v2920_v53  ;;  %v2977_v2 = vadd.f32 %v2970_v30, %v2959_v57  ;;  %v2978_v40 = vadd.f32 %v2970_v30, %v2960_v35  ;;  %v2979_v14 = vadd.f32 %v2970_v30, %v2961_v28 }
 0x56b   :  { %v2980_v62 = vadd.f32 %v2970_v30, %v2962_v27 }
 0x56c   :  { %v2926_v50 = vsub.f32 %v2922_v51, %v2924_v24  ;;  %v2985_v34 = vmax.f32 %v2977_v2, 0.0  ;;  %v2986_v48 = vmax.f32 %v2978_v40, 0.0  ;;  %v2987_v17 = vmax.f32 %v2979_v14, 0.0 }
 0x56d   :  { %v2988_v60 = vmax.f32 %v2980_v62, 0.0  ;;  %v2873_v44 = vpop.permute.xlu0 %2872  ;;  %v2975_v38 = vpop.permute.xlu1 %2974 }
 0x56e   :  { %v2928_v37 = vmax.f32 %v2926_v50, 0.0  ;;  %v3001_v11 = vrot.slane %v2985_v34, 4  ;;  %v3002_v49 = vrot.slane %v2986_v48, 4  ;;  %v3003_v32 = vrot.slane %v2987_v17, 4 }
 0x56f   :  { %v3004_v22 = vrot.slane %v2988_v60, 4  ;;  %v2875_v15 = vadd.f32 %v2873_v44, %v2866_v21  ;;  %v2876_v58 = vadd.f32 %v2873_v44, %v2867_v13  ;;  %v2877_v7 = vadd.f32 %v2873_v44, %v2868_v9 }
 0x570   :  { %v2938_v18 = vadd.f32 1e-05, %v2928_v37  ;;  %3025 = vst [vmem:[%s5426_s8] sm:$0xf0] %v3001_v11  ;;  %3026 = vst [vmem:[%s5426_s8 + $0x8] sm:$0xf0] %v3002_v49  ;;  %v2878_v29 = vadd.f32 %v2873_v44, %v2869_v12 }
 0x571   :  { %3027 = vst [vmem:[%s5426_s8 + $0x10] sm:$0xf0] %v3003_v32  ;;  %3028 = vst [vmem:[%s5426_s8 + $0x18] sm:$0xf0] %v3004_v22  ;;  %v2879_v23 = vmax.f32 %v2875_v15, 0.0  ;;  %v2880_v42 = vmax.f32 %v2876_v58, 0.0 }
 0x572   :  { %v2881_v25 = vmax.f32 %v2877_v7, 0.0  ;;  %3139 = vrsqrt.f32 %v2938_v18  ;;  %v2882_v52 = vmax.f32 %v2878_v29, 0.0 }
 0x573   :  { %2883 = vst [vmem:[%s5426_s8] sm:$0xf] %v2879_v23  ;;  %2884 = vst [vmem:[%s5426_s8 + $0x8] sm:$0xf] %v2880_v42 }
 0x574   :  { %2885 = vst [vmem:[%s5426_s8 + $0x10] sm:$0xf] %v2881_v25  ;;  %2886 = vst [vmem:[%s5426_s8 + $0x18] sm:$0xf] %v2882_v52 }
 0x57f   :  { %v3140_v26 = vpop.eup %3139 }
 0x580   :  { %v2945_v6 = vmul.f32 %v3140_v26, %v2933_v3  ;;  %v2946_v10 = vmul.f32 %v3140_v26, %v2934_v54  ;;  %v2947_v1 = vmul.f32 %v3140_v26, %v2935_v41  ;;  %v2948_v46 = vmul.f32 %v3140_v26, %v2936_v55 }
 0x582   :  { %v2963_v63 = vmul.f32 %v5344_v0, %v2945_v6  ;;  %v2964_v59 = vmul.f32 %v5344_v0, %v2946_v10  ;;  %v2965_v47 = vmul.f32 %v5344_v0, %v2947_v1  ;;  %v2966_v5 = vmul.f32 %v5344_v0, %v2948_v46 }
 0x584   :  { %v2981_v16 = vadd.f32 %v2975_v38, %v2963_v63  ;;  %v2982_v31 = vadd.f32 %v2975_v38, %v2964_v59  ;;  %v2983_v39 = vadd.f32 %v2975_v38, %v2965_v47  ;;  %v2984_v61 = vadd.f32 %v2975_v38, %v2966_v5 }
 0x586   :  { %v2989_v45 = vmax.f32 %v2981_v16, 0.0  ;;  %v2990_v56 = vmax.f32 %v2982_v31, 0.0  ;;  %v2991_v20 = vmax.f32 %v2983_v39, 0.0  ;;  %v2992_v8 = vmax.f32 %v2984_v61, 0.0 }
 0x588   :  { %v3005_v57 = vrot.slane %v2989_v45, 4  ;;  %v3007_v35 = vrot.slane %v2990_v56, 4  ;;  %v3009_v28 = vrot.slane %v2991_v20, 4  ;;  %v3011_v19 = vrot.slane %v2992_v8, 4 }
 0x58a   :  { %v3006_v27 = vsel %vm60_vm0, %v3001_v11, %v3005_v57  ;;  %v3008_v53 = vsel %vm60_vm0, %v3002_v49, %v3007_v35  ;;  %v3010_v24 = vsel %vm60_vm0, %v3003_v32, %v3009_v28  ;;  %v3012_v0 = vsel %vm60_vm0, %v3004_v22, %v3011_v19  ;;  %3033 = vst [vmem:[%s5426_s8 + $0x40] sm:$0xf] %v3005_v57 }
 0x58b   :  { %3034 = vst [vmem:[%s5426_s8 + $0x48] sm:$0xf] %v3007_v35  ;;  %3035 = vst [vmem:[%s5426_s8 + $0x50] sm:$0xf] %v3009_v28 }
 0x58c   :  { %3036 = vst [vmem:[%s5426_s8 + $0x58] sm:$0xf] %v3011_v19  ;;  %3029 = vst [vmem:[%s5426_s8 + $0x20] sm:$0xff] %v3006_v27 }
 0x58d   :  { %3030 = vst [vmem:[%s5426_s8 + $0x28] sm:$0xff] %v3008_v53  ;;  %3031 = vst [vmem:[%s5426_s8 + $0x30] sm:$0xff] %v3010_v24 }
 0x58e   :  { %3032 = vst [vmem:[%s5426_s8 + $0x38] sm:$0xff] %v3012_v0 }
 0x58f   :  { %3041 = vsyncpa [#allocation5], 1 }

</bundles_post_ra>
